<compile_context>
chip_gen: v5e
topology: v5e:2x2
jax: 0.10.0
libtpu: 0.0.40
codegen_flags: <defaults>
</compile_context>

<pallas_src>
import functools

import jax
import jax.numpy as jnp
from jax.experimental import pallas as pl
from jax.experimental.pallas import tpu as pltpu

MAX_TILE_ROWS = 1024   # sublane-tiled row block (amortizes per-step overhead)


def _focal_loss_kernel(x_ref, t_ref, out_ref, acc_ref, *, gamma):
    """x_ref:   (T, C) f32 logits block
       t_ref:   (T, 1) i32 target class per row (-1 marks a padded row)
       out_ref: (1, 1) f32 SMEM scalar output (focal-loss sum)
       acc_ref: (T, 1) f32 VMEM running per-row partial sums."""
    i = pl.program_id(0)

    @pl.when(i == 0)
    def _():
        acc_ref[...] = jnp.zeros_like(acc_ref)

    logits = x_ref[...]                                    # (T, C)
    targ = t_ref[...]                                      # (T, 1)
    valid = targ >= 0                                      # padded rows: targ == -1

    # one-hot of target class via lane iota (no gather needed)
    class_ids = jax.lax.broadcasted_iota(jnp.int32, logits.shape, 1)
    onehot = (class_ids == targ).astype(jnp.float32)       # (T, C)

    # numerically-stable softmax pieces (reused for both ce and p_t)
    mx = jnp.max(logits, axis=-1, keepdims=True)           # (T, 1)
    e = jnp.exp(logits - mx)                                # (T, C)
    sumexp = jnp.sum(e, axis=-1, keepdims=True)             # (T, 1)
    lse = mx + jnp.log(sumexp)
    tgt_logit = jnp.sum(logits * onehot, axis=-1, keepdims=True)
    ce = jnp.maximum(lse - tgt_logit, 0.0)                  # clamp tiny negatives

    # p_t = exp(-ce) == exp(tgt_logit - lse); reuse e instead of a second exp
    p_t = jnp.sum(e * onehot, axis=-1, keepdims=True) / sumexp
    one_minus = jnp.maximum(1.0 - p_t, 0.0)

    g = float(gamma)
    if g == 2.0:
        w = one_minus * one_minus                           # single VPU multiply
    elif g == int(g) and g >= 0:
        w = jax.lax.integer_pow(one_minus, int(g))
    else:
        w = one_minus ** g

    focal = w * ce                                          # (T, 1)
    acc_ref[...] += jnp.where(valid, focal, 0.0)

    @pl.when(i == pl.num_programs(0) - 1)
    def _():
        out_ref[0, 0] = jnp.sum(acc_ref[...])


def focal_loss(preds, targs, gamma=2.0):
    """preds: (N, C, H, W) float logits; targs: (N, H, W) int class indices."""
    N, C, H, W = preds.shape
    rows = N * H * W

    # NCHW -> (rows, C) with classes last (lane axis); single host pass.
    x = jnp.transpose(preds, (0, 2, 3, 1)).reshape(rows, C).astype(jnp.float32)
    t = targs.reshape(rows, 1).astype(jnp.int32)

    tile_rows = min(MAX_TILE_ROWS, ((rows + 7) // 8) * 8)   # multiple of 8
    num_tiles = pl.cdiv(rows, tile_rows)
    rows_p = num_tiles * tile_rows
    if rows_p != rows:
        x = jnp.pad(x, ((0, rows_p - rows), (0, 0)))
        t = jnp.pad(t, ((0, rows_p - rows), (0, 0)), constant_values=-1)

    total = pl.pallas_call(
        functools.partial(_focal_loss_kernel, gamma=gamma),
        out_shape=jax.ShapeDtypeStruct((1, 1), jnp.float32),
        grid=(num_tiles,),
        in_specs=[
            pl.BlockSpec((tile_rows, C), lambda i: (i, 0)),
            pl.BlockSpec((tile_rows, 1), lambda i: (i, 0)),
        ],
        out_specs=pl.BlockSpec(memory_space=pltpu.SMEM),
        scratch_shapes=[pltpu.VMEM((tile_rows, 1), jnp.float32)],
        compiler_params=pltpu.CompilerParams(
            dimension_semantics=("arbitrary",)),
    )(x, t)

    return total[0, 0] / rows


def focal_loss_ref(preds, targs, gamma=2.0):
    """Pure-JAX reference matching torch semantics."""
    C = preds.shape[1]
    logits = jnp.transpose(preds, (0, 2, 3, 1)).reshape(-1, C)
    t = targs.reshape(-1)
    logp = jax.nn.log_softmax(logits, axis=-1)
    ce = -jnp.take_along_axis(logp, t[:, None], axis=-1)[:, 0]
    p_t = jnp.exp(-ce)
    return jnp.mean((1.0 - p_t) ** gamma * ce)


if __name__ == "__main__":
    key = jax.random.PRNGKey(0)
    k1, k2 = jax.random.split(key)
    N, C, H, W = 2, 4, 16, 16
    preds = jax.random.normal(k1, (N, C, H, W), dtype=jnp.float32)
    targs = jax.random.randint(k2, (N, H, W), 0, C, dtype=jnp.int32)

    out = focal_loss(preds, targs, gamma=2.0)
    out = jax.block_until_ready(out)

    ref = focal_loss_ref(preds, targs, gamma=2.0)
    assert jnp.allclose(out, ref, atol=1e-5, rtol=1e-5), (out, ref)
    print("KERNEL_OK")
</pallas_src>

<mosaic_0001>
module attributes {stable_mosaic.version = 11 : i64} {
  func.func @_focal_loss_kernel(%arg0: i32, %arg1: memref<512x4xf32, #tpu.memory_space<vmem>>, %arg2: memref<512x1xi32, #tpu.memory_space<vmem>>, %arg3: memref<1x1xf32, #tpu.memory_space<smem>>, %arg4: memref<512x1xf32, #tpu.memory_space<vmem>>) attributes {dimension_semantics = [#tpu.dimension_semantics<arbitrary>], iteration_bounds = array<i64: 1>, scalar_prefetch = 0 : i64, scratch_operands = 1 : i64, tpu.core_type = #tpu.core_type<tc>, window_params = [{transform_indices = @transform_0, window_bounds = array<i64: 512, 4>}, {transform_indices = @transform_1, window_bounds = array<i64: 512, 1>}, {transform_indices = @transform_2, window_bounds = array<i64: 1, 1>}]} {
    %c0_i32 = arith.constant 0 : i32
    %0 = arith.cmpi eq, %arg0, %c0_i32 : i32
    %1 = arith.extui %0 : i1 to i32
    %c0_i32_0 = arith.constant 0 : i32
    %2 = arith.cmpi ne, %1, %c0_i32_0 : i32
    scf.if %2 {
      %cst_18 = arith.constant 0.000000e+00 : f32
      %45 = vector.broadcast %cst_18 : f32 to vector<512x1xf32>
      %c0_19 = arith.constant 0 : index
      %c0_20 = arith.constant 0 : index
      %46 = vector.load %arg4[%c0_19, %c0_20] : memref<512x1xf32, #tpu.memory_space<vmem>>, vector<512x1xf32>
      tpu.vector_store %arg4[%c0_19, %c0_20], %45 {strides = array<i32>} : memref<512x1xf32, #tpu.memory_space<vmem>>, vector<512x1xf32>,
    } else {
    }
    %c0 = arith.constant 0 : index
    %c0_1 = arith.constant 0 : index
    %3 = vector.load %arg1[%c0, %c0_1] : memref<512x4xf32, #tpu.memory_space<vmem>>, vector<512x4xf32>
    %c0_2 = arith.constant 0 : index
    %c0_3 = arith.constant 0 : index
    %4 = vector.load %arg2[%c0_2, %c0_3] : memref<512x1xi32, #tpu.memory_space<vmem>>, vector<512x1xi32>
    %c0_i32_4 = arith.constant 0 : i32
    %5 = vector.broadcast %c0_i32_4 : i32 to vector<512x1xi32>
    %6 = arith.cmpi sge, %4, %5 : vector<512x1xi32>
    %7 = tpu.iota {dimensions = array<i32: 1>} : vector<512x4xi32>
    %8 = vector.broadcast %4 : vector<512x1xi32> to vector<512x4xi32>
    %9 = arith.cmpi eq, %7, %8 : vector<512x4xi32>
    %10 = arith.extui %9 : vector<512x4xi1> to vector<512x4xi32>
    %11 = arith.sitofp %10 : vector<512x4xi32> to vector<512x4xf32>
    %cst = arith.constant dense<0xFF800000> : vector<512xf32>
    %12 = vector.multi_reduction <maximumf>, %3, %cst [1] : vector<512x4xf32> to vector<512xf32>
    %13 = vector.shape_cast %12 : vector<512xf32> to vector<512x1xf32>
    %14 = vector.broadcast %13 : vector<512x1xf32> to vector<512x4xf32>
    %15 = arith.subf %3, %14 : vector<512x4xf32>
    %16 = math.exp %15 : vector<512x4xf32>
    %cst_5 = arith.constant dense<0.000000e+00> : vector<512xf32>
    %17 = vector.multi_reduction <add>, %16, %cst_5 [1] : vector<512x4xf32> to vector<512xf32>
    %18 = vector.shape_cast %17 : vector<512xf32> to vector<512x1xf32>
    %19 = math.log %18 : vector<512x1xf32>
    %20 = arith.addf %13, %19 : vector<512x1xf32>
    %21 = arith.mulf %3, %11 : vector<512x4xf32>
    %cst_6 = arith.constant dense<0.000000e+00> : vector<512xf32>
    %22 = vector.multi_reduction <add>, %21, %cst_6 [1] : vector<512x4xf32> to vector<512xf32>
    %23 = vector.shape_cast %22 : vector<512xf32> to vector<512x1xf32>
    %24 = arith.subf %20, %23 : vector<512x1xf32>
    %cst_7 = arith.constant 0.000000e+00 : f32
    %25 = vector.broadcast %cst_7 : f32 to vector<512x1xf32>
    %26 = arith.maximumf %24, %25 : vector<512x1xf32>
    %27 = arith.mulf %16, %11 : vector<512x4xf32>
    %cst_8 = arith.constant dense<0.000000e+00> : vector<512xf32>
    %28 = vector.multi_reduction <add>, %27, %cst_8 [1] : vector<512x4xf32> to vector<512xf32>
    %29 = vector.shape_cast %28 : vector<512xf32> to vector<512x1xf32>
    %30 = arith.divf %29, %18 : vector<512x1xf32>
    %cst_9 = arith.constant 1.000000e+00 : f32
    %31 = vector.broadcast %cst_9 : f32 to vector<512x1xf32>
    %32 = arith.subf %31, %30 : vector<512x1xf32>
    %cst_10 = arith.constant 0.000000e+00 : f32
    %33 = vector.broadcast %cst_10 : f32 to vector<512x1xf32>
    %34 = arith.maximumf %32, %33 : vector<512x1xf32>
    %35 = arith.mulf %34, %34 : vector<512x1xf32>
    %36 = arith.mulf %35, %26 : vector<512x1xf32>
    %c0_11 = arith.constant 0 : index
    %c0_12 = arith.constant 0 : index
    %37 = vector.load %arg4[%c0_11, %c0_12] : memref<512x1xf32, #tpu.memory_space<vmem>>, vector<512x1xf32>
    %cst_13 = arith.constant 0.000000e+00 : f32
    %38 = vector.broadcast %cst_13 : f32 to vector<512x1xf32>
    %39 = arith.select %6, %36, %38 : vector<512x1xi1>, vector<512x1xf32>
    %40 = arith.addf %37, %39 : vector<512x1xf32>
    %c0_14 = arith.constant 0 : index
    %c0_15 = arith.constant 0 : index
    %41 = vector.load %arg4[%c0_14, %c0_15] : memref<512x1xf32, #tpu.memory_space<vmem>>, vector<512x1xf32>
    tpu.vector_store %arg4[%c0_14, %c0_15], %40 {strides = array<i32>} : memref<512x1xf32, #tpu.memory_space<vmem>>, vector<512x1xf32>,
    %c0_i32_16 = arith.constant 0 : i32
    %42 = arith.cmpi eq, %arg0, %c0_i32_16 : i32
    %43 = arith.extui %42 : i1 to i32
    %c0_i32_17 = arith.constant 0 : i32
    %44 = arith.cmpi ne, %43, %c0_i32_17 : i32
    scf.if %44 {
      %c0_18 = arith.constant 0 : index
      %c0_19 = arith.constant 0 : index
      %45 = vector.load %arg4[%c0_18, %c0_19] : memref<512x1xf32, #tpu.memory_space<vmem>>, vector<512x1xf32>
      %46 = vector.shape_cast %45 : vector<512x1xf32> to vector<1x512x1xf32>
      %cst_20 = arith.constant dense<0.000000e+00> : vector<1xf32>
      %47 = vector.multi_reduction <add>, %46, %cst_20 [1, 2] : vector<1x512x1xf32> to vector<1xf32>
      %48 = vector.shape_cast %47 : vector<1xf32> to vector<1x1x1xf32>
      %49 = vector.extract %48[0, 0, 0] : f32 from vector<1x1x1xf32>
      %c0_21 = arith.constant 0 : index
      %c0_22 = arith.constant 0 : index
      %50 = memref.load %arg3[%c0_21, %c0_22] : memref<1x1xf32, #tpu.memory_space<smem>>
      memref.store %49, %arg3[%c0_21, %c0_22] : memref<1x1xf32, #tpu.memory_space<smem>>
    } else {
    }
    return
  }
  func.func @transform_0(%arg0: i32) -> (i32, i32) {
    %c0_i32 = arith.constant 0 : i32
    %c0_i32_0 = arith.constant 0 : i32
    return %arg0, %c0_i32 : i32, i32
  }
  func.func @transform_1(%arg0: i32) -> (i32, i32) {
    %c0_i32 = arith.constant 0 : i32
    %c0_i32_0 = arith.constant 0 : i32
    return %arg0, %c0_i32 : i32, i32
  }
  func.func @transform_2(%arg0: i32) -> (i32, i32) {
    %c0_i32 = arith.constant 0 : i32
    %c0_i32_0 = arith.constant 0 : i32
    %c0_i32_1 = arith.constant 0 : i32
    return %c0_i32, %c0_i32_0 : i32, i32
  }
}

</mosaic_0001>

<bundles_post_ra>
// kernel: tpu_custom_call.1
= control target key start
LH: loop header
LB: loop body
LE: loop exit
PB: predicated region body
PF: predicated region fallthrough
CT: control target
= control target key end

     0   :  { %v4354_v3 = vmov 0   ;;  %s10405_s0 = inlined_call_operand.vmem [shape: f32[512,4], index: 0, kind: input, shape index: {}]   ;;  %s10406_s1 = inlined_call_operand.vmem [shape: s32[512,1], index: 1, kind: input, shape index: {}]   ;;  %s10407_s2 = inlined_call_operand.hbm [shape: f32[1,1], index: 2, kind: output, shape index: {}]  }
   0x1   :  { %v149_v0 = vld [vmem:[%s10406_s1 + $0x20] sm:$0xff]  ;;  %v147_v1 = vld [vmem:[%s10406_s1 + $0x10] sm:$0xff]  ;;  %3832 = vset.pattern.permute.xlu2 %v4354_v3  ;;  %3831 = vset.pattern.permute.xlu1 %v4354_v3 }
   0x2   :  { %v145_v2 = vld [vmem:[%s10406_s1] sm:$0xff]  ;;  %3830 = vset.pattern.permute.xlu0 %v4354_v3  ;;  %288 = vperm.xlu2 %3832, %v149_v0  }
   0x3   :  { %282 = vperm.xlu1 %3831, %v147_v1   ;;  %276 = vperm.xlu0 %3830, %v145_v2  }
   0x4   :  { %7 = vsyncpa [#allocation4], 0  ;;  %v150_v4 = vld [vmem:[%s10406_s1 + $0x28] sm:$0xff]  ;;  %v148_v5 = vld [vmem:[%s10406_s1 + $0x18] sm:$0xff]  ;;  %vm659_vm0 = vcmask 31744   ;;  %s3751_s3 = sshll.u32 %s10407_s2, 4  ;;  %s3752_s3 = int_to_ptr.hbm [resolvable:$true] %s3751_s3 }
   0x5   :  { %v146_v6 = vld [vmem:[%s10406_s1 + $0x8] sm:$0xff]  ;;  %v153_v7 = vld [vmem:[%s10406_s1 + $0x40] sm:$0xff]  ;;  %v152_v8 = vld [vmem:[%s10406_s1 + $0x38] sm:$0xff]  ;;  %s4356_s5 = smov [#allocation3]  }
   0x6   :  { %v151_v9 = vld [vmem:[%s10406_s1 + $0x30] sm:$0xff]  ;;  %v156_v10 = vld [vmem:[%s10406_s1 + $0x58] sm:$0xff]  ;;  %v154_v12 = vld [vmem:[%s10406_s1 + $0x48] sm:$0xff] }
   0x7   :  { %v155_v11 = vld [vmem:[%s10406_s1 + $0x50] sm:$0xff]  ;;  %v158_v14 = vld [vmem:[%s10406_s1 + $0x68] sm:$0xff]  ;;  %v157_v15 = vld [vmem:[%s10406_s1 + $0x60] sm:$0xff] }
   0x8   :  { %v159_v13 = vld [vmem:[%s10406_s1 + $0x70] sm:$0xff]  ;;  %v162_v16 = vld [vmem:[%s10406_s1 + $0x88] sm:$0xff]  ;;  %v161_v17 = vld [vmem:[%s10406_s1 + $0x80] sm:$0xff] }
   0x9   :  { %v160_v18 = vld [vmem:[%s10406_s1 + $0x78] sm:$0xff]  ;;  %v165_v19 = vld [vmem:[%s10406_s1 + $0xa0] sm:$0xff]  ;;  %v163_v21 = vld [vmem:[%s10406_s1 + $0x90] sm:$0xff] }
   0xa   :  { %291 = vperm.xlu2 %3832, %v150_v4   ;;  %v164_v20 = vld [vmem:[%s10406_s1 + $0x98] sm:$0xff]  ;;  %v167_v23 = vld [vmem:[%s10406_s1 + $0xb0] sm:$0xff]  ;;  %v166_v24 = vld [vmem:[%s10406_s1 + $0xa8] sm:$0xff] }
   0xb   :  { %285 = vperm.xlu1 %3831, %v148_v5   ;;  %279 = vperm.xlu0 %3830, %v146_v6   ;;  %v168_v22 = vld [vmem:[%s10406_s1 + $0xb8] sm:$0xff]  ;;  %v171_v25 = vld [vmem:[%s10406_s1 + $0xd0] sm:$0xff]  ;;  %v170_v26 = vld [vmem:[%s10406_s1 + $0xc8] sm:$0xff] }
   0xc   :  { %v169_v27 = vld [vmem:[%s10406_s1 + $0xc0] sm:$0xff]  ;;  %v174_v28 = vld [vmem:[%s10406_s1 + $0xe8] sm:$0xff]  ;;  %v172_v30 = vld [vmem:[%s10406_s1 + $0xd8] sm:$0xff] }
   0xd   :  { %v173_v29 = vld [vmem:[%s10406_s1 + $0xe0] sm:$0xff]  ;;  %v176_v32 = vld [vmem:[%s10406_s1 + $0xf8] sm:$0xff]  ;;  %v175_v33 = vld [vmem:[%s10406_s1 + $0xf0] sm:$0xff] }
   0xe   :  { %v177_v31 = vld [vmem:[%s10406_s1 + $0x100] sm:$0xff]  ;;  %v180_v34 = vld [vmem:[%s10406_s1 + $0x118] sm:$0xff]  ;;  %v179_v35 = vld [vmem:[%s10406_s1 + $0x110] sm:$0xff] }
   0xf   :  { %v178_v36 = vld [vmem:[%s10406_s1 + $0x108] sm:$0xff]  ;;  %v183_v37 = vld [vmem:[%s10406_s1 + $0x130] sm:$0xff]  ;;  %v181_v39 = vld [vmem:[%s10406_s1 + $0x120] sm:$0xff] }
  0x10   :  { %v182_v38 = vld [vmem:[%s10406_s1 + $0x128] sm:$0xff]  ;;  %v185_v41 = vld [vmem:[%s10406_s1 + $0x140] sm:$0xff]  ;;  %v184_v42 = vld [vmem:[%s10406_s1 + $0x138] sm:$0xff] }
  0x11   :  { %v186_v40 = vld [vmem:[%s10406_s1 + $0x148] sm:$0xff]  ;;  %v189_v44 = vld [vmem:[%s10406_s1 + $0x160] sm:$0xff]  ;;  %v188_v45 = vld [vmem:[%s10406_s1 + $0x158] sm:$0xff] }
  0x12   :  { %300 = vperm.xlu2 %3832, %v153_v7   ;;  %v187_v46 = vld [vmem:[%s10406_s1 + $0x150] sm:$0xff]  ;;  %v192_v49 = vld [vmem:[%s10406_s1 + $0x178] sm:$0xff]  ;;  %v190_v52 = vld [vmem:[%s10406_s1 + $0x168] sm:$0xff] }
  0x13   :  { %297 = vperm.xlu1 %3831, %v152_v8   ;;  %294 = vperm.xlu0 %3830, %v151_v9   ;;  %v191_v51 = vld [vmem:[%s10406_s1 + $0x170] sm:$0xff]  ;;  %v194_v56 = vld [vmem:[%s10406_s1 + $0x188] sm:$0xff]  ;;  %v193_v57 = vld [vmem:[%s10406_s1 + $0x180] sm:$0xff] }
  0x14   :  { %v195_v55 = vld [vmem:[%s10406_s1 + $0x190] sm:$0xff]  ;;  %v198_v61 = vld [vmem:[%s10406_s1 + $0x1a8] sm:$0xff]  ;;  %v197_v62 = vld [vmem:[%s10406_s1 + $0x1a0] sm:$0xff] }
  0x15   :  { %v196_v63 = vld [vmem:[%s10406_s1 + $0x198] sm:$0xff]  ;;  %v201_v3 = vld [vmem:[%s10406_s1 + $0x1c0] sm:$0xff]  ;;  %v199_v5 = vld [vmem:[%s10406_s1 + $0x1b0] sm:$0xff] }
  0x16   :  { %v200_v4 = vld [vmem:[%s10406_s1 + $0x1b8] sm:$0xff] }
  0x17   :  { %v204_v8 = vld [vmem:[%s10406_s1 + $0x1d8] sm:$0xff] }
  0x1a   :  { %309 = vperm.xlu2 %3832, %v156_v10   ;;  %v203_v10 = vld [vmem:[%s10406_s1 + $0x1d0] sm:$0xff] }
  0x1b   :  { %306 = vperm.xlu1 %3831, %v155_v11   ;;  %303 = vperm.xlu0 %3830, %v154_v12   ;;  %v202_v11 = vld [vmem:[%s10406_s1 + $0x1c8] sm:$0xff]  ;;  %v207_v12 = vld [vmem:[%s10406_s1 + $0x1f0] sm:$0xff] }
  0x22   :  { %318 = vperm.xlu2 %3832, %v159_v13  }
  0x23   :  { %315 = vperm.xlu1 %3831, %v158_v14   ;;  %312 = vperm.xlu0 %3830, %v157_v15   ;;  %v206_v15 = vld [vmem:[%s10406_s1 + $0x1e8] sm:$0xff] }
  0x2a   :  { %327 = vperm.xlu2 %3832, %v162_v16   ;;  %v205_v16 = vld [vmem:[%s10406_s1 + $0x1e0] sm:$0xff] }
  0x2b   :  { %324 = vperm.xlu1 %3831, %v161_v17   ;;  %321 = vperm.xlu0 %3830, %v160_v18   ;;  %v208_v18 = vld [vmem:[%s10406_s1 + $0x1f8] sm:$0xff] }
  0x32   :  { %336 = vperm.xlu2 %3832, %v165_v19  }
  0x33   :  { %333 = vperm.xlu1 %3831, %v164_v20   ;;  %330 = vperm.xlu0 %3830, %v163_v21  }
  0x3a   :  { %345 = vperm.xlu2 %3832, %v168_v22  }
  0x3b   :  { %342 = vperm.xlu1 %3831, %v167_v23   ;;  %339 = vperm.xlu0 %3830, %v166_v24  }
  0x42   :  { %354 = vperm.xlu2 %3832, %v171_v25  }
  0x43   :  { %351 = vperm.xlu1 %3831, %v170_v26   ;;  %348 = vperm.xlu0 %3830, %v169_v27  }
  0x4a   :  { %363 = vperm.xlu2 %3832, %v174_v28   ;;  %v4621_v28 = vld [vmem:[%s10405_s0 + $0x8] sm:$0xff] }
  0x4b   :  { %360 = vperm.xlu1 %3831, %v173_v29   ;;  %357 = vperm.xlu0 %3830, %v172_v30  }
  0x52   :  { %372 = vperm.xlu2 %3832, %v177_v31   ;;  %v663_v31 = vsel %vm659_vm0, %v4621_v28, -inf }
  0x53   :  { %369 = vperm.xlu1 %3831, %v176_v32   ;;  %366 = vperm.xlu0 %3830, %v175_v33   ;;  %v4632_v32 = vld [vmem:[%s10405_s0] sm:$0xff] }
  0x5a   :  { %381 = vperm.xlu2 %3832, %v180_v34   ;;  %v660_v34 = vsel %vm659_vm0, %v4632_v32, -inf }
  0x5b   :  { %378 = vperm.xlu1 %3831, %v179_v35   ;;  %375 = vperm.xlu0 %3830, %v178_v36   ;;  %v4641_v35 = vld [vmem:[%s10405_s0 + $0x18] sm:$0xff] }
  0x5c   :  { %v4498_v43 = vpop.permute.xlu2 %288  ;;  %v669_v36 = vsel %vm659_vm0, %v4641_v35, -inf }
  0x62   :  { %390 = vperm.xlu2 %3832, %v183_v37   ;;  %v4648_v37 = vld [vmem:[%s10405_s0 + $0x10] sm:$0xff] }
  0x63   :  { %387 = vperm.xlu1 %3831, %v182_v38   ;;  %384 = vperm.xlu0 %3830, %v181_v39   ;;  %v4653_v38 = vld [vmem:[%s10405_s0 + $0x20] sm:$0xff] }
  0x64   :  { %v4516_v50 = vpop.permute.xlu2 %291 }
  0x65   :  { %10761 = vst [vmem:[#allocation8_spill] sm:$0xff] %v4516_v50 }
  0x6a   :  { %399 = vperm.xlu2 %3832, %v186_v40  }
  0x6b   :  { %396 = vperm.xlu1 %3831, %v185_v41   ;;  %393 = vperm.xlu0 %3830, %v184_v42   ;;  %v666_v41 = vsel %vm659_vm0, %v4648_v37, -inf  ;;  %v672_v42 = vsel %vm659_vm0, %v4653_v38, -inf }
  0x6c   :  { %v4537_v58 = vpop.permute.xlu2 %300 }
  0x6d   :  { %10764 = vst [vmem:[#allocation11_spill] sm:$0xff] %v4537_v58 }
  0x72   :  { %408 = vperm.xlu2 %3832, %v189_v44  }
  0x73   :  { %405 = vperm.xlu1 %3831, %v188_v45   ;;  %402 = vperm.xlu0 %3830, %v187_v46   ;;  %v4668_v45 = vld [vmem:[%s10405_s0 + $0x28] sm:$0xff] }
  0x74   :  { %v4552_v0 = vpop.permute.xlu2 %309  ;;  %v675_v46 = vsel %vm659_vm0, %v4668_v45, -inf }
  0x75   :  { %v4509_v47 = vpop.permute.xlu1 %282  ;;  %v4511_v48 = vpop.permute.xlu0 %276  ;;  %10767 = vst [vmem:[#allocation14_spill] sm:$0xff] %v4552_v0 }
  0x76   :  { %10759 = vst [vmem:[#allocation6_spill] sm:$0xff] %v4509_v47 }
  0x77   :  { %10760 = vst [vmem:[#allocation7_spill] sm:$0xff] %v4511_v48 }
  0x7a   :  { %417 = vperm.xlu2 %3832, %v192_v49   ;;  %v4675_v49 = vld [vmem:[%s10405_s0 + $0x30] sm:$0xff] }
  0x7b   :  { %414 = vperm.xlu1 %3831, %v191_v51   ;;  %411 = vperm.xlu0 %3830, %v190_v52   ;;  %v4680_v51 = vld [vmem:[%s10405_s0 + $0x38] sm:$0xff]  ;;  %v678_v52 = vsel %vm659_vm0, %v4675_v49, -inf }
  0x7c   :  { %v4567_v6 = vpop.permute.xlu2 %318 }
  0x7d   :  { %v4524_v53 = vpop.permute.xlu1 %285  ;;  %v4526_v54 = vpop.permute.xlu0 %279  ;;  %10770 = vst [vmem:[#allocation17_spill] sm:$0xff] %v4567_v6 }
  0x7e   :  { %10762 = vst [vmem:[#allocation9_spill] sm:$0xff] %v4524_v53 }
  0x7f   :  { %10763 = vst [vmem:[#allocation10_spill] sm:$0xff] %v4526_v54 }
  0x82   :  { %426 = vperm.xlu2 %3832, %v195_v55   ;;  %v681_v55 = vsel %vm659_vm0, %v4680_v51, -inf }
  0x83   :  { %423 = vperm.xlu1 %3831, %v194_v56   ;;  %420 = vperm.xlu0 %3830, %v193_v57  }
  0x84   :  { %v4585_v13 = vpop.permute.xlu2 %327 }
  0x85   :  { %v4539_v59 = vpop.permute.xlu1 %297  ;;  %v4541_v60 = vpop.permute.xlu0 %294  ;;  %10773 = vst [vmem:[#allocation20_spill] sm:$0xff] %v4585_v13  ;;  %v5057_v13 = vld [vmem:[%s10405_s0 + $0x190] sm:$0xff] }
  0x86   :  { %10765 = vst [vmem:[#allocation12_spill] sm:$0xff] %v4539_v59 }
  0x87   :  { %10766 = vst [vmem:[#allocation13_spill] sm:$0xff] %v4541_v60 }
  0x88   :  { %10841 = vst [vmem:[#allocation88_spill] sm:$0xff] %v5057_v13 }
  0x8a   :  { %435 = vperm.xlu2 %3832, %v198_v61  }
  0x8b   :  { %432 = vperm.xlu1 %3831, %v197_v62   ;;  %429 = vperm.xlu0 %3830, %v196_v63   ;;  %v4695_v62 = vld [vmem:[%s10405_s0 + $0x40] sm:$0xff] }
  0x8c   :  { %v4600_v19 = vpop.permute.xlu2 %336  ;;  %v684_v63 = vsel %vm659_vm0, %v4695_v62, -inf }
  0x8d   :  { %v4554_v1 = vpop.permute.xlu0 %303  ;;  %v4556_v2 = vpop.permute.xlu1 %306  ;;  %10776 = vst [vmem:[#allocation23_spill] sm:$0xff] %v4600_v19 }
  0x8e   :  { %10768 = vst [vmem:[#allocation15_spill] sm:$0xff] %v4554_v1 }
  0x8f   :  { %10769 = vst [vmem:[#allocation16_spill] sm:$0xff] %v4556_v2 }
  0x92   :  { %444 = vperm.xlu2 %3832, %v201_v3   ;;  %v4702_v3 = vld [vmem:[%s10405_s0 + $0x48] sm:$0xff] }
  0x93   :  { %441 = vperm.xlu1 %3831, %v200_v4   ;;  %438 = vperm.xlu0 %3830, %v199_v5   ;;  %v4707_v4 = vld [vmem:[%s10405_s0 + $0x50] sm:$0xff]  ;;  %v687_v5 = vsel %vm659_vm0, %v4702_v3, -inf }
  0x94   :  { %v4606_v22 = vpop.permute.xlu2 %345 }
  0x95   :  { %v4569_v7 = vpop.permute.xlu0 %312  ;;  %v4574_v9 = vpop.permute.xlu1 %315  ;;  %10779 = vst [vmem:[#allocation26_spill] sm:$0xff] %v4606_v22 }
  0x96   :  { %10771 = vst [vmem:[#allocation18_spill] sm:$0xff] %v4569_v7 }
  0x97   :  { %10772 = vst [vmem:[#allocation19_spill] sm:$0xff] %v4574_v9  ;;  %v4978_v9 = vld [vmem:[%s10405_s0 + $0x148] sm:$0xff] }
  0x98   :  { %10824 = vst [vmem:[#allocation71_spill] sm:$0xff] %v4978_v9  ;;  %v783_v22 = vsel %vm659_vm0, %v4978_v9, -inf  ;;  %v5084_v9 = vld [vmem:[%s10405_s0 + $0x1a8] sm:$0xff] }
  0x99   :  { %10847 = vst [vmem:[#allocation94_spill] sm:$0xff] %v5084_v9 }
  0x9a   :  { %453 = vperm.xlu2 %3832, %v204_v8   ;;  %v690_v8 = vsel %vm659_vm0, %v4707_v4, -inf }
  0x9b   :  { %450 = vperm.xlu1 %3831, %v203_v10   ;;  %447 = vperm.xlu0 %3830, %v202_v11  }
  0x9c   :  { %v4612_v25 = vpop.permute.xlu2 %354 }
  0x9d   :  { %v4587_v14 = vpop.permute.xlu0 %321  ;;  %v4595_v17 = vpop.permute.xlu1 %324  ;;  %10782 = vst [vmem:[#allocation29_spill] sm:$0xff] %v4612_v25 }
  0x9e   :  { %10774 = vst [vmem:[#allocation21_spill] sm:$0xff] %v4587_v14 }
  0x9f   :  { %10775 = vst [vmem:[#allocation22_spill] sm:$0xff] %v4595_v17  ;;  %v4953_v17 = vld [vmem:[%s10405_s0 + $0x130] sm:$0xff] }
  0xa0   :  { %10819 = vst [vmem:[#allocation66_spill] sm:$0xff] %v4953_v17  ;;  %v774_v25 = vsel %vm659_vm0, %v4953_v17, -inf }
  0xa2   :  { %462 = vperm.xlu2 %3832, %v207_v12   ;;  %v4720_v12 = vld [vmem:[%s10405_s0 + $0x58] sm:$0xff] }
  0xa3   :  { %459 = vperm.xlu1 %3831, %v206_v15   ;;  %456 = vperm.xlu0 %3830, %v205_v16   ;;  %v693_v16 = vsel %vm659_vm0, %v4720_v12, -inf }
  0xa4   :  { %v4623_v29 = vpop.permute.xlu2 %363 }
  0xa5   :  { %v4602_v20 = vpop.permute.xlu0 %330  ;;  %v4604_v21 = vpop.permute.xlu1 %333  ;;  %10785 = vst [vmem:[#allocation32_spill] sm:$0xff] %v4623_v29 }
  0xa6   :  { %10777 = vst [vmem:[#allocation24_spill] sm:$0xff] %v4602_v20  ;;  %v4926_v20 = vld [vmem:[%s10405_s0 + $0x118] sm:$0xff] }
  0xa7   :  { %10778 = vst [vmem:[#allocation25_spill] sm:$0xff] %v4604_v21 }
  0xab   :  { %465 = vperm.xlu0 %3830, %v208_v18   ;;  %v4729_v18 = vld [vmem:[%s10405_s0 + $0x60] sm:$0xff] }
  0xac   :  { %v4655_v39 = vpop.permute.xlu2 %372 }
  0xad   :  { %v4608_v23 = vpop.permute.xlu0 %339  ;;  %v4610_v24 = vpop.permute.xlu1 %342  ;;  %10788 = vst [vmem:[#allocation35_spill] sm:$0xff] %v4655_v39 }
  0xae   :  { %10780 = vst [vmem:[#allocation27_spill] sm:$0xff] %v4608_v23  ;;  %v4911_v23 = vld [vmem:[%s10405_s0 + $0x110] sm:$0xff] }
  0xaf   :  { %10781 = vst [vmem:[#allocation28_spill] sm:$0xff] %v4610_v24  ;;  %v762_v39 = vsel %vm659_vm0, %v4911_v23, -inf }
  0xb4   :  { %v4686_v56 = vpop.permute.xlu2 %381 }
  0xb5   :  { %v4614_v26 = vpop.permute.xlu0 %348  ;;  %v4616_v27 = vpop.permute.xlu1 %351  ;;  %10791 = vst [vmem:[#allocation38_spill] sm:$0xff] %v4686_v56  ;;  %v4883_v56 = vld [vmem:[%s10405_s0 + $0xf0] sm:$0xff] }
  0xb6   :  { %10783 = vst [vmem:[#allocation30_spill] sm:$0xff] %v4614_v26 }
  0xb7   :  { %10784 = vst [vmem:[#allocation31_spill] sm:$0xff] %v4616_v27 }
  0xbc   :  { %v4713_v10 = vpop.permute.xlu2 %390 }
  0xbd   :  { %v4625_v30 = vpop.permute.xlu0 %357  ;;  %v4634_v33 = vpop.permute.xlu1 %360  ;;  %10794 = vst [vmem:[#allocation41_spill] sm:$0xff] %v4713_v10 }
  0xbe   :  { %10786 = vst [vmem:[#allocation33_spill] sm:$0xff] %v4625_v30 }
  0xbf   :  { %10787 = vst [vmem:[#allocation34_spill] sm:$0xff] %v4634_v33  ;;  %v4849_v33 = vld [vmem:[%s10405_s0 + $0xd0] sm:$0xff] }
  0xc0   :  { %v738_v10 = vsel %vm659_vm0, %v4849_v33, -inf }
  0xc5   :  { %v4657_v40 = vpop.permute.xlu0 %366  ;;  %v4663_v44 = vpop.permute.xlu1 %369 }
  0xc6   :  { %10789 = vst [vmem:[#allocation36_spill] sm:$0xff] %v4657_v40 }
  0xc7   :  { %10790 = vst [vmem:[#allocation37_spill] sm:$0xff] %v4663_v44  ;;  %v4824_v44 = vld [vmem:[%s10405_s0 + $0xb8] sm:$0xff] }
  0xcb   :  { %664 = vmax.xlane.f32.xlu2 %v663_v31  ;;  %v4734_v31 = vld [vmem:[%s10405_s0 + $0x68] sm:$0xff] }
  0xcd   :  { %661 = vmax.xlane.f32.xlu1 %v660_v34  ;;  %v4688_v57 = vpop.permute.xlu0 %375  ;;  %v4690_v61 = vpop.permute.xlu1 %378  ;;  %v696_v34 = vsel %vm659_vm0, %v4729_v18, -inf }
  0xce   :  { %10792 = vst [vmem:[#allocation39_spill] sm:$0xff] %v4688_v57  ;;  %v4797_v57 = vld [vmem:[%s10405_s0 + $0xa0] sm:$0xff] }
  0xcf   :  { %10793 = vst [vmem:[#allocation40_spill] sm:$0xff] %v4690_v61 }
  0xd3   :  { %670 = vmax.xlane.f32.xlu2 %v669_v36  ;;  %v699_v36 = vsel %vm659_vm0, %v4734_v31, -inf }
  0xd5   :  { %667 = vmax.xlane.f32.xlu0 %v666_v41  ;;  %673 = vmax.xlane.f32.xlu1 %v672_v42  ;;  %v4715_v11 = vpop.permute.xlu0 %384  ;;  %v4722_v15 = vpop.permute.xlu1 %387  ;;  %v4743_v41 = vld [vmem:[%s10405_s0 + $0x70] sm:$0xff] }
  0xd6   :  { %10795 = vst [vmem:[#allocation42_spill] sm:$0xff] %v4715_v11  ;;  %v4745_v42 = vpop.permute.xlu2 %399 }
  0xd7   :  { %10796 = vst [vmem:[#allocation43_spill] sm:$0xff] %v4722_v15 }
  0xd8   :  { %10797 = vst [vmem:[#allocation44_spill] sm:$0xff] %v4745_v42  ;;  %v729_v42 = vsel %vm659_vm0, %v4824_v44, -inf }
  0xdb   :  { %676 = vmax.xlane.f32.xlu2 %v675_v46 }
  0xdd   :  { %679 = vmax.xlane.f32.xlu0 %v678_v52  ;;  %682 = vmax.xlane.f32.xlu1 %v681_v55  ;;  %v4747_v46 = vpop.permute.xlu0 %393  ;;  %v702_v52 = vsel %vm659_vm0, %v4743_v41, -inf  ;;  %v4754_v55 = vld [vmem:[%s10405_s0 + $0x78] sm:$0xff] }
  0xde   :  { %10798 = vst [vmem:[#allocation45_spill] sm:$0xff] %v4747_v46  ;;  %v4782_v46 = vld [vmem:[%s10405_s0 + $0x98] sm:$0xff] }
  0xdf   :  { %v717_v11 = vsel %vm659_vm0, %v4782_v46, -inf }
  0xe3   :  { %685 = vmax.xlane.f32.xlu2 %v684_v63  ;;  %v4759_v63 = vld [vmem:[%s10405_s0 + $0x80] sm:$0xff] }
  0xe5   :  { %688 = vmax.xlane.f32.xlu0 %v687_v5  ;;  %691 = vmax.xlane.f32.xlu1 %v690_v8  ;;  %v4761_v5 = vpop.permute.xlu1 %396  ;;  %v705_v8 = vsel %vm659_vm0, %v4754_v55, -inf }
  0xe6   :  { %10799 = vst [vmem:[#allocation46_spill] sm:$0xff] %v4761_v5  ;;  %v4777_v5 = vld [vmem:[%s10405_s0 + $0x90] sm:$0xff] }
  0xeb   :  { %694 = vmax.xlane.f32.xlu2 %v693_v16  ;;  %v708_v16 = vsel %vm659_vm0, %v4759_v63, -inf }
  0xed   :  { %697 = vmax.xlane.f32.xlu0 %v696_v34  ;;  %700 = vmax.xlane.f32.xlu1 %v699_v36  ;;  %v4770_v34 = vld [vmem:[%s10405_s0 + $0x88] sm:$0xff]  ;;  %v4792_v15 = vpop.permute.xlu1 %405 }
  0xee   :  { %v711_v36 = vsel %vm659_vm0, %v4770_v34, -inf  ;;  %10802 = vst [vmem:[#allocation49_spill] sm:$0xff] %v4792_v15 }
  0xf3   :  { %703 = vmax.xlane.f32.xlu2 %v702_v52  ;;  %v4784_v52 = vpop.permute.xlu2 %408 }
  0xf4   :  { %10800 = vst [vmem:[#allocation47_spill] sm:$0xff] %v4784_v52  ;;  %v720_v52 = vsel %vm659_vm0, %v4797_v57, -inf }
  0xf5   :  { %706 = vmax.xlane.f32.xlu0 %v705_v8  ;;  %709 = vmax.xlane.f32.xlu1 %v708_v16  ;;  %v4786_v8 = vpop.permute.xlu0 %402  ;;  %v714_v16 = vsel %vm659_vm0, %v4777_v5, -inf  ;;  %v4819_v40 = vpop.permute.xlu1 %414 }
  0xf6   :  { %10801 = vst [vmem:[#allocation48_spill] sm:$0xff] %v4786_v8  ;;  %v4804_v8 = vld [vmem:[%s10405_s0 + $0xa8] sm:$0xff] }
  0xf7   :  { %10805 = vst [vmem:[#allocation52_spill] sm:$0xff] %v4819_v40 }
  0xfb   :  { %712 = vmax.xlane.f32.xlu2 %v711_v36  ;;  %v4809_v36 = vld [vmem:[%s10405_s0 + $0xb0] sm:$0xff]  ;;  %v4815_v15 = vpop.permute.xlu2 %417 }
  0xfc   :  { %10803 = vst [vmem:[#allocation50_spill] sm:$0xff] %v4815_v15 }
  0xfd   :  { %715 = vmax.xlane.f32.xlu0 %v714_v16  ;;  %718 = vmax.xlane.f32.xlu1 %v717_v11  ;;  %v723_v11 = vsel %vm659_vm0, %v4804_v8, -inf  ;;  %v726_v16 = vsel %vm659_vm0, %v4809_v36, -inf  ;;  %v4817_v61 = vpop.permute.xlu0 %411  ;;  %v4851_v30 = vpop.permute.xlu1 %423 }
  0xfe   :  { %10804 = vst [vmem:[#allocation51_spill] sm:$0xff] %v4817_v61 }
  0xff   :  { %10808 = vst [vmem:[#allocation55_spill] sm:$0xff] %v4851_v30  ;;  %v4872_v30 = vld [vmem:[%s10405_s0 + $0xe8] sm:$0xff] }
 0x100   :  { %v747_v26 = vsel %vm659_vm0, %v4872_v30, -inf }
 0x103   :  { %721 = vmax.xlane.f32.xlu2 %v720_v52  ;;  %v4831_v52 = vld [vmem:[%s10405_s0 + $0xc0] sm:$0xff]  ;;  %v4842_v40 = vpop.permute.xlu2 %426 }
 0x104   :  { %10806 = vst [vmem:[#allocation53_spill] sm:$0xff] %v4842_v40 }
 0x105   :  { %724 = vmax.xlane.f32.xlu0 %v723_v11  ;;  %727 = vmax.xlane.f32.xlu1 %v726_v16  ;;  %v4836_v11 = vld [vmem:[%s10405_s0 + $0xc8] sm:$0xff]  ;;  %v732_v16 = vsel %vm659_vm0, %v4831_v52, -inf  ;;  %v4844_v15 = vpop.permute.xlu0 %420 }
 0x106   :  { %v735_v61 = vsel %vm659_vm0, %v4836_v11, -inf  ;;  %10807 = vst [vmem:[#allocation54_spill] sm:$0xff] %v4844_v15 }
 0x10b   :  { %730 = vmax.xlane.f32.xlu2 %v729_v42  ;;  %v4858_v42 = vld [vmem:[%s10405_s0 + $0xd8] sm:$0xff]  ;;  %v4874_v40 = vpop.permute.xlu2 %435 }
 0x10c   :  { %10809 = vst [vmem:[#allocation56_spill] sm:$0xff] %v4874_v40  ;;  %v4899_v40 = vld [vmem:[%s10405_s0 + $0x100] sm:$0xff] }
 0x10d   :  { %733 = vmax.xlane.f32.xlu0 %v732_v16  ;;  %736 = vmax.xlane.f32.xlu1 %v735_v61  ;;  %v4863_v61 = vld [vmem:[%s10405_s0 + $0xe0] sm:$0xff]  ;;  %v741_v16 = vsel %vm659_vm0, %v4858_v42, -inf  ;;  %v4876_v27 = vpop.permute.xlu0 %429  ;;  %v756_v24 = vsel %vm659_vm0, %v4899_v40, -inf }
 0x10e   :  { %v744_v15 = vsel %vm659_vm0, %v4863_v61, -inf  ;;  %10810 = vst [vmem:[#allocation57_spill] sm:$0xff] %v4876_v27 }
 0x113   :  { %739 = vmax.xlane.f32.xlu2 %v738_v10  ;;  %v4888_v10 = vld [vmem:[%s10405_s0 + $0xf8] sm:$0xff] }
 0x114   :  { %v753_v27 = vsel %vm659_vm0, %v4888_v10, -inf }
 0x115   :  { %742 = vmax.xlane.f32.xlu0 %v741_v16  ;;  %745 = vmax.xlane.f32.xlu1 %v744_v15  ;;  %v4890_v15 = vpop.permute.xlu1 %432  ;;  %v750_v16 = vsel %vm659_vm0, %v4883_v56, -inf }
 0x116   :  { %10811 = vst [vmem:[#allocation58_spill] sm:$0xff] %v4890_v15  ;;  %v4906_v15 = vld [vmem:[%s10405_s0 + $0x108] sm:$0xff] }
 0x11b   :  { %748 = vmax.xlane.f32.xlu2 %v747_v26  ;;  %v4913_v26 = vpop.permute.xlu2 %444 }
 0x11c   :  { %10812 = vst [vmem:[#allocation59_spill] sm:$0xff] %v4913_v26  ;;  %v765_v26 = vsel %vm659_vm0, %v4926_v20, -inf }
 0x11d   :  { %751 = vmax.xlane.f32.xlu0 %v750_v16  ;;  %754 = vmax.xlane.f32.xlu1 %v753_v27  ;;  %v4915_v27 = vpop.permute.xlu0 %438  ;;  %v759_v16 = vsel %vm659_vm0, %v4906_v15, -inf  ;;  %v4921_v21 = vpop.permute.xlu1 %441 }
 0x11e   :  { %10813 = vst [vmem:[#allocation60_spill] sm:$0xff] %v4915_v27  ;;  %v4933_v27 = vld [vmem:[%s10405_s0 + $0x120] sm:$0xff] }
 0x11f   :  { %10814 = vst [vmem:[#allocation61_spill] sm:$0xff] %v4921_v21 }
 0x123   :  { %757 = vmax.xlane.f32.xlu2 %v756_v24  ;;  %v4938_v24 = vld [vmem:[%s10405_s0 + $0x128] sm:$0xff]  ;;  %v4944_v21 = vpop.permute.xlu2 %453 }
 0x124   :  { %10815 = vst [vmem:[#allocation62_spill] sm:$0xff] %v4938_v24 }
 0x125   :  { %760 = vmax.xlane.f32.xlu0 %v759_v16  ;;  %763 = vmax.xlane.f32.xlu1 %v762_v39  ;;  %v768_v39 = vsel %vm659_vm0, %v4933_v27, -inf  ;;  %v771_v16 = vsel %vm659_vm0, %v4938_v24, -inf  ;;  %10816 = vst [vmem:[#allocation63_spill] sm:$0xff] %v4944_v21  ;;  %v4946_v29 = vpop.permute.xlu0 %447  ;;  %v4948_v14 = vpop.permute.xlu1 %450 }
 0x126   :  { %10817 = vst [vmem:[#allocation64_spill] sm:$0xff] %v4946_v29 }
 0x127   :  { %10818 = vst [vmem:[#allocation65_spill] sm:$0xff] %v4948_v14 }
 0x12b   :  { %766 = vmax.xlane.f32.xlu2 %v765_v26  ;;  %v4960_v26 = vld [vmem:[%s10405_s0 + $0x138] sm:$0xff]  ;;  %v4971_v14 = vpop.permute.xlu2 %462 }
 0x12c   :  { %10820 = vst [vmem:[#allocation67_spill] sm:$0xff] %v4960_v26 }
 0x12d   :  { %769 = vmax.xlane.f32.xlu0 %v768_v39  ;;  %772 = vmax.xlane.f32.xlu1 %v771_v16  ;;  %v4965_v39 = vld [vmem:[%s10405_s0 + $0x140] sm:$0xff]  ;;  %v777_v16 = vsel %vm659_vm0, %v4960_v26, -inf  ;;  %10822 = vst [vmem:[#allocation69_spill] sm:$0xff] %v4971_v14  ;;  %v4973_v21 = vpop.permute.xlu0 %456  ;;  %v4980_v7 = vpop.permute.xlu1 %459 }
 0x12e   :  { %10821 = vst [vmem:[#allocation68_spill] sm:$0xff] %v4965_v39  ;;  %v780_v29 = vsel %vm659_vm0, %v4965_v39, -inf  ;;  %v5003_v14 = vld [vmem:[%s10405_s0 + $0x160] sm:$0xff] }
 0x12f   :  { %10823 = vst [vmem:[#allocation70_spill] sm:$0xff] %v4973_v21  ;;  %v792_v19 = vsel %vm659_vm0, %v5003_v14, -inf }
 0x130   :  { %10825 = vst [vmem:[#allocation72_spill] sm:$0xff] %v4980_v7 }
 0x131   :  { %10829 = vst [vmem:[#allocation76_spill] sm:$0xff] %v5003_v14 }
 0x133   :  { %775 = vmax.xlane.f32.xlu2 %v774_v25  ;;  %v4987_v25 = vld [vmem:[%s10405_s0 + $0x150] sm:$0xff] }
 0x134   :  { %10826 = vst [vmem:[#allocation73_spill] sm:$0xff] %v4987_v25 }
 0x135   :  { %778 = vmax.xlane.f32.xlu0 %v777_v16  ;;  %781 = vmax.xlane.f32.xlu1 %v780_v29  ;;  %v4992_v29 = vld [vmem:[%s10405_s0 + $0x158] sm:$0xff]  ;;  %v786_v16 = vsel %vm659_vm0, %v4987_v25, -inf  ;;  %v5005_v2 = vpop.permute.xlu0 %465 }
 0x136   :  { %10827 = vst [vmem:[#allocation74_spill] sm:$0xff] %v4992_v29  ;;  %v789_v21 = vsel %vm659_vm0, %v4992_v29, -inf  ;;  %v5030_v29 = vld [vmem:[%s10405_s0 + $0x178] sm:$0xff] }
 0x137   :  { %10830 = vst [vmem:[#allocation77_spill] sm:$0xff] %v5005_v2 }
 0x138   :  { %10835 = vst [vmem:[#allocation82_spill] sm:$0xff] %v5030_v29 }
 0x13b   :  { %784 = vmax.xlane.f32.xlu2 %v783_v22  ;;  %v5014_v22 = vld [vmem:[%s10405_s0 + $0x168] sm:$0xff] }
 0x13c   :  { %10832 = vst [vmem:[#allocation79_spill] sm:$0xff] %v5014_v22 }
 0x13d   :  { %787 = vmax.xlane.f32.xlu0 %v786_v16  ;;  %790 = vmax.xlane.f32.xlu1 %v789_v21  ;;  %v5019_v21 = vld [vmem:[%s10405_s0 + $0x170] sm:$0xff]  ;;  %v795_v16 = vsel %vm659_vm0, %v5014_v22, -inf  ;;  %v801_v22 = vsel %vm659_vm0, %v5030_v29, -inf }
 0x13e   :  { %v4998_v7 = vpop.xlane.xlu2 %664  ;;  %10833 = vst [vmem:[#allocation80_spill] sm:$0xff] %v5019_v21  ;;  %v798_v2 = vsel %vm659_vm0, %v5019_v21, -inf }
 0x13f   :  { %10828 = vst [vmem:[#allocation75_spill] sm:$0xff] %v4998_v7 }
 0x140   :  { %v5007_v1 = vpop.xlane.xlu1 %661 }
 0x141   :  { %10831 = vst [vmem:[#allocation78_spill] sm:$0xff] %v5007_v1 }
 0x143   :  { %793 = vmax.xlane.f32.xlu2 %v792_v19  ;;  %v5041_v19 = vld [vmem:[%s10405_s0 + $0x180] sm:$0xff] }
 0x144   :  { %10838 = vst [vmem:[#allocation85_spill] sm:$0xff] %v5041_v19 }
 0x145   :  { %796 = vmax.xlane.f32.xlu0 %v795_v16  ;;  %799 = vmax.xlane.f32.xlu1 %v798_v2  ;;  %v5046_v2 = vld [vmem:[%s10405_s0 + $0x188] sm:$0xff]  ;;  %v804_v16 = vsel %vm659_vm0, %v5041_v19, -inf  ;;  %v810_v19 = vsel %vm659_vm0, %v5057_v13, -inf }
 0x146   :  { %v5025_v14 = vpop.xlane.xlu2 %670  ;;  %10839 = vst [vmem:[#allocation86_spill] sm:$0xff] %v5046_v2  ;;  %v807_v21 = vsel %vm659_vm0, %v5046_v2, -inf }
 0x147   :  { %10834 = vst [vmem:[#allocation81_spill] sm:$0xff] %v5025_v14 }
 0x148   :  { %v5032_v59 = vpop.xlane.xlu0 %667  ;;  %v5034_v60 = vpop.xlane.xlu1 %673 }
 0x149   :  { %10836 = vst [vmem:[#allocation83_spill] sm:$0xff] %v5032_v59 }
 0x14a   :  { %10837 = vst [vmem:[#allocation84_spill] sm:$0xff] %v5034_v60 }
 0x14b   :  { %802 = vmax.xlane.f32.xlu2 %v801_v22  ;;  %v5068_v22 = vld [vmem:[%s10405_s0 + $0x198] sm:$0xff] }
 0x14c   :  { %10844 = vst [vmem:[#allocation91_spill] sm:$0xff] %v5068_v22 }
 0x14d   :  { %805 = vmax.xlane.f32.xlu0 %v804_v16  ;;  %808 = vmax.xlane.f32.xlu1 %v807_v21  ;;  %v5073_v21 = vld [vmem:[%s10405_s0 + $0x1a0] sm:$0xff]  ;;  %v813_v16 = vsel %vm659_vm0, %v5068_v22, -inf  ;;  %v819_v22 = vsel %vm659_vm0, %v5084_v9, -inf }
 0x14e   :  { %v5052_v29 = vpop.xlane.xlu2 %676  ;;  %10845 = vst [vmem:[#allocation92_spill] sm:$0xff] %v5073_v21  ;;  %v816_v2 = vsel %vm659_vm0, %v5073_v21, -inf  ;;  %v137_v9 = vld [vmem:[%s10405_s0 + $0x1c0] sm:$0xff] }
 0x14f   :  { %10840 = vst [vmem:[#allocation87_spill] sm:$0xff] %v5052_v29  ;;  %v828_v26 = vsel %vm659_vm0, %v137_v9, -inf  ;;  %v140_v9 = vld [vmem:[%s10405_s0 + $0x1d8] sm:$0xff] }
 0x150   :  { %v5059_v53 = vpop.xlane.xlu0 %679  ;;  %v5061_v25 = vpop.xlane.xlu1 %682 }
 0x151   :  { %10842 = vst [vmem:[#allocation89_spill] sm:$0xff] %v5059_v53 }
 0x152   :  { %10843 = vst [vmem:[#allocation90_spill] sm:$0xff] %v5061_v25 }
 0x153   :  { %811 = vmax.xlane.f32.xlu2 %v810_v19  ;;  %v5095_v19 = vld [vmem:[%s10405_s0 + $0x1b0] sm:$0xff] }
 0x154   :  { %10850 = vst [vmem:[#allocation97_spill] sm:$0xff] %v5095_v19 }
 0x155   :  { %814 = vmax.xlane.f32.xlu0 %v813_v16  ;;  %817 = vmax.xlane.f32.xlu1 %v816_v2  ;;  %v136_v2 = vld [vmem:[%s10405_s0 + $0x1b8] sm:$0xff]  ;;  %v822_v16 = vsel %vm659_vm0, %v5095_v19, -inf  ;;  %v138_v19 = vld [vmem:[%s10405_s0 + $0x1c8] sm:$0xff] }
 0x156   :  { %v5079_v13 = vpop.xlane.xlu2 %685  ;;  %v825_v21 = vsel %vm659_vm0, %v136_v2, -inf }
 0x157   :  { %10846 = vst [vmem:[#allocation93_spill] sm:$0xff] %v5079_v13 }
 0x158   :  { %v5086_v54 = vpop.xlane.xlu0 %688  ;;  %v5088_v39 = vpop.xlane.xlu1 %691 }
 0x159   :  { %10848 = vst [vmem:[#allocation95_spill] sm:$0xff] %v5086_v54 }
 0x15a   :  { %10849 = vst [vmem:[#allocation96_spill] sm:$0xff] %v5088_v39 }
 0x15b   :  { %820 = vmax.xlane.f32.xlu2 %v819_v22  ;;  %v139_v22 = vld [vmem:[%s10405_s0 + $0x1d0] sm:$0xff] }
 0x15c   :  { %v834_v2 = vsel %vm659_vm0, %v139_v22, -inf }
 0x15d   :  { %823 = vmax.xlane.f32.xlu0 %v822_v16  ;;  %826 = vmax.xlane.f32.xlu1 %v825_v21  ;;  %v831_v21 = vsel %vm659_vm0, %v138_v19, -inf  ;;  %v852_v16 = vsub.f32 %v4632_v32, %v5007_v1  ;;  %v837_v19 = vsel %vm659_vm0, %v140_v9, -inf  ;;  %v141_v32 = vld [vmem:[%s10405_s0 + $0x1e0] sm:$0xff]  ;;  %v854_v9 = vsub.f32 %v4648_v37, %v5032_v59 }
 0x15e   :  { %v5103_v6 = vpop.xlane.xlu2 %694  ;;  %v840_v1 = vsel %vm659_vm0, %v141_v32, -inf  ;;  %v856_v37 = vsub.f32 %v4653_v38, %v5034_v60 }
 0x15f   :  { %10851 = vst [vmem:[#allocation98_spill] sm:$0xff] %v5103_v6  ;;  %v916_v22 = vmul.f32 1.442695, %v852_v16  ;;  %v920_v50 = vmul.f32 1.442695, %v854_v9 }
 0x160   :  { %v5108_v48 = vpop.xlane.xlu0 %697  ;;  %v5110_v47 = vpop.xlane.xlu1 %700  ;;  %v924_v9 = vmul.f32 1.442695, %v856_v37  ;;  %v860_v37 = vsub.f32 %v4695_v62, %v5079_v13 }
 0x161   :  { %10852 = vst [vmem:[#allocation99_spill] sm:$0xff] %v5108_v48  ;;  %3833 = vpow2.f32 %v916_v22  ;;  %v858_v22 = vsub.f32 %v4675_v49, %v5059_v53 }
 0x162   :  { %10853 = vst [vmem:[#allocation100_spill] sm:$0xff] %v5110_v47 }
 0x163   :  { %829 = vmax.xlane.f32.xlu2 %v828_v26  ;;  %v853_v26 = vsub.f32 %v4621_v28, %v4998_v7 }
 0x165   :  { %832 = vmax.xlane.f32.xlu0 %v831_v21  ;;  %835 = vmax.xlane.f32.xlu1 %v834_v2  ;;  %v142_v21 = vld [vmem:[%s10405_s0 + $0x1e8] sm:$0xff]  ;;  %v855_v2 = vsub.f32 %v4641_v35, %v5025_v14  ;;  %v918_v28 = vmul.f32 1.442695, %v853_v26  ;;  %v143_v35 = vld [vmem:[%s10405_s0 + $0x1f0] sm:$0xff] }
 0x166   :  { %v5123_v0 = vpop.xlane.xlu2 %703  ;;  %v843_v24 = vsel %vm659_vm0, %v142_v21, -inf  ;;  %v846_v21 = vsel %vm659_vm0, %v143_v35, -inf }
 0x167   :  { %10854 = vst [vmem:[#allocation101_spill] sm:$0xff] %v5123_v0  ;;  %v922_v16 = vmul.f32 1.442695, %v855_v2  ;;  %3835 = vpow2.f32 %v918_v28  ;;  %v5165_v26 = vpop.eup %3833 }
 0x168   :  { %v5128_v17 = vpop.xlane.xlu0 %706  ;;  %v5130_v58 = vpop.xlane.xlu1 %709  ;;  %v1044_v2 = vsel %vm659_vm0, %v5165_v26, 0.0 }
 0x169   :  { %10855 = vst [vmem:[#allocation102_spill] sm:$0xff] %v5128_v17  ;;  %3837 = vpow2.f32 %v922_v16 }
 0x16a   :  { %10856 = vst [vmem:[#allocation103_spill] sm:$0xff] %v5130_v58  ;;  %3839 = vpow2.f32 %v920_v50 }
 0x16b   :  { %838 = vmax.xlane.f32.xlu2 %v837_v19  ;;  %3841 = vpow2.f32 %v924_v9 }
 0x16d   :  { %841 = vmax.xlane.f32.xlu0 %v840_v1  ;;  %844 = vmax.xlane.f32.xlu1 %v843_v24  ;;  %v144_v1 = vld [vmem:[%s10405_s0 + $0x1f8] sm:$0xff]  ;;  %v857_v24 = vsub.f32 %v4668_v45, %v5052_v29  ;;  %v5173_v35 = vpop.eup %3835  ;;  %v928_v29 = vmul.f32 1.442695, %v858_v22 }
 0x16e   :  { %v5147_v7 = vpop.xlane.xlu2 %712  ;;  %v849_v19 = vsel %vm659_vm0, %v144_v1, -inf }
 0x16f   :  { %10857 = vst [vmem:[#allocation104_spill] sm:$0xff] %v5147_v7  ;;  %v926_v28 = vmul.f32 1.442695, %v857_v24  ;;  %v5175_v1 = vpop.eup %3837  ;;  %v1047_v24 = vsel %vm659_vm0, %v5173_v35, 0.0 }
 0x170   :  { %v5152_v14 = vpop.xlane.xlu0 %715  ;;  %v5154_v32 = vpop.xlane.xlu1 %718 }
 0x171   :  { %10858 = vst [vmem:[#allocation105_spill] sm:$0xff] %v5152_v14  ;;  %v5181_v49 = vpop.eup %3839  ;;  %3843 = vpow2.f32 %v926_v28 }
 0x172   :  { %10859 = vst [vmem:[#allocation106_spill] sm:$0xff] %v5154_v32  ;;  %3845 = vpow2.f32 %v928_v29  ;;  %v1050_v22 = vsel %vm659_vm0, %v5181_v49, 0.0  ;;  %v5197_v13 = vpop.eup %3841 }
 0x173   :  { %847 = vmax.xlane.f32.xlu2 %v846_v21  ;;  %v859_v21 = vsub.f32 %v4680_v51, %v5061_v25  ;;  %v932_v51 = vmul.f32 1.442695, %v860_v37  ;;  %v863_v37 = vsub.f32 %v4720_v12, %v5103_v6 }
 0x175   :  { %850 = vmax.xlane.f32.xlu0 %v849_v19  ;;  %1045 = vadd.xlane.f32.xlu1 %v1044_v2  ;;  %v861_v19 = vsub.f32 %v4702_v3, %v5086_v54  ;;  %v1053_v2 = vsel %vm659_vm0, %v5175_v1, 0.0  ;;  %v930_v9 = vmul.f32 1.442695, %v859_v21  ;;  %v862_v21 = vsub.f32 %v4707_v4, %v5088_v39 }
 0x176   :  { %v5171_v16 = vpop.xlane.xlu2 %721  ;;  %v938_v4 = vmul.f32 1.442695, %v863_v37  ;;  %v866_v37 = vsub.f32 %v4743_v41, %v5123_v0 }
 0x177   :  { %10860 = vst [vmem:[#allocation107_spill] sm:$0xff] %v5171_v16  ;;  %v934_v25 = vmul.f32 1.442695, %v861_v19  ;;  %v5199_v29 = vpop.eup %3843  ;;  %3847 = vpow2.f32 %v930_v9  ;;  %v864_v19 = vsub.f32 %v4729_v18, %v5108_v48  ;;  %v936_v54 = vmul.f32 1.442695, %v862_v21 }
 0x178   :  { %v5177_v60 = vpop.xlane.xlu0 %724  ;;  %v5179_v50 = vpop.xlane.xlu1 %727  ;;  %3849 = vpow2.f32 %v932_v51  ;;  %v865_v21 = vsub.f32 %v4734_v31, %v5110_v47  ;;  %v944_v31 = vmul.f32 1.442695, %v866_v37  ;;  %v869_v37 = vsub.f32 %v4770_v34, %v5147_v7 }
 0x179   :  { %10861 = vst [vmem:[#allocation108_spill] sm:$0xff] %v5177_v60  ;;  %3851 = vpow2.f32 %v934_v25  ;;  %v940_v39 = vmul.f32 1.442695, %v864_v19  ;;  %v867_v19 = vsub.f32 %v4754_v55, %v5128_v17 }
 0x17a   :  { %10862 = vst [vmem:[#allocation109_spill] sm:$0xff] %v5179_v50  ;;  %3853 = vpow2.f32 %v936_v54  ;;  %v942_v48 = vmul.f32 1.442695, %v865_v21  ;;  %v868_v21 = vsub.f32 %v4759_v63, %v5130_v58  ;;  %v950_v63 = vmul.f32 1.442695, %v869_v37 }
 0x17b   :  { %1048 = vadd.xlane.f32.xlu2 %v1047_v24  ;;  %v5205_v24 = vpop.eup %3845  ;;  %3855 = vpow2.f32 %v938_v4  ;;  %v946_v47 = vmul.f32 1.442695, %v867_v19  ;;  %v870_v19 = vsub.f32 %v4777_v5, %v5152_v14  ;;  %v872_v37 = vsub.f32 %v4797_v57, %v5171_v16 }
 0x17c   :  { %v1062_v9 = vsel %vm659_vm0, %v5205_v24, 0.0  ;;  %3857 = vpow2.f32 %v940_v39  ;;  %v948_v17 = vmul.f32 1.442695, %v868_v21  ;;  %v871_v21 = vsub.f32 %v4782_v46, %v5154_v32 }
 0x17d   :  { %1051 = vadd.xlane.f32.xlu0 %v1050_v22  ;;  %1054 = vadd.xlane.f32.xlu1 %v1053_v2  ;;  %v1056_v22 = vsel %vm659_vm0, %v5197_v13, 0.0  ;;  %v1059_v2 = vsel %vm659_vm0, %v5199_v29, 0.0  ;;  %v5221_v6 = vpop.eup %3847  ;;  %3859 = vpow2.f32 %v942_v48  ;;  %v952_v7 = vmul.f32 1.442695, %v870_v19 }
 0x17e   :  { %v5195_v28 = vpop.xlane.xlu2 %730  ;;  %10867 = vst [vmem:[#allocation114_spill] sm:$0xff] %v5221_v6  ;;  %v5223_v25 = vpop.eup %3849  ;;  %3861 = vpow2.f32 %v944_v31  ;;  %v873_v19 = vsub.f32 %v4804_v8, %v5177_v60  ;;  %v954_v14 = vmul.f32 1.442695, %v871_v21  ;;  %v956_v46 = vmul.f32 1.442695, %v872_v37 }
 0x17f   :  { %10863 = vst [vmem:[#allocation110_spill] sm:$0xff] %v5195_v28  ;;  %3863 = vpow2.f32 %v946_v47  ;;  %v874_v21 = vsub.f32 %v4809_v36, %v5179_v50  ;;  %v875_v37 = vsub.f32 %v4824_v44, %v5195_v28 }
 0x180   :  { %v5201_v53 = vpop.xlane.xlu0 %733  ;;  %v5203_v3 = vpop.xlane.xlu1 %736  ;;  %3865 = vpow2.f32 %v948_v17  ;;  %v958_v16 = vmul.f32 1.442695, %v873_v19 }
 0x181   :  { %10864 = vst [vmem:[#allocation111_spill] sm:$0xff] %v5201_v53  ;;  %3867 = vpow2.f32 %v950_v63  ;;  %v876_v19 = vsub.f32 %v4831_v52, %v5201_v53  ;;  %v960_v60 = vmul.f32 1.442695, %v874_v21  ;;  %v962_v36 = vmul.f32 1.442695, %v875_v37 }
 0x182   :  { %10865 = vst [vmem:[#allocation112_spill] sm:$0xff] %v5203_v3  ;;  %3869 = vpow2.f32 %v952_v7  ;;  %v877_v21 = vsub.f32 %v4836_v11, %v5203_v3 }
 0x183   :  { %1057 = vadd.xlane.f32.xlu2 %v1056_v22  ;;  %v5229_v22 = vpop.eup %3851  ;;  %3871 = vpow2.f32 %v954_v14  ;;  %v964_v28 = vmul.f32 1.442695, %v876_v19 }
 0x184   :  { %v1071_v54 = vsel %vm659_vm0, %v5229_v22, 0.0  ;;  %v5245_v0 = vpop.eup %3853  ;;  %3873 = vpow2.f32 %v956_v46  ;;  %v966_v53 = vmul.f32 1.442695, %v877_v21 }
 0x185   :  { %1060 = vadd.xlane.f32.xlu0 %v1059_v2  ;;  %1063 = vadd.xlane.f32.xlu1 %v1062_v9  ;;  %v1065_v2 = vsel %vm659_vm0, %v5221_v6, 0.0  ;;  %v1068_v9 = vsel %vm659_vm0, %v5223_v25, 0.0  ;;  %v5247_v39 = vpop.eup %3855  ;;  %3875 = vpow2.f32 %v958_v16 }
 0x186   :  { %v5219_v51 = vpop.xlane.xlu2 %739  ;;  %3877 = vpow2.f32 %v960_v60 }
 0x187   :  { %10866 = vst [vmem:[#allocation113_spill] sm:$0xff] %v5219_v51  ;;  %3879 = vpow2.f32 %v962_v36  ;;  %v878_v37 = vsub.f32 %v4849_v33, %v5219_v51 }
 0x188   :  { %v5225_v59 = vpop.xlane.xlu0 %742  ;;  %v5227_v18 = vpop.xlane.xlu1 %745  ;;  %3881 = vpow2.f32 %v964_v28 }
 0x189   :  { %10868 = vst [vmem:[#allocation115_spill] sm:$0xff] %v5225_v59  ;;  %v879_v19 = vsub.f32 %v4858_v42, %v5225_v59  ;;  %v968_v11 = vmul.f32 1.442695, %v878_v37  ;;  %3883 = vpow2.f32 %v966_v53  ;;  %v880_v21 = vsub.f32 %v4863_v61, %v5227_v18 }
 0x18a   :  { %10869 = vst [vmem:[#allocation116_spill] sm:$0xff] %v5227_v18 }
 0x18b   :  { %1066 = vadd.xlane.f32.xlu2 %v1065_v2  ;;  %v5253_v2 = vpop.eup %3857  ;;  %v970_v3 = vmul.f32 1.442695, %v879_v19  ;;  %3885 = vpow2.f32 %v968_v11  ;;  %v972_v59 = vmul.f32 1.442695, %v880_v21 }
 0x18c   :  { %10873 = vst [vmem:[#allocation120_spill] sm:$0xff] %v5253_v2  ;;  %v1080_v48 = vsel %vm659_vm0, %v5253_v2, 0.0  ;;  %v5269_v34 = vpop.eup %3859 }
 0x18d   :  { %1069 = vadd.xlane.f32.xlu0 %v1068_v9  ;;  %1072 = vadd.xlane.f32.xlu1 %v1071_v54  ;;  %v1074_v9 = vsel %vm659_vm0, %v5245_v0, 0.0  ;;  %v1077_v54 = vsel %vm659_vm0, %v5247_v39, 0.0  ;;  %10875 = vst [vmem:[#allocation122_spill] sm:$0xff] %v5269_v34  ;;  %v5271_v47 = vpop.eup %3861  ;;  %3887 = vpow2.f32 %v970_v3 }
 0x18e   :  { %v5243_v4 = vpop.xlane.xlu2 %748  ;;  %10876 = vst [vmem:[#allocation123_spill] sm:$0xff] %v5271_v47  ;;  %3889 = vpow2.f32 %v972_v59 }
 0x18f   :  { %10870 = vst [vmem:[#allocation117_spill] sm:$0xff] %v5243_v4  ;;  %v881_v37 = vsub.f32 %v4872_v30, %v5243_v4 }
 0x190   :  { %v5249_v6 = vpop.xlane.xlu0 %751  ;;  %v5251_v55 = vpop.xlane.xlu1 %754 }
 0x191   :  { %10871 = vst [vmem:[#allocation118_spill] sm:$0xff] %v5249_v6  ;;  %v882_v19 = vsub.f32 %v4883_v56, %v5249_v6  ;;  %v974_v61 = vmul.f32 1.442695, %v881_v37  ;;  %v883_v21 = vsub.f32 %v4888_v10, %v5251_v55  ;;  %v273_v6 = vlaneseq }
 0x192   :  { %10872 = vst [vmem:[#allocation119_spill] sm:$0xff] %v5251_v55 }
 0x193   :  { %1075 = vadd.xlane.f32.xlu2 %v1074_v9  ;;  %v5277_v9 = vpop.eup %3863  ;;  %v976_v4 = vmul.f32 1.442695, %v882_v19  ;;  %3891 = vpow2.f32 %v974_v61  ;;  %v978_v10 = vmul.f32 1.442695, %v883_v21 }
 0x194   :  { %10879 = vst [vmem:[#allocation126_spill] sm:$0xff] %v5277_v9  ;;  %v1089_v17 = vsel %vm659_vm0, %v5277_v9, 0.0  ;;  %v5293_v57 = vpop.eup %3865 }
 0x195   :  { %1078 = vadd.xlane.f32.xlu0 %v1077_v54  ;;  %1081 = vadd.xlane.f32.xlu1 %v1080_v48  ;;  %v1083_v54 = vsel %vm659_vm0, %v5269_v34, 0.0  ;;  %v1086_v48 = vsel %vm659_vm0, %v5271_v47, 0.0  ;;  %10881 = vst [vmem:[#allocation128_spill] sm:$0xff] %v5293_v57  ;;  %v5295_v7 = vpop.eup %3867  ;;  %3893 = vpow2.f32 %v976_v4  ;;  %v10973_v47 = vld [vmem:[#allocation19_spill] sm:$0xff] }
 0x196   :  { %v5267_v31 = vpop.xlane.xlu2 %757  ;;  %10882 = vst [vmem:[#allocation129_spill] sm:$0xff] %v5295_v7  ;;  %3895 = vpow2.f32 %v978_v10 }
 0x197   :  { %10874 = vst [vmem:[#allocation121_spill] sm:$0xff] %v5267_v31  ;;  %v884_v37 = vsub.f32 %v4899_v40, %v5267_v31 }
 0x198   :  { %v5273_v58 = vpop.xlane.xlu0 %760  ;;  %v5275_v5 = vpop.xlane.xlu1 %763 }
 0x199   :  { %10877 = vst [vmem:[#allocation124_spill] sm:$0xff] %v5273_v58  ;;  %v885_v19 = vsub.f32 %v4906_v15, %v5273_v58  ;;  %v980_v61 = vmul.f32 1.442695, %v884_v37  ;;  %v886_v21 = vsub.f32 %v4911_v23, %v5275_v5 }
 0x19a   :  { %10878 = vst [vmem:[#allocation125_spill] sm:$0xff] %v5275_v5 }
 0x19b   :  { %1084 = vadd.xlane.f32.xlu2 %v1083_v54  ;;  %v5301_v54 = vpop.eup %3869  ;;  %v982_v4 = vmul.f32 1.442695, %v885_v19  ;;  %3897 = vpow2.f32 %v980_v61  ;;  %v984_v23 = vmul.f32 1.442695, %v886_v21  ;;  %v10916_v21 = vld [vmem:[#allocation8_spill] sm:$0xff] }
 0x19c   :  { %10885 = vst [vmem:[#allocation132_spill] sm:$0xff] %v5301_v54  ;;  %v1098_v14 = vsel %vm659_vm0, %v5301_v54, 0.0  ;;  %v5317_v44 = vpop.eup %3871  ;;  %v10954_v54 = vld [vmem:[#allocation15_spill] sm:$0xff] }
 0x19d   :  { %1087 = vadd.xlane.f32.xlu0 %v1086_v48  ;;  %1090 = vadd.xlane.f32.xlu1 %v1089_v17  ;;  %v1092_v48 = vsel %vm659_vm0, %v5293_v57, 0.0  ;;  %v1095_v17 = vsel %vm659_vm0, %v5295_v7, 0.0  ;;  %10887 = vst [vmem:[#allocation134_spill] sm:$0xff] %v5317_v44  ;;  %v5319_v16 = vpop.eup %3873  ;;  %3899 = vpow2.f32 %v982_v4 }
 0x19e   :  { %v5291_v63 = vpop.xlane.xlu2 %766  ;;  %10888 = vst [vmem:[#allocation135_spill] sm:$0xff] %v5319_v16  ;;  %3901 = vpow2.f32 %v984_v23 }
 0x19f   :  { %10880 = vst [vmem:[#allocation127_spill] sm:$0xff] %v5291_v63  ;;  %v887_v37 = vsub.f32 %v4926_v20, %v5291_v63 }
 0x1a0   :  { %v5297_v32 = vpop.xlane.xlu0 %769  ;;  %v5299_v8 = vpop.xlane.xlu1 %772 }
 0x1a1   :  { %10883 = vst [vmem:[#allocation130_spill] sm:$0xff] %v5297_v32  ;;  %v986_v20 = vmul.f32 1.442695, %v887_v37  ;;  %v10917_v37 = vld [vmem:[#allocation62_spill] sm:$0xff] }
 0x1a2   :  { %10884 = vst [vmem:[#allocation131_spill] sm:$0xff] %v5299_v8 }
 0x1a3   :  { %1093 = vadd.xlane.f32.xlu2 %v1092_v48  ;;  %v5325_v48 = vpop.eup %3875  ;;  %3903 = vpow2.f32 %v986_v20 }
 0x1a4   :  { %10891 = vst [vmem:[#allocation138_spill] sm:$0xff] %v5325_v48  ;;  %v1107_v60 = vsel %vm659_vm0, %v5325_v48, 0.0  ;;  %v5341_v33 = vpop.eup %3877  ;;  %v10936_v48 = vld [vmem:[#allocation73_spill] sm:$0xff] }
 0x1a5   :  { %1096 = vadd.xlane.f32.xlu0 %v1095_v17  ;;  %1099 = vadd.xlane.f32.xlu1 %v1098_v14  ;;  %v1101_v17 = vsel %vm659_vm0, %v5317_v44, 0.0  ;;  %v1104_v14 = vsel %vm659_vm0, %v5319_v16, 0.0  ;;  %10893 = vst [vmem:[#allocation140_spill] sm:$0xff] %v5341_v33  ;;  %v5343_v28 = vpop.eup %3879  ;;  %v10953_v16 = vld [vmem:[#allocation74_spill] sm:$0xff] }
 0x1a6   :  { %v5315_v46 = vpop.xlane.xlu2 %775  ;;  %10894 = vst [vmem:[#allocation141_spill] sm:$0xff] %v5343_v28 }
 0x1a7   :  { %10886 = vst [vmem:[#allocation133_spill] sm:$0xff] %v5315_v46 }
 0x1a8   :  { %v5321_v50 = vpop.xlane.xlu0 %778  ;;  %v5323_v52 = vpop.xlane.xlu1 %781 }
 0x1a9   :  { %10889 = vst [vmem:[#allocation136_spill] sm:$0xff] %v5321_v50 }
 0x1aa   :  { %10890 = vst [vmem:[#allocation137_spill] sm:$0xff] %v5323_v52 }
 0x1ab   :  { %1102 = vadd.xlane.f32.xlu2 %v1101_v17  ;;  %v5349_v17 = vpop.eup %3881 }
 0x1ac   :  { %10897 = vst [vmem:[#allocation144_spill] sm:$0xff] %v5349_v17  ;;  %v1116_v53 = vsel %vm659_vm0, %v5349_v17, 0.0  ;;  %v5365_v30 = vpop.eup %3883 }
 0x1ad   :  { %1105 = vadd.xlane.f32.xlu0 %v1104_v14  ;;  %1108 = vadd.xlane.f32.xlu1 %v1107_v60  ;;  %v1110_v14 = vsel %vm659_vm0, %v5341_v33, 0.0  ;;  %v1113_v60 = vsel %vm659_vm0, %v5343_v28, 0.0  ;;  %10899 = vst [vmem:[#allocation146_spill] sm:$0xff] %v5365_v30  ;;  %v5367_v3 = vpop.eup %3885  ;;  %v10934_v28 = vld [vmem:[#allocation10_spill] sm:$0xff] }
 0x1ae   :  { %v5339_v36 = vpop.xlane.xlu2 %784  ;;  %10900 = vst [vmem:[#allocation147_spill] sm:$0xff] %v5367_v3 }
 0x1af   :  { %10892 = vst [vmem:[#allocation139_spill] sm:$0xff] %v5339_v36 }
 0x1b0   :  { %v5345_v51 = vpop.xlane.xlu0 %787  ;;  %v5347_v42 = vpop.xlane.xlu1 %790 }
 0x1b1   :  { %10895 = vst [vmem:[#allocation142_spill] sm:$0xff] %v5345_v51  ;;  %v895_v44 = vsub.f32 %v10953_v16, %v5347_v42 }
 0x1b2   :  { %10896 = vst [vmem:[#allocation143_spill] sm:$0xff] %v5347_v42 }
 0x1b3   :  { %1111 = vadd.xlane.f32.xlu2 %v1110_v14  ;;  %v5373_v14 = vpop.eup %3887  ;;  %v1002_v42 = vmul.f32 1.442695, %v895_v44  ;;  %v4223_v44 = vld [vmem:[%s10405_s0 + $0x38] sm:$0xff] }
 0x1b4   :  { %10903 = vst [vmem:[#allocation150_spill] sm:$0xff] %v5373_v14  ;;  %v1125_v59 = vsel %vm659_vm0, %v5373_v14, 0.0  ;;  %v5389_v31 = vpop.eup %3889  ;;  %v10933_v14 = vld [vmem:[#allocation68_spill] sm:$0xff] }
 0x1b5   :  { %1114 = vadd.xlane.f32.xlu0 %v1113_v60  ;;  %1117 = vadd.xlane.f32.xlu1 %v1116_v53  ;;  %v1119_v60 = vsel %vm659_vm0, %v5365_v30, 0.0  ;;  %v1122_v53 = vsel %vm659_vm0, %v5367_v3, 0.0  ;;  %10905 = vst [vmem:[#allocation152_spill] sm:$0xff] %v5389_v31  ;;  %v5391_v55 = vpop.eup %3891  ;;  %v5399_v3 = vand.u32 127, %v273_v6  ;;  %v1128_v19 = vsel %vm659_vm0, %v5389_v31, 0.0 }
 0x1b6   :  { %v5363_v11 = vpop.xlane.xlu2 %793  ;;  %10906 = vst [vmem:[#allocation153_spill] sm:$0xff] %v5391_v55  ;;  %v5397_v58 = vpop.eup %3893  ;;  %v1131_v6 = vsel %vm659_vm0, %v5391_v55, 0.0  ;;  %v10920_v55 = vld [vmem:[#allocation14_spill] sm:$0xff]  ;;  %v892_v30 = vsub.f32 %v10933_v14, %v5323_v52 }
 0x1b7   :  { %10898 = vst [vmem:[#allocation145_spill] sm:$0xff] %v5363_v11  ;;  %vm471_vm1 = vcmp.eq.s32.totalorder %v5399_v3, %v4498_v43  ;;  %v5417_v61 = vpop.eup %3895  ;;  %vm472_vm2 = vcmp.eq.s32.totalorder %v5399_v3, %v10916_v21  ;;  %vm478_vm4 = vcmp.eq.s32.totalorder %v5399_v3, %v10920_v55  ;;  %v10921_v21 = vld [vmem:[#allocation67_spill] sm:$0xff]  ;;  %v10923_v55 = vld [vmem:[#allocation6_spill] sm:$0xff]  ;;  %vm468_vm8 = vcmp.eq.s32.totalorder %v5399_v3, %v10934_v28 }
 0x1b8   :  { %v5369_v18 = vpop.xlane.xlu0 %796  ;;  %v5371_v56 = vpop.xlane.xlu1 %799  ;;  %10909 = vst [vmem:[#allocation156_spill] sm:$0xff] %v5397_v58  ;;  %v891_v23 = vsub.f32 %v10921_v21, %v5321_v50  ;;  %vm469_vm5 = vcmp.eq.s32.totalorder %v5399_v3, %v10923_v55  ;;  %v4217_v14 = vld [vmem:[%s10405_s0] sm:$0xff]  ;;  %v996_v52 = vmul.f32 1.442695, %v892_v30  ;;  %vm476_vm14 = vcmp.eq.s32.totalorder %v5399_v3, %v10954_v54 }
 0x1b9   :  { %10901 = vst [vmem:[#allocation148_spill] sm:$0xff] %v5369_v18 }
 0x1ba   :  { %10902 = vst [vmem:[#allocation149_spill] sm:$0xff] %v5371_v56 }
 0x1bb   :  { %1120 = vadd.xlane.f32.xlu2 %v1119_v60  ;;  %10911 = vst [vmem:[#allocation158_spill] sm:$0xff] %v5417_v61 }
 0x1bd   :  { %1123 = vadd.xlane.f32.xlu0 %v1122_v53  ;;  %1126 = vadd.xlane.f32.xlu1 %v1125_v59  ;;  %v888_v53 = vsub.f32 %v4933_v27, %v5297_v32  ;;  %v1134_v59 = vsel %vm659_vm0, %v5397_v58, 0.0  ;;  %v5419_v27 = vpop.eup %3897  ;;  %v1137_v58 = vsel %vm659_vm0, %v5417_v61, 0.0 }
 0x1be   :  { %v5387_v40 = vpop.xlane.xlu2 %802  ;;  %10912 = vst [vmem:[#allocation159_spill] sm:$0xff] %v5419_v27  ;;  %v5428_v43 = vpop.eup %3899  ;;  %v1140_v20 = vsel %vm659_vm0, %v5419_v27, 0.0 }
 0x1bf   :  { %10904 = vst [vmem:[#allocation151_spill] sm:$0xff] %v5387_v40  ;;  %v988_v4 = vmul.f32 1.442695, %v888_v53  ;;  %v10918_v53 = vld [vmem:[#allocation11_spill] sm:$0xff]  ;;  %v5465_v27 = vpop.eup %3901 }
 0x1c0   :  { %v5393_v15 = vpop.xlane.xlu0 %805  ;;  %v5395_v60 = vpop.xlane.xlu1 %808  ;;  %10915 = vst [vmem:[#allocation162_spill] sm:$0xff] %v5428_v43  ;;  %vm475_vm3 = vcmp.eq.s32.totalorder %v5399_v3, %v10918_v53 }
 0x1c1   :  { %10907 = vst [vmem:[#allocation154_spill] sm:$0xff] %v5393_v15  ;;  %3905 = vpow2.f32 %v988_v4  ;;  %v10924_v4 = vld [vmem:[#allocation7_spill] sm:$0xff]  ;;  %v5470_v31 = vpop.eup %3903 }
 0x1c2   :  { %10908 = vst [vmem:[#allocation155_spill] sm:$0xff] %v5395_v60  ;;  %vm467_vm6 = vcmp.eq.s32.totalorder %v5399_v3, %v10924_v4  ;;  %v10932_v4 = vld [vmem:[#allocation17_spill] sm:$0xff] }
 0x1c3   :  { %1129 = vadd.xlane.f32.xlu2 %v1128_v19  ;;  %v10514_v19 = vmov 0.0   ;;  %10926 = vst [vmem:[#allocation62_spill] sm:$0xff] %v5465_v27  ;;  %vm481_vm7 = vcmp.eq.s32.totalorder %v5399_v3, %v10932_v4 }
 0x1c4   :  { %v5422_v32 = vsel %vm471_vm1, 1.0, %v10514_v19 }
 0x1c5   :  { %1132 = vadd.xlane.f32.xlu0 %v1131_v6  ;;  %1135 = vadd.xlane.f32.xlu1 %v1134_v59  ;;  %v889_v6 = vsub.f32 %v10917_v37, %v5299_v8  ;;  %v10919_v59 = vld [vmem:[#allocation66_spill] sm:$0xff]  ;;  %v1432_v37 = vmul.f32 %v5422_v32, %v4653_v38  ;;  %v10922_v8 = vmov 0.0  }
 0x1c6   :  { %v5415_v10 = vpop.xlane.xlu2 %811  ;;  %v890_v19 = vsub.f32 %v10919_v59, %v5315_v46  ;;  %v5447_v53 = vsel %vm472_vm2, 1.0, %v10922_v8  ;;  %v1143_v59 = vsel %vm659_vm0, %v5428_v43, 0.0  ;;  %v5454_v46 = vsel %vm475_vm3, 1.0, %v10922_v8  ;;  %10928 = vst [vmem:[#allocation66_spill] sm:$0xff] %v5470_v31 }
 0x1c7   :  { %10910 = vst [vmem:[#allocation157_spill] sm:$0xff] %v5415_v10  ;;  %v5461_v38 = vsel %vm478_vm4, 1.0, %v10922_v8  ;;  %v994_v43 = vmul.f32 1.442695, %v891_v23  ;;  %v5468_v61 = vsel %vm659_vm0, %v1432_v37, 0.0  ;;  %v5473_v55 = vsel %vm469_vm5, 1.0, %v10922_v8  ;;  %v5486_v37 = vpop.eup %3905 }
 0x1c8   :  { %v5424_v63 = vpop.xlane.xlu0 %814  ;;  %v5426_v5 = vpop.xlane.xlu1 %817  ;;  %v992_v21 = vmul.f32 1.442695, %v890_v19  ;;  %10927 = vst [vmem:[#allocation11_spill] sm:$0xff] %v5468_v61  ;;  %v1433_v19 = vmul.f32 %v5447_v53, %v4668_v45  ;;  %v1436_v23 = vmul.f32 %v5454_v46, %v4695_v62  ;;  %v1439_v17 = vmul.f32 %v5461_v38, %v4720_v12  ;;  %v10935_v45 = vld [vmem:[#allocation71_spill] sm:$0xff] }
 0x1c9   :  { %10913 = vst [vmem:[#allocation160_spill] sm:$0xff] %v5424_v63  ;;  %v893_v33 = vsub.f32 %v10935_v45, %v5339_v36  ;;  %v1146_v62 = vsel %vm659_vm0, %v5465_v27, 0.0  ;;  %v10937_v36 = vld [vmem:[#allocation9_spill] sm:$0xff]  ;;  %vm480_vm3 = vcmp.eq.s32.totalorder %v5399_v3, %v10973_v47 }
 0x1ca   :  { %10914 = vst [vmem:[#allocation161_spill] sm:$0xff] %v5426_v5  ;;  %vm470_vm9 = vcmp.eq.s32.totalorder %v5399_v3, %v10937_v36  ;;  %v5538_v4 = vsel %vm659_vm0, %v1436_v23, 0.0  ;;  %v5541_v27 = vsel %vm659_vm0, %v1439_v17, 0.0 }
 0x1cb   :  { %1138 = vadd.xlane.f32.xlu2 %v1137_v58  ;;  %v990_v58 = vmul.f32 1.442695, %v889_v6  ;;  %v5476_v6 = vsel %vm467_vm6, 1.0, %v10922_v8  ;;  %10931 = vst [vmem:[#allocation6_spill] sm:$0xff] %v5486_v37 }
 0x1cc   :  { %v1428_v12 = vmul.f32 %v4217_v14, %v5476_v6  ;;  %v5523_v14 = vsel %vm481_vm7, 1.0, %v10922_v8  ;;  %10943 = vst [vmem:[#allocation10_spill] sm:$0xff] %v5538_v4 }
 0x1cd   :  { %1141 = vadd.xlane.f32.xlu0 %v1140_v20  ;;  %1144 = vadd.xlane.f32.xlu1 %v1143_v59  ;;  %3907 = vpow2.f32 %v990_v58  ;;  %v894_v58 = vsub.f32 %v10936_v48, %v5345_v51  ;;  %v1152_v48 = vsel %vm659_vm0, %v5486_v37, 0.0  ;;  %10939 = vst [vmem:[#allocation17_spill] sm:$0xff] %v5523_v14  ;;  %v10940_v51 = vld [vmem:[#allocation20_spill] sm:$0xff]  ;;  %v998_v37 = vmul.f32 1.442695, %v893_v33 }
 0x1ce   :  { %v5463_v50 = vpop.xlane.xlu2 %820  ;;  %3909 = vpow2.f32 %v992_v21  ;;  %v4218_v21 = vld [vmem:[%s10405_s0 + $0x10] sm:$0xff]  ;;  %vm484_vm10 = vcmp.eq.s32.totalorder %v5399_v3, %v10940_v51  ;;  %10944 = vst [vmem:[#allocation71_spill] sm:$0xff] %v5541_v27  ;;  %v5549_v51 = vsel %vm470_vm9, 1.0, %v10922_v8 }
 0x1cf   :  { %10925 = vst [vmem:[#allocation8_spill] sm:$0xff] %v5463_v50  ;;  %3911 = vpow2.f32 %v994_v43  ;;  %v1430_v45 = vmul.f32 %v4218_v21, %v5473_v55  ;;  %v1149_v43 = vsel %vm659_vm0, %v5470_v31, 0.0  ;;  %v5529_v21 = vsel %vm468_vm8, 1.0, %v10922_v8 }
 0x1d0   :  { %v5478_v20 = vpop.xlane.xlu0 %823  ;;  %v5480_v59 = vpop.xlane.xlu1 %826  ;;  %v1000_v30 = vmul.f32 1.442695, %v894_v58  ;;  %v5560_v17 = vsel %vm484_vm10, 1.0, %v10922_v8  ;;  %v4219_v58 = vld [vmem:[%s10405_s0 + $0x8] sm:$0xff]  ;;  %3913 = vpow2.f32 %v996_v52  ;;  %v4220_v52 = vld [vmem:[%s10405_s0 + $0x18] sm:$0xff] }
 0x1d1   :  { %10929 = vst [vmem:[#allocation14_spill] sm:$0xff] %v5478_v20  ;;  %v5555_v33 = vsel %vm659_vm0, %v1430_v45, 0.0  ;;  %v1442_v45 = vmul.f32 %v5523_v14, %v4743_v41  ;;  %3915 = vpow2.f32 %v998_v37  ;;  %v10955_v41 = vld [vmem:[#allocation76_spill] sm:$0xff]  ;;  %v1431_v16 = vmul.f32 %v4220_v52, %v5549_v51  ;;  %v4221_v37 = vld [vmem:[%s10405_s0 + $0x88] sm:$0xff] }
 0x1d2   :  { %10930 = vst [vmem:[#allocation67_spill] sm:$0xff] %v5480_v59  ;;  %3917 = vpow2.f32 %v1000_v30  ;;  %v4222_v52 = vld [vmem:[%s10405_s0 + $0x30] sm:$0xff] }
 0x1d3   :  { %1147 = vadd.xlane.f32.xlu2 %v1146_v62  ;;  %v5517_v62 = vsel %vm659_vm0, %v1433_v19, 0.0  ;;  %v10941_v19 = vld [vmem:[#allocation13_spill] sm:$0xff]  ;;  %v5543_v28 = vpop.eup %3907  ;;  %10947 = vst [vmem:[#allocation20_spill] sm:$0xff] %v5560_v17  ;;  %v5643_v9 = vsel %vm659_vm0, %v1431_v16, 0.0  ;;  %3919 = vpow2.f32 %v1002_v42 }
 0x1d4   :  { %10938 = vst [vmem:[#allocation7_spill] sm:$0xff] %v5517_v62  ;;  %vm473_vm11 = vcmp.eq.s32.totalorder %v5399_v3, %v10941_v19  ;;  %v5557_v23 = vpop.eup %3909  ;;  %v10952_v62 = vld [vmem:[#allocation23_spill] sm:$0xff]  ;;  %v1155_v7 = vsel %vm659_vm0, %v5543_v28, 0.0 }
 0x1d5   :  { %1150 = vadd.xlane.f32.xlu0 %v1149_v43  ;;  %1153 = vadd.xlane.f32.xlu1 %v1152_v48  ;;  %10945 = vst [vmem:[#allocation73_spill] sm:$0xff] %v5543_v28  ;;  %v5552_v43 = vsel %vm659_vm0, %v1428_v12, 0.0  ;;  %v10948_v48 = vld [vmem:[#allocation12_spill] sm:$0xff]  ;;  %v1429_v12 = vmul.f32 %v4219_v58, %v5529_v21  ;;  %v5574_v4 = vpop.eup %3911  ;;  %v5580_v61 = vsel %vm473_vm11, 1.0, %v10922_v8  ;;  %vm487_vm13 = vcmp.eq.s32.totalorder %v5399_v3, %v10952_v62  ;;  %v10956_v19 = vld [vmem:[#allocation79_spill] sm:$0xff] }
 0x1d6   :  { %v5535_v31 = vpop.xlane.xlu2 %829  ;;  %10946 = vst [vmem:[#allocation9_spill] sm:$0xff] %v5557_v23  ;;  %vm474_vm12 = vcmp.eq.s32.totalorder %v5399_v3, %v10948_v48  ;;  %v896_v58 = vsub.f32 %v10955_v41, %v5363_v11  ;;  %v897_v57 = vsub.f32 %v10956_v19, %v5369_v18  ;;  %v1445_v41 = vmul.f32 %v4221_v37, %v5560_v17  ;;  %v10958_v48 = vld [vmem:[#allocation16_spill] sm:$0xff]  ;;  %v5640_v17 = vpop.eup %3913 }
 0x1d7   :  { %10942 = vst [vmem:[#allocation68_spill] sm:$0xff] %v5535_v31  ;;  %v5606_v30 = vsel %vm474_vm12, 1.0, %v10922_v8  ;;  %v1161_v19 = vsel %vm659_vm0, %v5574_v4, 0.0  ;;  %v1434_v18 = vmul.f32 %v4222_v52, %v5580_v61  ;;  %v5620_v37 = vsel %vm487_vm13, 1.0, %v10922_v8 }
 0x1d8   :  { %v5564_v27 = vpop.xlane.xlu0 %832  ;;  %v5566_v36 = vpop.xlane.xlu1 %835  ;;  %10951 = vst [vmem:[#allocation163_spill] sm:$0xff] %v5574_v4  ;;  %vm477_vm15 = vcmp.eq.s32.totalorder %v5399_v3, %v10958_v48  ;;  %v5628_v11 = vsel %vm476_vm14, 1.0, %v10922_v8  ;;  %v10959_v4 = vld [vmem:[#allocation26_spill] sm:$0xff]  ;;  %v1004_v52 = vmul.f32 1.442695, %v896_v58  ;;  %v5635_v62 = vsel %vm659_vm0, %v1429_v12, 0.0 }
 0x1d9   :  { %10949 = vst [vmem:[#allocation13_spill] sm:$0xff] %v5564_v27  ;;  %vm490_vm1 = vcmp.eq.s32.totalorder %v5399_v3, %v10959_v4  ;;  %v5638_v28 = vsel %vm659_vm0, %v1442_v45, 0.0  ;;  %v1006_v54 = vmul.f32 1.442695, %v897_v57  ;;  %v1435_v58 = vmul.f32 %v4223_v44, %v5606_v30  ;;  %v5652_v12 = vpop.eup %3915  ;;  %v10975_v4 = vld [vmem:[#allocation29_spill] sm:$0xff] }
 0x1da   :  { %10950 = vst [vmem:[#allocation12_spill] sm:$0xff] %v5566_v36  ;;  %v5658_v45 = vsel %vm477_vm15, 1.0, %v10922_v8  ;;  %3921 = vpow2.f32 %v1004_v52  ;;  %v1164_v14 = vsel %vm659_vm0, %v5640_v17, 0.0  ;;  %vm493_vm4 = vcmp.eq.s32.totalorder %v5399_v3, %v10975_v4 }
 0x1db   :  { %1156 = vadd.xlane.f32.xlu2 %v1155_v7  ;;  %v1158_v7 = vsel %vm659_vm0, %v5557_v23, 0.0  ;;  %10957 = vst [vmem:[#allocation23_spill] sm:$0xff] %v5620_v37  ;;  %3923 = vpow2.f32 %v1006_v54  ;;  %v4227_v54 = vld [vmem:[%s10405_s0 + $0xb8] sm:$0xff] }
 0x1dc   :  { %10961 = vst [vmem:[#allocation15_spill] sm:$0xff] %v5638_v28  ;;  %v5675_v28 = vpop.eup %3917 }
 0x1dd   :  { %1159 = vadd.xlane.f32.xlu0 %v1158_v7  ;;  %1162 = vadd.xlane.f32.xlu1 %v1161_v19  ;;  %10962 = vst [vmem:[#allocation76_spill] sm:$0xff] %v5640_v17  ;;  %v5650_v7 = vsel %vm659_vm0, %v1445_v41, 0.0  ;;  %v5665_v19 = vsel %vm659_vm0, %v1434_v18, 0.0  ;;  %v4224_v41 = vld [vmem:[%s10405_s0 + $0x48] sm:$0xff]  ;;  %v5681_v18 = vsel %vm490_vm1, 1.0, %v10922_v8  ;;  %v5728_v17 = vsel %vm659_vm0, %v1435_v58, 0.0  ;;  %v5733_v34 = vpop.eup %3919 }
 0x1de   :  { %v5632_v23 = vpop.xlane.xlu2 %838  ;;  %10963 = vst [vmem:[#allocation79_spill] sm:$0xff] %v5643_v9  ;;  %v1437_v44 = vmul.f32 %v4224_v41, %v5628_v11  ;;  %v10972_v41 = vld [vmem:[#allocation80_spill] sm:$0xff] }
 0x1df   :  { %10960 = vst [vmem:[#allocation74_spill] sm:$0xff] %v5632_v23  ;;  %v898_v9 = vsub.f32 %v10972_v41, %v5371_v56  ;;  %v4226_v41 = vld [vmem:[%s10405_s0 + $0x50] sm:$0xff] }
 0x1e0   :  { %10964 = vst [vmem:[#allocation16_spill] sm:$0xff] %v5650_v7  ;;  %v5660_v57 = vpop.xlane.xlu0 %841  ;;  %v5662_v16 = vpop.xlane.xlu1 %844  ;;  %v4225_v7 = vld [vmem:[%s10405_s0 + $0xa0] sm:$0xff]  ;;  %v1438_v47 = vmul.f32 %v4226_v41, %v5658_v45  ;;  %v10979_v41 = vld [vmem:[#allocation21_spill] sm:$0xff] }
 0x1e1   :  { %10965 = vst [vmem:[#allocation26_spill] sm:$0xff] %v5652_v12  ;;  %v1448_v48 = vmul.f32 %v4225_v7, %v5620_v37  ;;  %v10974_v7 = vld [vmem:[#allocation82_spill] sm:$0xff]  ;;  %vm482_vm6 = vcmp.eq.s32.totalorder %v5399_v3, %v10979_v41  ;;  %v1008_v56 = vmul.f32 1.442695, %v898_v9  ;;  %v5745_v58 = vpop.eup %3921 }
 0x1e2   :  { %10966 = vst [vmem:[#allocation164_spill] sm:$0xff] %v5660_v57  ;;  %v899_v37 = vsub.f32 %v10974_v7, %v5387_v40  ;;  %v1167_v7 = vsel %vm659_vm0, %v5652_v12, 0.0  ;;  %v1170_v40 = vsel %vm659_vm0, %v5675_v28, 0.0  ;;  %v10993_v41 = vld [vmem:[#allocation86_spill] sm:$0xff] }
 0x1e3   :  { %10967 = vst [vmem:[#allocation165_spill] sm:$0xff] %v5662_v16  ;;  %1165 = vadd.xlane.f32.xlu2 %v1164_v14  ;;  %v1451_v14 = vmul.f32 %v4227_v54, %v5681_v18  ;;  %3925 = vpow2.f32 %v1008_v56  ;;  %v10996_v56 = vld [vmem:[#allocation91_spill] sm:$0xff] }
 0x1e4   :  { %10968 = vst [vmem:[#allocation166_spill] sm:$0xff] %v5665_v19  ;;  %v10971_v19 = vld [vmem:[#allocation18_spill] sm:$0xff]  ;;  %v1010_v12 = vmul.f32 1.442695, %v899_v37 }
 0x1e5   :  { %10969 = vst [vmem:[#allocation167_spill] sm:$0xff] %v5675_v28  ;;  %vm479_vm2 = vcmp.eq.s32.totalorder %v5399_v3, %v10971_v19  ;;  %v10976_v19 = vld [vmem:[#allocation85_spill] sm:$0xff]  ;;  %1168 = vadd.xlane.f32.xlu0 %v1167_v7  ;;  %1171 = vadd.xlane.f32.xlu1 %v1170_v40  ;;  %v5723_v28 = vsel %vm493_vm4, 1.0, %v10922_v8  ;;  %v5736_v40 = vsel %vm659_vm0, %v1437_v44, 0.0  ;;  %v5739_v7 = vsel %vm659_vm0, %v1438_v47, 0.0  ;;  %v4228_v37 = vld [vmem:[%s10405_s0 + $0x60] sm:$0xff] }
 0x1e6   :  { %10970 = vst [vmem:[#allocation168_spill] sm:$0xff] %v5681_v18  ;;  %v900_v42 = vsub.f32 %v10976_v19, %v5393_v15  ;;  %v5702_v52 = vsel %vm479_vm2, 1.0, %v10922_v8  ;;  %v5713_v19 = vsel %vm480_vm3, 1.0, %v10922_v8  ;;  %v10978_v15 = vld [vmem:[#allocation22_spill] sm:$0xff]  ;;  %v5725_v54 = vpop.xlane.xlu2 %847  ;;  %v5731_v18 = vsel %vm659_vm0, %v1448_v48, 0.0 }
 0x1e7   :  { %10977 = vst [vmem:[#allocation18_spill] sm:$0xff] %v5702_v52  ;;  %vm483_vm5 = vcmp.eq.s32.totalorder %v5399_v3, %v10978_v15  ;;  %v1440_v4 = vmul.f32 %v4228_v37, %v5702_v52  ;;  %v5757_v44 = vsel %vm482_vm6, 1.0, %v10922_v8  ;;  %v4229_v37 = vld [vmem:[%s10405_s0 + $0x68] sm:$0xff]  ;;  %v5768_v15 = vsel %vm659_vm0, %v1451_v14, 0.0  ;;  %v10994_v52 = vld [vmem:[#allocation24_spill] sm:$0xff] }
 0x1e8   :  { %10980 = vst [vmem:[#allocation80_spill] sm:$0xff] %v5723_v28  ;;  %v1012_v9 = vmul.f32 1.442695, %v900_v42  ;;  %v5751_v48 = vsel %vm483_vm5, 1.0, %v10922_v8  ;;  %v5759_v42 = vpop.xlane.xlu0 %850  ;;  %v5761_v47 = vpop.xlane.xlu1 %1045  ;;  %vm485_vm8 = vcmp.eq.s32.totalorder %v5399_v3, %v10994_v52  ;;  %3927 = vpow2.f32 %v1010_v12  ;;  %v10995_v14 = vld [vmem:[#allocation88_spill] sm:$0xff]  ;;  %v4232_v12 = vld [vmem:[%s10405_s0 + $0x80] sm:$0xff] }
 0x1e9   :  { %10981 = vst [vmem:[#allocation19_spill] sm:$0xff] %v5725_v54 }
 0x1ea   :  { %10982 = vst [vmem:[#allocation82_spill] sm:$0xff] %v5728_v17  ;;  %v901_v17 = vsub.f32 %v10993_v41, %v5395_v60  ;;  %3929 = vpow2.f32 %v1012_v9  ;;  %v903_v41 = vsub.f32 %v10996_v56, %v5424_v63  ;;  %v4231_v60 = vld [vmem:[%s10405_s0 + $0x78] sm:$0xff]  ;;  %v1176_v9 = vsel %vm659_vm0, %v5745_v58, 0.0  ;;  %v11001_v63 = vld [vmem:[#allocation35_spill] sm:$0xff] }
 0x1eb   :  { %10983 = vst [vmem:[#allocation29_spill] sm:$0xff] %v5731_v18  ;;  %v1441_v18 = vmul.f32 %v4229_v37, %v5713_v19  ;;  %v902_v37 = vsub.f32 %v10995_v14, %v5415_v10  ;;  %v1444_v14 = vmul.f32 %v4232_v12, %v5751_v48  ;;  %v10997_v10 = vld [vmem:[#allocation25_spill] sm:$0xff]  ;;  %v5803_v56 = vsel %vm659_vm0, %v1440_v4, 0.0  ;;  %v11002_v4 = vld [vmem:[#allocation27_spill] sm:$0xff] }
 0x1ec   :  { %10984 = vst [vmem:[#allocation85_spill] sm:$0xff] %v5733_v34  ;;  %vm486_vm9 = vcmp.eq.s32.totalorder %v5399_v3, %v10997_v10  ;;  %v5815_v12 = vsel %vm485_vm8, 1.0, %v10922_v8  ;;  %vm499_vm10 = vcmp.eq.s32.totalorder %v5399_v3, %v11001_v63  ;;  %vm488_vm11 = vcmp.eq.s32.totalorder %v5399_v3, %v11002_v4  ;;  %v11020_v4 = vld [vmem:[#allocation97_spill] sm:$0xff] }
 0x1ed   :  { %10985 = vst [vmem:[#allocation22_spill] sm:$0xff] %v5736_v40  ;;  %v10992_v40 = vld [vmem:[#allocation32_spill] sm:$0xff]  ;;  %1177 = vadd.xlane.f32.xlu0 %v1176_v9  ;;  %v5835_v63 = vsel %vm486_vm9, 1.0, %v10922_v8 }
 0x1ee   :  { %10986 = vst [vmem:[#allocation21_spill] sm:$0xff] %v5739_v7  ;;  %v5770_v7 = vpop.eup %3923  ;;  %vm496_vm7 = vcmp.eq.s32.totalorder %v5399_v3, %v10992_v40  ;;  %v5824_v40 = vsel %vm659_vm0, %v1441_v18, 0.0 }
 0x1ef   :  { %10987 = vst [vmem:[#allocation169_spill] sm:$0xff] %v5745_v58  ;;  %v1014_v58 = vmul.f32 1.442695, %v901_v17  ;;  %v5829_v52 = vpop.eup %3925  ;;  %v1018_v17 = vmul.f32 1.442695, %v903_v41  ;;  %v4233_v41 = vld [vmem:[%s10405_s0 + $0x90] sm:$0xff] }
 0x1f0   :  { %10988 = vst [vmem:[#allocation170_spill] sm:$0xff] %v5759_v42  ;;  %v5843_v18 = vpop.eup %3927  ;;  %v5852_v10 = vpop.xlane.xlu1 %1054 }
 0x1f1   :  { %10989 = vst [vmem:[#allocation171_spill] sm:$0xff] %v5761_v47  ;;  %v4230_v47 = vld [vmem:[%s10405_s0 + $0xd0] sm:$0xff]  ;;  %3931 = vpow2.f32 %v1014_v58  ;;  %v4235_v58 = vld [vmem:[%s10405_s0 + $0x98] sm:$0xff] }
 0x1f2   :  { %10990 = vst [vmem:[#allocation172_spill] sm:$0xff] %v5768_v15  ;;  %v1454_v2 = vmul.f32 %v4230_v47, %v5723_v28  ;;  %v1173_v15 = vsel %vm659_vm0, %v5733_v34, 0.0  ;;  %v1443_v47 = vmul.f32 %v4231_v60, %v5757_v44  ;;  %v5809_v60 = vsel %vm496_vm7, 1.0, %v10922_v8 }
 0x1f3   :  { %10991 = vst [vmem:[#allocation173_spill] sm:$0xff] %v5770_v7  ;;  %1174 = vadd.xlane.f32.xlu2 %v1173_v15  ;;  %v1179_v15 = vsel %vm659_vm0, %v5770_v7, 0.0  ;;  %v5821_v7 = vpop.xlane.xlu2 %1048  ;;  %v1182_v28 = vsel %vm659_vm0, %v5829_v52, 0.0 }
 0x1f4   :  { %10998 = vst [vmem:[#allocation32_spill] sm:$0xff] %v5803_v56  ;;  %1180 = vadd.xlane.f32.xlu1 %v1179_v15  ;;  %v1016_v56 = vmul.f32 1.442695, %v902_v37  ;;  %v5827_v34 = vsel %vm659_vm0, %v1454_v2, 0.0  ;;  %v5838_v9 = vsel %vm659_vm0, %v1443_v47, 0.0  ;;  %v5841_v37 = vsel %vm659_vm0, %v1444_v14, 0.0 }
 0x1f5   :  { %10999 = vst [vmem:[#allocation86_spill] sm:$0xff] %v5809_v60  ;;  %v5846_v2 = vsel %vm499_vm10, 1.0, %v10922_v8  ;;  %v11011_v15 = vld [vmem:[#allocation28_spill] sm:$0xff]  ;;  %v1446_v47 = vmul.f32 %v4233_v41, %v5815_v12  ;;  %v4234_v14 = vld [vmem:[%s10405_s0 + $0xe8] sm:$0xff] }
 0x1f6   :  { %11000 = vst [vmem:[#allocation24_spill] sm:$0xff] %v5815_v12  ;;  %vm489_vm12 = vcmp.eq.s32.totalorder %v5399_v3, %v11011_v15  ;;  %v11017_v41 = vld [vmem:[#allocation92_spill] sm:$0xff]  ;;  %3933 = vpow2.f32 %v1016_v56  ;;  %v906_v12 = vsub.f32 %v11020_v4, %v5478_v20  ;;  %v4236_v56 = vld [vmem:[%s10405_s0 + $0x100] sm:$0xff]  ;;  %v11022_v15 = vld [vmem:[#allocation31_spill] sm:$0xff] }
 0x1f7   :  { %11003 = vst [vmem:[#allocation88_spill] sm:$0xff] %v5821_v7  ;;  %v11018_v7 = vld [vmem:[#allocation30_spill] sm:$0xff]  ;;  %3935 = vpow2.f32 %v1018_v17  ;;  %v5894_v17 = vsel %vm489_vm12, 1.0, %v10922_v8  ;;  %vm492_vm15 = vcmp.eq.s32.totalorder %v5399_v3, %v11022_v15 }
 0x1f8   :  { %11004 = vst [vmem:[#allocation91_spill] sm:$0xff] %v5824_v40  ;;  %v5868_v40 = vsel %vm488_vm11, 1.0, %v10922_v8  ;;  %vm491_vm14 = vcmp.eq.s32.totalorder %v5399_v3, %v11018_v7  ;;  %v1024_v7 = vmul.f32 1.442695, %v906_v12 }
 0x1f9   :  { %11005 = vst [vmem:[#allocation25_spill] sm:$0xff] %v5827_v34  ;;  %v5850_v34 = vpop.xlane.xlu0 %1051 }
 0x1fa   :  { %11006 = vst [vmem:[#allocation35_spill] sm:$0xff] %v5829_v52 }
 0x1fb   :  { %11007 = vst [vmem:[#allocation27_spill] sm:$0xff] %v5838_v9  ;;  %v5862_v9 = vpop.eup %3929  ;;  %1183 = vadd.xlane.f32.xlu2 %v1182_v28  ;;  %v1185_v28 = vsel %vm659_vm0, %v5843_v18, 0.0 }
 0x1fc   :  { %11008 = vst [vmem:[#allocation174_spill] sm:$0xff] %v5841_v37  ;;  %v1457_v37 = vmul.f32 %v4234_v14, %v5809_v60  ;;  %v11019_v14 = vld [vmem:[#allocation94_spill] sm:$0xff]  ;;  %v1188_v4 = vsel %vm659_vm0, %v5862_v9, 0.0  ;;  %1186 = vadd.xlane.f32.xlu0 %v1185_v28 }
 0x1fd   :  { %11009 = vst [vmem:[#allocation175_spill] sm:$0xff] %v5843_v18  ;;  %v905_v60 = vsub.f32 %v11019_v14, %v5463_v50  ;;  %v1460_v14 = vmul.f32 %v4236_v56, %v5846_v2  ;;  %v5916_v50 = vsel %vm491_vm14, 1.0, %v10922_v8  ;;  %1189 = vadd.xlane.f32.xlu1 %v1188_v4  ;;  %v5920_v18 = vpop.xlane.xlu2 %1057 }
 0x1fe   :  { %11010 = vst [vmem:[#allocation176_spill] sm:$0xff] %v5846_v2  ;;  %v5926_v52 = vsel %vm659_vm0, %v1457_v37, 0.0  ;;  %v5928_v2 = vpop.eup %3931  ;;  %v5946_v37 = vsel %vm492_vm15, 1.0, %v10922_v8 }
 0x1ff   :  { %11012 = vst [vmem:[#allocation28_spill] sm:$0xff] %v5850_v34  ;;  %v904_v34 = vsub.f32 %v11017_v41, %v5426_v5  ;;  %v1447_v41 = vmul.f32 %v4235_v58, %v5835_v63  ;;  %v4237_v58 = vld [vmem:[%s10405_s0 + $0xa8] sm:$0xff]  ;;  %v5938_v28 = vsel %vm659_vm0, %v1460_v14, 0.0  ;;  %v4239_v14 = vld [vmem:[%s10405_s0 + $0xc0] sm:$0xff] }
 0x200   :  { %11013 = vst [vmem:[#allocation177_spill] sm:$0xff] %v5852_v10  ;;  %v11016_v10 = vld [vmem:[#allocation38_spill] sm:$0xff]  ;;  %v1449_v20 = vmul.f32 %v4237_v58, %v5868_v40  ;;  %v1022_v58 = vmul.f32 1.442695, %v905_v60 }
 0x201   :  { %11014 = vst [vmem:[#allocation178_spill] sm:$0xff] %v5862_v9  ;;  %vm502_vm13 = vcmp.eq.s32.totalorder %v5399_v3, %v11016_v10  ;;  %v1020_v5 = vmul.f32 1.442695, %v904_v34  ;;  %v11024_v9 = vld [vmem:[#allocation41_spill] sm:$0xff]  ;;  %v5923_v10 = vsel %vm659_vm0, %v1446_v47, 0.0  ;;  %v4238_v34 = vld [vmem:[%s10405_s0 + $0xb0] sm:$0xff]  ;;  %v5940_v47 = vpop.eup %3933  ;;  %v5948_v12 = vpop.xlane.xlu0 %1060 }
 0x202   :  { %11015 = vst [vmem:[#allocation179_spill] sm:$0xff] %v5868_v40  ;;  %v5908_v56 = vsel %vm502_vm13, 1.0, %v10922_v8  ;;  %vm505_vm1 = vcmp.eq.s32.totalorder %v5399_v3, %v11024_v9  ;;  %v5931_v40 = vsel %vm659_vm0, %v1447_v41, 0.0  ;;  %v1450_v60 = vmul.f32 %v4238_v34, %v5894_v17  ;;  %v5950_v41 = vpop.xlane.xlu1 %1063  ;;  %v5985_v9 = vld [vmem:[%s10405_s0 + $0x1c0] sm:$0xff] }
 0x203   :  { %11021 = vst [vmem:[#allocation38_spill] sm:$0xff] %v5908_v56  ;;  %v5953_v4 = vsel %vm659_vm0, %v1449_v20, 0.0  ;;  %v1452_v34 = vmul.f32 %v4239_v14, %v5916_v50  ;;  %v5969_v20 = vsel %vm505_vm1, 1.0, %v10922_v8  ;;  %3937 = vpow2.f32 %v1020_v5  ;;  %v5976_v14 = vld [vmem:[%s10405_s0 + $0x1b8] sm:$0xff] }
 0x204   :  { %11023 = vst [vmem:[#allocation92_spill] sm:$0xff] %v5916_v50  ;;  %3939 = vpow2.f32 %v1022_v58  ;;  %v908_v5 = vsub.f32 %v5985_v9, %v5535_v31  ;;  %v4244_v31 = vld [vmem:[%s10405_s0 + $0xc8] sm:$0xff] }
 0x205   :  { %11025 = vst [vmem:[#allocation30_spill] sm:$0xff] %v5920_v18  ;;  %3941 = vpow2.f32 %v1024_v7  ;;  %v1194_v18 = vsel %vm659_vm0, %v5940_v47, 0.0 }
 0x206   :  { %11026 = vst [vmem:[#allocation94_spill] sm:$0xff] %v5923_v10  ;;  %v1191_v10 = vsel %vm659_vm0, %v5928_v2, 0.0  ;;  %1195 = vadd.xlane.f32.xlu0 %v1194_v18  ;;  %v6045_v18 = vsel %vm659_vm0, %v1452_v34, 0.0 }
 0x207   :  { %11027 = vst [vmem:[#allocation97_spill] sm:$0xff] %v5926_v52  ;;  %v5963_v52 = vpop.eup %3935  ;;  %1192 = vadd.xlane.f32.xlu2 %v1191_v10  ;;  %v4245_v10 = vld [vmem:[%s10405_s0 + $0x130] sm:$0xff] }
 0x208   :  { %11028 = vst [vmem:[#allocation31_spill] sm:$0xff] %v5928_v2  ;;  %v1197_v2 = vsel %vm659_vm0, %v5963_v52, 0.0 }
 0x209   :  { %11029 = vst [vmem:[#allocation41_spill] sm:$0xff] %v5931_v40  ;;  %v11039_v40 = vld [vmem:[#allocation34_spill] sm:$0xff]  ;;  %1198 = vadd.xlane.f32.xlu1 %v1197_v2  ;;  %v6042_v50 = vpop.eup %3937  ;;  %v6068_v34 = vpop.xlane.xlu0 %1069 }
 0x20a   :  { %11030 = vst [vmem:[#allocation180_spill] sm:$0xff] %v5938_v28  ;;  %v4240_v28 = vld [vmem:[%s10405_s0 + $0x118] sm:$0xff]  ;;  %vm495_vm3 = vcmp.eq.s32.totalorder %v5399_v3, %v11039_v40  ;;  %v6037_v40 = vsel %vm659_vm0, %v1450_v60, 0.0  ;;  %v6054_v60 = vpop.eup %3939 }
 0x20b   :  { %11031 = vst [vmem:[#allocation181_spill] sm:$0xff] %v5940_v47  ;;  %v1463_v15 = vmul.f32 %v4240_v28, %v5908_v56  ;;  %v907_v28 = vsub.f32 %v5976_v14, %v5480_v59  ;;  %v5996_v59 = vld [vmem:[%s10405_s0 + $0x1c8] sm:$0xff]  ;;  %v11044_v56 = vld [vmem:[#allocation36_spill] sm:$0xff] }
 0x20c   :  { %11032 = vst [vmem:[#allocation182_spill] sm:$0xff] %v5946_v37  ;;  %v909_v58 = vsub.f32 %v5996_v59, %v5564_v27  ;;  %v1466_v27 = vmul.f32 %v4245_v10, %v5969_v20  ;;  %vm497_vm6 = vcmp.eq.s32.totalorder %v5399_v3, %v11044_v56  ;;  %v6086_v56 = vld [vmem:[%s10405_s0 + $0x1d0] sm:$0xff] }
 0x20d   :  { %11033 = vst [vmem:[#allocation183_spill] sm:$0xff] %v5948_v12  ;;  %v1453_v12 = vmul.f32 %v4244_v31, %v5946_v37  ;;  %v6022_v31 = vsel %vm495_vm3, 1.0, %v10922_v8  ;;  %v1026_v47 = vmul.f32 1.442695, %v907_v28  ;;  %v6040_v37 = vsel %vm659_vm0, %v1463_v15, 0.0 }
 0x20e   :  { %11034 = vst [vmem:[#allocation184_spill] sm:$0xff] %v5950_v41  ;;  %v11040_v41 = vld [vmem:[#allocation44_spill] sm:$0xff]  ;;  %v1030_v28 = vmul.f32 1.442695, %v909_v58  ;;  %v6070_v58 = vpop.xlane.xlu1 %1072 }
 0x20f   :  { %11035 = vst [vmem:[#allocation185_spill] sm:$0xff] %v5953_v4  ;;  %v11038_v4 = vld [vmem:[#allocation33_spill] sm:$0xff]  ;;  %vm508_vm4 = vcmp.eq.s32.totalorder %v5399_v3, %v11040_v41  ;;  %v6048_v2 = vsel %vm659_vm0, %v1453_v12, 0.0  ;;  %v6066_v12 = vsel %vm497_vm6, 1.0, %v10922_v8  ;;  %3943 = vpow2.f32 %v1026_v47 }
 0x210   :  { %11036 = vst [vmem:[#allocation186_spill] sm:$0xff] %v5963_v52  ;;  %vm494_vm2 = vcmp.eq.s32.totalorder %v5399_v3, %v11038_v4  ;;  %v11043_v4 = vld [vmem:[#allocation37_spill] sm:$0xff]  ;;  %v6032_v10 = vsel %vm508_vm4, 1.0, %v10922_v8  ;;  %v1028_v52 = vmul.f32 1.442695, %v908_v5 }
 0x211   :  { %11037 = vst [vmem:[#allocation187_spill] sm:$0xff] %v5969_v20  ;;  %v6008_v7 = vsel %vm494_vm2, 1.0, %v10922_v8  ;;  %vm498_vm5 = vcmp.eq.s32.totalorder %v5399_v3, %v11043_v4  ;;  %v6034_v20 = vpop.xlane.xlu2 %1066  ;;  %v4246_v41 = vld [vmem:[%s10405_s0 + $0xd8] sm:$0xff]  ;;  %v6077_v4 = vsel %vm659_vm0, %v1466_v27, 0.0 }
 0x212   :  { %11041 = vst [vmem:[#allocation33_spill] sm:$0xff] %v6008_v7  ;;  %v1455_v5 = vmul.f32 %v4246_v41, %v6008_v7  ;;  %v6060_v15 = vsel %vm498_vm5, 1.0, %v10922_v8  ;;  %v4247_v41 = vld [vmem:[%s10405_s0 + $0xe0] sm:$0xff]  ;;  %3945 = vpow2.f32 %v1028_v52  ;;  %v6099_v47 = vld [vmem:[%s10405_s0 + $0x1d8] sm:$0xff] }
 0x213   :  { %11042 = vst [vmem:[#allocation34_spill] sm:$0xff] %v6022_v31  ;;  %3947 = vpow2.f32 %v1030_v28  ;;  %v1203_v28 = vsel %vm659_vm0, %v6054_v60, 0.0 }
 0x214   :  { %11045 = vst [vmem:[#allocation44_spill] sm:$0xff] %v6032_v10  ;;  %1204 = vadd.xlane.f32.xlu0 %v1203_v28  ;;  %v11072_v28 = vld [vmem:[#allocation45_spill] sm:$0xff] }
 0x215   :  { %11046 = vst [vmem:[#allocation37_spill] sm:$0xff] %v6034_v20  ;;  %vm506_vm12 = vcmp.eq.s32.totalorder %v5399_v3, %v11072_v28 }
 0x216   :  { %11047 = vst [vmem:[#allocation36_spill] sm:$0xff] %v6037_v40  ;;  %v910_v40 = vsub.f32 %v6086_v56, %v5566_v36  ;;  %v1200_v36 = vsel %vm659_vm0, %v6042_v50, 0.0 }
 0x217   :  { %11048 = vst [vmem:[#allocation188_spill] sm:$0xff] %v6040_v37  ;;  %v1456_v37 = vmul.f32 %v4247_v41, %v6022_v31  ;;  %v4249_v41 = vld [vmem:[%s10405_s0 + $0x148] sm:$0xff]  ;;  %1201 = vadd.xlane.f32.xlu2 %v1200_v36 }
 0x218   :  { %11049 = vst [vmem:[#allocation189_spill] sm:$0xff] %v6042_v50  ;;  %v1469_v27 = vmul.f32 %v4249_v41, %v6032_v10  ;;  %v6108_v41 = vld [vmem:[%s10405_s0 + $0x1e0] sm:$0xff]  ;;  %v11062_v50 = vld [vmem:[#allocation47_spill] sm:$0xff] }
 0x219   :  { %11050 = vst [vmem:[#allocation190_spill] sm:$0xff] %v6045_v18  ;;  %v11059_v18 = vld [vmem:[#allocation40_spill] sm:$0xff]  ;;  %v912_v52 = vsub.f32 %v6108_v41, %v5660_v57  ;;  %vm511_vm9 = vcmp.eq.s32.totalorder %v5399_v3, %v11062_v50  ;;  %v6126_v36 = vsel %vm659_vm0, %v1456_v37, 0.0  ;;  %v1032_v57 = vmul.f32 1.442695, %v910_v40  ;;  %v4253_v37 = vld [vmem:[%s10405_s0 + $0xf8] sm:$0xff]  ;;  %v6174_v50 = vpop.xlane.xlu1 %1081 }
 0x21a   :  { %11051 = vst [vmem:[#allocation191_spill] sm:$0xff] %v6048_v2  ;;  %v6079_v2 = vpop.eup %3941  ;;  %vm501_vm7 = vcmp.eq.s32.totalorder %v5399_v3, %v11059_v18  ;;  %v11067_v18 = vld [vmem:[#allocation42_spill] sm:$0xff] }
 0x21b   :  { %11052 = vst [vmem:[#allocation192_spill] sm:$0xff] %v6054_v60  ;;  %v1206_v10 = vsel %vm659_vm0, %v6079_v2, 0.0  ;;  %vm503_vm11 = vcmp.eq.s32.totalorder %v5399_v3, %v11067_v18  ;;  %v6148_v60 = vpop.xlane.xlu2 %1075  ;;  %v6153_v40 = vpop.eup %3943  ;;  %3949 = vpow2.f32 %v1032_v57  ;;  %v6214_v18 = vld [vmem:[%s10405_s0 + $0x1f0] sm:$0xff] }
 0x21c   :  { %11053 = vst [vmem:[#allocation193_spill] sm:$0xff] %v6060_v15  ;;  %1207 = vadd.xlane.f32.xlu1 %v1206_v10  ;;  %v6159_v10 = vsel %vm511_vm9, 1.0, %v10922_v8  ;;  %v914_v57 = vsub.f32 %v6214_v18, %v5725_v54  ;;  %v4259_v54 = vld [vmem:[%s10405_s0 + $0x160] sm:$0xff] }
 0x21d   :  { %11054 = vst [vmem:[#allocation194_spill] sm:$0xff] %v6066_v12 }
 0x21e   :  { %11055 = vst [vmem:[#allocation195_spill] sm:$0xff] %v6068_v34  ;;  %v6113_v34 = vsel %vm659_vm0, %v1455_v5, 0.0  ;;  %v6132_v5 = vsel %vm501_vm7, 1.0, %v10922_v8 }
 0x21f   :  { %11056 = vst [vmem:[#allocation196_spill] sm:$0xff] %v6070_v58  ;;  %v911_v58 = vsub.f32 %v6099_v47, %v5632_v23  ;;  %v4252_v23 = vld [vmem:[%s10405_s0 + $0xf0] sm:$0xff] }
 0x220   :  { %11057 = vst [vmem:[#allocation197_spill] sm:$0xff] %v6077_v4  ;;  %v11060_v4 = vld [vmem:[#allocation39_spill] sm:$0xff]  ;;  %v1458_v20 = vmul.f32 %v4252_v23, %v6066_v12 }
 0x221   :  { %11058 = vst [vmem:[#allocation198_spill] sm:$0xff] %v6079_v2  ;;  %vm500_vm8 = vcmp.eq.s32.totalorder %v5399_v3, %v11060_v4  ;;  %v1459_v2 = vmul.f32 %v4253_v37, %v6060_v15  ;;  %v6151_v4 = vsel %vm659_vm0, %v1469_v27, 0.0  ;;  %v1036_v37 = vmul.f32 1.442695, %v912_v52  ;;  %v11076_v27 = vld [vmem:[#allocation46_spill] sm:$0xff]  ;;  %v4254_v12 = vld [vmem:[%s10405_s0 + $0x108] sm:$0xff] }
 0x222   :  { %11061 = vst [vmem:[#allocation40_spill] sm:$0xff] %v6113_v34  ;;  %v6138_v23 = vsel %vm500_vm8, 1.0, %v10922_v8  ;;  %v1034_v34 = vmul.f32 1.442695, %v911_v58  ;;  %v6164_v15 = vsel %vm659_vm0, %v1458_v20, 0.0  ;;  %v6166_v58 = vpop.eup %3945  ;;  %vm507_vm14 = vcmp.eq.s32.totalorder %v5399_v3, %v11076_v27  ;;  %v4255_v20 = vld [vmem:[%s10405_s0 + $0x110] sm:$0xff] }
 0x223   :  { %11063 = vst [vmem:[#allocation39_spill] sm:$0xff] %v6126_v36  ;;  %v11066_v36 = vld [vmem:[#allocation43_spill] sm:$0xff]  ;;  %v1461_v52 = vmul.f32 %v4254_v12, %v6138_v23  ;;  %v6184_v31 = vpop.eup %3947  ;;  %v1212_v27 = vsel %vm659_vm0, %v6166_v58, 0.0 }
 0x224   :  { %11064 = vst [vmem:[#allocation47_spill] sm:$0xff] %v6132_v5  ;;  %vm504_vm10 = vcmp.eq.s32.totalorder %v5399_v3, %v11066_v36  ;;  %v6201_v12 = vld [vmem:[%s10405_s0 + $0x1e8] sm:$0xff]  ;;  %v6209_v36 = vsel %vm506_vm12, 1.0, %v10922_v8  ;;  %3951 = vpow2.f32 %v1034_v34  ;;  %v6229_v34 = vld [vmem:[%s10405_s0 + $0x1f8] sm:$0xff]  ;;  %1213 = vadd.xlane.f32.xlu0 %v1212_v27  ;;  %v6268_v27 = vpop.eup %3949 }
 0x225   :  { %11065 = vst [vmem:[#allocation199_spill] sm:$0xff] %v6138_v23  ;;  %3953 = vpow2.f32 %v1036_v37  ;;  %v915_v28 = vsub.f32 %v6229_v34, %v5759_v42  ;;  %v1215_v37 = vsel %vm659_vm0, %v6184_v31, 0.0  ;;  %v4260_v23 = vld [vmem:[%s10405_s0 + $0x120] sm:$0xff] }
 0x226   :  { %11068 = vst [vmem:[#allocation43_spill] sm:$0xff] %v6148_v60  ;;  %v11075_v60 = vld [vmem:[#allocation50_spill] sm:$0xff]  ;;  %1216 = vadd.xlane.f32.xlu1 %v1215_v37 }
 0x227   :  { %11069 = vst [vmem:[#allocation42_spill] sm:$0xff] %v6151_v4  ;;  %vm514_vm13 = vcmp.eq.s32.totalorder %v5399_v3, %v11075_v60  ;;  %v6172_v4 = vpop.xlane.xlu0 %1078  ;;  %v1042_v37 = vmul.f32 1.442695, %v915_v28  ;;  %v6292_v60 = vpop.xlane.xlu1 %1090 }
 0x228   :  { %11070 = vst [vmem:[#allocation200_spill] sm:$0xff] %v6153_v40 }
 0x229   :  { %11071 = vst [vmem:[#allocation201_spill] sm:$0xff] %v6159_v10 }
 0x22a   :  { %11073 = vst [vmem:[#allocation45_spill] sm:$0xff] %v6164_v15  ;;  %v1462_v15 = vmul.f32 %v4255_v20, %v6132_v5  ;;  %v913_v20 = vsub.f32 %v6201_v12, %v5662_v16  ;;  %v1209_v5 = vsel %vm659_vm0, %v6153_v40, 0.0  ;;  %v6224_v16 = vsel %vm507_vm14, 1.0, %v10922_v8 }
 0x22b   :  { %11074 = vst [vmem:[#allocation202_spill] sm:$0xff] %v6166_v58  ;;  %1210 = vadd.xlane.f32.xlu2 %v1209_v5  ;;  %v1472_v40 = vmul.f32 %v4259_v54, %v6159_v10  ;;  %v4261_v5 = vld [vmem:[%s10405_s0 + $0x128] sm:$0xff]  ;;  %v4262_v58 = vld [vmem:[%s10405_s0 + $0x138] sm:$0xff] }
 0x22c   :  { %11077 = vst [vmem:[#allocation50_spill] sm:$0xff] %v6172_v4  ;;  %v6190_v4 = vsel %vm504_vm10, 1.0, %v10922_v8  ;;  %v1038_v54 = vmul.f32 1.442695, %v913_v20  ;;  %v11087_v10 = vld [vmem:[#allocation53_spill] sm:$0xff] }
 0x22d   :  { %11078 = vst [vmem:[#allocation46_spill] sm:$0xff] %v6174_v50  ;;  %v6196_v50 = vsel %vm503_vm11, 1.0, %v10922_v8  ;;  %v1465_v42 = vmul.f32 %v4261_v5, %v6190_v4  ;;  %vm517_vm1 = vcmp.eq.s32.totalorder %v5399_v3, %v11087_v10  ;;  %v1040_v5 = vmul.f32 1.442695, %v914_v57 }
 0x22e   :  { %11079 = vst [vmem:[#allocation203_spill] sm:$0xff] %v6184_v31  ;;  %v1464_v7 = vmul.f32 %v4260_v23, %v6196_v50  ;;  %v6252_v31 = vsel %vm659_vm0, %v1459_v2, 0.0  ;;  %v1467_v23 = vmul.f32 %v4262_v58, %v6209_v36  ;;  %v4263_v2 = vld [vmem:[%s10405_s0 + $0x140] sm:$0xff]  ;;  %v6274_v58 = vsel %vm514_vm13, 1.0, %v10922_v8 }
 0x22f   :  { %11080 = vst [vmem:[#allocation204_spill] sm:$0xff] %v6190_v4  ;;  %v6262_v4 = vpop.xlane.xlu2 %1084  ;;  %v1468_v20 = vmul.f32 %v4263_v2, %v6224_v16  ;;  %v6280_v57 = vsel %vm659_vm0, %v1462_v15, 0.0  ;;  %v6301_v15 = vsel %vm659_vm0, %v1472_v40, 0.0  ;;  %3955 = vpow2.f32 %v1038_v54  ;;  %v11105_v40 = vld [vmem:[#allocation52_spill] sm:$0xff] }
 0x230   :  { %11081 = vst [vmem:[#allocation205_spill] sm:$0xff] %v6196_v50  ;;  %v11088_v50 = vld [vmem:[#allocation49_spill] sm:$0xff]  ;;  %v6295_v28 = vsel %vm659_vm0, %v1464_v7, 0.0  ;;  %vm513_vm3 = vcmp.eq.s32.totalorder %v5399_v3, %v11105_v40  ;;  %3957 = vpow2.f32 %v1040_v5 }
 0x231   :  { %11082 = vst [vmem:[#allocation206_spill] sm:$0xff] %v6209_v36  ;;  %vm510_vm2 = vcmp.eq.s32.totalorder %v5399_v3, %v11088_v50  ;;  %v6325_v10 = vsel %vm659_vm0, %v1468_v20, 0.0  ;;  %3959 = vpow2.f32 %v1042_v37  ;;  %v4264_v50 = vld [vmem:[%s10405_s0 + $0x150] sm:$0xff]  ;;  %v11115_v40 = vld [vmem:[#allocation57_spill] sm:$0xff] }
 0x232   :  { %11083 = vst [vmem:[#allocation207_spill] sm:$0xff] %v6224_v16  ;;  %v6290_v16 = vpop.xlane.xlu0 %1087  ;;  %v6315_v7 = vsel %vm510_vm2, 1.0, %v10922_v8  ;;  %vm518_vm10 = vcmp.eq.s32.totalorder %v5399_v3, %v11115_v40  ;;  %v11129_v40 = vld [vmem:[#allocation69_spill] sm:$0xff] }
 0x233   :  { %11084 = vst [vmem:[#allocation208_spill] sm:$0xff] %v6229_v34  ;;  %v11085_v34 = vld [vmem:[#allocation48_spill] sm:$0xff]  ;;  %vm529_vm12 = vcmp.eq.s32.totalorder %v5399_v3, %v11129_v40  ;;  %v11133_v36 = vld [vmem:[#allocation65_spill] sm:$0xff] }
 0x234   :  { %vm509_vm15 = vcmp.eq.s32.totalorder %v5399_v3, %v11085_v34  ;;  %11086 = vst [vmem:[#allocation48_spill] sm:$0xff] %v6252_v31  ;;  %v6277_v31 = vsel %vm659_vm0, %v1461_v52, 0.0  ;;  %v6298_v52 = vsel %vm659_vm0, %v1465_v42, 0.0  ;;  %v6309_v34 = vsel %vm517_vm1, 1.0, %v10922_v8  ;;  %v11142_v40 = vld [vmem:[#allocation77_spill] sm:$0xff] }
 0x235   :  { %11089 = vst [vmem:[#allocation53_spill] sm:$0xff] %v6262_v4  ;;  %v6282_v4 = vpop.eup %3951  ;;  %v6288_v2 = vsel %vm509_vm15, 1.0, %v10922_v8  ;;  %v6318_v42 = vsel %vm659_vm0, %v1467_v23, 0.0  ;;  %v4265_v23 = vld [vmem:[%s10405_s0 + $0x178] sm:$0xff]  ;;  %vm525_vm15 = vcmp.eq.s32.totalorder %v5399_v3, %v11133_v36 }
 0x236   :  { %11090 = vst [vmem:[#allocation49_spill] sm:$0xff] %v6268_v27  ;;  %v1470_v54 = vmul.f32 %v4264_v50, %v6288_v2  ;;  %v1475_v5 = vmul.f32 %v4265_v23, %v6274_v58  ;;  %v1221_v20 = vsel %vm659_vm0, %v6282_v4, 0.0  ;;  %v6353_v23 = vsel %vm513_vm3, 1.0, %v10922_v8 }
 0x237   :  { %11091 = vst [vmem:[#allocation209_spill] sm:$0xff] %v6274_v58  ;;  %1222 = vadd.xlane.f32.xlu0 %v1221_v20 }
 0x238   :  { %11092 = vst [vmem:[#allocation210_spill] sm:$0xff] %v6277_v31  ;;  %v11112_v31 = vld [vmem:[#allocation54_spill] sm:$0xff] }
 0x239   :  { %11093 = vst [vmem:[#allocation211_spill] sm:$0xff] %v6280_v57  ;;  %v6303_v57 = vpop.eup %3953  ;;  %vm515_vm8 = vcmp.eq.s32.totalorder %v5399_v3, %v11112_v31  ;;  %v6430_v31 = vsel %vm518_vm10, 1.0, %v10922_v8 }
 0x23a   :  { %11094 = vst [vmem:[#allocation212_spill] sm:$0xff] %v6282_v4  ;;  %v1224_v37 = vsel %vm659_vm0, %v6303_v57, 0.0  ;;  %v6369_v4 = vpop.xlane.xlu2 %1093 }
 0x23b   :  { %11095 = vst [vmem:[#allocation213_spill] sm:$0xff] %v6288_v2  ;;  %1225 = vadd.xlane.f32.xlu1 %v1224_v37  ;;  %v6375_v37 = vpop.eup %3955 }
 0x23c   :  { %11096 = vst [vmem:[#allocation214_spill] sm:$0xff] %v6290_v16  ;;  %v6386_v16 = vsel %vm659_vm0, %v1470_v54, 0.0  ;;  %v6391_v58 = vpop.eup %3957  ;;  %v6409_v54 = vsel %vm515_vm8, 1.0, %v10922_v8 }
 0x23d   :  { %11097 = vst [vmem:[#allocation215_spill] sm:$0xff] %v6292_v60  ;;  %v11118_v60 = vld [vmem:[#allocation63_spill] sm:$0xff] }
 0x23e   :  { %11098 = vst [vmem:[#allocation216_spill] sm:$0xff] %v6295_v28  ;;  %v11111_v28 = vld [vmem:[#allocation55_spill] sm:$0xff]  ;;  %vm526_vm11 = vcmp.eq.s32.totalorder %v5399_v3, %v11118_v60  ;;  %v4270_v60 = vld [vmem:[%s10405_s0 + $0x180] sm:$0xff] }
 0x23f   :  { %11099 = vst [vmem:[#allocation217_spill] sm:$0xff] %v6298_v52  ;;  %v11107_v52 = vld [vmem:[#allocation51_spill] sm:$0xff]  ;;  %vm516_vm7 = vcmp.eq.s32.totalorder %v5399_v3, %v11111_v28 }
 0x240   :  { %11100 = vst [vmem:[#allocation218_spill] sm:$0xff] %v6301_v15  ;;  %v1218_v15 = vsel %vm659_vm0, %v6268_v27, 0.0  ;;  %vm512_vm4 = vcmp.eq.s32.totalorder %v5399_v3, %v11107_v52  ;;  %v4267_v27 = vld [vmem:[%s10405_s0 + $0x190] sm:$0xff] }
 0x241   :  { %11101 = vst [vmem:[#allocation219_spill] sm:$0xff] %v6303_v57  ;;  %1219 = vadd.xlane.f32.xlu2 %v1218_v15  ;;  %v4266_v15 = vld [vmem:[%s10405_s0 + $0x158] sm:$0xff]  ;;  %v11114_v57 = vld [vmem:[#allocation58_spill] sm:$0xff]  ;;  %v1478_v20 = vmul.f32 %v4267_v27, %v6309_v34 }
 0x242   :  { %11102 = vst [vmem:[#allocation220_spill] sm:$0xff] %v6309_v34  ;;  %v1471_v50 = vmul.f32 %v4266_v15, %v6315_v7  ;;  %v6363_v15 = vsel %vm512_vm4, 1.0, %v10922_v8  ;;  %vm519_vm9 = vcmp.eq.s32.totalorder %v5399_v3, %v11114_v57  ;;  %v1227_v34 = vsel %vm659_vm0, %v6375_v37, 0.0 }
 0x243   :  { %11103 = vst [vmem:[#allocation221_spill] sm:$0xff] %v6315_v7  ;;  %v6424_v28 = vsel %vm519_vm9, 1.0, %v10922_v8  ;;  %v11132_v7 = vld [vmem:[#allocation60_spill] sm:$0xff]  ;;  %vm530_vm4 = vcmp.eq.s32.totalorder %v5399_v3, %v11142_v40  ;;  %v1812_v40 = vmul.f32 %v5165_v26, %v5476_v6  ;;  %v1817_v26 = vmul.f32 %v5199_v29, %v5447_v53  ;;  %v11152_v6 = vld [vmem:[#allocation114_spill] sm:$0xff] }
 0x244   :  { %11104 = vst [vmem:[#allocation222_spill] sm:$0xff] %v6318_v42  ;;  %v11108_v42 = vld [vmem:[#allocation56_spill] sm:$0xff]  ;;  %vm521_vm14 = vcmp.eq.s32.totalorder %v5399_v3, %v11132_v7  ;;  %v1822_v29 = vmul.f32 %v5245_v0, %v5658_v45 }
 0x245   :  { %11106 = vst [vmem:[#allocation52_spill] sm:$0xff] %v6325_v10  ;;  %vm520_vm5 = vcmp.eq.s32.totalorder %v5399_v3, %v11108_v42  ;;  %v11109_v10 = vld [vmem:[#allocation59_spill] sm:$0xff]  ;;  %v6403_v42 = vsel %vm516_vm7, 1.0, %v10922_v8 }
 0x246   :  { %vm523_vm6 = vcmp.eq.s32.totalorder %v5399_v3, %v11109_v10  ;;  %11110 = vst [vmem:[#allocation51_spill] sm:$0xff] %v6353_v23  ;;  %v6381_v52 = vsel %vm520_vm5, 1.0, %v10922_v8  ;;  %v6416_v10 = vsel %vm659_vm0, %v1471_v50, 0.0 }
 0x247   :  { %11113 = vst [vmem:[#allocation56_spill] sm:$0xff] %v6363_v15  ;;  %v6397_v27 = vsel %vm523_vm6, 1.0, %v10922_v8 }
 0x248   :  { %11116 = vst [vmem:[#allocation59_spill] sm:$0xff] %v6369_v4  ;;  %v6389_v4 = vsel %vm659_vm0, %v1475_v5, 0.0  ;;  %v6411_v5 = vpop.xlane.xlu0 %1096 }
 0x249   :  { %11117 = vst [vmem:[#allocation55_spill] sm:$0xff] %v6375_v37  ;;  %1228 = vadd.xlane.f32.xlu2 %v1227_v34  ;;  %v4271_v37 = vld [vmem:[%s10405_s0 + $0x188] sm:$0xff]  ;;  %v4272_v34 = vld [vmem:[%s10405_s0 + $0x198] sm:$0xff] }
 0x24a   :  { %11119 = vst [vmem:[#allocation54_spill] sm:$0xff] %v6386_v16  ;;  %v6418_v16 = vpop.eup %3959  ;;  %v1479_v2 = vmul.f32 %v4272_v34, %v6430_v31  ;;  %v6491_v34 = vsel %vm529_vm12, 1.0, %v10922_v8 }
 0x24b   :  { %11120 = vst [vmem:[#allocation58_spill] sm:$0xff] %v6389_v4  ;;  %v6413_v4 = vpop.xlane.xlu1 %1099 }
 0x24c   :  { %11121 = vst [vmem:[#allocation57_spill] sm:$0xff] %v6391_v58 }
 0x24d   :  { %11122 = vst [vmem:[#allocation63_spill] sm:$0xff] %v6397_v27 }
 0x24e   :  { %11123 = vst [vmem:[#allocation223_spill] sm:$0xff] %v6409_v54 }
 0x24f   :  { %11124 = vst [vmem:[#allocation224_spill] sm:$0xff] %v6411_v5  ;;  %v6444_v5 = vsel %vm526_vm11, 1.0, %v10922_v8 }
 0x250   :  { %11125 = vst [vmem:[#allocation225_spill] sm:$0xff] %v6413_v4  ;;  %v4268_v4 = vld [vmem:[%s10405_s0 + $0x168] sm:$0xff] }
 0x251   :  { %11126 = vst [vmem:[#allocation226_spill] sm:$0xff] %v6416_v10  ;;  %v1473_v50 = vmul.f32 %v4268_v4, %v6363_v15  ;;  %v4269_v10 = vld [vmem:[%s10405_s0 + $0x170] sm:$0xff]  ;;  %v6451_v4 = vsel %vm659_vm0, %v1478_v20, 0.0  ;;  %v11131_v15 = vld [vmem:[#allocation61_spill] sm:$0xff]  ;;  %v1477_v20 = vmul.f32 %v4271_v37, %v6403_v42  ;;  %1493 = vadd.xlane.f32.xlu2 %v5552_v43 }
 0x252   :  { %11127 = vst [vmem:[#allocation227_spill] sm:$0xff] %v6418_v16  ;;  %v1474_v57 = vmul.f32 %v4269_v10, %v6353_v23  ;;  %vm522_vm13 = vcmp.eq.s32.totalorder %v5399_v3, %v11131_v15  ;;  %v1476_v10 = vmul.f32 %v4270_v60, %v6409_v54  ;;  %v1233_v23 = vsel %vm659_vm0, %v6418_v16, 0.0  ;;  %v4273_v60 = vld [vmem:[%s10405_s0 + $0x1a0] sm:$0xff]  ;;  %v11134_v37 = vld [vmem:[#allocation64_spill] sm:$0xff] }
 0x253   :  { %11128 = vst [vmem:[#allocation228_spill] sm:$0xff] %v6444_v5  ;;  %v1480_v54 = vmul.f32 %v4273_v60, %v6424_v28  ;;  %vm524_vm1 = vcmp.eq.s32.totalorder %v5399_v3, %v11134_v37  ;;  %1234 = vadd.xlane.f32.xlu1 %v1233_v23  ;;  %v6482_v16 = vsel %vm659_vm0, %v1473_v50, 0.0  ;;  %v6497_v36 = vsel %vm522_vm13, 1.0, %v10922_v8  ;;  %v11140_v23 = vld [vmem:[#allocation70_spill] sm:$0xff]  ;;  %v6503_v50 = vpop.xlane.xlu2 %1102  ;;  %v6527_v7 = vpop.xlane.xlu1 %1108  ;;  %v11154_v43 = vld [vmem:[#allocation120_spill] sm:$0xff] }
 0x254   :  { %11130 = vst [vmem:[#allocation69_spill] sm:$0xff] %v6451_v4  ;;  %v1230_v4 = vsel %vm659_vm0, %v6391_v58, 0.0  ;;  %v6485_v58 = vsel %vm659_vm0, %v1474_v57, 0.0  ;;  %vm527_vm3 = vcmp.eq.s32.totalorder %v5399_v3, %v11140_v23  ;;  %v6509_v57 = vsel %vm521_vm14, 1.0, %v10922_v8  ;;  %v6525_v23 = vpop.xlane.xlu0 %1105 }
 0x255   :  { %1231 = vadd.xlane.f32.xlu0 %v1230_v4  ;;  %11135 = vst [vmem:[#allocation61_spill] sm:$0xff] %v6482_v16  ;;  %v11139_v4 = vld [vmem:[#allocation72_spill] sm:$0xff]  ;;  %v6514_v15 = vsel %vm659_vm0, %v1476_v10, 0.0  ;;  %v6517_v60 = vsel %vm659_vm0, %v1477_v20, 0.0  ;;  %v6520_v37 = vsel %vm525_vm15, 1.0, %v10922_v8  ;;  %v6539_v20 = vsel %vm527_vm3, 1.0, %v10922_v8 }
 0x256   :  { %11136 = vst [vmem:[#allocation60_spill] sm:$0xff] %v6485_v58  ;;  %vm528_vm2 = vcmp.eq.s32.totalorder %v5399_v3, %v11139_v4  ;;  %v6523_v4 = vsel %vm524_vm1, 1.0, %v10922_v8  ;;  %v6530_v58 = vsel %vm659_vm0, %v1479_v2, 0.0  ;;  %v6533_v3 = vsel %vm659_vm0, %v1480_v54, 0.0  ;;  %v11204_v16 = vld [vmem:[#allocation33_spill] sm:$0xff] }
 0x257   :  { %11137 = vst [vmem:[#allocation65_spill] sm:$0xff] %v6491_v34  ;;  %v6536_v10 = vsel %vm528_vm2, 1.0, %v10922_v8  ;;  %v1814_v2 = vmul.f32 %v5181_v49, %v5473_v55  ;;  %v1815_v54 = vmul.f32 %v5175_v1, %v5549_v51  ;;  %v4274_v49 = vld [vmem:[%s10405_s0 + $0x1a8] sm:$0xff]  ;;  %v11153_v51 = vld [vmem:[#allocation18_spill] sm:$0xff] }
 0x258   :  { %11138 = vst [vmem:[#allocation64_spill] sm:$0xff] %v6497_v36  ;;  %v1481_v1 = vmul.f32 %v4274_v49, %v6381_v52 }
 0x259   :  { %11141 = vst [vmem:[#allocation72_spill] sm:$0xff] %v6509_v57 }
 0x25a   :  { %11143 = vst [vmem:[#allocation70_spill] sm:$0xff] %v6514_v15  ;;  %v6546_v15 = vsel %vm530_vm4, 1.0, %v10922_v8  ;;  %v11205_v8 = vld [vmem:[#allocation150_spill] sm:$0xff] }
 0x25b   :  { %11144 = vst [vmem:[#allocation77_spill] sm:$0xff] %v6517_v60  ;;  %v1813_v60 = vmul.f32 %v5173_v35, %v5529_v21  ;;  %v1818_v35 = vmul.f32 %v5205_v24, %v5580_v61  ;;  %v1819_v21 = vmul.f32 %v11152_v6, %v5606_v30  ;;  %v1484_v24 = vmul.f32 %v5985_v9, %v6397_v27  ;;  %v6585_v0 = vpop.xlane.xlu2 %1111  ;;  %v6612_v9 = vpop.xlane.xlu1 %1117  ;;  %v11161_v6 = vld [vmem:[#allocation123_spill] sm:$0xff]  ;;  %v11216_v27 = vld [vmem:[#allocation176_spill] sm:$0xff] }
 0x25c   :  { %11145 = vst [vmem:[#allocation229_spill] sm:$0xff] %v6520_v37  ;;  %1499 = vadd.xlane.f32.xlu1 %v5555_v33  ;;  %v6576_v61 = vsel %vm659_vm0, %v1812_v40, 0.0  ;;  %v1824_v33 = vmul.f32 %v11154_v43, %v11153_v51  ;;  %v6599_v30 = vsel %vm659_vm0, %v1817_v26, 0.0  ;;  %v6610_v45 = vpop.xlane.xlu0 %1114  ;;  %v11166_v51 = vld [vmem:[#allocation79_spill] sm:$0xff]  ;;  %v11168_v43 = vld [vmem:[#allocation129_spill] sm:$0xff] }
 0x25d   :  { %11146 = vst [vmem:[#allocation230_spill] sm:$0xff] %v6523_v4  ;;  %1496 = vadd.xlane.f32.xlu0 %v5635_v62  ;;  %v6579_v53 = vsel %vm659_vm0, %v1813_v60, 0.0  ;;  %v6608_v62 = vsel %vm659_vm0, %v1481_v1, 0.0  ;;  %v6624_v40 = vsel %vm659_vm0, %v1484_v24, 0.0  ;;  %1502 = vadd.xlane.f32.xlu2 %v11166_v51  ;;  %v11173_v51 = vld [vmem:[#allocation135_spill] sm:$0xff] }
 0x25e   :  { %11147 = vst [vmem:[#allocation231_spill] sm:$0xff] %v6530_v58  ;;  %v6637_v1 = vsel %vm659_vm0, %v1824_v33, 0.0  ;;  %v4275_v33 = vld [vmem:[%s10405_s0 + $0x1b0] sm:$0xff] }
 0x25f   :  { %11148 = vst [vmem:[#allocation232_spill] sm:$0xff] %v6533_v3  ;;  %v1816_v3 = vmul.f32 %v5197_v13, %v5422_v32  ;;  %v1820_v13 = vmul.f32 %v5223_v25, %v5454_v46  ;;  %v1821_v32 = vmul.f32 %v5229_v22, %v5628_v11  ;;  %v1823_v25 = vmul.f32 %v5247_v39, %v5461_v38 }
 0x260   :  { %11149 = vst [vmem:[#allocation233_spill] sm:$0xff] %v6536_v10  ;;  %v1487_v22 = vmul.f32 %v6099_v47, %v6444_v5  ;;  %v6588_v46 = vsel %vm659_vm0, %v1814_v2, 0.0  ;;  %v6591_v11 = vsel %vm659_vm0, %v1815_v54, 0.0  ;;  %v6602_v39 = vsel %vm659_vm0, %v1818_v35, 0.0  ;;  %v11159_v54 = vld [vmem:[#allocation122_spill] sm:$0xff]  ;;  %v11160_v35 = vld [vmem:[#allocation17_spill] sm:$0xff] }
 0x261   :  { %11150 = vst [vmem:[#allocation234_spill] sm:$0xff] %v6539_v20  ;;  %v6594_v55 = vsel %vm659_vm0, %v1816_v3, 0.0  ;;  %v6605_v38 = vsel %vm659_vm0, %v1819_v21, 0.0  ;;  %v6615_v47 = vsel %vm659_vm0, %v1820_v13, 0.0  ;;  %v6618_v60 = vsel %vm659_vm0, %v1821_v32, 0.0  ;;  %v11164_v13 = vld [vmem:[#allocation126_spill] sm:$0xff] }
 0x262   :  { %11151 = vst [vmem:[#allocation235_spill] sm:$0xff] %v6546_v15  ;;  %v6621_v3 = vsel %vm659_vm0, %v1822_v29, 0.0  ;;  %v6627_v2 = vsel %vm659_vm0, %v1823_v25, 0.0  ;;  %v1825_v26 = vmul.f32 %v11159_v54, %v5713_v19  ;;  %v1826_v21 = vmul.f32 %v11161_v6, %v11160_v35  ;;  %v11165_v29 = vld [vmem:[#allocation128_spill] sm:$0xff] }
 0x263   :  { %11155 = vst [vmem:[#allocation114_spill] sm:$0xff] %v6608_v62  ;;  %v6634_v49 = vsel %vm659_vm0, %v1487_v22, 0.0  ;;  %v1827_v32 = vmul.f32 %v11164_v13, %v5757_v44  ;;  %v1828_v24 = vmul.f32 %v11165_v29, %v5751_v48  ;;  %v1490_v25 = vmul.f32 %v6214_v18, %v6491_v34  ;;  %v11167_v19 = vld [vmem:[#allocation20_spill] sm:$0xff]  ;;  %v11171_v13 = vld [vmem:[#allocation134_spill] sm:$0xff]  ;;  %v11172_v29 = vld [vmem:[#allocation23_spill] sm:$0xff] }
 0x264   :  { %11156 = vst [vmem:[#allocation18_spill] sm:$0xff] %v6621_v3  ;;  %v1829_v54 = vmul.f32 %v11168_v43, %v11167_v19  ;;  %v11169_v35 = vld [vmem:[#allocation24_spill] sm:$0xff]  ;;  %v1482_v44 = vmul.f32 %v4275_v33, %v6509_v57  ;;  %v1483_v48 = vmul.f32 %v5976_v14, %v6497_v36  ;;  %v1831_v18 = vmul.f32 %v11171_v13, %v5835_v63  ;;  %v11178_v63 = vld [vmem:[#allocation179_spill] sm:$0xff]  ;;  %v11179_v13 = vld [vmem:[#allocation138_spill] sm:$0xff] }
 0x265   :  { %11157 = vst [vmem:[#allocation120_spill] sm:$0xff] %v6624_v40  ;;  %v11170_v22 = vld [vmem:[#allocation132_spill] sm:$0xff]  ;;  %v1485_v19 = vmul.f32 %v5996_v59, %v6523_v4  ;;  %v1486_v43 = vmul.f32 %v6086_v56, %v6520_v37  ;;  %v6667_v33 = vsel %vm659_vm0, %v1825_v26, 0.0  ;;  %v6670_v14 = vsel %vm659_vm0, %v1826_v21, 0.0  ;;  %v6676_v59 = vpop.xlane.xlu2 %1120  ;;  %v11184_v26 = vld [vmem:[#allocation141_spill] sm:$0xff]  ;;  %v11206_v34 = vld [vmem:[#allocation34_spill] sm:$0xff] }
 0x266   :  { %11158 = vst [vmem:[#allocation236_spill] sm:$0xff] %v6627_v2  ;;  %v1830_v6 = vmul.f32 %v11170_v22, %v11169_v35  ;;  %v11174_v35 = vld [vmem:[#allocation7_spill] sm:$0xff]  ;;  %v1833_v40 = vmul.f32 %v11179_v13, %v11178_v63  ;;  %v6679_v56 = vsel %vm659_vm0, %v1827_v32, 0.0  ;;  %v6687_v21 = vsel %vm659_vm0, %v1490_v25, 0.0  ;;  %v6703_v13 = vpop.xlane.xlu1 %1126  ;;  %v11210_v37 = vld [vmem:[#allocation208_spill] sm:$0xff] }
 0x267   :  { %11162 = vst [vmem:[#allocation122_spill] sm:$0xff] %v6634_v49  ;;  %v1832_v49 = vmul.f32 %v11173_v51, %v11172_v29  ;;  %1508 = vadd.xlane.f32.xlu1 %v11174_v35  ;;  %v11175_v22 = vld [vmem:[#allocation11_spill] sm:$0xff]  ;;  %v11180_v29 = vld [vmem:[#allocation140_spill] sm:$0xff]  ;;  %v6682_v35 = vsel %vm659_vm0, %v1828_v24, 0.0  ;;  %v6690_v58 = vsel %vm659_vm0, %v1829_v54, 0.0  ;;  %v6699_v32 = vsel %vm659_vm0, %v1483_v48, 0.0  ;;  %v6701_v24 = vpop.xlane.xlu0 %1123 }
 0x268   :  { %11163 = vst [vmem:[#allocation17_spill] sm:$0xff] %v6637_v1  ;;  %1505 = vadd.xlane.f32.xlu0 %v11175_v22  ;;  %v1834_v51 = vmul.f32 %v11180_v29, %v5894_v17  ;;  %v11183_v22 = vld [vmem:[#allocation168_spill] sm:$0xff]  ;;  %v6693_v63 = vsel %vm659_vm0, %v1830_v6, 0.0  ;;  %v6696_v17 = vsel %vm659_vm0, %v1482_v44, 0.0  ;;  %v6706_v29 = vsel %vm659_vm0, %v1831_v18, 0.0  ;;  %v11217_v36 = vld [vmem:[#allocation159_spill] sm:$0xff] }
 0x269   :  { %11176 = vst [vmem:[#allocation123_spill] sm:$0xff] %v6667_v33  ;;  %v1835_v62 = vmul.f32 %v11184_v26, %v11183_v22  ;;  %v6709_v25 = vsel %vm659_vm0, %v1832_v49, 0.0  ;;  %v6712_v54 = vsel %vm659_vm0, %v1485_v19, 0.0  ;;  %v6715_v6 = vsel %vm659_vm0, %v1486_v43, 0.0  ;;  %v11197_v19 = vld [vmem:[#allocation92_spill] sm:$0xff]  ;;  %v11199_v43 = vld [vmem:[#allocation182_spill] sm:$0xff] }
 0x26a   :  { %11177 = vst [vmem:[#allocation126_spill] sm:$0xff] %v6670_v14  ;;  %v6718_v44 = vsel %vm659_vm0, %v1833_v40, 0.0  ;;  %v6721_v48 = vsel %vm659_vm0, %v1834_v51, 0.0  ;;  %v1488_v22 = vmul.f32 %v6108_v41, %v6539_v20  ;;  %v1489_v18 = vmul.f32 %v6201_v12, %v6536_v10  ;;  %v11198_v26 = vld [vmem:[#allocation144_spill] sm:$0xff]  ;;  %v11203_v51 = vld [vmem:[#allocation166_spill] sm:$0xff]  ;;  %v11222_v57 = vld [vmem:[#allocation47_spill] sm:$0xff] }
 0x26b   :  { %11181 = vst [vmem:[#allocation128_spill] sm:$0xff] %v6679_v56  ;;  %v6728_v49 = vsel %vm659_vm0, %v1835_v62, 0.0  ;;  %v11201_v40 = vld [vmem:[#allocation80_spill] sm:$0xff]  ;;  %1511 = vadd.xlane.f32.xlu2 %v11203_v51  ;;  %v1839_v41 = vmul.f32 %v11205_v8, %v11204_v16  ;;  %v11208_v10 = vld [vmem:[#allocation86_spill] sm:$0xff]  ;;  %v11209_v62 = vld [vmem:[#allocation153_spill] sm:$0xff]  ;;  %v1844_v8 = vmul.f32 %v11217_v36, %v11216_v27 }
 0x26c   :  { %11182 = vst [vmem:[#allocation79_spill] sm:$0xff] %v6682_v35  ;;  %v11207_v20 = vld [vmem:[#allocation152_spill] sm:$0xff]  ;;  %v1841_v5 = vmul.f32 %v11209_v62, %v11208_v10  ;;  %v11218_v16 = vld [vmem:[#allocation10_spill] sm:$0xff]  ;;  %v11312_v14 = vld [vmem:[#allocation27_spill] sm:$0xff] }
 0x26d   :  { %11185 = vst [vmem:[#allocation20_spill] sm:$0xff] %v6687_v21  ;;  %v1836_v21 = vmul.f32 %v11198_v26, %v11197_v19  ;;  %v1840_v12 = vmul.f32 %v11207_v20, %v11206_v34  ;;  %v1491_v19 = vmul.f32 %v11210_v37, %v6546_v15  ;;  %v11211_v26 = vld [vmem:[#allocation171_spill] sm:$0xff]  ;;  %v11219_v34 = vld [vmem:[#allocation82_spill] sm:$0xff] }
 0x26e   :  { %11186 = vst [vmem:[#allocation129_spill] sm:$0xff] %v6690_v58  ;;  %3961 = vrcp.f32 %v11211_v26  ;;  %v11220_v20 = vld [vmem:[#allocation199_spill] sm:$0xff]  ;;  %v11221_v10 = vld [vmem:[#allocation162_spill] sm:$0xff]  ;;  %vm2073_vm5 = vweird.f32 %v11211_v26 }
 0x26f   :  { %11187 = vst [vmem:[#allocation24_spill] sm:$0xff] %v6693_v63  ;;  %1517 = vadd.xlane.f32.xlu1 %v11218_v16  ;;  %v1845_v62 = vmul.f32 %v11221_v10, %v11220_v20  ;;  %v11223_v37 = vld [vmem:[#allocation62_spill] sm:$0xff]  ;;  %v6766_v27 = vsel %vm659_vm0, %v1836_v21, 0.0  ;;  %v6786_v21 = vsel %vm659_vm0, %v1491_v19, 0.0  ;;  %v6793_v20 = vsel %vm659_vm0, %v1841_v5, 0.0  ;;  %v11240_v10 = vld [vmem:[#allocation73_spill] sm:$0xff] }
 0x270   :  { %11188 = vst [vmem:[#allocation132_spill] sm:$0xff] %v6696_v17  ;;  %1514 = vadd.xlane.f32.xlu0 %v11219_v34  ;;  %v1846_v15 = vmul.f32 %v11223_v37, %v11222_v57  ;;  %v6774_v34 = vsel %vm659_vm0, %v1489_v18, 0.0  ;;  %v6804_v37 = vsel %vm659_vm0, %v1844_v8, 0.0  ;;  %v11316_v33 = vld [vmem:[#allocation174_spill] sm:$0xff]  ;;  %v11328_v2 = vld [vmem:[#allocation75_spill] sm:$0xff] }
 0x271   :  { %11189 = vst [vmem:[#allocation134_spill] sm:$0xff] %v6699_v32  ;;  %v11202_v32 = vld [vmem:[#allocation147_spill] sm:$0xff]  ;;  %v6807_v19 = vsel %vm659_vm0, %v1845_v62, 0.0 }
 0x272   :  { %11190 = vst [vmem:[#allocation23_spill] sm:$0xff] %v6706_v29  ;;  %v1838_v17 = vmul.f32 %v11202_v32, %v11201_v40  ;;  %v11214_v32 = vld [vmem:[#allocation193_spill] sm:$0xff]  ;;  %v11215_v40 = vld [vmem:[#allocation158_spill] sm:$0xff] }
 0x273   :  { %11191 = vst [vmem:[#allocation135_spill] sm:$0xff] %v6709_v25  ;;  %v1843_v51 = vmul.f32 %v11215_v40, %v11214_v32  ;;  %v11229_v32 = vld [vmem:[#allocation205_spill] sm:$0xff]  ;;  %v11230_v40 = vld [vmem:[#allocation6_spill] sm:$0xff]  ;;  %v11277_v25 = vld [vmem:[#allocation31_spill] sm:$0xff] }
 0x274   :  { %11192 = vst [vmem:[#allocation7_spill] sm:$0xff] %v6712_v54  ;;  %v1848_v16 = vmul.f32 %v11230_v40, %v11229_v32  ;;  %v6777_v57 = vsel %vm659_vm0, %v1838_v17, 0.0  ;;  %v6810_v32 = vsel %vm659_vm0, %v1846_v15, 0.0  ;;  %v11245_v40 = vld [vmem:[#allocation88_spill] sm:$0xff]  ;;  %v11252_v15 = vld [vmem:[#allocation22_spill] sm:$0xff]  ;;  %v1861_v29 = vmul.f32 %v11277_v25, %v6403_v42 }
 0x275   :  { %11193 = vst [vmem:[#allocation11_spill] sm:$0xff] %v6715_v6  ;;  %v11200_v6 = vld [vmem:[#allocation146_spill] sm:$0xff]  ;;  %v6799_v17 = vsel %vm659_vm0, %v1843_v51, 0.0  ;;  %3963 = vrcp.f32 %v11245_v40  ;;  %1520 = vadd.xlane.f32.xlu2 %v11252_v15  ;;  %vm2088_vm8 = vweird.f32 %v11245_v40 }
 0x276   :  { %11194 = vst [vmem:[#allocation179_spill] sm:$0xff] %v6718_v44  ;;  %v1837_v54 = vmul.f32 %v11200_v6, %v11199_v43  ;;  %v11212_v6 = vld [vmem:[#allocation194_spill] sm:$0xff]  ;;  %v11213_v43 = vld [vmem:[#allocation156_spill] sm:$0xff]  ;;  %v6819_v51 = vsel %vm659_vm0, %v1848_v16, 0.0 }
 0x277   :  { %11195 = vst [vmem:[#allocation138_spill] sm:$0xff] %v6721_v48  ;;  %v1842_v4 = vmul.f32 %v11213_v43, %v11212_v6  ;;  %v11225_v48 = vld [vmem:[#allocation66_spill] sm:$0xff]  ;;  %v6761_v6 = vsel %vm659_vm0, %v1488_v22, 0.0  ;;  %v6763_v43 = vpop.xlane.xlu2 %1129  ;;  %v6783_v22 = vsel %vm659_vm0, %v1840_v12, 0.0 }
 0x278   :  { %11196 = vst [vmem:[#allocation140_spill] sm:$0xff] %v6728_v49  ;;  %v11224_v49 = vld [vmem:[#allocation38_spill] sm:$0xff]  ;;  %v6769_v36 = vsel %vm659_vm0, %v1837_v54, 0.0  ;;  %v6788_v54 = vpop.xlane.xlu0 %1132 }
 0x279   :  { %v1847_v44 = vmul.f32 %v11225_v48, %v11224_v49  ;;  %11226 = vst [vmem:[#allocation168_spill] sm:$0xff] %v6761_v6  ;;  %v6780_v48 = vsel %vm659_vm0, %v1839_v41, 0.0  ;;  %v6790_v49 = vpop.xlane.xlu1 %1135  ;;  %v6796_v18 = vsel %vm659_vm0, %v1842_v4, 0.0  ;;  %v11239_v41 = vld [vmem:[#allocation204_spill] sm:$0xff]  ;;  %v6815_v4 = vpop.eup %3961 }
 0x27a   :  { %11227 = vst [vmem:[#allocation141_spill] sm:$0xff] %v6766_v27  ;;  %v1849_v12 = vmul.f32 %v11240_v10, %v11239_v41  ;;  %v11247_v41 = vld [vmem:[#allocation187_spill] sm:$0xff]  ;;  %v11248_v10 = vld [vmem:[#allocation9_spill] sm:$0xff]  ;;  %v11251_v6 = vld [vmem:[#allocation28_spill] sm:$0xff]  ;;  %vm2074_vm6 = vweird.f32 %v6815_v4 }
 0x27b   :  { %11228 = vst [vmem:[#allocation92_spill] sm:$0xff] %v6769_v36  ;;  %v6813_v5 = vsel %vm659_vm0, %v1847_v44, 0.0  ;;  %v1850_v8 = vmul.f32 %v11248_v10, %v11247_v41  ;;  %3965 = vrcp.f32 %v11251_v6  ;;  %v11254_v44 = vld [vmem:[#allocation76_spill] sm:$0xff]  ;;  %v11261_v10 = vld [vmem:[#allocation221_spill] sm:$0xff]  ;;  %vm2103_vm9 = vweird.f32 %v11251_v6  ;;  %vm6980_vm11 = vmor %vm2073_vm5, %vm2074_vm6 }
 0x27c   :  { %11231 = vst [vmem:[#allocation144_spill] sm:$0xff] %v6774_v34  ;;  %v11250_v34 = vld [vmem:[#allocation163_spill] sm:$0xff]  ;;  %v6835_v41 = vsel %vm659_vm0, %v1849_v12, 0.0 }
 0x27d   :  { %11232 = vst [vmem:[#allocation182_spill] sm:$0xff] %v6777_v57  ;;  %v11265_v57 = vld [vmem:[#allocation71_spill] sm:$0xff] }
 0x27e   :  { %11233 = vst [vmem:[#allocation146_spill] sm:$0xff] %v6780_v48  ;;  %v11264_v48 = vld [vmem:[#allocation169_spill] sm:$0xff]  ;;  %1526 = vadd.xlane.f32.xlu1 %v11265_v57  ;;  %v11269_v12 = vld [vmem:[#allocation51_spill] sm:$0xff] }
 0x27f   :  { %11234 = vst [vmem:[#allocation80_spill] sm:$0xff] %v6783_v22  ;;  %v11263_v22 = vld [vmem:[#allocation201_spill] sm:$0xff]  ;;  %v6850_v36 = vpop.xlane.xlu2 %1138  ;;  %v11274_v57 = vld [vmem:[#allocation175_spill] sm:$0xff] }
 0x280   :  { %11235 = vst [vmem:[#allocation147_spill] sm:$0xff] %v6786_v21  ;;  %v11249_v21 = vld [vmem:[#allocation206_spill] sm:$0xff]  ;;  %v1856_v15 = vmul.f32 %v11264_v48, %v11263_v22  ;;  %v11273_v48 = vld [vmem:[#allocation209_spill] sm:$0xff] }
 0x281   :  { %11236 = vst [vmem:[#allocation166_spill] sm:$0xff] %v6793_v20  ;;  %v1851_v62 = vmul.f32 %v11250_v34, %v11249_v21  ;;  %v11258_v20 = vld [vmem:[#allocation167_spill] sm:$0xff]  ;;  %v11262_v34 = vld [vmem:[#allocation85_spill] sm:$0xff]  ;;  %v1859_v22 = vmul.f32 %v11274_v57, %v11273_v48  ;;  %v6876_v48 = vpop.xlane.xlu0 %1141  ;;  %v6878_v57 = vpop.xlane.xlu1 %1144 }
 0x282   :  { %11237 = vst [vmem:[#allocation33_spill] sm:$0xff] %v6796_v18  ;;  %v11257_v18 = vld [vmem:[#allocation213_spill] sm:$0xff]  ;;  %v1855_v21 = vmul.f32 %v11262_v34, %v11261_v10  ;;  %v6853_v10 = vsel %vm659_vm0, %v1850_v8, 0.0  ;;  %v11275_v34 = vld [vmem:[#allocation223_spill] sm:$0xff]  ;;  %v6884_v25 = vsel %vm659_vm0, %v1856_v15, 0.0 }
 0x283   :  { %11238 = vst [vmem:[#allocation150_spill] sm:$0xff] %v6799_v17  ;;  %v1854_v16 = vmul.f32 %v11258_v20, %v11257_v18  ;;  %v2069_v20 = vmul.f32 %v6815_v4, %v11211_v26  ;;  %v11267_v18 = vld [vmem:[#allocation56_spill] sm:$0xff]  ;;  %v6862_v63 = vsel %vm659_vm0, %v1851_v62, 0.0  ;;  %v6901_v15 = vsel %vm659_vm0, %v1859_v22, 0.0 }
 0x284   :  { %11241 = vst [vmem:[#allocation34_spill] sm:$0xff] %v6804_v37  ;;  %v11256_v37 = vld [vmem:[#allocation26_spill] sm:$0xff]  ;;  %v6881_v42 = vsel %vm659_vm0, %v1855_v21, 0.0 }
 0x285   :  { %11242 = vst [vmem:[#allocation152_spill] sm:$0xff] %v6807_v19  ;;  %v11255_v19 = vld [vmem:[#allocation44_spill] sm:$0xff]  ;;  %v6871_v8 = vsel %vm659_vm0, %v1854_v16, 0.0  ;;  %v2070_v16 = vsub.f32 1.0, %v2069_v20  ;;  %v11295_v20 = vld [vmem:[#allocation189_spill] sm:$0xff] }
 0x286   :  { %11243 = vst [vmem:[#allocation86_spill] sm:$0xff] %v6810_v32  ;;  %v11253_v32 = vld [vmem:[#allocation207_spill] sm:$0xff]  ;;  %v1853_v17 = vmul.f32 %v11256_v37, %v11255_v19  ;;  %v11268_v37 = vld [vmem:[#allocation173_spill] sm:$0xff] }
 0x287   :  { %11244 = vst [vmem:[#allocation153_spill] sm:$0xff] %v6813_v5  ;;  %v1852_v5 = vmul.f32 %v11254_v44, %v11253_v32  ;;  %v11266_v32 = vld [vmem:[#allocation21_spill] sm:$0xff]  ;;  %v1857_v19 = vmul.f32 %v11268_v37, %v11267_v18  ;;  %v11270_v44 = vld [vmem:[#allocation35_spill] sm:$0xff] }
 0x288   :  { %11246 = vst [vmem:[#allocation208_spill] sm:$0xff] %v6819_v51  ;;  %v11259_v51 = vld [vmem:[#allocation177_spill] sm:$0xff]  ;;  %1523 = vadd.xlane.f32.xlu0 %v11266_v32  ;;  %v11276_v32 = vld [vmem:[#allocation178_spill] sm:$0xff]  ;;  %v6868_v37 = vsel %vm659_vm0, %v1853_v17, 0.0 }
 0x289   :  { %3967 = vrcp.f32 %v11259_v51  ;;  %11260 = vst [vmem:[#allocation171_spill] sm:$0xff] %v6835_v41  ;;  %v1858_v41 = vmul.f32 %v11270_v44, %v11269_v12  ;;  %v1860_v27 = vmul.f32 %v11276_v32, %v11275_v34  ;;  %v6865_v18 = vsel %vm659_vm0, %v1852_v5, 0.0  ;;  %v6873_v12 = vpop.eup %3963  ;;  %v11282_v44 = vld [vmem:[#allocation30_spill] sm:$0xff]  ;;  %v11287_v5 = vld [vmem:[#allocation220_spill] sm:$0xff]  ;;  %v11288_v17 = vld [vmem:[#allocation181_spill] sm:$0xff] }
 0x28a   :  { %3969 = vlog2.f32 %v11211_v26  ;;  %11271 = vst [vmem:[#allocation194_spill] sm:$0xff] %v6850_v36  ;;  %v1862_v62 = vmul.f32 %v11288_v17, %v11287_v5  ;;  %v6888_v34 = vpop.eup %3965  ;;  %v6891_v32 = vsel %vm659_vm0, %v1857_v19, 0.0  ;;  %v6907_v5 = vsel %vm659_vm0, %v1861_v29, 0.0 }
 0x28b   :  { %11272 = vst [vmem:[#allocation156_spill] sm:$0xff] %v6853_v10  ;;  %3971 = vrcp.f32 %v11282_v44  ;;  %v1864_v19 = vmul.f32 %v11295_v20, %v6424_v28  ;;  %v2084_v22 = vmul.f32 %v6873_v12, %v11245_v40  ;;  %v2094_v29 = vand.u32 2147483648, %v11245_v40  ;;  %v11298_v20 = vld [vmem:[#allocation183_spill] sm:$0xff] }
 0x28c   :  { %11278 = vst [vmem:[#allocation193_spill] sm:$0xff] %v6862_v63  ;;  %3973 = vlog2.f32 %v11245_v40  ;;  %v6922_v28 = vsel %vm659_vm0, %v1862_v62, 0.0  ;;  %vm2118_vm10 = vweird.f32 %v11259_v51  ;;  %vm2089_vm12 = vweird.f32 %v6873_v12 }
 0x28d   :  { %11279 = vst [vmem:[#allocation158_spill] sm:$0xff] %v6865_v18  ;;  %3975 = vlog2.f32 %v11251_v6  ;;  %v6952_v63 = vor.u32 1.1754944e-38, %v2094_v29  ;;  %v11309_v29 = vld [vmem:[#allocation184_spill] sm:$0xff]  ;;  %vm2104_vm1 = vweird.f32 %v6888_v34  ;;  %vm7042_vm3 = vmor %vm2088_vm8, %vm2089_vm12  ;;  %vm2133_vm5 = vweird.f32 %v11282_v44 }
 0x28e   :  { %11280 = vst [vmem:[#allocation176_spill] sm:$0xff] %v6868_v37  ;;  %v11291_v37 = vld [vmem:[#allocation186_spill] sm:$0xff]  ;;  %3977 = vrcp.f32 %v11298_v20  ;;  %vm7059_vm4 = vmor %vm2103_vm9, %vm2104_vm1 }
 0x28f   :  { %11281 = vst [vmem:[#allocation159_spill] sm:$0xff] %v6871_v8  ;;  %v6894_v8 = vsel %vm659_vm0, %v1858_v41, 0.0  ;;  %v1863_v18 = vmul.f32 %v11291_v37, %v6430_v31  ;;  %v6898_v21 = vpop.eup %3967  ;;  %v11296_v41 = vld [vmem:[#allocation32_spill] sm:$0xff]  ;;  %v2077_v31 = vand.u32 2147483647, %v11211_v26  ;;  %v2079_v37 = vand.u32 2147483648, %v11211_v26 }
 0x290   :  { %11283 = vst [vmem:[#allocation10_spill] sm:$0xff] %v6876_v48  ;;  %v3970_v17 = vpop.eup %3969  ;;  %1529 = vadd.xlane.f32.xlu2 %v11296_v41  ;;  %v11299_v41 = vld [vmem:[#allocation15_spill] sm:$0xff]  ;;  %3979 = vlog2.f32 %v11259_v51  ;;  %vm2119_vm2 = vweird.f32 %v6898_v21 }
 0x291   :  { %11284 = vst [vmem:[#allocation82_spill] sm:$0xff] %v6878_v57  ;;  %1535 = vadd.xlane.f32.xlu1 %v11299_v41  ;;  %v1237_v62 = vmul.f32 0.6931472, %v3970_v17  ;;  %v6940_v41 = vsel %vm659_vm0, %v1864_v19, 0.0  ;;  %vm6943_vm7 = vcmp.eq.f32.partialorder %v2077_v31, 8.507059e+37  ;;  %v6950_v17 = vpop.xlane.xlu1 %1153  ;;  %v2109_v19 = vand.u32 2147483648, %v11251_v6  ;;  %vm7074_vm6 = vmor %vm2118_vm10, %vm2119_vm2 }
 0x292   :  { %11285 = vst [vmem:[#allocation199_spill] sm:$0xff] %v6881_v42  ;;  %v6935_v42 = vpop.xlane.xlu2 %1147  ;;  %3981 = vlog2.f32 %v11282_v44 }
 0x293   :  { %11286 = vst [vmem:[#allocation162_spill] sm:$0xff] %v6884_v25  ;;  %v6904_v25 = vsel %vm659_vm0, %v1860_v27, 0.0  ;;  %v2099_v27 = vmul.f32 %v6888_v34, %v11251_v6  ;;  %3983 = vrcp.f32 %v11309_v29 }
 0x294   :  { %11289 = vst [vmem:[#allocation47_spill] sm:$0xff] %v6891_v32  ;;  %v6933_v32 = vpop.eup %3971  ;;  %3985 = vlog2.f32 %v11298_v20 }
 0x295   :  { %11290 = vst [vmem:[#allocation62_spill] sm:$0xff] %v6894_v8  ;;  %v6931_v8 = vsel %vm659_vm0, %v1863_v18, 0.0  ;;  %v2080_v18 = vor.u32 1.1754944e-38, %v2079_v37  ;;  %v2100_v10 = vsub.f32 1.0, %v2099_v27  ;;  %v3974_v31 = vpop.eup %3973  ;;  %v2129_v35 = vmul.f32 %v6933_v32, %v11282_v44  ;;  %v11310_v27 = vld [vmem:[#allocation78_spill] sm:$0xff] }
 0x296   :  { %11292 = vst [vmem:[#allocation38_spill] sm:$0xff] %v6901_v15  ;;  %v2114_v15 = vmul.f32 %v6898_v21, %v11259_v51  ;;  %v6964_v56 = vadd.f32 %v1237_v62, %v11310_v27  ;;  %v1239_v27 = vmul.f32 0.6931472, %v3974_v31  ;;  %3987 = vlog2.f32 %v11309_v29 }
 0x297   :  { %11293 = vst [vmem:[#allocation66_spill] sm:$0xff] %v6904_v25  ;;  %v2071_v25 = vmul.f32 %v6815_v4, %v2070_v16  ;;  %v2130_v48 = vsub.f32 1.0, %v2129_v35  ;;  %v11347_v16 = vld [vmem:[#allocation84_spill] sm:$0xff]  ;;  %v2152_v35 = vand.u32 2147483647, %v11298_v20 }
 0x298   :  { %11294 = vst [vmem:[#allocation205_spill] sm:$0xff] %v6907_v5  ;;  %v11300_v5 = vld [vmem:[#allocation91_spill] sm:$0xff]  ;;  %1538 = vadd.xlane.f32.xlu2 %v11312_v14  ;;  %v2101_v14 = vmul.f32 %v6888_v34, %v2100_v10  ;;  %v11319_v10 = vld [vmem:[#allocation37_spill] sm:$0xff]  ;;  %v7023_v3 = vadd.f32 %v1239_v27, %v11328_v2 }
 0x299   :  { %11297 = vst [vmem:[#allocation6_spill] sm:$0xff] %v6922_v28  ;;  %1532 = vadd.xlane.f32.xlu0 %v11300_v5  ;;  %v2085_v5 = vsub.f32 1.0, %v2084_v22  ;;  %v6948_v28 = vpop.xlane.xlu0 %1150  ;;  %v2072_v37 = vadd.f32 %v6815_v4, %v2071_v25  ;;  %v2115_v22 = vsub.f32 1.0, %v2114_v15  ;;  %v2122_v15 = vand.u32 2147483647, %v11259_v51  ;;  %v7020_v1 = vpop.xlane.xlu1 %1162 }
 0x29a   :  { %11301 = vst [vmem:[#allocation204_spill] sm:$0xff] %v6931_v8  ;;  %v2092_v8 = vand.u32 2147483647, %v11245_v40  ;;  %3989 = vrcp.f32 %v11319_v10  ;;  %vm2178_vm2 = vweird.f32 %v11319_v10 }
 0x29b   :  { %11302 = vst [vmem:[#allocation73_spill] sm:$0xff] %v6935_v42  ;;  %v2086_v25 = vmul.f32 %v6873_v12, %v2085_v5  ;;  %v6986_v5 = vor.u32 1.1754944e-38, %v2109_v19  ;;  %v11315_v42 = vld [vmem:[#allocation16_spill] sm:$0xff]  ;;  %v2076_v26 = vsel %vm6980_vm11, %v6815_v4, %v2072_v37  ;;  %v2116_v57 = vmul.f32 %v6898_v21, %v2115_v22  ;;  %v7000_v19 = vpop.xlane.xlu2 %1156 }
 0x29c   :  { %11303 = vst [vmem:[#allocation88_spill] sm:$0xff] %v6940_v41  ;;  %v11308_v41 = vld [vmem:[#allocation192_spill] sm:$0xff]  ;;  %1544 = vadd.xlane.f32.xlu1 %v11315_v42  ;;  %vm6994_vm13 = vcmp.eq.f32.partialorder %v2092_v8, 8.507059e+37  ;;  %vm7012_vm15 = vcmp.eq.f32.partialorder %v2122_v15, 8.507059e+37  ;;  %3991 = vlog2.f32 %v11319_v10  ;;  %vm2148_vm11 = vweird.f32 %v11298_v20 }
 0x29d   :  { %11306 = vst [vmem:[#allocation187_spill] sm:$0xff] %v6948_v28  ;;  %v1865_v58 = vmul.f32 %v11308_v41, %v6381_v52  ;;  %v2107_v52 = vand.u32 2147483647, %v11251_v6  ;;  %v2124_v28 = vand.u32 2147483648, %v11259_v51  ;;  %v2087_v22 = vadd.f32 %v6873_v12, %v2086_v25 }
 0x29e   :  { %11307 = vst [vmem:[#allocation9_spill] sm:$0xff] %v6950_v17  ;;  %v3976_v17 = vpop.eup %3975  ;;  %v2102_v25 = vadd.f32 %v6888_v34, %v2101_v14 }
 0x29f   :  { %11311 = vst [vmem:[#allocation206_spill] sm:$0xff] %v6964_v56  ;;  %v6968_v41 = vpop.eup %3977  ;;  %v1241_v42 = vmul.f32 0.6931472, %v3976_v17  ;;  %vm7002_vm14 = vcmp.eq.f32.partialorder %v2107_v52, 8.507059e+37  ;;  %v7009_v4 = vsel %vm659_vm0, %v1865_v58, 0.0  ;;  %v7027_v58 = vsel %vm6943_vm7, %v2080_v18, %v2076_v26  ;;  %v11335_v26 = vld [vmem:[#allocation94_spill] sm:$0xff] }
 0x2a0   :  { %v3980_v62 = vpop.eup %3979  ;;  %11320 = vst [vmem:[#allocation163_spill] sm:$0xff] %v7000_v19  ;;  %v2144_v56 = vmul.f32 %v6968_v41, %v11298_v20  ;;  %v2125_v19 = vor.u32 1.1754944e-38, %v2124_v28  ;;  %v2117_v28 = vadd.f32 %v6898_v21, %v2116_v57  ;;  %v2137_v18 = vand.u32 2147483647, %v11282_v44  ;;  %1547 = vadd.xlane.f32.xlu2 %v11335_v26 }
 0x2a1   :  { %1541 = vadd.xlane.f32.xlu0 %v11316_v33  ;;  %11323 = vst [vmem:[#allocation28_spill] sm:$0xff] %v7009_v4  ;;  %v3982_v8 = vpop.eup %3981  ;;  %v1243_v37 = vmul.f32 0.6931472, %v3980_v62  ;;  %v7018_v52 = vpop.xlane.xlu0 %1159  ;;  %v2131_v62 = vmul.f32 %v6933_v32, %v2130_v48  ;;  %v11331_v4 = vld [vmem:[#allocation83_spill] sm:$0xff]  ;;  %vm2134_vm7 = vweird.f32 %v6933_v32  ;;  %vm2149_vm10 = vweird.f32 %v6968_v41 }
 0x2a2   :  { %v7016_v17 = vpop.eup %3983  ;;  %11326 = vst [vmem:[#allocation22_spill] sm:$0xff] %v7018_v52  ;;  %v7036_v2 = vadd.f32 %v1241_v42, %v11331_v4  ;;  %v1245_v27 = vmul.f32 0.6931472, %v3982_v8  ;;  %v2145_v14 = vsub.f32 1.0, %v2144_v56  ;;  %v11338_v42 = vld [vmem:[#allocation195_spill] sm:$0xff]  ;;  %v2091_v4 = vsel %vm7042_vm3, %v6873_v12, %v2087_v22  ;;  %v11343_v22 = vld [vmem:[#allocation29_spill] sm:$0xff]  ;;  %vm7127_vm9 = vmor %vm2133_vm5, %vm2134_vm7 }
 0x2a3   :  { %11327 = vst [vmem:[#allocation207_spill] sm:$0xff] %v7020_v1  ;;  %v3986_v15 = vpop.eup %3985  ;;  %3993 = vlog2.f32 %v11338_v42  ;;  %v2159_v12 = vmul.f32 %v7016_v17, %v11309_v29  ;;  %v7088_v51 = vpop.xlane.xlu2 %1165  ;;  %v7096_v40 = vsel %vm6994_vm13, %v6952_v63, %v2091_v4  ;;  %vm7098_vm8 = vcmp.eq.f32.partialorder %v2137_v18, 8.507059e+37  ;;  %v11355_v4 = vld [vmem:[#allocation87_spill] sm:$0xff]  ;;  %vm7156_vm12 = vmor %vm2148_vm11, %vm2149_vm10  ;;  %v11419_v1 = vld [vmem:[#allocation101_spill] sm:$0xff] }
 0x2a4   :  { %11329 = vst [vmem:[#allocation76_spill] sm:$0xff] %v7023_v3  ;;  %v3988_v57 = vpop.eup %3987  ;;  %3995 = vrcp.f32 %v11338_v42  ;;  %v1247_v8 = vmul.f32 0.6931472, %v3986_v15  ;;  %1553 = vadd.xlane.f32.xlu1 %v11343_v22  ;;  %v11345_v15 = vld [vmem:[#allocation196_spill] sm:$0xff]  ;;  %v7091_v26 = vadd.f32 %v1245_v27, %v11347_v16  ;;  %v2139_v27 = vand.u32 2147483648, %v11282_v44  ;;  %v7114_v18 = vpop.xlane.xlu1 %1171  ;;  %v11374_v22 = vld [vmem:[#allocation90_spill] sm:$0xff] }
 0x2a5   :  { %11330 = vst [vmem:[#allocation44_spill] sm:$0xff] %v7027_v58  ;;  %v11336_v58 = vld [vmem:[#allocation81_spill] sm:$0xff]  ;;  %v7064_v56 = vpop.eup %3989  ;;  %3997 = vlog2.f32 %v11345_v15  ;;  %v2160_v33 = vsub.f32 1.0, %v2159_v12  ;;  %vm7160_vm13 = vcmp.eq.f32.partialorder %v2152_v35, 8.507059e+37  ;;  %vm2193_vm7 = vweird.f32 %v11338_v42 }
 0x2a6   :  { %11332 = vst [vmem:[#allocation26_spill] sm:$0xff] %v7036_v2  ;;  %v7049_v48 = vadd.f32 %v1243_v37, %v11336_v58  ;;  %v2106_v37 = vsel %vm7059_vm4, %v6888_v34, %v2102_v25  ;;  %v11344_v58 = vld [vmem:[#allocation41_spill] sm:$0xff]  ;;  %v2121_v34 = vsel %vm7074_vm6, %v6898_v21, %v2117_v28  ;;  %v2132_v25 = vadd.f32 %v6933_v32, %v2131_v62  ;;  %v3992_v28 = vpop.eup %3991  ;;  %v11384_v2 = vld [vmem:[#allocation190_spill] sm:$0xff] }
 0x2a7   :  { %11346 = vst [vmem:[#allocation167_spill] sm:$0xff] %v7088_v51  ;;  %v2146_v21 = vmul.f32 %v6968_v41, %v2145_v14  ;;  %v1249_v62 = vmul.f32 0.6931472, %v3988_v57  ;;  %v7106_v6 = vsel %vm7002_vm14, %v6986_v5, %v2106_v37  ;;  %v2174_v31 = vmul.f32 %v7064_v56, %v11319_v10 }
 0x2a8   :  { %11337 = vst [vmem:[#allocation213_spill] sm:$0xff] %v7049_v48  ;;  %3999 = vrcp.f32 %v11345_v15  ;;  %v7117_v14 = vadd.f32 %v1247_v8, %v11355_v4  ;;  %v7121_v57 = vsel %vm7012_vm15, %v2125_v19, %v2121_v34  ;;  %v2136_v8 = vsel %vm7127_vm9, %v6933_v32, %v2132_v25  ;;  %v11361_v4 = vld [vmem:[#allocation185_spill] sm:$0xff]  ;;  %v11364_v32 = vld [vmem:[#allocation50_spill] sm:$0xff] }
 0x2a9   :  { %1550 = vadd.xlane.f32.xlu0 %v11344_v58  ;;  %11348 = vst [vmem:[#allocation177_spill] sm:$0xff] %v7091_v26  ;;  %v7112_v63 = vpop.xlane.xlu0 %1168  ;;  %v3994_v37 = vpop.eup %3993  ;;  %v11360_v58 = vld [vmem:[#allocation43_spill] sm:$0xff]  ;;  %v2154_v19 = vand.u32 2147483648, %v11298_v20  ;;  %v1251_v44 = vmul.f32 0.6931472, %v3992_v28  ;;  %v2147_v16 = vadd.f32 %v6968_v41, %v2146_v21  ;;  %1556 = vadd.xlane.f32.xlu2 %v11361_v4  ;;  %v2140_v25 = vor.u32 1.1754944e-38, %v2139_v27 }
 0x2aa   :  { %11349 = vst [vmem:[#allocation221_spill] sm:$0xff] %v7096_v40  ;;  %4001 = vlog2.f32 %v11360_v58  ;;  %v7137_v34 = vpop.eup %3995  ;;  %v2175_v5 = vsub.f32 1.0, %v2174_v31  ;;  %v1253_v40 = vmul.f32 0.6931472, %v3994_v37  ;;  %v11365_v26 = vld [vmem:[#allocation46_spill] sm:$0xff]  ;;  %v2161_v28 = vmul.f32 %v7016_v17, %v2160_v33  ;;  %v11366_v21 = vld [vmem:[#allocation172_spill] sm:$0xff] }
 0x2ab   :  { %11352 = vst [vmem:[#allocation85_spill] sm:$0xff] %v7106_v6  ;;  %4003 = vrcp.f32 %v11360_v58  ;;  %v3998_v12 = vpop.eup %3997  ;;  %v7154_v4 = vsel %vm7098_vm8, %v2140_v25, %v2136_v8  ;;  %v2155_v31 = vor.u32 1.1754944e-38, %v2154_v19  ;;  %v2189_v20 = vmul.f32 %v7137_v34, %v11338_v42  ;;  %v11401_v27 = vld [vmem:[#allocation98_spill] sm:$0xff] }
 0x2ac   :  { %11353 = vst [vmem:[#allocation201_spill] sm:$0xff] %v7112_v63  ;;  %4005 = vlog2.f32 %v11364_v32  ;;  %1562 = vadd.xlane.f32.xlu1 %v11366_v21  ;;  %v7172_v33 = vadd.f32 %v1251_v44, %v11374_v22  ;;  %v1255_v37 = vmul.f32 0.6931472, %v3998_v12  ;;  %v2151_v8 = vsel %vm7156_vm12, %v6968_v41, %v2147_v16  ;;  %v7185_v44 = vpop.xlane.xlu1 %1180  ;;  %v11378_v12 = vld [vmem:[#allocation93_spill] sm:$0xff] }
 0x2ad   :  { %11354 = vst [vmem:[#allocation169_spill] sm:$0xff] %v7114_v18  ;;  %4007 = vlog2.f32 %v11365_v26  ;;  %vm2163_vm14 = vweird.f32 %v11309_v29  ;;  %vm2164_vm15 = vweird.f32 %v7016_v17  ;;  %v2176_v19 = vmul.f32 %v7064_v56, %v2175_v5 }
 0x2ae   :  { %11356 = vst [vmem:[#allocation71_spill] sm:$0xff] %v7117_v14  ;;  %v11367_v14 = vld [vmem:[#allocation36_spill] sm:$0xff]  ;;  %4009 = vrcp.f32 %v11364_v32  ;;  %v7188_v22 = vadd.f32 %v1253_v40, %v11378_v12  ;;  %v2162_v41 = vadd.f32 %v7016_v17, %v2161_v28  ;;  %v2167_v16 = vand.u32 2147483647, %v11309_v29  ;;  %v11382_v40 = vld [vmem:[#allocation95_spill] sm:$0xff]  ;;  %vm7211_vm1 = vmor %vm2163_vm14, %vm2164_vm15 }
 0x2af   :  { %11357 = vst [vmem:[#allocation21_spill] sm:$0xff] %v7121_v57  ;;  %v11362_v57 = vld [vmem:[#allocation89_spill] sm:$0xff]  ;;  %4011 = vrcp.f32 %v11365_v26  ;;  %v7196_v5 = vsel %vm7160_vm13, %v2155_v31, %v2151_v8  ;;  %v7201_v12 = vadd.f32 %v1255_v37, %v11382_v40  ;;  %v2177_v31 = vadd.f32 %v7064_v56, %v2176_v19 }
 0x2b0   :  { %v7144_v6 = vadd.f32 %v1249_v62, %v11362_v57  ;;  %11368 = vst [vmem:[#allocation173_spill] sm:$0xff] %v7154_v4  ;;  %v7166_v57 = vpop.eup %3999  ;;  %v2169_v62 = vand.u32 2147483648, %v11309_v29  ;;  %vm2179_vm3 = vweird.f32 %v7064_v56  ;;  %v2184_v29 = vand.u32 2147483648, %v11319_v10  ;;  %v11388_v40 = vld [vmem:[#allocation25_spill] sm:$0xff] }
 0x2b1   :  { %1559 = vadd.xlane.f32.xlu0 %v11367_v14  ;;  %v7169_v14 = vpop.xlane.xlu2 %1174  ;;  %11375 = vst [vmem:[#allocation35_spill] sm:$0xff] %v7172_v33  ;;  %v4002_v35 = vpop.eup %4001  ;;  %v11380_v33 = vld [vmem:[#allocation53_spill] sm:$0xff]  ;;  %v2204_v48 = vmul.f32 %v7166_v57, %v11345_v15  ;;  %1565 = vadd.xlane.f32.xlu2 %v11384_v2  ;;  %v2166_v2 = vsel %vm7211_vm1, %v7016_v17, %v2162_v41  ;;  %v11392_v17 = vld [vmem:[#allocation96_spill] sm:$0xff]  ;;  %vm2168_vm4 = vcmp.eq.f32.partialorder %v2167_v16, 8.507059e+37  ;;  %vm7240_vm5 = vmor %vm2178_vm2, %vm2179_vm3  ;;  %vm2194_vm8 = vweird.f32 %v7137_v34 }
 0x2b2   :  { %11363 = vst [vmem:[#allocation56_spill] sm:$0xff] %v7144_v6  ;;  %v7181_v25 = vpop.eup %4003  ;;  %v7183_v21 = vpop.xlane.xlu0 %1177  ;;  %4013 = vrcp.f32 %v11380_v33  ;;  %v2190_v6 = vsub.f32 1.0, %v2189_v20  ;;  %v1257_v28 = vmul.f32 0.6931472, %v4002_v35  ;;  %v2170_v8 = vor.u32 1.1754944e-38, %v2169_v62  ;;  %vm7291_vm9 = vmor %vm2193_vm7, %vm2194_vm8 }
 0x2b3   :  { %11373 = vst [vmem:[#allocation51_spill] sm:$0xff] %v7169_v14  ;;  %v4006_v4 = vpop.eup %4005  ;;  %4015 = vlog2.f32 %v11380_v33  ;;  %v2205_v14 = vsub.f32 1.0, %v2204_v48  ;;  %v2181_v16 = vsel %vm7240_vm5, %v7064_v56, %v2177_v31  ;;  %v11405_v56 = vld [vmem:[#allocation59_spill] sm:$0xff]  ;;  %vm2208_vm10 = vweird.f32 %v11345_v15 }
 0x2b4   :  { %11376 = vst [vmem:[#allocation209_spill] sm:$0xff] %v7183_v21  ;;  %v4008_v3 = vpop.eup %4007  ;;  %v1259_v37 = vmul.f32 0.6931472, %v4006_v4  ;;  %1571 = vadd.xlane.f32.xlu1 %v11388_v40  ;;  %v2191_v21 = vmul.f32 %v7137_v34, %v2190_v6  ;;  %v7234_v41 = vadd.f32 %v1257_v28, %v11392_v17  ;;  %v7251_v6 = vsel %vm2168_vm4, %v2170_v8, %v2166_v2  ;;  %v11403_v8 = vld [vmem:[#allocation99_spill] sm:$0xff] }
 0x2b5   :  { %11377 = vst [vmem:[#allocation175_spill] sm:$0xff] %v7185_v44  ;;  %v11385_v44 = vld [vmem:[#allocation214_spill] sm:$0xff]  ;;  %v7218_v20 = vpop.eup %4009  ;;  %v1261_v19 = vmul.f32 0.6931472, %v4008_v3  ;;  %v2185_v17 = vor.u32 1.1754944e-38, %v2184_v29  ;;  %v11409_v3 = vld [vmem:[#allocation225_spill] sm:$0xff]  ;;  %vm2209_vm11 = vweird.f32 %v7166_v57  ;;  %vm2223_vm15 = vweird.f32 %v11360_v58 }
 0x2b6   :  { %11379 = vst [vmem:[#allocation223_spill] sm:$0xff] %v7188_v22  ;;  %v2182_v22 = vand.u32 2147483647, %v11319_v10  ;;  %4017 = vlog2.f32 %v11385_v44  ;;  %v7224_v35 = vpop.eup %4011  ;;  %v2219_v10 = vmul.f32 %v7181_v25, %v11360_v58  ;;  %v7263_v40 = vadd.f32 %v1259_v37, %v11401_v27  ;;  %vm7330_vm13 = vmor %vm2208_vm10, %vm2209_vm11 }
 0x2b7   :  { %11381 = vst [vmem:[#allocation178_spill] sm:$0xff] %v7196_v5  ;;  %v11389_v5 = vld [vmem:[#allocation191_spill] sm:$0xff]  ;;  %v7268_v62 = vadd.f32 %v1261_v19, %v11403_v8  ;;  %v2192_v31 = vadd.f32 %v7137_v34, %v2191_v21  ;;  %v2197_v29 = vand.u32 2147483647, %v11338_v42  ;;  %v2199_v27 = vand.u32 2147483648, %v11338_v42  ;;  %v11408_v8 = vld [vmem:[#allocation224_spill] sm:$0xff] }
 0x2b8   :  { %11383 = vst [vmem:[#allocation31_spill] sm:$0xff] %v7201_v12  ;;  %v11390_v12 = vld [vmem:[#allocation215_spill] sm:$0xff]  ;;  %vm7244_vm6 = vcmp.eq.f32.partialorder %v2182_v22, 8.507059e+37  ;;  %v7248_v48 = vpop.eup %4013  ;;  %v7260_v22 = vpop.xlane.xlu1 %1189  ;;  %vm2224_vm1 = vweird.f32 %v7181_v25  ;;  %vm2238_vm4 = vweird.f32 %v11364_v32  ;;  %vm2239_vm5 = vweird.f32 %v7218_v20 }
 0x2b9   :  { %1568 = vadd.xlane.f32.xlu0 %v11389_v5  ;;  %4019 = vlog2.f32 %v11390_v12  ;;  %v7231_v4 = vpop.xlane.xlu2 %1183  ;;  %11393 = vst [vmem:[#allocation220_spill] sm:$0xff] %v7234_v41  ;;  %v4016_v5 = vpop.eup %4015  ;;  %v7276_v37 = vsel %vm7244_vm6, %v2185_v17, %v2181_v16  ;;  %v11413_v17 = vld [vmem:[#allocation39_spill] sm:$0xff]  ;;  %vm2198_vm12 = vcmp.eq.f32.partialorder %v2197_v29, 8.507059e+37  ;;  %v2200_v18 = vor.u32 1.1754944e-38, %v2199_v27  ;;  %vm7383_vm3 = vmor %vm2223_vm15, %vm2224_vm1 }
 0x2ba   :  { %4021 = vrcp.f32 %v11385_v44  ;;  %11391 = vst [vmem:[#allocation30_spill] sm:$0xff] %v7231_v4  ;;  %v7258_v28 = vpop.xlane.xlu0 %1186  ;;  %v1263_v19 = vmul.f32 0.6931472, %v4016_v5  ;;  %v2249_v27 = vmul.f32 %v7224_v35, %v11365_v26  ;;  %vm7421_vm6 = vmor %vm2238_vm4, %vm2239_vm5  ;;  %vm2254_vm8 = vweird.f32 %v7224_v35 }
 0x2bb   :  { %4023 = vrcp.f32 %v11390_v12  ;;  %11398 = vst [vmem:[#allocation181_spill] sm:$0xff] %v7251_v6  ;;  %v2206_v6 = vmul.f32 %v7166_v57, %v2205_v14  ;;  %v2234_v14 = vmul.f32 %v7218_v20, %v11364_v32  ;;  %vm2283_vm1 = vweird.f32 %v11385_v44 }
 0x2bc   :  { %11399 = vst [vmem:[#allocation186_spill] sm:$0xff] %v7258_v28  ;;  %v4018_v2 = vpop.eup %4017  ;;  %4025 = vlog2.f32 %v11405_v56  ;;  %vm2298_vm5 = vweird.f32 %v11390_v12 }
 0x2bd   :  { %11400 = vst [vmem:[#allocation189_spill] sm:$0xff] %v7260_v22  ;;  %4027 = vrcp.f32 %v11405_v56  ;;  %v1265_v22 = vmul.f32 0.6931472, %v4018_v2  ;;  %v2196_v2 = vsel %vm7291_vm9, %v7137_v34, %v2192_v31  ;;  %v2207_v42 = vadd.f32 %v7166_v57, %v2206_v6 }
 0x2be   :  { %11402 = vst [vmem:[#allocation32_spill] sm:$0xff] %v7263_v40  ;;  %v11407_v40 = vld [vmem:[#allocation40_spill] sm:$0xff]  ;;  %4029 = vlog2.f32 %v11408_v8  ;;  %v2235_v6 = vsub.f32 1.0, %v2234_v14  ;;  %v11426_v14 = vld [vmem:[#allocation102_spill] sm:$0xff]  ;;  %vm2253_vm9 = vweird.f32 %v11365_v26 }
 0x2bf   :  { %11404 = vst [vmem:[#allocation183_spill] sm:$0xff] %v7268_v62  ;;  %v4020_v41 = vpop.eup %4019  ;;  %1574 = vadd.xlane.f32.xlu2 %v11407_v40  ;;  %v2220_v62 = vsub.f32 1.0, %v2219_v10  ;;  %4031 = vlog2.f32 %v11409_v3  ;;  %v2212_v10 = vand.u32 2147483647, %v11345_v15  ;;  %v11412_v40 = vld [vmem:[#allocation97_spill] sm:$0xff]  ;;  %vm7460_vm10 = vmor %vm2253_vm9, %vm2254_vm8 }
 0x2c0   :  { %11406 = vst [vmem:[#allocation15_spill] sm:$0xff] %v7276_v37  ;;  %v7284_v21 = vpop.eup %4021  ;;  %1580 = vadd.xlane.f32.xlu1 %v11412_v40  ;;  %v2214_v37 = vand.u32 2147483648, %v11345_v15  ;;  %4033 = vrcp.f32 %v11408_v8  ;;  %v1267_v4 = vmul.f32 0.6931472, %v4020_v41  ;;  %v7319_v51 = vpop.xlane.xlu1 %1198  ;;  %v7324_v41 = vsel %vm2198_vm12, %v2200_v18, %v2196_v2 }
 0x2c1   :  { %v7297_v5 = vpop.eup %4023  ;;  %1577 = vadd.xlane.f32.xlu0 %v11413_v17  ;;  %v7308_v28 = vpop.xlane.xlu2 %1192  ;;  %4035 = vrcp.f32 %v11409_v3  ;;  %v11415_v17 = vld [vmem:[#allocation100_spill] sm:$0xff]  ;;  %v2221_v34 = vmul.f32 %v7181_v25, %v2220_v62  ;;  %11418 = vst [vmem:[#allocation78_spill] sm:$0xff] %v7319_v51  ;;  %vm7334_vm14 = vcmp.eq.f32.partialorder %v2212_v10, 8.507059e+37  ;;  %v2227_v15 = vand.u32 2147483647, %v11360_v58 }
 0x2c2   :  { %11414 = vst [vmem:[#allocation91_spill] sm:$0xff] %v7308_v28  ;;  %v4026_v40 = vpop.eup %4025  ;;  %v7312_v63 = vadd.f32 %v1263_v19, %v11415_v17  ;;  %v7317_v16 = vpop.xlane.xlu0 %1195  ;;  %v7322_v28 = vadd.f32 %v1265_v22, %v11419_v1  ;;  %4037 = vlog2.f32 %v6503_v50  ;;  %v2211_v1 = vsel %vm7330_vm13, %v7166_v57, %v2207_v42 }
 0x2c3   :  { %v7315_v31 = vpop.eup %4027  ;;  %11417 = vst [vmem:[#allocation184_spill] sm:$0xff] %v7317_v16  ;;  %v2215_v18 = vor.u32 1.1754944e-38, %v2214_v37  ;;  %v7346_v2 = vadd.f32 %v1267_v4, %v11426_v14  ;;  %v1269_v10 = vmul.f32 0.6931472, %v4026_v40  ;;  %v2229_v17 = vand.u32 2147483648, %v11360_v58 }
 0x2c4   :  { %11416 = vst [vmem:[#allocation192_spill] sm:$0xff] %v7312_v63  ;;  %v4030_v19 = vpop.eup %4029  ;;  %4039 = vlog2.f32 %v6525_v23  ;;  %v2222_v63 = vadd.f32 %v7181_v25, %v2221_v34  ;;  %v2236_v57 = vmul.f32 %v7218_v20, %v2235_v6  ;;  %v2250_v40 = vsub.f32 1.0, %v2249_v27  ;;  %v11434_v27 = vld [vmem:[#allocation103_spill] sm:$0xff] }
 0x2c5   :  { %11420 = vst [vmem:[#allocation27_spill] sm:$0xff] %v7322_v28  ;;  %v4032_v22 = vpop.eup %4031  ;;  %4041 = vrcp.f32 %v6503_v50  ;;  %v1271_v4 = vmul.f32 0.6931472, %v4030_v19  ;;  %v7360_v42 = vsel %vm7334_vm14, %v2215_v18, %v2211_v1  ;;  %vm7367_vm2 = vcmp.eq.f32.partialorder %v2227_v15, 8.507059e+37 }
 0x2c6   :  { %11421 = vst [vmem:[#allocation16_spill] sm:$0xff] %v7324_v41  ;;  %v11428_v41 = vld [vmem:[#allocation45_spill] sm:$0xff]  ;;  %v7355_v37 = vpop.eup %4033  ;;  %v1273_v34 = vmul.f32 0.6931472, %v4032_v22  ;;  %4043 = vlog2.f32 %v6527_v7  ;;  %v2264_v19 = vmul.f32 %v7248_v48, %v11380_v33  ;;  %v7377_v1 = vadd.f32 %v1269_v10, %v11434_v27 }
 0x2c7   :  { %11427 = vst [vmem:[#allocation174_spill] sm:$0xff] %v7346_v2  ;;  %1583 = vadd.xlane.f32.xlu2 %v11428_v41  ;;  %v7362_v29 = vpop.eup %4035  ;;  %v11430_v41 = vld [vmem:[#allocation48_spill] sm:$0xff]  ;;  %4045 = vrcp.f32 %v6525_v23  ;;  %v2230_v18 = vor.u32 1.1754944e-38, %v2229_v17  ;;  %v2242_v15 = vand.u32 2147483647, %v11364_v32  ;;  %v2226_v14 = vsel %vm7383_vm3, %v7181_v25, %v2222_v63  ;;  %v11442_v25 = vld [vmem:[#allocation105_spill] sm:$0xff] }
 0x2c8   :  { %11429 = vst [vmem:[#allocation37_spill] sm:$0xff] %v7360_v42  ;;  %1877 = vadd.xlane.f32.xlu1 %v6576_v61  ;;  %v4038_v22 = vpop.eup %4037  ;;  %4047 = vrcp.f32 %v6527_v7  ;;  %v7397_v10 = vpop.xlane.xlu1 %1207  ;;  %v11440_v17 = vld [vmem:[#allocation104_spill] sm:$0xff]  ;;  %v2244_v42 = vand.u32 2147483648, %v11364_v32  ;;  %v2251_v61 = vmul.f32 %v7224_v35, %v2250_v40  ;;  %v2279_v2 = vmul.f32 %v7284_v21, %v11385_v44 }
 0x2c9   :  { %1586 = vadd.xlane.f32.xlu0 %v11430_v41  ;;  %v7374_v62 = vpop.xlane.xlu2 %1201  ;;  %11435 = vst [vmem:[#allocation83_spill] sm:$0xff] %v7377_v1  ;;  %v2237_v41 = vadd.f32 %v7218_v20, %v2236_v57  ;;  %v7400_v27 = vadd.f32 %v1271_v4, %v11440_v17  ;;  %v7405_v57 = vadd.f32 %v1273_v34, %v11442_v25  ;;  %4049 = vlog2.f32 %v6585_v0 }
 0x2ca   :  { %11433 = vst [vmem:[#allocation75_spill] sm:$0xff] %v7374_v62  ;;  %v7395_v58 = vpop.xlane.xlu0 %1204  ;;  %v4040_v63 = vpop.eup %4039  ;;  %v2265_v1 = vsub.f32 1.0, %v2264_v19  ;;  %4051 = vlog2.f32 %v6610_v45  ;;  %v7415_v4 = vsel %vm7367_vm2, %v2230_v18, %v2226_v14  ;;  %vm7425_vm7 = vcmp.eq.f32.partialorder %v2242_v15, 8.507059e+37 }
 0x2cb   :  { %11438 = vst [vmem:[#allocation94_spill] sm:$0xff] %v7395_v58  ;;  %v7410_v28 = vpop.eup %4041  ;;  %4053 = vlog2.f32 %v6612_v9  ;;  %v2241_v6 = vsel %vm7421_vm6, %v7218_v20, %v2237_v41  ;;  %v2257_v18 = vand.u32 2147483647, %v11365_v26  ;;  %v2259_v32 = vand.u32 2147483648, %v11365_v26 }
 0x2cc   :  { %11439 = vst [vmem:[#allocation81_spill] sm:$0xff] %v7397_v10  ;;  %v1275_v10 = vmul.f32 0.6931472, %v4038_v22  ;;  %v4044_v19 = vpop.eup %4043  ;;  %v1277_v14 = vmul.f32 0.6931472, %v4040_v63  ;;  %v2245_v15 = vor.u32 1.1754944e-38, %v2244_v42  ;;  %v2252_v17 = vadd.f32 %v7224_v35, %v2251_v61 }
 0x2cd   :  { %11441 = vst [vmem:[#allocation195_spill] sm:$0xff] %v7400_v27  ;;  %v7436_v22 = vpop.eup %4045  ;;  %4055 = vrcp.f32 %v6585_v0  ;;  %v2280_v20 = vsub.f32 1.0, %v2279_v2  ;;  %v11450_v61 = vld [vmem:[#allocation106_spill] sm:$0xff]  ;;  %v1279_v25 = vmul.f32 0.6931472, %v4044_v19  ;;  %vm7464_vm11 = vcmp.eq.f32.partialorder %v2257_v18, 8.507059e+37 }
 0x2ce   :  { %11443 = vst [vmem:[#allocation29_spill] sm:$0xff] %v7405_v57  ;;  %v7445_v41 = vpop.eup %4047  ;;  %4057 = vrcp.f32 %v6610_v45  ;;  %v7451_v63 = vadd.f32 %v1275_v10, %v11450_v61  ;;  %v2294_v10 = vmul.f32 %v7297_v5, %v11390_v12  ;;  %v2256_v61 = vsel %vm7460_vm10, %v7224_v35, %v2252_v17  ;;  %v11497_v27 = vld [vmem:[#allocation18_spill] sm:$0xff] }
 0x2cf   :  { %11444 = vst [vmem:[#allocation41_spill] sm:$0xff] %v7415_v4  ;;  %1880 = vadd.xlane.f32.xlu2 %v6579_v53  ;;  %v2266_v53 = vmul.f32 %v7248_v48, %v2265_v1  ;;  %4059 = vrcp.f32 %v6612_v9  ;;  %v2260_v1 = vor.u32 1.1754944e-38, %v2259_v32  ;;  %vm2268_vm12 = vweird.f32 %v11380_v33 }
 0x2d0   :  { %1886 = vadd.xlane.f32.xlu1 %v6591_v11  ;;  %11451 = vst [vmem:[#allocation84_spill] sm:$0xff] %v7451_v63  ;;  %v4050_v11 = vpop.eup %4049  ;;  %v7472_v19 = vpop.xlane.xlu1 %1216  ;;  %vm2269_vm13 = vweird.f32 %v7248_v48  ;;  %4061 = vrcp.f32 %v6676_v59  ;;  %v2309_v4 = vmul.f32 %v7315_v31, %v11405_v56  ;;  %v2272_v35 = vand.u32 2147483647, %v11380_v33 }
 0x2d1   :  { %1883 = vadd.xlane.f32.xlu0 %v6588_v46  ;;  %v7448_v42 = vpop.xlane.xlu2 %1210  ;;  %v7455_v46 = vsel %vm7425_vm7, %v2245_v15, %v2241_v6  ;;  %v4052_v40 = vpop.eup %4051  ;;  %11458 = vst [vmem:[#allocation185_spill] sm:$0xff] %v7472_v19  ;;  %v11459_v6 = vld [vmem:[#allocation107_spill] sm:$0xff]  ;;  %v2267_v32 = vadd.f32 %v7248_v48, %v2266_v53  ;;  %4063 = vlog2.f32 %v6676_v59  ;;  %v2274_v17 = vand.u32 2147483648, %v11380_v33  ;;  %vm7507_vm14 = vmor %vm2268_vm12, %vm2269_vm13 }
 0x2d2   :  { %11449 = vst [vmem:[#allocation196_spill] sm:$0xff] %v7448_v42  ;;  %v7470_v34 = vpop.xlane.xlu0 %1213  ;;  %v7475_v15 = vadd.f32 %v1277_v14, %v11459_v6  ;;  %v4054_v18 = vpop.eup %4053  ;;  %v11461_v14 = vld [vmem:[#allocation108_spill] sm:$0xff]  ;;  %v1281_v63 = vmul.f32 0.6931472, %v4050_v11  ;;  %4065 = vlog2.f32 %v6701_v24  ;;  %v7499_v53 = vsel %vm7464_vm11, %v2260_v1, %v2256_v61 }
 0x2d3   :  { %11452 = vst [vmem:[#allocation87_spill] sm:$0xff] %v7455_v46  ;;  %v2281_v46 = vmul.f32 %v7284_v21, %v2280_v20  ;;  %v7488_v6 = vadd.f32 %v1279_v25, %v11461_v14  ;;  %v7493_v26 = vpop.eup %4055  ;;  %v2295_v20 = vsub.f32 1.0, %v2294_v10  ;;  %v1283_v14 = vmul.f32 0.6931472, %v4052_v40 }
 0x2d4   :  { %11457 = vst [vmem:[#allocation43_spill] sm:$0xff] %v7470_v34  ;;  %v7501_v25 = vpop.eup %4057  ;;  %vm2284_vm15 = vweird.f32 %v7284_v21  ;;  %4067 = vlog2.f32 %v6703_v13  ;;  %v2271_v33 = vsel %vm7507_vm14, %v7248_v48, %v2267_v32  ;;  %v2310_v1 = vsub.f32 1.0, %v2309_v4  ;;  %v11471_v32 = vld [vmem:[#allocation110_spill] sm:$0xff] }
 0x2d5   :  { %11460 = vst [vmem:[#allocation89_spill] sm:$0xff] %v7475_v15  ;;  %v7513_v11 = vpop.eup %4059  ;;  %v2282_v2 = vadd.f32 %v7284_v21, %v2281_v46  ;;  %4069 = vrcp.f32 %v6701_v24  ;;  %v2275_v40 = vor.u32 1.1754944e-38, %v2274_v17  ;;  %vm2273_vm2 = vcmp.eq.f32.partialorder %v2272_v35, 8.507059e+37  ;;  %vm7548_vm3 = vmor %vm2283_vm1, %vm2284_vm15 }
 0x2d6   :  { %11462 = vst [vmem:[#allocation50_spill] sm:$0xff] %v7488_v6  ;;  %v1285_v6 = vmul.f32 0.6931472, %v4054_v18  ;;  %v7527_v61 = vpop.eup %4061  ;;  %4071 = vrcp.f32 %v6703_v13  ;;  %v2296_v48 = vmul.f32 %v7297_v5, %v2295_v20  ;;  %v7539_v17 = vadd.f32 %v1283_v14, %v11471_v32 }
 0x2d7   :  { %1889 = vadd.xlane.f32.xlu2 %v6594_v55  ;;  %11463 = vst [vmem:[#allocation46_spill] sm:$0xff] %v7499_v53  ;;  %v2287_v55 = vand.u32 2147483647, %v11385_v44  ;;  %v4064_v4 = vpop.eup %4063  ;;  %v11473_v53 = vld [vmem:[#allocation111_spill] sm:$0xff]  ;;  %v7544_v57 = vsel %vm2273_vm2, %v2275_v40, %v2271_v33  ;;  %4073 = vlog2.f32 %v6763_v43  ;;  %v2324_v14 = vmul.f32 %v7355_v37, %v11408_v8 }
 0x2d8   :  { %1895 = vadd.xlane.f32.xlu1 %v6602_v39  ;;  %v11467_v39 = vld [vmem:[#allocation109_spill] sm:$0xff]  ;;  %v7536_v15 = vpop.xlane.xlu1 %1225  ;;  %11472 = vst [vmem:[#allocation53_spill] sm:$0xff] %v7539_v17  ;;  %v4066_v20 = vpop.eup %4065  ;;  %v2304_v40 = vand.u32 2147483648, %v11390_v12  ;;  %4075 = vrcp.f32 %v6763_v43  ;;  %v1287_v32 = vmul.f32 0.6931472, %v4064_v4  ;;  %vm2299_vm6 = vweird.f32 %v7297_v5 }
 0x2d9   :  { %1892 = vadd.xlane.f32.xlu0 %v6599_v30  ;;  %v7523_v10 = vpop.xlane.xlu2 %1219  ;;  %v2289_v30 = vand.u32 2147483648, %v11385_v44  ;;  %v7531_v18 = vadd.f32 %v1281_v63, %v11467_v39  ;;  %11470 = vst [vmem:[#allocation93_spill] sm:$0xff] %v7536_v15  ;;  %v7542_v44 = vadd.f32 %v1285_v6, %v11473_v53  ;;  %vm7552_vm4 = vcmp.eq.f32.partialorder %v2287_v55, 8.507059e+37  ;;  %vm7592_vm8 = vmor %vm2298_vm5, %vm2299_vm6 }
 0x2da   :  { %11466 = vst [vmem:[#allocation172_spill] sm:$0xff] %v7523_v10  ;;  %v7534_v46 = vpop.xlane.xlu0 %1222  ;;  %v2286_v6 = vsel %vm7548_vm3, %v7284_v21, %v2282_v2  ;;  %v2311_v53 = vmul.f32 %v7315_v31, %v2310_v1  ;;  %v2302_v55 = vand.u32 2147483647, %v11390_v12  ;;  %v4068_v39 = vpop.eup %4067  ;;  %v2297_v21 = vadd.f32 %v7297_v5, %v2296_v48 }
 0x2db   :  { %11468 = vst [vmem:[#allocation36_spill] sm:$0xff] %v7531_v18  ;;  %v2290_v33 = vor.u32 1.1754944e-38, %v2289_v30  ;;  %v7570_v2 = vpop.eup %4069  ;;  %v1289_v1 = vmul.f32 0.6931472, %v4066_v20  ;;  %4077 = vlog2.f32 %v6788_v54  ;;  %v2339_v63 = vmul.f32 %v7362_v29, %v11409_v3 }
 0x2dc   :  { %11469 = vst [vmem:[#allocation90_spill] sm:$0xff] %v7534_v46  ;;  %4079 = vlog2.f32 %v6790_v49  ;;  %vm2314_vm7 = vweird.f32 %v7315_v31  ;;  %v2325_v48 = vsub.f32 1.0, %v2324_v14  ;;  %v1291_v35 = vmul.f32 0.6931472, %v4068_v39 }
 0x2dd   :  { %11474 = vst [vmem:[#allocation95_spill] sm:$0xff] %v7542_v44  ;;  %v7575_v30 = vsel %vm7552_vm4, %v2290_v33, %v2286_v6  ;;  %vm7596_vm9 = vcmp.eq.f32.partialorder %v2302_v55, 8.507059e+37  ;;  %v2319_v6 = vand.u32 2147483648, %v11405_v56  ;;  %4081 = vrcp.f32 %v6788_v54 }
 0x2de   :  { %11475 = vst [vmem:[#allocation190_spill] sm:$0xff] %v7544_v57  ;;  %v7579_v57 = vpop.eup %4071  ;;  %v2301_v14 = vsel %vm7592_vm8, %v7297_v5, %v2297_v21  ;;  %vm2313_vm10 = vweird.f32 %v11405_v56  ;;  %v2317_v12 = vand.u32 2147483647, %v11405_v56  ;;  %4083 = vrcp.f32 %v6790_v49 }
 0x2df   :  { %1898 = vadd.xlane.f32.xlu2 %v6605_v38  ;;  %11480 = vst [vmem:[#allocation214_spill] sm:$0xff] %v7575_v30  ;;  %v2312_v38 = vadd.f32 %v7315_v31, %v2311_v53  ;;  %v4074_v53 = vpop.eup %4073  ;;  %v11490_v30 = vld [vmem:[#allocation112_spill] sm:$0xff]  ;;  %vm7620_vm11 = vmor %vm2313_vm10, %vm2314_vm7  ;;  %v2340_v21 = vsub.f32 1.0, %v2339_v63  ;;  %4085 = vlog2.f32 %v6850_v36  ;;  %v2320_v18 = vor.u32 1.1754944e-38, %v2319_v6 }
 0x2e0   :  { %1904 = vadd.xlane.f32.xlu1 %v6618_v60  ;;  %v2305_v60 = vor.u32 1.1754944e-38, %v2304_v40  ;;  %v7610_v55 = vpop.xlane.xlu1 %1234  ;;  %v11488_v40 = vld [vmem:[#allocation113_spill] sm:$0xff]  ;;  %v7616_v44 = vadd.f32 %v1287_v32, %v11490_v30  ;;  %v7624_v56 = vpop.eup %4075  ;;  %v2354_v32 = vmul.f32 %v7410_v28, %v6503_v50  ;;  %vm2318_vm12 = vcmp.eq.f32.partialorder %v2317_v12, 8.507059e+37 }
 0x2e1   :  { %1901 = vadd.xlane.f32.xlu0 %v6615_v47  ;;  %v7586_v4 = vpop.xlane.xlu2 %1228  ;;  %11487 = vst [vmem:[#allocation215_spill] sm:$0xff] %v7610_v55  ;;  %v7613_v39 = vadd.f32 %v1289_v1, %v11488_v40  ;;  %v2316_v20 = vsel %vm7620_vm11, %v7315_v31, %v2312_v38  ;;  %v2326_v1 = vmul.f32 %v7355_v37, %v2325_v48  ;;  %v4078_v30 = vpop.eup %4077  ;;  %v11494_v40 = vld [vmem:[#allocation115_spill] sm:$0xff]  ;;  %vm2328_vm13 = vweird.f32 %v11408_v8 }
 0x2e2   :  { %11481 = vst [vmem:[#allocation25_spill] sm:$0xff] %v7586_v4  ;;  %v7608_v33 = vpop.xlane.xlu0 %1231  ;;  %v7638_v63 = vsel %vm7596_vm9, %v2305_v60, %v2301_v14  ;;  %v4080_v17 = vpop.eup %4079  ;;  %vm2329_vm14 = vweird.f32 %v7355_v37  ;;  %v2332_v31 = vand.u32 2147483647, %v11408_v8  ;;  %4087 = vrcp.f32 %v6850_v36  ;;  %v11499_v60 = vld [vmem:[#allocation236_spill] sm:$0xff] }
 0x2e3   :  { %11486 = vst [vmem:[#allocation191_spill] sm:$0xff] %v7608_v33  ;;  %v7645_v38 = vsel %vm2318_vm12, %v2320_v18, %v2316_v20  ;;  %v2334_v48 = vand.u32 2147483648, %v11408_v8  ;;  %v7649_v47 = vpop.eup %4081  ;;  %v1295_v6 = vmul.f32 0.6931472, %v4078_v30  ;;  %v2355_v14 = vsub.f32 1.0, %v2354_v32  ;;  %v11501_v18 = vld [vmem:[#allocation10_spill] sm:$0xff]  ;;  %vm7681_vm1 = vmor %vm2328_vm13, %vm2329_vm14 }
 0x2e4   :  { %11489 = vst [vmem:[#allocation96_spill] sm:$0xff] %v7613_v39  ;;  %v1293_v39 = vmul.f32 0.6931472, %v4074_v53  ;;  %v2327_v53 = vadd.f32 %v7355_v37, %v2326_v1  ;;  %v2369_v12 = vmul.f32 %v7436_v22, %v6525_v23  ;;  %v7656_v5 = vpop.eup %4083  ;;  %4089 = vrcp.f32 %v11501_v18  ;;  %v11504_v30 = vld [vmem:[#allocation82_spill] sm:$0xff] }
 0x2e5   :  { %11491 = vst [vmem:[#allocation98_spill] sm:$0xff] %v7616_v44  ;;  %v7634_v44 = vadd.f32 %v1291_v35, %v11494_v40  ;;  %v2341_v35 = vmul.f32 %v7362_v29, %v2340_v21  ;;  %v11502_v21 = vld [vmem:[#allocation116_spill] sm:$0xff]  ;;  %4091 = vrcp.f32 %v11504_v30  ;;  %vm7666_vm15 = vcmp.eq.f32.partialorder %v2332_v31, 8.507059e+37 }
 0x2e6   :  { %11496 = vst [vmem:[#allocation59_spill] sm:$0xff] %v7638_v63  ;;  %v7662_v40 = vadd.f32 %v1293_v39, %v11502_v21  ;;  %v2349_v32 = vand.u32 2147483648, %v11409_v3  ;;  %v2335_v39 = vor.u32 1.1754944e-38, %v2334_v48  ;;  %vm2343_vm2 = vweird.f32 %v11409_v3  ;;  %v11511_v21 = vld [vmem:[#allocation117_spill] sm:$0xff] }
 0x2e7   :  { %11495 = vst [vmem:[#allocation99_spill] sm:$0xff] %v7634_v44  ;;  %1907 = vadd.xlane.f32.xlu2 %v11497_v27  ;;  %v11500_v27 = vld [vmem:[#allocation17_spill] sm:$0xff]  ;;  %v2384_v44 = vmul.f32 %v7445_v41, %v6527_v7  ;;  %v2342_v31 = vadd.f32 %v7362_v29, %v2341_v35  ;;  %vm2344_vm3 = vweird.f32 %v7362_v29  ;;  %v2331_v30 = vsel %vm7681_vm1, %v7355_v37, %v2327_v53 }
 0x2e8   :  { %11498 = vst [vmem:[#allocation40_spill] sm:$0xff] %v7645_v38  ;;  %1913 = vadd.xlane.f32.xlu1 %v11500_v27  ;;  %v1297_v38 = vmul.f32 0.6931472, %v4080_v17  ;;  %v4086_v27 = vpop.eup %4085  ;;  %v7673_v63 = vpop.xlane.xlu1 %1499  ;;  %v2356_v8 = vmul.f32 %v7410_v28, %v2355_v14  ;;  %v2370_v36 = vsub.f32 1.0, %v2369_v12  ;;  %vm2358_vm5 = vweird.f32 %v6503_v50  ;;  %vm7706_vm6 = vmor %vm2343_vm2, %vm2344_vm3  ;;  %v11520_v14 = vld [vmem:[#allocation73_spill] sm:$0xff]  ;;  %v11525_v17 = vld [vmem:[#allocation119_spill] sm:$0xff] }
 0x2e9   :  { %1910 = vadd.xlane.f32.xlu0 %v11499_v60  ;;  %v7659_v20 = vpop.xlane.xlu2 %1493  ;;  %11503 = vst [vmem:[#allocation224_spill] sm:$0xff] %v7662_v40  ;;  %v2347_v60 = vand.u32 2147483647, %v11409_v3  ;;  %v7689_v40 = vadd.f32 %v1295_v6, %v11511_v21  ;;  %v1299_v35 = vmul.f32 0.6931472, %v4086_v27  ;;  %v11517_v6 = vld [vmem:[#allocation123_spill] sm:$0xff]  ;;  %vm2359_vm7 = vweird.f32 %v7410_v28 }
 0x2ea   :  { %11507 = vst [vmem:[#allocation225_spill] sm:$0xff] %v7673_v63  ;;  %v7675_v18 = vpop.xlane.xlu0 %1496  ;;  %v11513_v63 = vld [vmem:[#allocation118_spill] sm:$0xff]  ;;  %v2350_v37 = vor.u32 1.1754944e-38, %v2349_v32  ;;  %v2385_v53 = vsub.f32 1.0, %v2384_v44  ;;  %4093 = vrcp.f32 %v11520_v14  ;;  %v7718_v12 = vsel %vm7666_vm15, %v2335_v39, %v2331_v30  ;;  %v11522_v44 = vld [vmem:[#allocation187_spill] sm:$0xff]  ;;  %vm7755_vm9 = vmor %vm2358_vm5, %vm2359_vm7 }
 0x2eb   :  { %11508 = vst [vmem:[#allocation97_spill] sm:$0xff] %v7675_v18  ;;  %v7695_v18 = vpop.eup %4087  ;;  %v7698_v48 = vadd.f32 %v1297_v38, %v11513_v63  ;;  %vm7700_vm4 = vcmp.eq.f32.partialorder %v2347_v60, 8.507059e+37  ;;  %v2399_v63 = vmul.f32 %v7493_v26, %v6585_v0  ;;  %v2346_v60 = vsel %vm7706_vm6, %v7362_v29, %v2342_v31  ;;  %v11523_v21 = vld [vmem:[#allocation126_spill] sm:$0xff] }
 0x2ec   :  { %11512 = vst [vmem:[#allocation39_spill] sm:$0xff] %v7689_v40  ;;  %v7713_v38 = vpop.eup %4089  ;;  %v2362_v27 = vand.u32 2147483647, %v6503_v50  ;;  %4095 = vrcp.f32 %v11522_v44  ;;  %v2364_v1 = vand.u32 2147483648, %v6503_v50  ;;  %v2371_v30 = vmul.f32 %v7436_v22, %v2370_v36 }
 0x2ed   :  { %11514 = vst [vmem:[#allocation100_spill] sm:$0xff] %v7698_v48  ;;  %v7724_v32 = vpop.eup %4091  ;;  %v2357_v48 = vadd.f32 %v7410_v28, %v2356_v8  ;;  %v7735_v29 = vadd.f32 %v1299_v35, %v11525_v17  ;;  %vm2373_vm8 = vweird.f32 %v6525_v23  ;;  %v2377_v31 = vand.u32 2147483647, %v6525_v23 }
 0x2ee   :  { %11521 = vst [vmem:[#allocation101_spill] sm:$0xff] %v7718_v12  ;;  %v11527_v12 = vld [vmem:[#allocation9_spill] sm:$0xff]  ;;  %v7744_v8 = vsel %vm7700_vm4, %v2350_v37, %v2346_v60  ;;  %v2386_v36 = vmul.f32 %v7445_v41, %v2385_v53  ;;  %vm7759_vm10 = vcmp.eq.f32.partialorder %v2362_v27, 8.507059e+37  ;;  %vm2374_vm11 = vweird.f32 %v7436_v22 }
 0x2ef   :  { %1916 = vadd.xlane.f32.xlu2 %v11517_v6  ;;  %v11524_v6 = vld [vmem:[#allocation128_spill] sm:$0xff]  ;;  %11526 = vst [vmem:[#allocation102_spill] sm:$0xff] %v7735_v29  ;;  %4097 = vrcp.f32 %v11527_v12  ;;  %v2379_v3 = vand.u32 2147483648, %v6525_v23  ;;  %v2392_v37 = vand.u32 2147483647, %v6527_v7  ;;  %v2361_v53 = vsel %vm7755_vm9, %v7410_v28, %v2357_v48  ;;  %v11537_v28 = vld [vmem:[#allocation79_spill] sm:$0xff]  ;;  %vm7797_vm15 = vmor %vm2373_vm8, %vm2374_vm11 }
 0x2f0   :  { %1922 = vadd.xlane.f32.xlu1 %v11524_v6  ;;  %11528 = vst [vmem:[#allocation45_spill] sm:$0xff] %v7744_v8  ;;  %v2400_v6 = vsub.f32 1.0, %v2399_v63  ;;  %v7747_v40 = vpop.xlane.xlu1 %1508  ;;  %v2372_v50 = vadd.f32 %v7436_v22, %v2371_v30  ;;  %v2394_v63 = vand.u32 2147483648, %v6527_v7  ;;  %v2429_v60 = vmul.f32 %v7513_v11, %v6612_v9  ;;  %v7773_v27 = vpop.eup %4093 }
 0x2f1   :  { %1919 = vadd.xlane.f32.xlu0 %v11523_v21  ;;  %v7732_v39 = vpop.xlane.xlu2 %1502  ;;  %v2414_v21 = vmul.f32 %v7501_v25, %v6610_v45  ;;  %11533 = vst [vmem:[#allocation48_spill] sm:$0xff] %v7773_v27  ;;  %v2365_v8 = vor.u32 1.1754944e-38, %v2364_v1  ;;  %vm7775_vm12 = vcmp.eq.f32.partialorder %v2377_v31, 8.507059e+37  ;;  %vm2388_vm13 = vweird.f32 %v6527_v7  ;;  %v11538_v31 = vld [vmem:[#allocation163_spill] sm:$0xff]  ;;  %v11658_v27 = vld [vmem:[#allocation212_spill] sm:$0xff] }
 0x2f2   :  { %v7749_v35 = vpop.xlane.xlu0 %1505  ;;  %v7780_v14 = vpop.eup %4095  ;;  %v2387_v48 = vadd.f32 %v7445_v41, %v2386_v36  ;;  %vm2389_vm14 = vweird.f32 %v7445_v41  ;;  %v2401_v30 = vmul.f32 %v7493_v26, %v2400_v6  ;;  %v2444_v1 = vmul.f32 %v7527_v61, %v6676_v59  ;;  %v11549_v7 = vld [vmem:[#allocation207_spill] sm:$0xff] }
 0x2f3   :  { %v2415_v44 = vsub.f32 1.0, %v2414_v21  ;;  %11536 = vst [vmem:[#allocation103_spill] sm:$0xff] %v7780_v14  ;;  %4099 = vrcp.f32 %v11538_v31  ;;  %v7791_v17 = vsel %vm7759_vm10, %v2365_v8, %v2361_v53  ;;  %v2380_v36 = vor.u32 1.1754944e-38, %v2379_v3  ;;  %v11543_v14 = vld [vmem:[#allocation129_spill] sm:$0xff]  ;;  %v11544_v31 = vld [vmem:[#allocation24_spill] sm:$0xff]  ;;  %vm7820_vm2 = vmor %vm2388_vm13, %vm2389_vm14 }
 0x2f4   :  { %11539 = vst [vmem:[#allocation104_spill] sm:$0xff] %v7791_v17  ;;  %v2407_v6 = vand.u32 2147483647, %v6585_v0  ;;  %v2376_v29 = vsel %vm7797_vm15, %v7436_v22, %v2372_v50  ;;  %vm7809_vm1 = vcmp.eq.f32.partialorder %v2392_v37, 8.507059e+37  ;;  %v2395_v23 = vor.u32 1.1754944e-38, %v2394_v63 }
 0x2f5   :  { %v2430_v53 = vsub.f32 1.0, %v2429_v60  ;;  %4101 = vrcp.f32 %v7018_v52  ;;  %vm2404_vm3 = vweird.f32 %v7493_v26  ;;  %v2409_v22 = vand.u32 2147483648, %v6585_v0 }
 0x2f6   :  { %v2416_v37 = vmul.f32 %v7501_v25, %v2415_v44  ;;  %v2391_v50 = vsel %vm7820_vm2, %v7445_v41, %v2387_v48  ;;  %v2402_v63 = vadd.f32 %v7493_v26, %v2401_v30  ;;  %v2422_v60 = vand.u32 2147483647, %v6610_v45 }
 0x2f7   :  { %1925 = vadd.xlane.f32.xlu2 %v11537_v28  ;;  %v7802_v28 = vpop.eup %4097  ;;  %4103 = vrcp.f32 %v11549_v7  ;;  %v7839_v52 = vsel %vm7775_vm12, %v2380_v36, %v2376_v29  ;;  %vm2403_vm4 = vweird.f32 %v6585_v0  ;;  %vm7842_vm5 = vcmp.eq.f32.partialorder %v2407_v6, 8.507059e+37  ;;  %v11557_v29 = vld [vmem:[#allocation23_spill] sm:$0xff]  ;;  %v11569_v7 = vld [vmem:[#allocation169_spill] sm:$0xff] }
 0x2f8   :  { %11542 = vst [vmem:[#allocation105_spill] sm:$0xff] %v7802_v28  ;;  %1931 = vadd.xlane.f32.xlu1 %v11544_v31  ;;  %v2445_v31 = vsub.f32 1.0, %v2444_v1  ;;  %v7833_v21 = vpop.xlane.xlu1 %1517  ;;  %vm2418_vm6 = vweird.f32 %v6610_v45  ;;  %vm2419_vm7 = vweird.f32 %v7501_v25  ;;  %v2424_v41 = vand.u32 2147483648, %v6610_v45  ;;  %vm7858_vm8 = vmor %vm2403_vm4, %vm2404_vm3  ;;  %v11656_v28 = vld [vmem:[#allocation49_spill] sm:$0xff] }
 0x2f9   :  { %1928 = vadd.xlane.f32.xlu0 %v11543_v14  ;;  %v7814_v3 = vpop.xlane.xlu2 %1511  ;;  %11550 = vst [vmem:[#allocation106_spill] sm:$0xff] %v7839_v52  ;;  %v2431_v48 = vmul.f32 %v7513_v11, %v2430_v53  ;;  %v7850_v30 = vpop.eup %4099  ;;  %v7854_v12 = vsel %vm7809_vm1, %v2395_v23, %v2391_v50  ;;  %v2410_v1 = vor.u32 1.1754944e-38, %v2409_v22  ;;  %v2417_v36 = vadd.f32 %v7501_v25, %v2416_v37  ;;  %v11561_v22 = vld [vmem:[#allocation167_spill] sm:$0xff]  ;;  %vm7889_vm11 = vmor %vm2418_vm6, %vm2419_vm7 }
 0x2fa   :  { %v7835_v17 = vpop.xlane.xlu0 %1514  ;;  %11553 = vst [vmem:[#allocation107_spill] sm:$0xff] %v7850_v30  ;;  %v2459_v6 = vmul.f32 %v7570_v2, %v6701_v24  ;;  %v2406_v8 = vsel %vm7858_vm8, %v7493_v26, %v2402_v63  ;;  %vm7869_vm9 = vcmp.eq.f32.partialorder %v2422_v60, 8.507059e+37  ;;  %vm2433_vm10 = vweird.f32 %v6612_v9  ;;  %v11562_v26 = vld [vmem:[#allocation201_spill] sm:$0xff]  ;;  %v11563_v63 = vld [vmem:[#allocation135_spill] sm:$0xff] }
 0x2fb   :  { %11554 = vst [vmem:[#allocation108_spill] sm:$0xff] %v7854_v12  ;;  %v2446_v53 = vmul.f32 %v7527_v61, %v2445_v31  ;;  %v7875_v14 = vpop.eup %4101  ;;  %4105 = vrcp.f32 %v11561_v22  ;;  %v2437_v37 = vand.u32 2147483647, %v6612_v9  ;;  %v2439_v50 = vand.u32 2147483648, %v6612_v9  ;;  %v11564_v60 = vld [vmem:[#allocation179_spill] sm:$0xff] }
 0x2fc   :  { %11560 = vst [vmem:[#allocation109_spill] sm:$0xff] %v7875_v14  ;;  %v2474_v0 = vmul.f32 %v7579_v57, %v6703_v13  ;;  %4107 = vrcp.f32 %v11562_v26  ;;  %v2432_v12 = vadd.f32 %v7513_v11, %v2431_v48  ;;  %vm2434_vm12 = vweird.f32 %v7513_v11  ;;  %v11634_v14 = vld [vmem:[#allocation80_spill] sm:$0xff] }
 0x2fd   :  { %v7895_v52 = vpop.eup %4103  ;;  %v2421_v45 = vsel %vm7889_vm11, %v7501_v25, %v2417_v36  ;;  %v2460_v22 = vsub.f32 1.0, %v2459_v6  ;;  %vm2449_vm13 = vweird.f32 %v7527_v61  ;;  %v2454_v48 = vand.u32 2147483648, %v6676_v59  ;;  %vm7919_vm14 = vmor %vm2433_vm10, %vm2434_vm12 }
 0x2fe   :  { %11567 = vst [vmem:[#allocation110_spill] sm:$0xff] %v7895_v52  ;;  %v2489_v52 = vmul.f32 %v7624_v56, %v6763_v43  ;;  %4109 = vrcp.f32 %v11569_v7  ;;  %vm7923_vm15 = vcmp.eq.f32.partialorder %v2437_v37, 8.507059e+37  ;;  %v2440_v6 = vor.u32 1.1754944e-38, %v2439_v50  ;;  %v11588_v7 = vld [vmem:[#allocation141_spill] sm:$0xff] }
 0x2ff   :  { %1934 = vadd.xlane.f32.xlu2 %v11557_v29  ;;  %v2425_v29 = vor.u32 1.1754944e-38, %v2424_v41  ;;  %v2447_v41 = vadd.f32 %v7527_v61, %v2446_v53  ;;  %v2436_v31 = vsel %vm7919_vm14, %v7513_v11, %v2432_v12  ;;  %vm2448_vm1 = vweird.f32 %v6676_v59  ;;  %v11583_v11 = vld [vmem:[#allocation51_spill] sm:$0xff]  ;;  %v11584_v12 = vld [vmem:[#allocation138_spill] sm:$0xff] }
 0x300   :  { %1940 = vadd.xlane.f32.xlu1 %v11564_v60  ;;  %v2452_v60 = vand.u32 2147483647, %v6676_v59  ;;  %v7913_v44 = vpop.xlane.xlu1 %1526  ;;  %v2467_v9 = vand.u32 2147483647, %v6701_v24  ;;  %vm7940_vm2 = vmor %vm2448_vm1, %vm2449_vm13  ;;  %v2461_v50 = vmul.f32 %v7570_v2, %v2460_v22  ;;  %vm2463_vm4 = vweird.f32 %v6701_v24 }
 0x301   :  { %1937 = vadd.xlane.f32.xlu0 %v11563_v63  ;;  %v7897_v26 = vpop.xlane.xlu2 %1520  ;;  %v7901_v63 = vsel %vm7842_vm5, %v2410_v1, %v2406_v8  ;;  %11570 = vst [vmem:[#allocation113_spill] sm:$0xff] %v7913_v44  ;;  %v2475_v8 = vsub.f32 1.0, %v2474_v0  ;;  %v7929_v53 = vsel %vm7869_vm9, %v2425_v29, %v2421_v45  ;;  %vm2464_vm5 = vweird.f32 %v7570_v2 }
 0x302   :  { %11568 = vst [vmem:[#allocation111_spill] sm:$0xff] %v7901_v63  ;;  %v7915_v1 = vpop.xlane.xlu0 %1523  ;;  %v7936_v63 = vpop.eup %4105  ;;  %vm7944_vm3 = vcmp.eq.f32.partialorder %v2452_v60, 8.507059e+37  ;;  %4111 = vrcp.f32 %v11583_v11  ;;  %v2451_v0 = vsel %vm7940_vm2, %v7527_v61, %v2447_v41  ;;  %v2455_v29 = vor.u32 1.1754944e-38, %v2454_v48  ;;  %v11586_v11 = vld [vmem:[#allocation209_spill] sm:$0xff]  ;;  %v11592_v48 = vld [vmem:[#allocation175_spill] sm:$0xff]  ;;  %vm8004_vm9 = vmor %vm2463_vm4, %vm2464_vm5 }
 0x303   :  { %11571 = vst [vmem:[#allocation112_spill] sm:$0xff] %v7915_v1  ;;  %v7951_v59 = vpop.eup %4107  ;;  %v2490_v45 = vsub.f32 1.0, %v2489_v52  ;;  %v7960_v60 = vsel %vm7923_vm15, %v2440_v6, %v2436_v31  ;;  %v2469_v22 = vand.u32 2147483648, %v6701_v24  ;;  %v2476_v25 = vmul.f32 %v7579_v57, %v2475_v8  ;;  %v11595_v8 = vld [vmem:[#allocation30_spill] sm:$0xff]  ;;  %v11666_v1 = vld [vmem:[#allocation57_spill] sm:$0xff] }
 0x304   :  { %11576 = vst [vmem:[#allocation115_spill] sm:$0xff] %v7929_v53  ;;  %v2504_v53 = vmul.f32 %v7649_v47, %v6788_v54  ;;  %4113 = vrcp.f32 %v11586_v11  ;;  %vm7969_vm6 = vcmp.eq.f32.partialorder %v2467_v9, 8.507059e+37  ;;  %vm2478_vm7 = vweird.f32 %v6703_v13  ;;  %v7976_v41 = vpop.eup %4109 }
 0x305   :  { %11577 = vst [vmem:[#allocation18_spill] sm:$0xff] %v7936_v63  ;;  %v2519_v52 = vmul.f32 %v7656_v5, %v6790_v49  ;;  %4115 = vrcp.f32 %v11592_v48  ;;  %v7983_v6 = vsel %vm7944_vm3, %v2455_v29, %v2451_v0  ;;  %vm2479_vm8 = vweird.f32 %v7579_v57 }
 0x306   :  { %11582 = vst [vmem:[#allocation236_spill] sm:$0xff] %v7951_v59  ;;  %4117 = vrcp.f32 %v11595_v8  ;;  %v2482_v31 = vand.u32 2147483647, %v6703_v13  ;;  %v2484_v9 = vand.u32 2147483648, %v6703_v13  ;;  %v2491_v37 = vmul.f32 %v7624_v56, %v2490_v45  ;;  %vm8024_vm12 = vmor %vm2478_vm7, %vm2479_vm8 }
 0x307   :  { %1943 = vadd.xlane.f32.xlu2 %v11584_v12  ;;  %11585 = vst [vmem:[#allocation17_spill] sm:$0xff] %v7960_v60  ;;  %v11587_v12 = vld [vmem:[#allocation140_spill] sm:$0xff]  ;;  %v2470_v23 = vor.u32 1.1754944e-38, %v2469_v22  ;;  %v2477_v0 = vadd.f32 %v7579_v57, %v2476_v25  ;;  %vm2493_vm10 = vweird.f32 %v6763_v43  ;;  %v2497_v60 = vand.u32 2147483647, %v6763_v43 }
 0x308   :  { %1949 = vadd.xlane.f32.xlu1 %v11588_v7  ;;  %11591 = vst [vmem:[#allocation116_spill] sm:$0xff] %v7976_v41  ;;  %v2462_v7 = vadd.f32 %v7570_v2, %v2461_v50  ;;  %v7992_v48 = vpop.xlane.xlu1 %1535  ;;  %v2505_v50 = vsub.f32 1.0, %v2504_v53  ;;  %v7997_v29 = vpop.eup %4111  ;;  %v2520_v22 = vsub.f32 1.0, %v2519_v52  ;;  %v11603_v41 = vld [vmem:[#allocation91_spill] sm:$0xff]  ;;  %vm2494_vm11 = vweird.f32 %v7624_v56 }
 0x309   :  { %1946 = vadd.xlane.f32.xlu0 %v11587_v12  ;;  %v7979_v36 = vpop.xlane.xlu2 %1529  ;;  %11594 = vst [vmem:[#allocation118_spill] sm:$0xff] %v7983_v6  ;;  %v11596_v12 = vld [vmem:[#allocation186_spill] sm:$0xff]  ;;  %v11600_v6 = vld [vmem:[#allocation189_spill] sm:$0xff]  ;;  %v2499_v25 = vand.u32 2147483648, %v6763_v43  ;;  %vm8028_vm13 = vcmp.eq.f32.partialorder %v2482_v31, 8.507059e+37  ;;  %v2492_v45 = vadd.f32 %v7624_v56, %v2491_v37  ;;  %vm8050_vm14 = vcmp.eq.f32.partialorder %v2497_v60, 8.507059e+37  ;;  %vm8064_vm15 = vmor %vm2493_vm10, %vm2494_vm11 }
 0x30a   :  { %11593 = vst [vmem:[#allocation117_spill] sm:$0xff] %v7979_v36  ;;  %4119 = vrcp.f32 %v11596_v12  ;;  %v2466_v53 = vsel %vm8004_vm9, %v7570_v2, %v2462_v7  ;;  %v8016_v24 = vpop.eup %4113  ;;  %v2485_v7 = vor.u32 1.1754944e-38, %v2484_v9  ;;  %v2506_v13 = vmul.f32 %v7649_v47, %v2505_v50  ;;  %v11612_v31 = vld [vmem:[#allocation182_spill] sm:$0xff]  ;;  %v11660_v36 = vld [vmem:[#allocation219_spill] sm:$0xff] }
 0x30b   :  { %11597 = vst [vmem:[#allocation123_spill] sm:$0xff] %v7992_v48  ;;  %4121 = vrcp.f32 %v11600_v6  ;;  %v2512_v59 = vand.u32 2147483647, %v6788_v54  ;;  %v11613_v9 = vld [vmem:[#allocation146_spill] sm:$0xff]  ;;  %v8048_v37 = vsel %vm7969_vm6, %v2470_v23, %v2466_v53  ;;  %v2500_v60 = vor.u32 1.1754944e-38, %v2499_v25  ;;  %v11622_v53 = vld [vmem:[#allocation81_spill] sm:$0xff] }
 0x30c   :  { %v7994_v11 = vpop.xlane.xlu0 %1532  ;;  %11599 = vst [vmem:[#allocation128_spill] sm:$0xff] %v7997_v29  ;;  %4123 = vrcp.f32 %v11603_v41  ;;  %v11605_v29 = vld [vmem:[#allocation92_spill] sm:$0xff]  ;;  %vm2508_vm1 = vweird.f32 %v6788_v54  ;;  %v2514_v23 = vand.u32 2147483648, %v6788_v54  ;;  %v2496_v43 = vsel %vm8064_vm15, %v7624_v56, %v2492_v45  ;;  %v11659_v48 = vld [vmem:[#allocation234_spill] sm:$0xff] }
 0x30d   :  { %11598 = vst [vmem:[#allocation126_spill] sm:$0xff] %v7994_v11  ;;  %4125 = vrcp.f32 %v7317_v16  ;;  %vm2509_vm2 = vweird.f32 %v7649_v47  ;;  %vm8089_vm3 = vcmp.eq.f32.partialorder %v2512_v59, 8.507059e+37  ;;  %vm2524_vm4 = vweird.f32 %v7656_v5 }
 0x30e   :  { %11604 = vst [vmem:[#allocation119_spill] sm:$0xff] %v8016_v24  ;;  %v8033_v24 = vpop.eup %4115  ;;  %4127 = vrcp.f32 %v7319_v51  ;;  %v2529_v45 = vand.u32 2147483648, %v6790_v49  ;;  %v8105_v59 = vsel %vm8050_vm14, %v2500_v60, %v2496_v43  ;;  %vm2523_vm5 = vweird.f32 %v6790_v49  ;;  %vm8120_vm6 = vmor %vm2508_vm1, %vm2509_vm2  ;;  %v11637_v60 = vld [vmem:[#allocation72_spill] sm:$0xff] }
 0x30f   :  { %1952 = vadd.xlane.f32.xlu2 %v11605_v29  ;;  %11610 = vst [vmem:[#allocation79_spill] sm:$0xff] %v8033_v24  ;;  %v2481_v29 = vsel %vm8024_vm12, %v7579_v57, %v2477_v0  ;;  %v8041_v63 = vpop.eup %4117  ;;  %4129 = vrcp.f32 %v7374_v62  ;;  %v2521_v57 = vmul.f32 %v7656_v5, %v2520_v22  ;;  %v11639_v43 = vld [vmem:[#allocation64_spill] sm:$0xff]  ;;  %vm8136_vm7 = vmor %vm2523_vm5, %vm2524_vm4  ;;  %v1872_v54 = vmul.f32 %v11660_v36, %v11659_v48 }
 0x310   :  { %11611 = vst [vmem:[#allocation129_spill] sm:$0xff] %v8041_v63  ;;  %1958 = vadd.xlane.f32.xlu1 %v11613_v9  ;;  %v8055_v0 = vpop.eup %4119  ;;  %4131 = vrcp.f32 %v7395_v58  ;;  %v8075_v52 = vsel %vm8028_vm13, %v2485_v7, %v2481_v29  ;;  %v8084_v25 = vpop.xlane.xlu1 %1544  ;;  %v2527_v7 = vand.u32 2147483647, %v6790_v49  ;;  %v11638_v49 = vld [vmem:[#allocation198_spill] sm:$0xff]  ;;  %v2530_v24 = vor.u32 1.1754944e-38, %v2529_v45  ;;  %v11664_v45 = vld [vmem:[#allocation55_spill] sm:$0xff] }
 0x311   :  { %1955 = vadd.xlane.f32.xlu0 %v11612_v31  ;;  %11614 = vst [vmem:[#allocation24_spill] sm:$0xff] %v8048_v37  ;;  %v8058_v50 = vpop.xlane.xlu2 %1538  ;;  %v8070_v22 = vpop.eup %4121  ;;  %4133 = vrcp.f32 %v11622_v53  ;;  %v2507_v37 = vadd.f32 %v7649_v47, %v2506_v13  ;;  %v2522_v56 = vadd.f32 %v7656_v5, %v2521_v57  ;;  %v2515_v13 = vor.u32 1.1754944e-38, %v2514_v23 }
 0x312   :  { %11617 = vst [vmem:[#allocation23_spill] sm:$0xff] %v8055_v0  ;;  %v8081_v31 = vpop.eup %4123  ;;  %4135 = vrcp.f32 %v7448_v42  ;;  %v8112_v57 = vmul.f32 %v8041_v63, %v11595_v8  ;;  %v1866_v23 = vmul.f32 %v11638_v49, %v11637_v60  ;;  %vm8140_vm8 = vcmp.eq.f32.partialorder %v2527_v7, 8.507059e+37  ;;  %v11646_v60 = vld [vmem:[#allocation63_spill] sm:$0xff]  ;;  %v11651_v7 = vld [vmem:[#allocation230_spill] sm:$0xff] }
 0x313   :  { %11618 = vst [vmem:[#allocation135_spill] sm:$0xff] %v8058_v50  ;;  %v8094_v29 = vpop.eup %4125  ;;  %4137 = vrcp.f32 %v7470_v34  ;;  %v8222_v63 = vsel %vm659_vm0, %v1872_v54, 0.0  ;;  %vm16_vm9 = vcmask 7168   ;;  %vm2539_vm13 = vweird.f32 %v7695_v18 }
 0x314   :  { %11621 = vst [vmem:[#allocation179_spill] sm:$0xff] %v8070_v22  ;;  %v8086_v9 = vpop.xlane.xlu0 %1541  ;;  %v8100_v61 = vpop.eup %4127  ;;  %4139 = vrcp.f32 %v7472_v19  ;;  %vm2554_vm15 = vweird.f32 %v7713_v38  ;;  %vm2569_vm1 = vweird.f32 %v7724_v32 }
 0x315   :  { %11623 = vst [vmem:[#allocation138_spill] sm:$0xff] %v8075_v52  ;;  %v8108_v52 = vpop.eup %4129  ;;  %4141 = vrcp.f32 %v7523_v10  ;;  %v8245_v54 = vmul.f32 %v8100_v61, %v7319_v51 }
 0x316   :  { %11624 = vst [vmem:[#allocation140_spill] sm:$0xff] %v8081_v31  ;;  %v8128_v8 = vpop.eup %4131  ;;  %4143 = vrcp.f32 %v7534_v46 }
 0x317   :  { %11625 = vst [vmem:[#allocation141_spill] sm:$0xff] %v8084_v25  ;;  %1961 = vadd.xlane.f32.xlu2 %v11634_v14  ;;  %v2511_v14 = vsel %vm8120_vm6, %v7649_v47, %v2507_v37  ;;  %4145 = vrcp.f32 %v7536_v15  ;;  %v11650_v47 = vld [vmem:[#allocation33_spill] sm:$0xff]  ;;  %v2526_v37 = vsel %vm8136_vm7, %v7656_v5, %v2522_v56 }
 0x318   :  { %11626 = vst [vmem:[#allocation92_spill] sm:$0xff] %v8086_v9  ;;  %1967 = vadd.xlane.f32.xlu1 %v11650_v47  ;;  %v11652_v9 = vld [vmem:[#allocation203_spill] sm:$0xff]  ;;  %4147 = vrcp.f32 %v7586_v4  ;;  %v11663_v56 = vld [vmem:[#allocation233_spill] sm:$0xff]  ;;  %v8184_v48 = vpop.xlane.xlu1 %1553 }
 0x319   :  { %11629 = vst [vmem:[#allocation182_spill] sm:$0xff] %v8094_v29  ;;  %v1869_v25 = vmul.f32 %v11652_v9, %v11651_v7  ;;  %4149 = vrcp.f32 %v7608_v33  ;;  %v8171_v9 = vsel %vm659_vm0, %v1866_v23, 0.0  ;;  %v1873_v7 = vmul.f32 %v11664_v45, %v11663_v56 }
 0x31a   :  { %11630 = vst [vmem:[#allocation146_spill] sm:$0xff] %v8100_v61  ;;  %4151 = vrcp.f32 %v7610_v55  ;;  %v8190_v23 = vsel %vm8089_vm3, %v2515_v13, %v2511_v14  ;;  %v8202_v45 = vsel %vm8140_vm8, %v2530_v24, %v2526_v37  ;;  %v11696_v61 = vld [vmem:[#allocation206_spill] sm:$0xff] }
 0x31b   :  { %11631 = vst [vmem:[#allocation237_spill] sm:$0xff] %v8105_v59  ;;  %v11640_v59 = vld [vmem:[#allocation200_spill] sm:$0xff]  ;;  %v8213_v14 = vsel %vm659_vm0, %v1869_v25, 0.0  ;;  %v8232_v25 = vsel %vm659_vm0, %v1873_v7, 0.0 }
 0x31c   :  { %11632 = vst [vmem:[#allocation238_spill] sm:$0xff] %v8108_v52  ;;  %v1867_v30 = vmul.f32 %v11640_v59, %v11639_v43  ;;  %v11647_v59 = vld [vmem:[#allocation202_spill] sm:$0xff]  ;;  %v8146_v43 = vpop.eup %4133  ;;  %v8186_v36 = vpop.xlane.xlu0 %1550 }
 0x31d   :  { %11633 = vst [vmem:[#allocation239_spill] sm:$0xff] %v8112_v57  ;;  %v1868_v49 = vmul.f32 %v11647_v59, %v11646_v60  ;;  %v11649_v57 = vld [vmem:[#allocation166_spill] sm:$0xff]  ;;  %v8156_v50 = vpop.eup %4135  ;;  %v8159_v60 = vpop.xlane.xlu2 %1547  ;;  %v11655_v59 = vld [vmem:[#allocation229_spill] sm:$0xff]  ;;  %v8264_v51 = vmul.f32 %v8146_v43, %v11622_v53 }
 0x31e   :  { %11641 = vst [vmem:[#allocation80_spill] sm:$0xff] %v8128_v8  ;;  %1964 = vadd.xlane.f32.xlu0 %v11649_v57  ;;  %v1870_v11 = vmul.f32 %v11656_v28, %v11655_v59  ;;  %v11657_v57 = vld [vmem:[#allocation228_spill] sm:$0xff]  ;;  %v8167_v5 = vpop.eup %4137  ;;  %v11670_v59 = vld [vmem:[#allocation235_spill] sm:$0xff] }
 0x31f   :  { %11648 = vst [vmem:[#allocation72_spill] sm:$0xff] %v8146_v43  ;;  %v1871_v47 = vmul.f32 %v11658_v27, %v11657_v57  ;;  %v8177_v28 = vpop.eup %4139  ;;  %v8181_v27 = vmul.f32 %v8055_v0, %v11596_v12  ;;  %v11671_v57 = vld [vmem:[#allocation227_spill] sm:$0xff]  ;;  %v8205_v12 = vsel %vm659_vm0, %v1867_v30, 0.0  ;;  %v8208_v2 = vsel %vm659_vm0, %v1868_v49, 0.0  ;;  %v11684_v49 = vld [vmem:[#allocation150_spill] sm:$0xff] }
 0x320   :  { %11653 = vst [vmem:[#allocation198_spill] sm:$0xff] %v8156_v50  ;;  %v1875_v56 = vmul.f32 %v11671_v57, %v11670_v59  ;;  %v8216_v59 = vsel %vm659_vm0, %v1870_v11, 0.0  ;;  %v8228_v30 = vmul.f32 %v8081_v31, %v11603_v41  ;;  %1970 = vadd.xlane.f32.xlu2 %v11684_v49  ;;  %v8249_v49 = vmul.f32 %v8108_v52, %v7374_v62  ;;  %v11697_v52 = vld [vmem:[#allocation34_spill] sm:$0xff]  ;;  %v11743_v0 = vld [vmem:[#allocation211_spill] sm:$0xff] }
 0x321   :  { %11654 = vst [vmem:[#allocation64_spill] sm:$0xff] %v8159_v60  ;;  %v11665_v60 = vld [vmem:[#allocation65_spill] sm:$0xff]  ;;  %v8219_v57 = vsel %vm659_vm0, %v1871_v47, 0.0  ;;  %v8241_v47 = vmul.f32 %v8094_v29, %v7317_v16  ;;  %v11691_v41 = vmov 0.0   ;;  %v8260_v16 = vmul.f32 %v8128_v8, %v7395_v58  ;;  %v11731_v8 = vld [vmem:[#allocation183_spill] sm:$0xff] }
 0x322   :  { %11661 = vst [vmem:[#allocation200_spill] sm:$0xff] %v8167_v5  ;;  %v1874_v44 = vmul.f32 %v11666_v1, %v11665_v60  ;;  %v8194_v1 = vpop.eup %4141  ;;  %v8198_v60 = vmul.f32 %v8070_v22, %v11600_v6  ;;  %v1684_v62 = vsub.f32 %v11696_v61, %v7659_v20  ;;  %v8276_v58 = vmul.f32 %v8156_v50, %v7448_v42  ;;  %v11704_v61 = vld [vmem:[#allocation26_spill] sm:$0xff]  ;;  %v11732_v29 = vld [vmem:[#allocation123_spill] sm:$0xff]  ;;  %v11738_v6 = vld [vmem:[#allocation153_spill] sm:$0xff] }
 0x323   :  { %11662 = vst [vmem:[#allocation63_spill] sm:$0xff] %v8171_v9  ;;  %v8210_v13 = vpop.eup %4143  ;;  %v8280_v53 = vmul.f32 %v8167_v5, %v7470_v34  ;;  %v8284_v20 = vmul.f32 %v8177_v28, %v7472_v19  ;;  %v8294_v42 = vmul.f32 %v8194_v1, %v7523_v10  ;;  %v11711_v10 = vld [vmem:[#allocation213_spill] sm:$0xff]  ;;  %v11741_v22 = vld [vmem:[#allocation187_spill] sm:$0xff] }
 0x324   :  { %11667 = vst [vmem:[#allocation202_spill] sm:$0xff] %v8177_v28  ;;  %v8224_v37 = vpop.eup %4145  ;;  %v8235_v11 = vsel %vm659_vm0, %v1874_v44, 0.0  ;;  %v8254_v44 = vsel %vm659_vm0, %v1875_v56, 0.0  ;;  %v8298_v34 = vmul.f32 %v8210_v13, %v7534_v46  ;;  %v11708_v28 = vld [vmem:[#allocation97_spill] sm:$0xff]  ;;  %v11712_v46 = vld [vmem:[#allocation71_spill] sm:$0xff]  ;;  %vm2598_vm5 = vweird.f32 %v11741_v22 }
 0x325   :  { %11668 = vst [vmem:[#allocation166_spill] sm:$0xff] %v8181_v27  ;;  %v8237_v24 = vpop.eup %4147  ;;  %v8288_v43 = vpop.xlane.xlu2 %1556  ;;  %v8302_v19 = vmul.f32 %v8224_v37, %v7536_v15  ;;  %v11748_v27 = vld [vmem:[#allocation105_spill] sm:$0xff] }
 0x326   :  { %11669 = vst [vmem:[#allocation33_spill] sm:$0xff] %v8190_v23  ;;  %v8256_v7 = vpop.eup %4149  ;;  %1973 = vadd.xlane.f32.xlu0 %v11697_v52  ;;  %v11703_v52 = vld [vmem:[#allocation225_spill] sm:$0xff] }
 0x327   :  { %11672 = vst [vmem:[#allocation230_spill] sm:$0xff] %v8194_v1  ;;  %v8272_v56 = vpop.eup %4151  ;;  %v1687_v1 = vsub.f32 %v11711_v10, %v7732_v39  ;;  %v8332_v39 = vmax.f32 %v1684_v62, 0.0 }
 0x328   :  { %11673 = vst [vmem:[#allocation203_spill] sm:$0xff] %v8198_v60  ;;  %v8330_v10 = vmul.f32 %v8272_v56, %v7610_v55 }
 0x329   :  { %11674 = vst [vmem:[#allocation229_spill] sm:$0xff] %v8202_v45 }
 0x32a   :  { %11675 = vst [vmem:[#allocation49_spill] sm:$0xff] %v8205_v12  ;;  %v11752_v12 = vld [vmem:[#allocation174_spill] sm:$0xff] }
 0x32b   :  { %11676 = vst [vmem:[#allocation228_spill] sm:$0xff] %v8208_v2  ;;  %v11751_v2 = vld [vmem:[#allocation135_spill] sm:$0xff] }
 0x32c   :  { %11677 = vst [vmem:[#allocation212_spill] sm:$0xff] %v8210_v13  ;;  %v1689_v13 = vsub.f32 %v11712_v46, %v7747_v40  ;;  %v1699_v9 = vsub.f32 %v11752_v12, %v11751_v2  ;;  %v11757_v2 = vld [vmem:[#allocation141_spill] sm:$0xff] }
 0x32d   :  { %11678 = vst [vmem:[#allocation234_spill] sm:$0xff] %v8213_v14 }
 0x32e   :  { %11679 = vst [vmem:[#allocation219_spill] sm:$0xff] %v8216_v59 }
 0x32f   :  { %11680 = vst [vmem:[#allocation233_spill] sm:$0xff] %v8219_v57 }
 0x330   :  { %11681 = vst [vmem:[#allocation55_spill] sm:$0xff] %v8222_v63 }
 0x331   :  { %11682 = vst [vmem:[#allocation65_spill] sm:$0xff] %v8224_v37  ;;  %v8318_v37 = vpop.xlane.xlu1 %1562 }
 0x332   :  { %11683 = vst [vmem:[#allocation57_spill] sm:$0xff] %v8228_v30 }
 0x333   :  { %11685 = vst [vmem:[#allocation235_spill] sm:$0xff] %v8232_v25  ;;  %v11742_v25 = vld [vmem:[#allocation103_spill] sm:$0xff] }
 0x334   :  { %11686 = vst [vmem:[#allocation227_spill] sm:$0xff] %v8235_v11  ;;  %v2594_v60 = vmul.f32 %v11742_v25, %v11741_v22 }
 0x335   :  { %11687 = vst [vmem:[#allocation150_spill] sm:$0xff] %v8237_v24 }
 0x336   :  { %11688 = vst [vmem:[#allocation240_spill] sm:$0xff] %v8241_v47  ;;  %v11733_v47 = vld [vmem:[#allocation27_spill] sm:$0xff]  ;;  %v2595_v14 = vsub.f32 1.0, %v2594_v60 }
 0x337   :  { %11689 = vst [vmem:[#allocation241_spill] sm:$0xff] %v8245_v54 }
 0x338   :  { %11690 = vst [vmem:[#allocation242_spill] sm:$0xff] %v8249_v49  ;;  %v11698_v49 = vld [vmem:[#allocation152_spill] sm:$0xff] }
 0x339   :  { %17 = vst.msk [vmem:[#allocation2] sm:$0xff] %vm16_vm9, %v11691_v41  ;;  %1976 = vadd.xlane.f32.xlu1 %v11698_v49  ;;  %v1686_v49 = vsub.f32 %v11704_v61, %v11703_v52  ;;  %v8310_v61 = vmul.f32 %v8237_v24, %v7586_v4  ;;  %v11719_v4 = vld [vmem:[#allocation35_spill] sm:$0xff]  ;;  %v11727_v24 = vld [vmem:[#allocation220_spill] sm:$0xff] }
 0x33a   :  { %11692 = vst [vmem:[#allocation243_spill] sm:$0xff] %v8254_v44  ;;  %v1691_v55 = vsub.f32 %v11719_v4, %v7835_v17  ;;  %v8360_v4 = vmax.f32 %v1689_v13, 0.0  ;;  %v11736_v44 = vld [vmem:[#allocation126_spill] sm:$0xff] }
 0x33b   :  { %11693 = vst [vmem:[#allocation244_spill] sm:$0xff] %v8256_v7  ;;  %v8338_v40 = vmax.f32 %v1686_v49, 0.0 }
 0x33c   :  { %11694 = vst [vmem:[#allocation245_spill] sm:$0xff] %v8260_v16 }
 0x33d   :  { %11695 = vst [vmem:[#allocation246_spill] sm:$0xff] %v8264_v51  ;;  %v11730_v51 = vld [vmem:[#allocation117_spill] sm:$0xff] }
 0x33e   :  { %18 = vst.msk [vmem:[#allocation2 + $0x8] sm:$0xff] %vm16_vm9, %v11691_v41  ;;  %v1696_v16 = vsub.f32 %v11731_v8, %v11730_v51  ;;  %v11734_v51 = vld [vmem:[#allocation73_spill] sm:$0xff]  ;;  %v11735_v8 = vld [vmem:[#allocation48_spill] sm:$0xff] }
 0x33f   :  { %11699 = vst [vmem:[#allocation206_spill] sm:$0xff] %v8272_v56  ;;  %v11720_v56 = vld [vmem:[#allocation31_spill] sm:$0xff]  ;;  %v2579_v31 = vmul.f32 %v11735_v8, %v11734_v51  ;;  %vm2583_vm4 = vweird.f32 %v11734_v51  ;;  %v2587_v12 = vand.u32 2147483647, %v11734_v51 }
 0x340   :  { %11700 = vst [vmem:[#allocation34_spill] sm:$0xff] %v8276_v58 }
 0x341   :  { %11701 = vst [vmem:[#allocation152_spill] sm:$0xff] %v8280_v53  ;;  %v8381_v53 = vmax.f32 %v1691_v55, 0.0  ;;  %vm8552_vm8 = vcmp.eq.f32.partialorder %v2587_v12, 8.507059e+37 }
 0x342   :  { %11702 = vst [vmem:[#allocation247_spill] sm:$0xff] %v8284_v20  ;;  %v11709_v20 = vld [vmem:[#allocation76_spill] sm:$0xff] }
 0x343   :  { %19 = vst.msk [vmem:[#allocation2 + $0x10] sm:$0xff] %vm16_vm9, %v11691_v41  ;;  %v1685_v52 = vsub.f32 %v11709_v20, %v11708_v28  ;;  %v8326_v28 = vmul.f32 %v8256_v7, %v7608_v33  ;;  %v11718_v33 = vld [vmem:[#allocation223_spill] sm:$0xff] }
 0x344   :  { %11705 = vst [vmem:[#allocation225_spill] sm:$0xff] %v8294_v42  ;;  %v1692_v7 = vsub.f32 %v11718_v33, %v7833_v21  ;;  %v8358_v33 = vmax.f32 %v1687_v1, 0.0  ;;  %v11723_v21 = vld [vmem:[#allocation82_spill] sm:$0xff] }
 0x345   :  { %11706 = vst [vmem:[#allocation26_spill] sm:$0xff] %v8298_v34  ;;  %v11713_v34 = vld [vmem:[#allocation177_spill] sm:$0xff]  ;;  %v8348_v62 = vmax.f32 %v1685_v52, 0.0  ;;  %v11725_v52 = vld [vmem:[#allocation32_spill] sm:$0xff]  ;;  %v11728_v42 = vld [vmem:[#allocation86_spill] sm:$0xff]  ;;  %vm2568_vm11 = vweird.f32 %v11723_v21 }
 0x346   :  { %11707 = vst [vmem:[#allocation248_spill] sm:$0xff] %v8302_v19  ;;  %v1688_v15 = vsub.f32 %v11713_v34, %v7749_v35  ;;  %v8320_v19 = vpop.xlane.xlu0 %1559  ;;  %v11716_v34 = vld [vmem:[#allocation194_spill] sm:$0xff]  ;;  %v11717_v35 = vld [vmem:[#allocation56_spill] sm:$0xff]  ;;  %1979 = vadd.xlane.f32.xlu0 %v11728_v42  ;;  %v8379_v5 = vmax.f32 %v1692_v7, 0.0  ;;  %vm8533_vm7 = vmor %vm2568_vm11, %vm2569_vm1 }
 0x347   :  { %20 = vst.msk [vmem:[#allocation2 + $0x18] sm:$0xff] %vm16_vm9, %v11691_v41  ;;  %v2534_v46 = vmul.f32 %v7695_v18, %v11716_v34  ;;  %v1690_v20 = vsub.f32 %v11717_v35, %v7814_v3  ;;  %v11722_v3 = vld [vmem:[#allocation10_spill] sm:$0xff]  ;;  %v11726_v35 = vld [vmem:[#allocation112_spill] sm:$0xff]  ;;  %v2544_v42 = vand.u32 2147483648, %v11716_v34  ;;  %vm2538_vm0 = vweird.f32 %v11716_v34 }
 0x348   :  { %11710 = vst [vmem:[#allocation97_spill] sm:$0xff] %v8310_v61  ;;  %v2549_v49 = vmul.f32 %v7713_v38, %v11722_v3  ;;  %4153 = vlog2.f32 %v11722_v3  ;;  %v8362_v17 = vmax.f32 %v1688_v15, 0.0  ;;  %v1694_v61 = vsub.f32 %v11727_v24, %v11726_v35  ;;  %v11729_v1 = vld [vmem:[#allocation210_spill] sm:$0xff]  ;;  %vm8486_vm3 = vmor %vm2538_vm0, %vm2539_vm13 }
 0x349   :  { %21 = vst.msk [vmem:[#allocation2 + $0x20] sm:$0xff] %vm16_vm9, %v11691_v41  ;;  %1592 = vadd.xlane.f32.xlu1 %v11729_v1  ;;  %v2535_v15 = vsub.f32 1.0, %v2534_v46  ;;  %4155 = vlog2.f32 %v11723_v21  ;;  %v8377_v13 = vmax.f32 %v1690_v20, 0.0  ;;  %v2542_v46 = vand.u32 2147483647, %v11716_v34 }
 0x34a   :  { %11714 = vst [vmem:[#allocation76_spill] sm:$0xff] %v8326_v28  ;;  %v11721_v28 = vld [vmem:[#allocation180_spill] sm:$0xff]  ;;  %v2550_v20 = vsub.f32 1.0, %v2549_v49  ;;  %v2559_v7 = vand.u32 2147483648, %v11722_v3  ;;  %v2574_v1 = vand.u32 2147483648, %v11723_v21  ;;  %v8405_v49 = vmax.f32 %v1694_v61, 0.0 }
 0x34b   :  { %11715 = vst [vmem:[#allocation213_spill] sm:$0xff] %v8330_v10  ;;  %v1693_v10 = vsub.f32 %v11720_v56, %v7897_v26  ;;  %1589 = vadd.xlane.f32.xlu2 %v11721_v28  ;;  %v2564_v26 = vmul.f32 %v7724_v32, %v11723_v21  ;;  %v11724_v56 = vld [vmem:[#allocation113_spill] sm:$0xff]  ;;  %v2536_v54 = vmul.f32 %v7695_v18, %v2535_v15  ;;  %vm2553_vm10 = vweird.f32 %v11722_v3  ;;  %v11737_v15 = vld [vmem:[#allocation192_spill] sm:$0xff] }
 0x34c   :  { %22 = vst.msk [vmem:[#allocation2 + $0x28] sm:$0xff] %vm16_vm9, %v11691_v41  ;;  %v1695_v28 = vsub.f32 %v11725_v52, %v11724_v56  ;;  %v8383_v56 = vpop.xlane.xlu2 %1565  ;;  %v8394_v52 = vpop.xlane.xlu1 %1571  ;;  %v2572_v61 = vand.u32 2147483647, %v11723_v21  ;;  %v1697_v11 = vsub.f32 %v11737_v15, %v11736_v44  ;;  %vm8428_vm12 = vcmp.eq.f32.partialorder %v2542_v46, 8.507059e+37  ;;  %vm8514_vm6 = vmor %vm2553_vm10, %vm2554_vm15  ;;  %v11771_v21 = vld [vmem:[#allocation163_spill] sm:$0xff] }
 0x34d   :  { %23 = vst.msk [vmem:[#allocation2 + $0x30] sm:$0xff] %vm16_vm9, %v11691_v41  ;;  %v8388_v24 = vmax.f32 %v1693_v10, 0.0  ;;  %v2557_v10 = vand.u32 2147483647, %v11722_v3  ;;  %v2565_v35 = vsub.f32 1.0, %v2564_v26  ;;  %v1698_v26 = vsub.f32 %v11733_v47, %v11732_v29 }
 0x34e   :  { %24 = vst.msk [vmem:[#allocation2 + $0x38] sm:$0xff] %vm16_vm9, %v11691_v41  ;;  %v8396_v55 = vpop.xlane.xlu0 %1568  ;;  %v4154_v50 = vpop.eup %4153  ;;  %v8403_v58 = vmax.f32 %v1695_v28, 0.0  ;;  %v8417_v28 = vor.u32 1.1754944e-38, %v2544_v42  ;;  %v2551_v47 = vmul.f32 %v7713_v38, %v2550_v20  ;;  %v8433_v42 = vor.u32 1.1754944e-38, %v2559_v7  ;;  %1595 = vadd.xlane.f32.xlu0 %v11743_v0  ;;  %v11744_v20 = vld [vmem:[#allocation208_spill] sm:$0xff] }
 0x34f   :  { %25 = vst.msk [vmem:[#allocation2 + $0x40] sm:$0xff] %vm16_vm9, %v11691_v41  ;;  %v4156_v30 = vpop.eup %4155  ;;  %v8441_v44 = vor.u32 1.1754944e-38, %v2574_v1  ;;  %v1301_v46 = vmul.f32 0.6931472, %v4154_v50  ;;  %v8443_v15 = vmax.f32 %v1696_v16, 0.0  ;;  %v2537_v7 = vadd.f32 %v7695_v18, %v2536_v54  ;;  %v11747_v1 = vld [vmem:[#allocation9_spill] sm:$0xff] }
 0x350   :  { %26 = vst.msk [vmem:[#allocation2 + $0x48] sm:$0xff] %vm16_vm9, %v11691_v41  ;;  %vm8450_vm14 = vcmp.eq.f32.partialorder %v2557_v10, 8.507059e+37  ;;  %v2609_v50 = vmul.f32 %v11748_v27, %v11747_v1  ;;  %vm8463_vm2 = vcmp.eq.f32.partialorder %v2572_v61, 8.507059e+37  ;;  %v2580_v54 = vsub.f32 1.0, %v2579_v31 }
 0x351   :  { %27 = vst.msk [vmem:[#allocation2 + $0x50] sm:$0xff] %vm16_vm9, %v11691_v41  ;;  %1985 = vadd.xlane.f32.xlu1 %v11744_v20  ;;  %v1303_v10 = vmul.f32 0.6931472, %v4156_v30  ;;  %v8467_v20 = vmax.f32 %v1698_v26, 0.0  ;;  %v8469_v57 = vmax.f32 %v1697_v11, 0.0  ;;  %v2552_v59 = vadd.f32 %v7713_v38, %v2551_v47  ;;  %v11755_v30 = vld [vmem:[#allocation121_spill] sm:$0xff] }
 0x352   :  { %28 = vst.msk [vmem:[#allocation2 + $0x58] sm:$0xff] %vm16_vm9, %v11691_v41  ;;  %v8492_v11 = vadd.f32 %v1301_v46, %v11755_v30  ;;  %v11758_v26 = vld [vmem:[#allocation195_spill] sm:$0xff]  ;;  %v2541_v34 = vsel %vm8486_vm3, %v7695_v18, %v2537_v7  ;;  %v11759_v46 = vld [vmem:[#allocation92_spill] sm:$0xff]  ;;  %v2581_v18 = vmul.f32 %v11735_v8, %v2580_v54  ;;  %4157 = vlog2.f32 %v11734_v51 }
 0x353   :  { %29 = vst.msk [vmem:[#allocation2 + $0x60] sm:$0xff] %vm16_vm9, %v11691_v41  ;;  %1982 = vadd.xlane.f32.xlu2 %v11738_v6  ;;  %v2566_v6 = vmul.f32 %v7724_v32, %v2565_v35  ;;  %v2589_v35 = vand.u32 2147483648, %v11734_v51  ;;  %v1701_v47 = vsub.f32 %v11758_v26, %v11757_v2  ;;  %v11760_v30 = vld [vmem:[#allocation83_spill] sm:$0xff]  ;;  %v11763_v7 = vld [vmem:[#allocation124_spill] sm:$0xff]  ;;  %v2556_v3 = vsel %vm8514_vm6, %v7713_v38, %v2552_v59  ;;  %v11798_v51 = vld [vmem:[#allocation22_spill] sm:$0xff] }
 0x354   :  { %30 = vst.msk [vmem:[#allocation2 + $0x68] sm:$0xff] %vm16_vm9, %v11691_v41  ;;  %v8457_v16 = vpop.xlane.xlu2 %1574  ;;  %v8476_v45 = vpop.xlane.xlu1 %1580  ;;  %v2602_v31 = vand.u32 2147483647, %v11741_v22  ;;  %v2604_v26 = vand.u32 2147483648, %v11741_v22  ;;  %v8547_v38 = vsel %vm8428_vm12, %v8417_v28, %v2541_v34  ;;  %vm2584_vm0 = vweird.f32 %v11735_v8  ;;  %v11776_v34 = vld [vmem:[#allocation64_spill] sm:$0xff] }
 0x355   :  { %31 = vst.msk [vmem:[#allocation2 + $0x70] sm:$0xff] %vm16_vm9, %v11691_v41  ;;  %v2567_v60 = vadd.f32 %v7724_v32, %v2566_v6  ;;  %v8503_v23 = vor.u32 1.1754944e-38, %v2589_v35  ;;  %v2610_v6 = vsub.f32 1.0, %v2609_v50  ;;  %v8520_v35 = vadd.f32 %v1303_v10, %v11763_v7  ;;  %v11765_v50 = vld [vmem:[#allocation188_spill] sm:$0xff]  ;;  %v11773_v7 = vld [vmem:[#allocation171_spill] sm:$0xff]  ;;  %vm8617_vm13 = vmor %vm2583_vm4, %vm2584_vm0 }
 0x356   :  { %32 = vst.msk [vmem:[#allocation2 + $0x78] sm:$0xff] %vm16_vm9, %v11691_v41  ;;  %v8478_v61 = vpop.xlane.xlu0 %1577  ;;  %v2596_v10 = vmul.f32 %v11742_v25, %v2595_v14  ;;  %v8558_v2 = vmax.f32 %v1701_v47, 0.0  ;;  %1988 = vadd.xlane.f32.xlu0 %v11773_v7  ;;  %4159 = vlog2.f32 %v11741_v22  ;;  %v2582_v12 = vadd.f32 %v11735_v8, %v2581_v18  ;;  %v11779_v18 = vld [vmem:[#allocation89_spill] sm:$0xff] }
 0x357   :  { %33 = vst.msk [vmem:[#allocation2 + $0x80] sm:$0xff] %vm16_vm9, %v11691_v41  ;;  %v2571_v59 = vsel %vm8533_vm7, %v7724_v32, %v2567_v60  ;;  %v2611_v32 = vmul.f32 %v11748_v27, %v2610_v6  ;;  %v8576_v60 = vsel %vm8450_vm14, %v8433_v42, %v2556_v3  ;;  %v2617_v47 = vand.u32 2147483647, %v11747_v1  ;;  %v11777_v6 = vld [vmem:[#allocation29_spill] sm:$0xff]  ;;  %v8594_v42 = vld [vmem:[%s10406_s1] sm:$0xff] }
 0x358   :  { %34 = vst.msk [vmem:[#allocation2 + $0x88] sm:$0xff] %vm16_vm9, %v11691_v41  ;;  %v1702_v54 = vsub.f32 %v11777_v6, %v11776_v34  ;;  %v2597_v7 = vadd.f32 %v11742_v25, %v2596_v10  ;;  %vm2599_vm10 = vweird.f32 %v11742_v25  ;;  %v4158_v63 = vpop.eup %4157  ;;  %vm209_vm11 = vcmp.ge.s32.totalorder %v8594_v42, 0  ;;  %v11783_v34 = vld [vmem:[#allocation84_spill] sm:$0xff] }
 0x359   :  { %35 = vst.msk [vmem:[#allocation2 + $0x90] sm:$0xff] %vm16_vm9, %v11691_v41  ;;  %v1704_v3 = vsub.f32 %v11779_v18, %v8184_v48  ;;  %vm8603_vm12 = vcmp.eq.f32.partialorder %v2602_v31, 8.507059e+37  ;;  %v2619_v10 = vand.u32 2147483648, %v11747_v1  ;;  %v1703_v6 = vsub.f32 %v11783_v34, %v8186_v36  ;;  %vm8632_vm15 = vmor %vm2598_vm5, %vm2599_vm10 }
 0x35a   :  { %36 = vst.msk [vmem:[#allocation2 + $0x98] sm:$0xff] %vm16_vm9, %v11691_v41  ;;  %v2612_v31 = vadd.f32 %v11748_v27, %v2611_v32  ;;  %vm2614_vm14 = vweird.f32 %v11748_v27  ;;  %v2586_v36 = vsel %vm8617_vm13, %v11735_v8, %v2582_v12  ;;  %vm2613_vm1 = vweird.f32 %v11747_v1  ;;  %v11791_v8 = vld [vmem:[#allocation156_spill] sm:$0xff] }
 0x35b   :  { %37 = vst.msk [vmem:[#allocation2 + $0xa0] sm:$0xff] %vm16_vm9, %v11691_v41  ;;  %1598 = vadd.xlane.f32.xlu2 %v11765_v50  ;;  %v11774_v50 = vld [vmem:[#allocation216_spill] sm:$0xff]  ;;  %v8641_v18 = vmax.f32 %v1702_v54, 0.0  ;;  %v2601_v22 = vsel %vm8632_vm15, %v11742_v25, %v2597_v7  ;;  %vm2628_vm3 = vweird.f32 %v11771_v21  ;;  %v8650_v12 = vmax.f32 %v1704_v3, 0.0  ;;  %vm8656_vm4 = vmor %vm2613_vm1, %vm2614_vm14  ;;  %v11795_v3 = vld [vmem:[#allocation193_spill] sm:$0xff] }
 0x35c   :  { %11756 = vst [vmem:[#allocation71_spill] sm:$0xff] %v8492_v11  ;;  %v1700_v11 = vsub.f32 %v11760_v30, %v11759_v46  ;;  %v8540_v46 = vmax.f32 %v1699_v9, 0.0  ;;  %v11772_v30 = vld [vmem:[#allocation107_spill] sm:$0xff]  ;;  %1601 = vadd.xlane.f32.xlu1 %v11774_v50  ;;  %v8569_v29 = vpop.xlane.xlu2 %1583  ;;  %v1878_v0 = vpop.xlane.xlu1 %1877  ;;  %v2620_v54 = vor.u32 1.1754944e-38, %v2619_v10  ;;  %v2632_v34 = vand.u32 2147483647, %v11771_v21 }
 0x35d   :  { %38 = vst.msk [vmem:[#allocation2 + $0xa8] sm:$0xff] %vm16_vm9, %v11691_v41  ;;  %v2624_v9 = vmul.f32 %v11772_v30, %v11771_v21  ;;  %v4160_v32 = vpop.eup %4159  ;;  %v8662_v25 = vmax.f32 %v1703_v6, 0.0  ;;  %v8671_v48 = vsel %vm8552_vm8, %v8503_v23, %v2586_v36  ;;  %v2616_v10 = vsel %vm8656_vm4, %v11748_v27, %v2612_v31  ;;  %v11799_v27 = vld [vmem:[#allocation109_spill] sm:$0xff] }
 0x35e   :  { %39 = vst.msk [vmem:[#allocation2 + $0xb0] sm:$0xff] %vm16_vm9, %v11691_v41  ;;  %v8567_v28 = vmax.f32 %v1700_v11, 0.0  ;;  %v8587_v11 = vsel %vm8463_vm2, %v8441_v44, %v2571_v59  ;;  %v8599_v50 = vpop.xlane.xlu0 %1586  ;;  %vm8637_vm2 = vcmp.eq.f32.partialorder %v2617_v47, 8.507059e+37  ;;  %v1307_v23 = vmul.f32 0.6931472, %v4160_v32  ;;  %v8701_v44 = vld [vmem:[%s10406_s1 + $0x10] sm:$0xff] }
 0x35f   :  { %11764 = vst [vmem:[#allocation177_spill] sm:$0xff] %v8520_v35  ;;  %v2625_v59 = vsub.f32 1.0, %v2624_v9  ;;  %v11784_v35 = vld [vmem:[#allocation44_spill] sm:$0xff]  ;;  %v2634_v36 = vand.u32 2147483648, %v11771_v21  ;;  %v2639_v31 = vmul.f32 %v11799_v27, %v11798_v51  ;;  %vm2629_vm6 = vweird.f32 %v11772_v30  ;;  %v11803_v32 = vld [vmem:[#allocation50_spill] sm:$0xff]  ;;  %v11809_v9 = vld [vmem:[#allocation127_spill] sm:$0xff] }
 0x360   :  { %40 = vst.msk [vmem:[#allocation2 + $0xb8] sm:$0xff] %vm16_vm9, %v11691_v41  ;;  %vm211_vm7 = vcmp.ge.s32.totalorder %v8701_v44, 0  ;;  %vm8719_vm0 = vcmp.eq.f32.partialorder %v2632_v34, 8.507059e+37  ;;  %4161 = vlog2.f32 %v11747_v1  ;;  %vm8751_vm10 = vmor %vm2628_vm3, %vm2629_vm6  ;;  %vm2644_vm13 = vweird.f32 %v11799_v27 }
 0x361   :  { %41 = vst.msk [vmem:[#allocation2 + $0xc0] sm:$0xff] %vm16_vm9, %v11691_v41  ;;  %v2640_v34 = vsub.f32 1.0, %v2639_v31  ;;  %4163 = vlog2.f32 %v11771_v21 }
 0x362   :  { %11768 = vst [vmem:[#allocation194_spill] sm:$0xff] %v8547_v38  ;;  %4165 = vlog2.f32 %v11798_v51 }
 0x363   :  { %42 = vst.msk [vmem:[#allocation2 + $0xc8] sm:$0xff] %vm16_vm9, %v11691_v41  ;;  %1991 = vadd.xlane.f32.xlu2 %v11791_v8  ;;  %v11800_v8 = vld [vmem:[#allocation221_spill] sm:$0xff] }
 0x364   :  { %43 = vst.msk [vmem:[#allocation2 + $0xd0] sm:$0xff] %vm16_vm9, %v11691_v41  ;;  %1994 = vadd.xlane.f32.xlu1 %v11795_v3  ;;  %v1881_v6 = vpop.xlane.xlu2 %1880 }
 0x365   :  { %11775 = vst [vmem:[#allocation56_spill] sm:$0xff] %v8576_v60  ;;  %v2097_v47 = vmul.f32 %v11800_v8, %v1881_v6  ;;  %v8716_v6 = vsel %vm8637_vm2, %v2620_v54, %v2616_v10  ;;  %v11808_v60 = vld [vmem:[#allocation21_spill] sm:$0xff]  ;;  %v8731_v54 = vadd.f32 %v1307_v23, %v11809_v9  ;;  %v2647_v9 = vand.u32 2147483647, %v11798_v51 }
 0x366   :  { %44 = vst.msk [vmem:[#allocation2 + $0xd8] sm:$0xff] %vm16_vm9, %v11691_v41  ;;  %v11812_v23 = vld [vmem:[#allocation53_spill] sm:$0xff] }
 0x367   :  { %11778 = vst [vmem:[#allocation223_spill] sm:$0xff] %v8587_v11  ;;  %v2082_v11 = vmul.f32 %v11784_v35, %v1878_v0  ;;  %v2605_v35 = vor.u32 1.1754944e-38, %v2604_v26  ;;  %v1305_v26 = vmul.f32 0.6931472, %v4158_v63  ;;  %v11794_v63 = vld [vmem:[#allocation217_spill] sm:$0xff]  ;;  %vm8833_vm1 = vcmp.eq.f32.partialorder %v2647_v9, 8.507059e+37 }
 0x368   :  { %11780 = vst [vmem:[#allocation35_spill] sm:$0xff] %v8599_v50  ;;  %1604 = vadd.xlane.f32.xlu0 %v11794_v63  ;;  %v11801_v63 = vld [vmem:[#allocation125_spill] sm:$0xff]  ;;  %v11840_v50 = vld [vmem:[#allocation98_spill] sm:$0xff] }
 0x369   :  { %45 = vst.msk [vmem:[#allocation2 + $0xe0] sm:$0xff] %vm16_vm9, %v11691_v41  ;;  %v3028_v0 = vsub.f32 1.0, %v2082_v11  ;;  %v2626_v11 = vmul.f32 %v11772_v30, %v2625_v59  ;;  %v8679_v59 = vld [vmem:[%s10406_s1 + $0x8] sm:$0xff]  ;;  %v8686_v14 = vsel %vm8603_vm12, %v2605_v35, %v2601_v22  ;;  %v8695_v3 = vadd.f32 %v1305_v26, %v11801_v63  ;;  %v8707_v35 = vld [vmem:[%s10406_s1 + $0x18] sm:$0xff]  ;;  %v1884_v26 = vpop.xlane.xlu0 %1883 }
 0x36a   :  { %46 = vst.msk [vmem:[#allocation2 + $0xe8] sm:$0xff] %vm16_vm9, %v11691_v41  ;;  %vm210_vm5 = vcmp.ge.s32.totalorder %v8679_v59, 0  ;;  %vm212_vm8 = vcmp.ge.s32.totalorder %v8707_v35, 0  ;;  %v1705_v22 = vsub.f32 %v11803_v32, %v8288_v43  ;;  %v3029_v43 = vsub.f32 1.0, %v2097_v47  ;;  %v11807_v32 = vld [vmem:[#allocation85_spill] sm:$0xff] }
 0x36b   :  { %47 = vst.msk [vmem:[#allocation2 + $0xf0] sm:$0xff] %vm16_vm9, %v11691_v41  ;;  %v3092_v7 = vmax.f32 %v3028_v0, 0.0  ;;  %v2627_v8 = vadd.f32 %v11772_v30, %v2626_v11  ;;  %v2635_v11 = vor.u32 1.1754944e-38, %v2634_v36  ;;  %v11813_v36 = vld [vmem:[#allocation36_spill] sm:$0xff]  ;;  %v8848_v9 = vld [vmem:[%s10406_s1 + $0x38] sm:$0xff] }
 0x36c   :  { %48 = vst.msk [vmem:[#allocation2 + $0xf8] sm:$0xff] %vm16_vm9, %v11691_v41  ;;  %v3093_v10 = vmax.f32 %v3029_v43, 0.0  ;;  %v1706_v1 = vsub.f32 %v11813_v36, %v8320_v19  ;;  %v11817_v19 = vld [vmem:[#allocation222_spill] sm:$0xff]  ;;  %v1890_v43 = vpop.xlane.xlu2 %1889  ;;  %vm216_vm3 = vcmp.ge.s32.totalorder %v8848_v9, 0 }
 0x36d   :  { %49 = vst.msk [vmem:[#allocation2 + $0x100] sm:$0xff] %vm16_vm9, %v11691_v41  ;;  %v3156_v0 = vmul.f32 %v3092_v7, %v3092_v7  ;;  %v1887_v7 = vpop.xlane.xlu1 %1886  ;;  %1610 = vadd.xlane.f32.xlu1 %v11817_v19  ;;  %v11824_v19 = vld [vmem:[#allocation178_spill] sm:$0xff] }
 0x36e   :  { %50 = vst.msk [vmem:[#allocation2 + $0x108] sm:$0xff] %vm16_vm9, %v11691_v41  ;;  %v2127_v38 = vmul.f32 %v11808_v60, %v1887_v7  ;;  %v11811_v60 = vld [vmem:[#allocation197_spill] sm:$0xff]  ;;  %v1707_v7 = vsub.f32 %v11812_v23, %v8318_v37  ;;  %v3157_v42 = vmul.f32 %v3093_v10, %v3093_v10  ;;  %v8780_v36 = vmax.f32 %v1706_v1, 0.0 }
 0x36f   :  { %11796 = vst [vmem:[#allocation31_spill] sm:$0xff] %v8671_v48  ;;  %v2112_v48 = vmul.f32 %v11807_v32, %v1884_v26  ;;  %1607 = vadd.xlane.f32.xlu2 %v11811_v60  ;;  %v8739_v26 = vmax.f32 %v1705_v22, 0.0  ;;  %v8766_v22 = vld [vmem:[%s10406_s1 + $0x20] sm:$0xff]  ;;  %v2641_v32 = vmul.f32 %v11799_v27, %v2640_v34  ;;  %v4162_v60 = vpop.eup %4161 }
 0x370   :  { %51 = vst.msk [vmem:[#allocation2 + $0x110] sm:$0xff] %vm16_vm9, %v11691_v41  ;;  %v3031_v47 = vsub.f32 1.0, %v2127_v38  ;;  %vm213_vm12 = vcmp.ge.s32.totalorder %v8766_v22, 0  ;;  %v8778_v23 = vmax.f32 %v1707_v7, 0.0  ;;  %v8799_v7 = vld [vmem:[%s10406_s1 + $0x30] sm:$0xff] }
 0x371   :  { %11797 = vst [vmem:[#allocation180_spill] sm:$0xff] %v8686_v14  ;;  %v3284_v14 = vld [vmem:[#allocation2] sm:$0xff]  ;;  %v1893_v34 = vpop.xlane.xlu0 %1892  ;;  %vm215_vm15 = vcmp.ge.s32.totalorder %v8799_v7, 0 }
 0x372   :  { %52 = vst.msk [vmem:[#allocation2 + $0x118] sm:$0xff] %vm16_vm9, %v11691_v41 }
 0x373   :  { %11802 = vst [vmem:[#allocation10_spill] sm:$0xff] %v8695_v3  ;;  %v3220_v3 = vmul.f32 %v3156_v0, %v8332_v39  ;;  %v3030_v0 = vsub.f32 1.0, %v2112_v48  ;;  %v3095_v48 = vmax.f32 %v3031_v47, 0.0 }
 0x374   :  { %53 = vst.msk [vmem:[#allocation2 + $0x120] sm:$0xff] %vm16_vm9, %v11691_v41 }
 0x375   :  { %11804 = vst [vmem:[#allocation82_spill] sm:$0xff] %v8716_v6  ;;  %v3348_v39 = vsel %vm209_vm11, %v3220_v3, 0.0  ;;  %v3094_v37 = vmax.f32 %v3030_v0, 0.0  ;;  %v11816_v3 = vld [vmem:[#allocation158_spill] sm:$0xff]  ;;  %vm2643_vm11 = vweird.f32 %v11798_v51  ;;  %v3159_v10 = vmul.f32 %v3095_v48, %v3095_v48  ;;  %v11818_v0 = vld [vmem:[#allocation173_spill] sm:$0xff] }
 0x376   :  { %54 = vst.msk [vmem:[#allocation2 + $0x128] sm:$0xff] %vm16_vm9, %v11691_v41  ;;  %v3412_v31 = vadd.f32 %v3348_v39, %v3284_v14  ;;  %1997 = vadd.xlane.f32.xlu0 %v11816_v3  ;;  %v2631_v14 = vsel %vm8751_vm10, %v11772_v30, %v2627_v8  ;;  %v2649_v30 = vand.u32 2147483648, %v11798_v51  ;;  %v3221_v8 = vmul.f32 %v3157_v42, %v8348_v62  ;;  %v11822_v3 = vld [vmem:[#allocation207_spill] sm:$0xff]  ;;  %v11823_v62 = vld [vmem:[#allocation110_spill] sm:$0xff]  ;;  %vm8859_vm4 = vmor %vm2643_vm11, %vm2644_vm13 }
 0x377   :  { %55 = vst.msk [vmem:[#allocation2 + $0x130] sm:$0xff] %vm16_vm9, %v11691_v41  ;;  %v3158_v39 = vmul.f32 %v3094_v37, %v3094_v37  ;;  %v2142_v47 = vmul.f32 %v11818_v0, %v1890_v43  ;;  %v8786_v38 = vsel %vm8719_vm0, %v2635_v11, %v2631_v14  ;;  %v2654_v42 = vmul.f32 %v11823_v62, %v11822_v3  ;;  %v8793_v37 = vld [vmem:[%s10406_s1 + $0x28] sm:$0xff]  ;;  %v11825_v43 = vld [vmem:[#allocation181_spill] sm:$0xff]  ;;  %v11836_v51 = vld [vmem:[#allocation18_spill] sm:$0xff] }
 0x378   :  { %11810 = vst [vmem:[#allocation113_spill] sm:$0xff] %v8731_v54  ;;  %vm214_vm14 = vcmp.ge.s32.totalorder %v8793_v37, 0  ;;  %v8806_v63 = vsel %vm210_vm5, %v3221_v8, 0.0  ;;  %v3223_v1 = vmul.f32 %v3159_v10, %v8358_v33  ;;  %v2157_v14 = vmul.f32 %v11824_v19, %v1893_v34  ;;  %v11826_v8 = vld [vmem:[#allocation176_spill] sm:$0xff]  ;;  %v1899_v19 = vpop.xlane.xlu2 %1898  ;;  %v11843_v37 = vld [vmem:[#allocation130_spill] sm:$0xff] }
 0x379   :  { %56 = vst.msk [vmem:[#allocation2 + $0x138] sm:$0xff] %vm16_vm9, %v11691_v41  ;;  %v3222_v11 = vmul.f32 %v3158_v39, %v8338_v40  ;;  %v3032_v48 = vsub.f32 1.0, %v2142_v47  ;;  %2000 = vadd.xlane.f32.xlu2 %v11826_v8  ;;  %v8829_v39 = vadd.f32 %v11799_v27, %v2641_v32  ;;  %v2655_v44 = vsub.f32 1.0, %v2654_v42  ;;  %v11829_v34 = vld [vmem:[#allocation52_spill] sm:$0xff]  ;;  %v11830_v32 = vld [vmem:[#allocation159_spill] sm:$0xff]  ;;  %v11846_v10 = vld [vmem:[#allocation54_spill] sm:$0xff] }
 0x37a   :  { %57 = vst.msk [vmem:[#allocation2 + $0x140] sm:$0xff] %vm16_vm9, %v11691_v41  ;;  %v8825_v33 = vsel %vm212_vm8, %v3223_v1, 0.0  ;;  %v3033_v21 = vsub.f32 1.0, %v2157_v14  ;;  %v2664_v35 = vand.u32 2147483648, %v11822_v3  ;;  %2003 = vadd.xlane.f32.xlu1 %v11830_v32  ;;  %vm2659_vm2 = vweird.f32 %v11823_v62  ;;  %v11831_v42 = vld [vmem:[#allocation95_spill] sm:$0xff]  ;;  %v1902_v32 = vpop.xlane.xlu0 %1901  ;;  %v11839_v54 = vld [vmem:[#allocation96_spill] sm:$0xff] }
 0x37b   :  { %58 = vst.msk [vmem:[#allocation2 + $0x148] sm:$0xff] %vm16_vm9, %v11691_v41  ;;  %v8821_v40 = vsel %vm211_vm7, %v3222_v11, 0.0  ;;  %v3096_v59 = vmax.f32 %v3032_v48, 0.0  ;;  %v1708_v11 = vsub.f32 %v11831_v42, %v8383_v56  ;;  %v1309_v14 = vmul.f32 0.6931472, %v4162_v60  ;;  %v11835_v8 = vld [vmem:[#allocation167_spill] sm:$0xff] }
 0x37c   :  { %3477 = vst.msk [vmem:[#allocation2] sm:$0xff] %vm16_vm9, %v3412_v31  ;;  %v1896_v31 = vpop.xlane.xlu1 %1895  ;;  %v3097_v1 = vmax.f32 %v3033_v21, 0.0  ;;  %vm2658_vm5 = vweird.f32 %v11822_v3  ;;  %v2646_v60 = vsel %vm8859_vm4, %v11799_v27, %v8829_v39  ;;  %v8874_v21 = vmul.f32 %v11836_v51, %v11835_v8 }
 0x37d   :  { %59 = vst.msk [vmem:[#allocation2 + $0x150] sm:$0xff] %vm16_vm9, %v11691_v41  ;;  %v2172_v0 = vmul.f32 %v11825_v43, %v1896_v31  ;;  %v3160_v47 = vmul.f32 %v3096_v59, %v3096_v59  ;;  %v2662_v31 = vand.u32 2147483647, %v11822_v3  ;;  %v2656_v27 = vmul.f32 %v11823_v62, %v2655_v44  ;;  %v11837_v43 = vld [vmem:[#allocation16_spill] sm:$0xff]  ;;  %v11838_v44 = vld [vmem:[#allocation37_spill] sm:$0xff]  ;;  %vm8966_vm10 = vmor %vm2658_vm5, %vm2659_vm2 }
 0x37e   :  { %11819 = vst [vmem:[#allocation32_spill] sm:$0xff] %v8778_v23  ;;  %1613 = vadd.xlane.f32.xlu0 %v11829_v34  ;;  %v8879_v34 = vld [vmem:[%s10406_s1 + $0x40] sm:$0xff]  ;;  %v8885_v39 = vor.u32 1.1754944e-38, %v2664_v35  ;;  %v1710_v6 = vsub.f32 %v11839_v54, %v8394_v52  ;;  %v1709_v23 = vsub.f32 %v11840_v50, %v8396_v55  ;;  %v2670_v50 = vsub.f32 1.0, %v8874_v21  ;;  %v8948_v21 = vld [vmem:[%s10406_s1 + $0x50] sm:$0xff] }
 0x37f   :  { %11820 = vst [vmem:[#allocation112_spill] sm:$0xff] %v8780_v36  ;;  %v3224_v56 = vmul.f32 %v3160_v47, %v8362_v17  ;;  %vm217_vm6 = vcmp.ge.s32.totalorder %v8879_v34, 0  ;;  %v3161_v17 = vmul.f32 %v3097_v1, %v3097_v1  ;;  %v11841_v54 = vld [vmem:[#allocation42_spill] sm:$0xff]  ;;  %v8927_v55 = vadd.f32 %v11823_v62, %v2656_v27 }
 0x380   :  { %60 = vst.msk [vmem:[#allocation2 + $0x158] sm:$0xff] %vm16_vm9, %v11691_v41  ;;  %vm8941_vm8 = vcmp.eq.f32.partialorder %v2662_v31, 8.507059e+37  ;;  %vm219_vm0 = vcmp.ge.s32.totalorder %v8948_v21, 0  ;;  %v1908_v31 = vpop.xlane.xlu2 %1907  ;;  %vm2674_vm13 = vweird.f32 %v11836_v51  ;;  %v2677_v9 = vand.u32 2147483647, %v11835_v8  ;;  %v3292_v34 = vld [vmem:[#allocation2 + $0x40] sm:$0xff] }
 0x381   :  { %11821 = vst [vmem:[#allocation220_spill] sm:$0xff] %v8786_v38  ;;  %v8814_v38 = vor.u32 1.1754944e-38, %v2649_v30  ;;  %v3034_v30 = vsub.f32 1.0, %v2172_v0  ;;  %v11834_v0 = vld [vmem:[#allocation15_spill] sm:$0xff]  ;;  %v8897_v1 = vsel %vm213_vm12, %v3224_v56, 0.0  ;;  %v3225_v36 = vmul.f32 %v3161_v17, %v8360_v4  ;;  %1616 = vadd.xlane.f32.xlu2 %v11841_v54 }
 0x382   :  { %61 = vst.msk [vmem:[#allocation2 + $0x160] sm:$0xff] %vm16_vm9, %v11691_v41  ;;  %v2187_v59 = vmul.f32 %v11834_v0, %v1899_v19  ;;  %v8890_v19 = vld [vmem:[%s10406_s1 + $0x48] sm:$0xff]  ;;  %v2202_v0 = vmul.f32 %v11837_v43, %v1902_v32  ;;  %v8951_v43 = vmax.f32 %v1710_v6, 0.0  ;;  %1619 = vadd.xlane.f32.xlu1 %v11846_v10  ;;  %v1911_v54 = vpop.xlane.xlu0 %1910  ;;  %4167 = vlog2.f32 %v11822_v3 }
 0x383   :  { %62 = vst.msk [vmem:[#allocation2 + $0x168] sm:$0xff] %vm16_vm9, %v11691_v41  ;;  %v3098_v48 = vmax.f32 %v3034_v30, 0.0  ;;  %v4164_v30 = vpop.eup %4163  ;;  %vm218_vm7 = vcmp.ge.s32.totalorder %v8890_v19, 0  ;;  %v8920_v4 = vsel %vm214_vm14, %v3225_v36, 0.0  ;;  %v8934_v36 = vadd.f32 %v1309_v14, %v11843_v37  ;;  %v8990_v37 = vld [vmem:[%s10406_s1 + $0x60] sm:$0xff]  ;;  %v9028_v19 = vld [vmem:[%s10406_s1 + $0x68] sm:$0xff] }
 0x384   :  { %63 = vst.msk [vmem:[#allocation2 + $0x170] sm:$0xff] %vm16_vm9, %v11691_v41  ;;  %v1905_v42 = vpop.xlane.xlu1 %1904  ;;  %v8909_v56 = vpop.eup %4165  ;;  %v8939_v7 = vsel %vm8833_vm1, %v8814_v38, %v2646_v60  ;;  %v8953_v14 = vmax.f32 %v1709_v23, 0.0  ;;  %v1311_v60 = vmul.f32 0.6931472, %v4164_v30  ;;  %v8974_v30 = vld [vmem:[%s10406_s1 + $0x58] sm:$0xff]  ;;  %vm221_vm12 = vcmp.ge.s32.totalorder %v8990_v37, 0 }
 0x385   :  { %64 = vst.msk [vmem:[#allocation2 + $0x178] sm:$0xff] %vm16_vm9, %v11691_v41  ;;  %v3162_v47 = vmul.f32 %v3098_v48, %v3098_v48  ;;  %v3035_v48 = vsub.f32 1.0, %v2187_v59  ;;  %v2217_v35 = vmul.f32 %v11838_v44, %v1905_v42  ;;  %v8911_v59 = vmax.f32 %v1708_v11, 0.0  ;;  %v3285_v11 = vld [vmem:[#allocation2 + $0x8] sm:$0xff]  ;;  %v11851_v23 = vld [vmem:[#allocation46_spill] sm:$0xff]  ;;  %v11877_v37 = vld [vmem:[#allocation45_spill] sm:$0xff] }
 0x386   :  { %65 = vst.msk [vmem:[#allocation2 + $0x180] sm:$0xff] %vm16_vm9, %v11691_v41  ;;  %v3036_v42 = vsub.f32 1.0, %v2202_v0  ;;  %v3286_v0 = vld [vmem:[#allocation2 + $0x10] sm:$0xff]  ;;  %vm220_vm11 = vcmp.ge.s32.totalorder %v8974_v30, 0  ;;  %vm2673_vm14 = vweird.f32 %v11835_v8  ;;  %vm9099_vm4 = vcmp.eq.f32.partialorder %v2677_v9, 8.507059e+37 }
 0x387   :  { %66 = vst.msk [vmem:[#allocation2 + $0x188] sm:$0xff] %vm16_vm9, %v11691_v41  ;;  %v3226_v22 = vmul.f32 %v3162_v47, %v8377_v13  ;;  %v3099_v32 = vmax.f32 %v3035_v48, 0.0  ;;  %v3037_v52 = vsub.f32 1.0, %v2217_v35  ;;  %v11842_v48 = vld [vmem:[#allocation199_spill] sm:$0xff]  ;;  %v3414_v10 = vadd.f32 %v8821_v40, %v3286_v0  ;;  %v11852_v0 = vld [vmem:[#allocation162_spill] sm:$0xff] }
 0x388   :  { %67 = vst.msk [vmem:[#allocation2 + $0x190] sm:$0xff] %vm16_vm9, %v11691_v41  ;;  %v3100_v47 = vmax.f32 %v3036_v42, 0.0  ;;  %2006 = vadd.xlane.f32.xlu0 %v11842_v48  ;;  %v3287_v42 = vld [vmem:[#allocation2 + $0x18] sm:$0xff]  ;;  %v8985_v48 = vmul.f32 %v11836_v51, %v2670_v50  ;;  %4169 = vlog2.f32 %v11835_v8 }
 0x389   :  { %68 = vst.msk [vmem:[#allocation2 + $0x198] sm:$0xff] %vm16_vm9, %v11691_v41  ;;  %v8924_v13 = vsel %vm215_vm15, %v3226_v22, 0.0  ;;  %v3163_v17 = vmul.f32 %v3099_v32, %v3099_v32  ;;  %v3101_v38 = vmax.f32 %v3037_v52, 0.0  ;;  %v11847_v22 = vld [vmem:[#allocation41_spill] sm:$0xff]  ;;  %2009 = vadd.xlane.f32.xlu2 %v11852_v0  ;;  %vm222_vm15 = vcmp.ge.s32.totalorder %v9028_v19, 0 }
 0x38a   :  { %69 = vst.msk [vmem:[#allocation2 + $0x1a0] sm:$0xff] %vm16_vm9, %v11691_v41  ;;  %v3164_v35 = vmul.f32 %v3100_v47, %v3100_v47  ;;  %v2232_v6 = vmul.f32 %v11847_v22, %v1908_v31  ;;  %v2661_v47 = vsel %vm8966_vm10, %v11823_v62, %v8927_v55  ;;  %v11850_v55 = vld [vmem:[#allocation87_spill] sm:$0xff]  ;;  %v3295_v0 = vld [vmem:[#allocation2 + $0x58] sm:$0xff]  ;;  %v9072_v21 = vadd.f32 %v11836_v51, %v8985_v48 }
 0x38b   :  { %70 = vst.msk [vmem:[#allocation2 + $0x1a8] sm:$0xff] %vm16_vm9, %v11691_v41  ;;  %v3227_v44 = vmul.f32 %v3163_v17, %v8381_v53  ;;  %v3413_v53 = vadd.f32 %v8806_v63, %v3285_v11  ;;  %v3165_v52 = vmul.f32 %v3101_v38, %v3101_v38  ;;  %v3288_v63 = vld [vmem:[#allocation2 + $0x20] sm:$0xff]  ;;  %v2247_v50 = vmul.f32 %v11850_v55, %v1911_v54  ;;  %v3289_v31 = vld [vmem:[#allocation2 + $0x28] sm:$0xff] }
 0x38c   :  { %71 = vst.msk [vmem:[#allocation2 + $0x1b0] sm:$0xff] %vm16_vm9, %v11691_v41  ;;  %v1914_v17 = vpop.xlane.xlu1 %1913  ;;  %v3228_v38 = vmul.f32 %v3164_v35, %v8379_v5  ;;  %v3038_v62 = vsub.f32 1.0, %v2232_v6  ;;  %v3415_v5 = vadd.f32 %v8825_v33, %v3287_v42  ;;  %v3417_v33 = vadd.f32 %v8920_v4, %v3289_v31  ;;  %v3293_v42 = vld [vmem:[#allocation2 + $0x48] sm:$0xff] }
 0x38d   :  { %72 = vst.msk [vmem:[#allocation2 + $0x1b8] sm:$0xff] %vm16_vm9, %v11691_v41  ;;  %v3355_v11 = vsel %vm216_vm3, %v3227_v44, 0.0  ;;  %v3229_v22 = vmul.f32 %v3165_v52, %v8388_v24  ;;  %v2262_v32 = vmul.f32 %v11851_v23, %v1914_v17  ;;  %v3290_v44 = vld [vmem:[#allocation2 + $0x30] sm:$0xff]  ;;  %v3039_v40 = vsub.f32 1.0, %v2247_v50  ;;  %v3291_v52 = vld [vmem:[#allocation2 + $0x38] sm:$0xff]  ;;  %v11856_v23 = vld [vmem:[#allocation190_spill] sm:$0xff] }
 0x38e   :  { %73 = vst.msk [vmem:[#allocation2 + $0x1c0] sm:$0xff] %vm16_vm9, %v11691_v41  ;;  %v3356_v35 = vsel %vm217_vm6, %v3228_v38, 0.0  ;;  %v3102_v6 = vmax.f32 %v3038_v62, 0.0  ;;  %v3416_v24 = vadd.f32 %v8897_v1, %v3288_v63  ;;  %v11854_v1 = vld [vmem:[#allocation131_spill] sm:$0xff]  ;;  %v3418_v3 = vadd.f32 %v8924_v13, %v3290_v44  ;;  %v9046_v44 = vld [vmem:[%s10406_s1 + $0x70] sm:$0xff]  ;;  %vm9093_vm3 = vmor %vm2673_vm14, %vm2674_vm13 }
 0x38f   :  { %74 = vst.msk [vmem:[#allocation2 + $0x1c8] sm:$0xff] %vm16_vm9, %v11691_v41  ;;  %v3357_v54 = vsel %vm218_vm7, %v3229_v22, 0.0  ;;  %v3040_v17 = vsub.f32 1.0, %v2262_v32  ;;  %v3103_v62 = vmax.f32 %v3039_v40, 0.0  ;;  %v9023_v63 = vadd.f32 %v1311_v60, %v11854_v1  ;;  %v11855_v32 = vld [vmem:[#allocation47_spill] sm:$0xff]  ;;  %v3294_v22 = vld [vmem:[#allocation2 + $0x50] sm:$0xff] }
 0x390   :  { %75 = vst.msk [vmem:[#allocation2 + $0x1d0] sm:$0xff] %vm16_vm9, %v11691_v41  ;;  %v3166_v38 = vmul.f32 %v3102_v6, %v3102_v6  ;;  %2012 = vadd.xlane.f32.xlu1 %v11855_v32  ;;  %v9037_v60 = vsel %vm8941_vm8, %v8885_v39, %v2661_v47  ;;  %v1313_v55 = vmul.f32 0.6931472, %v8909_v56  ;;  %v3419_v50 = vadd.f32 %v3355_v11, %v3291_v52  ;;  %v1920_v47 = vpop.xlane.xlu0 %1919  ;;  %v9057_v6 = vld [vmem:[%s10406_s1 + $0x78] sm:$0xff]  ;;  %v11858_v52 = vld [vmem:[#allocation214_spill] sm:$0xff]  ;;  %v11862_v32 = vld [vmem:[#allocation236_spill] sm:$0xff] }
 0x391   :  { %76 = vst.msk [vmem:[#allocation2 + $0x1d8] sm:$0xff] %vm16_vm9, %v11691_v41  ;;  %v3104_v4 = vmax.f32 %v3040_v17, 0.0  ;;  %vm223_vm1 = vcmp.ge.s32.totalorder %v9046_v44, 0  ;;  %v3420_v39 = vadd.f32 %v3356_v35, %v3292_v34  ;;  %v3421_v56 = vadd.f32 %v3357_v54, %v3293_v42  ;;  %v9065_v17 = vpop.eup %4167  ;;  %v9159_v44 = vld [vmem:[%s10406_s1 + $0x90] sm:$0xff] }
 0x392   :  { %77 = vst.msk [vmem:[#allocation2 + $0x1e0] sm:$0xff] %vm16_vm9, %v11691_v41  ;;  %v3230_v31 = vmul.f32 %v3166_v38, %v8405_v49  ;;  %v11857_v49 = vand.u32 2147483648, %v11835_v8  ;;  %vm224_vm2 = vcmp.ge.s32.totalorder %v9057_v6, 0  ;;  %v2292_v54 = vmul.f32 %v11858_v52, %v1920_v47  ;;  %v3296_v38 = vld [vmem:[#allocation2 + $0x60] sm:$0xff]  ;;  %v11869_v47 = vld [vmem:[#allocation61_spill] sm:$0xff]  ;;  %v11873_v8 = vld [vmem:[#allocation224_spill] sm:$0xff]  ;;  %v9164_v6 = vpop.eup %4169 }
 0x393   :  { %78 = vst.msk [vmem:[#allocation2 + $0x1e8] sm:$0xff] %vm16_vm9, %v11691_v41  ;;  %v3168_v27 = vmul.f32 %v3104_v4, %v3104_v4  ;;  %v11860_v4 = vld [vmem:[#allocation218_spill] sm:$0xff]  ;;  %v2676_v9 = vsel %vm9093_vm3, %v11836_v51, %v9072_v21  ;;  %vm227_vm7 = vcmp.ge.s32.totalorder %v9159_v44, 0  ;;  %vm2689_vm10 = vweird.f32 %v11862_v32 }
 0x394   :  { %79 = vst.msk [vmem:[#allocation2 + $0x1f0] sm:$0xff] %vm16_vm9, %v11691_v41  ;;  %v1923_v11 = vpop.xlane.xlu1 %1922  ;;  %v3358_v35 = vsel %vm219_vm0, %v3230_v31, 0.0  ;;  %v3042_v1 = vsub.f32 1.0, %v2292_v54  ;;  %1625 = vadd.xlane.f32.xlu2 %v11860_v4  ;;  %v11871_v54 = vld [vmem:[#allocation40_spill] sm:$0xff] }
 0x395   :  { %80 = vst.msk [vmem:[#allocation2 + $0x1f8] sm:$0xff] %vm16_vm9, %v11691_v41  ;;  %v11853_v41 = vld [vmem:[#allocation226_spill] sm:$0xff]  ;;  %v3422_v34 = vadd.f32 %v3358_v35, %v3294_v22  ;;  %v3232_v42 = vmul.f32 %v3168_v27, %v8443_v15  ;;  %v11863_v15 = vld [vmem:[#allocation99_spill] sm:$0xff] }
 0x396   :  { %3478 = vst.msk [vmem:[#allocation2 + $0x8] sm:$0xff] %vm16_vm9, %v3413_v53  ;;  %1622 = vadd.xlane.f32.xlu0 %v11853_v41  ;;  %v1917_v53 = vpop.xlane.xlu2 %1916  ;;  %v1711_v31 = vsub.f32 %v11863_v15, %v8457_v16  ;;  %v11872_v15 = vld [vmem:[#allocation39_spill] sm:$0xff] }
 0x397   :  { %3479 = vst.msk [vmem:[#allocation2 + $0x10] sm:$0xff] %vm16_vm9, %v3414_v10  ;;  %v3167_v10 = vmul.f32 %v3103_v62, %v3103_v62  ;;  %v2277_v13 = vmul.f32 %v11856_v23, %v1917_v53  ;;  %v11859_v62 = vld [vmem:[#allocation59_spill] sm:$0xff]  ;;  %v3106_v23 = vmax.f32 %v3042_v1, 0.0  ;;  %v3298_v1 = vld [vmem:[#allocation2 + $0x70] sm:$0xff] }
 0x398   :  { %3480 = vst.msk [vmem:[#allocation2 + $0x18] sm:$0xff] %vm16_vm9, %v3415_v5  ;;  %v9052_v5 = vor.u32 1.1754944e-38, %v11857_v49  ;;  %v2307_v41 = vmul.f32 %v11859_v62, %v1923_v11  ;;  %1628 = vadd.xlane.f32.xlu1 %v11869_v47  ;;  %v11870_v49 = vld [vmem:[#allocation133_spill] sm:$0xff] }
 0x399   :  { %3481 = vst.msk [vmem:[#allocation2 + $0x20] sm:$0xff] %vm16_vm9, %v3416_v24  ;;  %v3231_v40 = vmul.f32 %v3167_v10, %v8403_v58  ;;  %v3041_v24 = vsub.f32 1.0, %v2277_v13  ;;  %v11864_v13 = vld [vmem:[#allocation62_spill] sm:$0xff]  ;;  %v9112_v35 = vadd.f32 %v1313_v55, %v11870_v49  ;;  %v3170_v52 = vmul.f32 %v3106_v23, %v3106_v23 }
 0x39a   :  { %3482 = vst.msk [vmem:[#allocation2 + $0x28] sm:$0xff] %vm16_vm9, %v3417_v33  ;;  %v3043_v22 = vsub.f32 1.0, %v2307_v41  ;;  %v3544_v55 = vld [vmem:[#allocation2] sm:$0xff]  ;;  %v1929_v41 = vpop.xlane.xlu0 %1928 }
 0x39b   :  { %3483 = vst.msk [vmem:[#allocation2 + $0x30] sm:$0xff] %vm16_vm9, %v3418_v3  ;;  %v3359_v58 = vsel %vm220_vm11, %v3231_v40, 0.0  ;;  %v3105_v33 = vmax.f32 %v3041_v24, 0.0  ;;  %v11861_v3 = vld [vmem:[#allocation201_spill] sm:$0xff]  ;;  %v3297_v24 = vld [vmem:[#allocation2 + $0x68] sm:$0xff] }
 0x39c   :  { %3484 = vst.msk [vmem:[#allocation2 + $0x38] sm:$0xff] %vm16_vm9, %v3419_v50  ;;  %v9080_v53 = vmul.f32 %v11862_v32, %v11861_v3  ;;  %v3423_v48 = vadd.f32 %v3359_v58, %v3295_v0  ;;  %v3360_v50 = vsel %vm221_vm12, %v3232_v42, 0.0  ;;  %v3107_v27 = vmax.f32 %v3043_v22, 0.0  ;;  %v1932_v51 = vpop.xlane.xlu1 %1931 }
 0x39d   :  { %3485 = vst.msk [vmem:[#allocation2 + $0x40] sm:$0xff] %vm16_vm9, %v3420_v39  ;;  %v3424_v30 = vadd.f32 %v3360_v50, %v3296_v38  ;;  %v3169_v10 = vmul.f32 %v3105_v33, %v3105_v33  ;;  %v9106_v39 = vld [vmem:[%s10406_s1 + $0x80] sm:$0xff]  ;;  %v2692_v40 = vand.u32 2147483647, %v11861_v3  ;;  %v9123_v38 = vmax.f32 %v1711_v31, 0.0 }
 0x39e   :  { %3486 = vst.msk [vmem:[#allocation2 + $0x48] sm:$0xff] %vm16_vm9, %v3421_v56  ;;  %2015 = vadd.xlane.f32.xlu0 %v11864_v13  ;;  %vm225_vm5 = vcmp.ge.s32.totalorder %v9106_v39, 0  ;;  %v3545_v56 = vld [vmem:[#allocation2 + $0x8] sm:$0xff]  ;;  %v1926_v11 = vpop.xlane.xlu2 %1925  ;;  %v2685_v42 = vsub.f32 1.0, %v9080_v53  ;;  %v3171_v62 = vmul.f32 %v3107_v27, %v3107_v27  ;;  %v2694_v21 = vand.u32 2147483648, %v11861_v3  ;;  %v3546_v50 = vld [vmem:[#allocation2 + $0x10] sm:$0xff] }
 0x39f   :  { %3487 = vst.msk [vmem:[#allocation2 + $0x50] sm:$0xff] %vm16_vm9, %v3422_v34  ;;  %v3233_v0 = vmul.f32 %v3169_v10, %v8469_v57  ;;  %v2322_v34 = vmul.f32 %v11871_v54, %v1926_v11  ;;  %v3609_v57 = vsel %vm16_vm9, %v3545_v56, 0.0  ;;  %v3234_v33 = vmul.f32 %v3170_v52, %v8467_v20  ;;  %v9135_v53 = vld [vmem:[%s10406_s1 + $0x88] sm:$0xff]  ;;  %v3299_v20 = vld [vmem:[#allocation2 + $0x78] sm:$0xff]  ;;  %v11875_v56 = vld [vmem:[#allocation38_spill] sm:$0xff] }
 0x3a0   :  { %3488 = vst.msk [vmem:[#allocation2 + $0x58] sm:$0xff] %vm16_vm9, %v3423_v48  ;;  %vm226_vm6 = vcmp.ge.s32.totalorder %v9135_v53, 0  ;;  %v1713_v31 = vsub.f32 %v11872_v15, %v8476_v45  ;;  %v1712_v48 = vsub.f32 %v11873_v8, %v8478_v61  ;;  %v3235_v22 = vmul.f32 %v3171_v62, %v8540_v46  ;;  %v11874_v13 = vld [vmem:[#allocation101_spill] sm:$0xff]  ;;  %2018 = vadd.xlane.f32.xlu2 %v11875_v56  ;;  %v11878_v52 = vld [vmem:[#allocation66_spill] sm:$0xff]  ;;  %v11881_v15 = vld [vmem:[#allocation104_spill] sm:$0xff] }
 0x3a1   :  { %3489 = vst.msk [vmem:[#allocation2 + $0x60] sm:$0xff] %vm16_vm9, %v3424_v30  ;;  %v3361_v58 = vsel %vm222_vm15, %v3233_v0, 0.0  ;;  %v3044_v4 = vsub.f32 1.0, %v2322_v34  ;;  %v3608_v30 = vsel %vm16_vm9, %v3544_v55, 0.0  ;;  %v3362_v10 = vsel %vm223_vm1, %v3234_v33, 0.0  ;;  %2021 = vadd.xlane.f32.xlu1 %v11878_v52  ;;  %v11879_v62 = vld [vmem:[#allocation169_spill] sm:$0xff] }
 0x3a2   :  { %v3425_v19 = vadd.f32 %v3361_v58, %v3297_v24  ;;  %v2337_v16 = vmul.f32 %v11874_v13, %v1929_v41  ;;  %v3610_v27 = vadd.f32 %v3609_v57, %v3608_v30  ;;  %v3426_v45 = vadd.f32 %v3362_v10, %v3298_v1  ;;  %v11876_v24 = vld [vmem:[#allocation60_spill] sm:$0xff]  ;;  %v3547_v33 = vld [vmem:[#allocation2 + $0x18] sm:$0xff]  ;;  %v11882_v13 = vld [vmem:[#allocation106_spill] sm:$0xff] }
 0x3a3   :  { %v3108_v23 = vmax.f32 %v3044_v4, 0.0  ;;  %v3363_v61 = vsel %vm224_vm2, %v3235_v22, 0.0  ;;  %v9154_v46 = vsel %vm9099_vm4, %v9052_v5, %v2676_v9  ;;  %v3611_v47 = vsel %vm16_vm9, %v3546_v50, 0.0  ;;  %v9169_v5 = vld [vmem:[%s10406_s1 + $0x98] sm:$0xff]  ;;  %v11880_v41 = vld [vmem:[#allocation116_spill] sm:$0xff]  ;;  %v3300_v4 = vld [vmem:[#allocation2 + $0x80] sm:$0xff]  ;;  %v1938_v22 = vpop.xlane.xlu0 %1937 }
 0x3a4   :  { %3490 = vst.msk [vmem:[#allocation2 + $0x68] sm:$0xff] %vm16_vm9, %v3425_v19  ;;  %v3427_v11 = vadd.f32 %v3363_v61, %v3299_v20  ;;  %v3045_v0 = vsub.f32 1.0, %v2337_v16  ;;  %vm228_vm8 = vcmp.ge.s32.totalorder %v9169_v5, 0  ;;  %v2352_v9 = vmul.f32 %v11877_v37, %v1932_v51  ;;  %v3548_v50 = vld [vmem:[#allocation2 + $0x20] sm:$0xff]  ;;  %v1941_v20 = vpop.xlane.xlu1 %1940  ;;  %v9226_v53 = vld [vmem:[%s10406_s1 + $0xb0] sm:$0xff] }
 0x3a5   :  { %v3172_v49 = vmul.f32 %v3108_v23, %v3108_v23  ;;  %3491 = vst.msk [vmem:[#allocation2 + $0x70] sm:$0xff] %vm16_vm9, %v3426_v45  ;;  %v2686_v34 = vmul.f32 %v11862_v32, %v2685_v42  ;;  %v9176_v55 = vor.u32 1.1754944e-38, %v2694_v21  ;;  %v9180_v57 = vmul.f32 %v11880_v41, %v11879_v62  ;;  %v9190_v42 = vld [vmem:[%s10406_s1 + $0xa0] sm:$0xff]  ;;  %v11883_v45 = vld [vmem:[#allocation108_spill] sm:$0xff] }
 0x3a6   :  { %1631 = vadd.xlane.f32.xlu0 %v11876_v24  ;;  %v1935_v54 = vpop.xlane.xlu2 %1934  ;;  %v9182_v58 = vmax.f32 %v1713_v31, 0.0  ;;  %3492 = vst.msk [vmem:[#allocation2 + $0x78] sm:$0xff] %vm16_vm9, %v3427_v11  ;;  %v3109_v51 = vmax.f32 %v3045_v0, 0.0  ;;  %vm229_vm0 = vcmp.ge.s32.totalorder %v9190_v42, 0  ;;  %v9193_v21 = vmax.f32 %v1712_v48, 0.0  ;;  %v9203_v48 = vld [vmem:[%s10406_s1 + $0xa8] sm:$0xff] }
 0x3a7   :  { %v3236_v1 = vmul.f32 %v3172_v49, %v8567_v28  ;;  %v2367_v8 = vmul.f32 %v11881_v15, %v1935_v54  ;;  %v3612_v31 = vadd.f32 %v3611_v47, %v3610_v27  ;;  %v3046_v19 = vsub.f32 1.0, %v2352_v9  ;;  %v3301_v11 = vld [vmem:[#allocation2 + $0x88] sm:$0xff]  ;;  %v11884_v24 = vld [vmem:[#allocation58_spill] sm:$0xff] }
 0x3a8   :  { %v1315_v28 = vmul.f32 0.6931472, %v9065_v17  ;;  %v3173_v10 = vmul.f32 %v3109_v51, %v3109_v51  ;;  %v2382_v16 = vmul.f32 %v11882_v13, %v1938_v22  ;;  %vm230_vm11 = vcmp.ge.s32.totalorder %v9203_v48, 0  ;;  %1634 = vadd.xlane.f32.xlu2 %v11884_v24  ;;  %v3549_v9 = vld [vmem:[#allocation2 + $0x28] sm:$0xff]  ;;  %v11886_v22 = vld [vmem:[#allocation70_spill] sm:$0xff] }
 0x3a9   :  { %v3364_v30 = vsel %vm225_vm5, %v3236_v1, 0.0  ;;  %v3047_v23 = vsub.f32 1.0, %v2367_v8  ;;  %v3613_v56 = vsel %vm16_vm9, %v3547_v33, 0.0  ;;  %v3110_v17 = vmax.f32 %v3046_v19, 0.0  ;;  %v3302_v19 = vld [vmem:[#allocation2 + $0x90] sm:$0xff]  ;;  %1637 = vadd.xlane.f32.xlu1 %v11886_v22  ;;  %v3304_v24 = vld [vmem:[#allocation2 + $0xa0] sm:$0xff] }
 0x3aa   :  { %v3428_v27 = vadd.f32 %v3364_v30, %v3300_v4  ;;  %v2397_v61 = vmul.f32 %v11883_v45, %v1941_v20  ;;  %vm2688_vm12 = vweird.f32 %v11861_v3  ;;  %v3615_v39 = vsel %vm16_vm9, %v3548_v50, 0.0  ;;  %v9257_v5 = vld [vmem:[%s10406_s1 + $0xc0] sm:$0xff]  ;;  %v11896_v22 = vld [vmem:[#allocation51_spill] sm:$0xff] }
 0x3ab   :  { %v3237_v47 = vmul.f32 %v3173_v10, %v8558_v2  ;;  %v3111_v49 = vmax.f32 %v3047_v23, 0.0  ;;  %v3048_v0 = vsub.f32 1.0, %v2382_v16  ;;  %v3614_v37 = vadd.f32 %v3613_v56, %v3612_v31  ;;  %v11885_v2 = vld [vmem:[#allocation205_spill] sm:$0xff]  ;;  %v11887_v56 = vld [vmem:[#allocation111_spill] sm:$0xff]  ;;  %vm9271_vm2 = vmor %vm2688_vm12, %vm2689_vm10 }
 0x3ac   :  { %3493 = vst.msk [vmem:[#allocation2 + $0x80] sm:$0xff] %vm16_vm9, %v3428_v27  ;;  %v3174_v52 = vmul.f32 %v3110_v17, %v3110_v17  ;;  %v3049_v54 = vsub.f32 1.0, %v2397_v61  ;;  %v9214_v33 = vadd.f32 %v11862_v32, %v2686_v34  ;;  %v2700_v15 = vsub.f32 1.0, %v9180_v57  ;;  %v3303_v23 = vld [vmem:[#allocation2 + $0x98] sm:$0xff]  ;;  %v1947_v17 = vpop.xlane.xlu0 %1946  ;;  %v1950_v45 = vpop.xlane.xlu1 %1949  ;;  %v11888_v61 = vld [vmem:[#allocation136_spill] sm:$0xff] }
 0x3ad   :  { %v3365_v1 = vsel %vm226_vm6, %v3237_v47, 0.0  ;;  %v3175_v4 = vmul.f32 %v3111_v49, %v3111_v49  ;;  %v3112_v51 = vmax.f32 %v3048_v0, 0.0  ;;  %v3616_v8 = vadd.f32 %v3615_v39, %v3614_v37  ;;  %v3306_v57 = vld [vmem:[#allocation2 + $0xb0] sm:$0xff] }
 0x3ae   :  { %2024 = vadd.xlane.f32.xlu0 %v11885_v2  ;;  %v3429_v50 = vadd.f32 %v3365_v1, %v3301_v11  ;;  %v3238_v31 = vmul.f32 %v3174_v52, %v8641_v18  ;;  %v1944_v20 = vpop.xlane.xlu2 %1943  ;;  %v2707_v34 = vand.u32 2147483647, %v11879_v62  ;;  %vm231_vm13 = vcmp.ge.s32.totalorder %v9226_v53, 0  ;;  %v3550_v11 = vld [vmem:[#allocation2 + $0x30] sm:$0xff]  ;;  %v3305_v2 = vld [vmem:[#allocation2 + $0xa8] sm:$0xff]  ;;  %v11906_v53 = vld [vmem:[#allocation69_spill] sm:$0xff] }
 0x3af   :  { %v3617_v30 = vsel %vm16_vm9, %v3549_v9, 0.0  ;;  %v3239_v10 = vmul.f32 %v3175_v4, %v8662_v25  ;;  %v3176_v13 = vmul.f32 %v3112_v51, %v3112_v51  ;;  %v3113_v18 = vmax.f32 %v3049_v54, 0.0  ;;  %v3551_v9 = vld [vmem:[#allocation2 + $0x38] sm:$0xff]  ;;  %v11891_v54 = vld [vmem:[#allocation115_spill] sm:$0xff] }
 0x3b0   :  { %3494 = vst.msk [vmem:[#allocation2 + $0x88] sm:$0xff] %vm16_vm9, %v3429_v50  ;;  %v3366_v16 = vsel %vm227_vm7, %v3238_v31, 0.0  ;;  %v2412_v27 = vmul.f32 %v11887_v56, %v1944_v20  ;;  %v9236_v39 = vadd.f32 %v1315_v28, %v11888_v61  ;;  %v2709_v47 = vand.u32 2147483648, %v11879_v62  ;;  %v9251_v28 = vld [vmem:[%s10406_s1 + $0xb8] sm:$0xff]  ;;  %v11897_v20 = vld [vmem:[#allocation128_spill] sm:$0xff] }
 0x3b1   :  { %v3430_v49 = vadd.f32 %v3366_v16, %v3302_v19  ;;  %v3367_v25 = vsel %vm228_vm8, %v3239_v10, 0.0  ;;  %v3240_v0 = vmul.f32 %v3176_v13, %v8650_v12  ;;  %v3177_v37 = vmul.f32 %v3113_v18, %v3113_v18  ;;  %v11892_v50 = vld [vmem:[#allocation17_spill] sm:$0xff]  ;;  %v11893_v19 = vld [vmem:[#allocation6_spill] sm:$0xff] }
 0x3b2   :  { %vm9244_vm14 = vcmp.eq.f32.partialorder %v2692_v40, 8.507059e+37  ;;  %vm232_vm15 = vcmp.ge.s32.totalorder %v9251_v28, 0  ;;  %vm233_vm1 = vcmp.ge.s32.totalorder %v9257_v5, 0  ;;  %v3618_v12 = vadd.f32 %v3617_v30, %v3616_v8  ;;  %2027 = vadd.xlane.f32.xlu2 %v11893_v19  ;;  %v3552_v18 = vld [vmem:[#allocation2 + $0x40] sm:$0xff]  ;;  %v9318_v19 = vld [vmem:[%s10406_s1 + $0xd8] sm:$0xff]  ;;  %v3553_v8 = vld [vmem:[#allocation2 + $0x48] sm:$0xff] }
 0x3b3   :  { %v3431_v40 = vadd.f32 %v3367_v25, %v3303_v23  ;;  %v3050_v52 = vsub.f32 1.0, %v2412_v27  ;;  %v2427_v1 = vmul.f32 %v11891_v54, %v1947_v17  ;;  %3495 = vst.msk [vmem:[#allocation2 + $0x90] sm:$0xff] %vm16_vm9, %v3430_v49  ;;  %v3368_v4 = vsel %vm229_vm0, %v3240_v0, 0.0  ;;  %v11898_v17 = vld [vmem:[#allocation77_spill] sm:$0xff]  ;;  %v11899_v49 = vld [vmem:[#allocation204_spill] sm:$0xff]  ;;  %v11900_v0 = vld [vmem:[#allocation118_spill] sm:$0xff] }
 0x3b4   :  { %v3241_v51 = vmul.f32 %v3177_v37, %v8739_v26  ;;  %v2442_v31 = vmul.f32 %v11892_v50, %v1950_v45  ;;  %v9277_v30 = vmul.f32 %v11897_v20, %v11896_v22  ;;  %v3619_v42 = vsel %vm16_vm9, %v3550_v11, 0.0  ;;  %2030 = vadd.xlane.f32.xlu1 %v11899_v49  ;;  %v9299_v37 = vld [vmem:[%s10406_s1 + $0xc8] sm:$0xff]  ;;  %v11903_v50 = vld [vmem:[#allocation24_spill] sm:$0xff] }
 0x3b5   :  { %3496 = vst.msk [vmem:[#allocation2 + $0x98] sm:$0xff] %vm16_vm9, %v3431_v40  ;;  %v3432_v26 = vadd.f32 %v3368_v4, %v3304_v24  ;;  %v3114_v10 = vmax.f32 %v3050_v52, 0.0  ;;  %v2691_v23 = vsel %vm9271_vm2, %v11862_v32, %v9214_v33  ;;  %v3621_v13 = vsel %vm16_vm9, %v3551_v9, 0.0  ;;  %v11902_v52 = vld [vmem:[#allocation112_spill] sm:$0xff]  ;;  %v11908_v5 = vld [vmem:[#allocation231_spill] sm:$0xff] }
 0x3b6   :  { %v3369_v16 = vsel %vm230_vm11, %v3241_v51, 0.0  ;;  %v3051_v56 = vsub.f32 1.0, %v2427_v1  ;;  %v3052_v27 = vsub.f32 1.0, %v2442_v31  ;;  %1640 = vadd.xlane.f32.xlu0 %v11898_v17  ;;  %v3620_v45 = vadd.f32 %v3619_v42, %v3618_v12  ;;  %v1953_v25 = vpop.xlane.xlu2 %1952  ;;  %v11901_v12 = vld [vmem:[#allocation100_spill] sm:$0xff]  ;;  %v1956_v1 = vpop.xlane.xlu0 %1955 }
 0x3b7   :  { %3497 = vst.msk [vmem:[#allocation2 + $0xa0] sm:$0xff] %vm16_vm9, %v3432_v26  ;;  %v3433_v61 = vadd.f32 %v3369_v16, %v3305_v2  ;;  %v3178_v11 = vmul.f32 %v3114_v10, %v3114_v10  ;;  %4171 = vlog2.f32 %v11861_v3  ;;  %v2457_v24 = vmul.f32 %v11900_v0, %v1953_v25  ;;  %v11904_v26 = vld [vmem:[#allocation138_spill] sm:$0xff]  ;;  %v3554_v16 = vld [vmem:[#allocation2 + $0x50] sm:$0xff] }
 0x3b8   :  { %v3115_v32 = vmax.f32 %v3051_v56, 0.0  ;;  %v3116_v33 = vmax.f32 %v3052_v27, 0.0  ;;  %v2701_v48 = vmul.f32 %v11880_v41, %v2700_v15  ;;  %vm234_vm3 = vcmp.ge.s32.totalorder %v9299_v37, 0  ;;  %v1959_v15 = vpop.xlane.xlu1 %1958  ;;  %v11905_v27 = vld [vmem:[#allocation32_spill] sm:$0xff] }
 0x3b9   :  { %v1714_v9 = vsub.f32 %v11901_v12, %v8569_v29  ;;  %v3622_v40 = vadd.f32 %v3621_v13, %v3620_v45  ;;  %v3623_v3 = vsel %vm16_vm9, %v3552_v18, 0.0  ;;  %3498 = vst.msk [vmem:[#allocation2 + $0xa8] sm:$0xff] %vm16_vm9, %v3433_v61  ;;  %v3242_v54 = vmul.f32 %v3178_v11, %v11902_v52  ;;  %v9312_v29 = vld [vmem:[%s10406_s1 + $0xd0] sm:$0xff]  ;;  %v3307_v45 = vld [vmem:[#allocation2 + $0xb8] sm:$0xff]  ;;  %v3308_v11 = vld [vmem:[#allocation2 + $0xc0] sm:$0xff] }
 0x3ba   :  { %v3179_v4 = vmul.f32 %v3115_v32, %v3115_v32  ;;  %v3180_v51 = vmul.f32 %v3116_v33, %v3116_v33  ;;  %v3053_v2 = vsub.f32 1.0, %v2457_v24  ;;  %v2472_v31 = vmul.f32 %v11903_v50, %v1956_v1  ;;  %1643 = vadd.xlane.f32.xlu2 %v11906_v53  ;;  %v11907_v0 = vld [vmem:[#allocation88_spill] sm:$0xff]  ;;  %v9355_v24 = vld [vmem:[%s10406_s1 + $0xe0] sm:$0xff]  ;;  %v3555_v52 = vld [vmem:[#allocation2 + $0x58] sm:$0xff] }
 0x3bb   :  { %vm2704_vm4 = vweird.f32 %v11880_v41  ;;  %vm235_vm5 = vcmp.ge.s32.totalorder %v9312_v29, 0  ;;  %vm236_vm6 = vcmp.ge.s32.totalorder %v9318_v19, 0  ;;  %v3370_v42 = vsel %vm231_vm13, %v3242_v54, 0.0  ;;  %v11911_v50 = vld [vmem:[#allocation102_spill] sm:$0xff] }
 0x3bc   :  { %v2487_v10 = vmul.f32 %v11904_v26, %v1959_v15  ;;  %v9327_v13 = vsel %vm9244_vm14, %v9176_v55, %v2691_v23  ;;  %v9330_v18 = vmul.f32 0.6931472, %v9164_v6  ;;  %v3434_v56 = vadd.f32 %v3370_v42, %v3306_v57  ;;  %1646 = vadd.xlane.f32.xlu1 %v11908_v5  ;;  %v11909_v15 = vld [vmem:[#allocation237_spill] sm:$0xff] }
 0x3bd   :  { %v3243_v17 = vmul.f32 %v3179_v4, %v11905_v27  ;;  %v3244_v61 = vmul.f32 %v3180_v51, %v8911_v59  ;;  %vm2703_vm7 = vweird.f32 %v11879_v62  ;;  %v9338_v44 = vor.u32 1.1754944e-38, %v2709_v47  ;;  %v9340_v55 = vpop.eup %4171 }
 0x3be   :  { %v3624_v6 = vadd.f32 %v3623_v3, %v3622_v40  ;;  %v3117_v23 = vmax.f32 %v3053_v2, 0.0  ;;  %v3054_v49 = vsub.f32 1.0, %v2472_v31  ;;  %v9343_v25 = vadd.f32 %v11880_v41, %v2701_v48  ;;  %3499 = vst.msk [vmem:[#allocation2 + $0xb0] sm:$0xff] %vm16_vm9, %v3434_v56  ;;  %2033 = vadd.xlane.f32.xlu0 %v11907_v0  ;;  %v1962_v3 = vpop.xlane.xlu2 %1961  ;;  %v11910_v2 = vld [vmem:[#allocation35_spill] sm:$0xff]  ;;  %vm9398_vm11 = vmor %vm2703_vm7, %vm2704_vm4 }
 0x3bf   :  { %v3371_v59 = vsel %vm232_vm15, %v3243_v17, 0.0  ;;  %v3372_v32 = vsel %vm233_vm1, %v3244_v61, 0.0  ;;  %v3055_v33 = vsub.f32 1.0, %v2487_v10  ;;  %v2715_v47 = vsub.f32 1.0, %v9277_v30  ;;  %v3309_v56 = vld [vmem:[#allocation2 + $0xc8] sm:$0xff]  ;;  %v9379_v61 = vld [vmem:[%s10406_s1 + $0xf0] sm:$0xff] }
 0x3c0   :  { %vm237_vm8 = vcmp.ge.s32.totalorder %v9355_v24, 0  ;;  %v3625_v48 = vsel %vm16_vm9, %v3553_v8, 0.0  ;;  %v3627_v28 = vsel %vm16_vm9, %v3554_v16, 0.0  ;;  %v3435_v12 = vadd.f32 %v3371_v59, %v3307_v45  ;;  %v1965_v8 = vpop.xlane.xlu0 %1964  ;;  %v1968_v26 = vpop.xlane.xlu1 %1967  ;;  %v9371_v16 = vld [vmem:[%s10406_s1 + $0xe8] sm:$0xff]  ;;  %v3558_v24 = vld [vmem:[#allocation2 + $0x70] sm:$0xff] }
 0x3c1   :  { %v3436_v40 = vadd.f32 %v3372_v32, %v3308_v11  ;;  %v3181_v54 = vmul.f32 %v3117_v23, %v3117_v23  ;;  %v3118_v57 = vmax.f32 %v3054_v49, 0.0  ;;  %v3119_v1 = vmax.f32 %v3055_v33, 0.0  ;;  %v11913_v49 = vld [vmem:[#allocation229_spill] sm:$0xff]  ;;  %v3310_v33 = vld [vmem:[#allocation2 + $0xd0] sm:$0xff] }
 0x3c2   :  { %v2502_v4 = vmul.f32 %v11909_v15, %v1962_v3  ;;  %v9362_v51 = vmax.f32 %v1714_v9, 0.0  ;;  %v1715_v31 = vsub.f32 %v11911_v50, %v11910_v2  ;;  %v3626_v42 = vadd.f32 %v3625_v48, %v3624_v6  ;;  %3500 = vst.msk [vmem:[#allocation2 + $0xb8] sm:$0xff] %vm16_vm9, %v3435_v12  ;;  %v11912_v6 = vld [vmem:[#allocation33_spill] sm:$0xff]  ;;  %v11918_v15 = vld [vmem:[#allocation232_spill] sm:$0xff]  ;;  %v3557_v2 = vld [vmem:[#allocation2 + $0x68] sm:$0xff] }
 0x3c3   :  { %v2722_v10 = vand.u32 2147483647, %v11896_v22  ;;  %vm238_vm0 = vcmp.ge.s32.totalorder %v9371_v16, 0  ;;  %3501 = vst.msk [vmem:[#allocation2 + $0xc0] sm:$0xff] %vm16_vm9, %v3436_v40  ;;  %v3245_v9 = vmul.f32 %v3181_v54, %v8953_v14  ;;  %v3182_v27 = vmul.f32 %v3118_v57, %v3118_v57  ;;  %v3311_v48 = vld [vmem:[#allocation2 + $0xd8] sm:$0xff]  ;;  %v11914_v40 = vld [vmem:[#allocation28_spill] sm:$0xff] }
 0x3c4   :  { %v3183_v17 = vmul.f32 %v3119_v1, %v3119_v1  ;;  %v3056_v45 = vsub.f32 1.0, %v2502_v4  ;;  %vm239_vm10 = vcmp.ge.s32.totalorder %v9379_v61, 0  ;;  %v3628_v11 = vadd.f32 %v3627_v28, %v3626_v42  ;;  %2036 = vadd.xlane.f32.xlu2 %v11914_v40  ;;  %v9414_v4 = vld [vmem:[%s10406_s1 + $0xf8] sm:$0xff] }
 0x3c5   :  { %v3629_v53 = vsel %vm16_vm9, %v3555_v52, 0.0  ;;  %v2517_v23 = vmul.f32 %v11912_v6, %v1965_v8  ;;  %v2532_v59 = vmul.f32 %v11913_v49, %v1968_v26  ;;  %v3373_v14 = vsel %vm234_vm3, %v3245_v9, 0.0  ;;  %v11915_v52 = vld [vmem:[#allocation137_spill] sm:$0xff]  ;;  %v11919_v8 = vld [vmem:[#allocation63_spill] sm:$0xff]  ;;  %v3560_v6 = vld [vmem:[#allocation2 + $0x80] sm:$0xff] }
 0x3c6   :  { %v3246_v32 = vmul.f32 %v3182_v27, %v8951_v43  ;;  %v3247_v0 = vmul.f32 %v3183_v17, %v9123_v38  ;;  %v3120_v12 = vmax.f32 %v3056_v45, 0.0  ;;  %v3437_v5 = vadd.f32 %v3373_v14, %v3309_v56  ;;  %v3556_v38 = vld [vmem:[#allocation2 + $0x60] sm:$0xff]  ;;  %1649 = vadd.xlane.f32.xlu0 %v11918_v15  ;;  %2039 = vadd.xlane.f32.xlu1 %v11919_v8  ;;  %v1971_v26 = vpop.xlane.xlu2 %1970  ;;  %v11930_v16 = vld [vmem:[#allocation49_spill] sm:$0xff] }
 0x3c7   :  { %v3057_v28 = vsub.f32 1.0, %v2517_v23  ;;  %v3058_v3 = vsub.f32 1.0, %v2532_v59  ;;  %v9392_v54 = vadd.f32 %v9330_v18, %v11915_v52  ;;  %v2706_v18 = vsel %vm9398_vm11, %v11880_v41, %v9343_v25  ;;  %v3312_v56 = vld [vmem:[#allocation2 + $0xe0] sm:$0xff]  ;;  %v3559_v25 = vld [vmem:[#allocation2 + $0x78] sm:$0xff] }
 0x3c8   :  { %v3374_v37 = vsel %vm235_vm5, %v3246_v32, 0.0  ;;  %v3375_v57 = vsel %vm236_vm6, %v3247_v0, 0.0  ;;  %v3184_v1 = vmul.f32 %v3120_v12, %v3120_v12  ;;  %vm240_vm12 = vcmp.ge.s32.totalorder %v9414_v4, 0  ;;  %3502 = vst.msk [vmem:[#allocation2 + $0xc8] sm:$0xff] %vm16_vm9, %v3437_v5  ;;  %v11920_v17 = vld [vmem:[#allocation194_spill] sm:$0xff]  ;;  %v1974_v49 = vpop.xlane.xlu0 %1973  ;;  %v1977_v59 = vpop.xlane.xlu1 %1976  ;;  %v11923_v12 = vld [vmem:[#allocation56_spill] sm:$0xff] }
 0x3c9   :  { %v3630_v29 = vadd.f32 %v3629_v53, %v3628_v11  ;;  %v3438_v19 = vadd.f32 %v3374_v37, %v3310_v33  ;;  %v3439_v50 = vadd.f32 %v3375_v57, %v3311_v48  ;;  %v3121_v42 = vmax.f32 %v3057_v28, 0.0  ;;  %v3313_v48 = vld [vmem:[#allocation2 + $0xe8] sm:$0xff]  ;;  %v9444_v5 = vld [vmem:[%s10406_s1 + $0x100] sm:$0xff]  ;;  %v3562_v4 = vld [vmem:[#allocation2 + $0x90] sm:$0xff] }
 0x3ca   :  { %v3248_v9 = vmul.f32 %v3184_v1, %v9193_v21  ;;  %v3122_v27 = vmax.f32 %v3058_v3, 0.0  ;;  %v2547_v45 = vmul.f32 %v11920_v17, %v1971_v26  ;;  %vm9423_vm13 = vcmp.eq.f32.partialorder %v2707_v34, 8.507059e+37  ;;  %v3314_v3 = vld [vmem:[#allocation2 + $0xf0] sm:$0xff]  ;;  %v11925_v57 = vld [vmem:[#allocation114_spill] sm:$0xff]  ;;  %v11927_v1 = vld [vmem:[#allocation119_spill] sm:$0xff] }
 0x3cb   :  { %v2716_v11 = vmul.f32 %v11897_v20, %v2715_v47  ;;  %vm2719_vm14 = vweird.f32 %v11897_v20  ;;  %v1779_v53 = vmax.f32 %v1715_v31, 0.0  ;;  %v3631_v23 = vsel %vm16_vm9, %v3556_v38, 0.0  ;;  %3503 = vst.msk [vmem:[#allocation2 + $0xd0] sm:$0xff] %vm16_vm9, %v3438_v19  ;;  %v11924_v38 = vld [vmem:[#allocation223_spill] sm:$0xff]  ;;  %v9568_v43 = vld [vmem:[%s10406_s1 + $0x120] sm:$0xff] }
 0x3cc   :  { %v3185_v21 = vmul.f32 %v3121_v42, %v3121_v42  ;;  %v2724_v14 = vand.u32 2147483648, %v11896_v22  ;;  %v3633_v34 = vsel %vm16_vm9, %v3557_v2, 0.0  ;;  %3504 = vst.msk [vmem:[#allocation2 + $0xd8] sm:$0xff] %vm16_vm9, %v3439_v50  ;;  %v3376_v30 = vsel %vm237_vm8, %v3248_v9, 0.0  ;;  %1652 = vadd.xlane.f32.xlu2 %v11925_v57  ;;  %v11928_v50 = vld [vmem:[#allocation175_spill] sm:$0xff]  ;;  %v9519_v57 = vld [vmem:[%s10406_s1 + $0x110] sm:$0xff] }
 0x3cd   :  { %v3186_v47 = vmul.f32 %v3122_v27, %v3122_v27  ;;  %v3059_v32 = vsub.f32 1.0, %v2547_v45  ;;  %vm2718_vm15 = vweird.f32 %v11896_v22  ;;  %v3632_v31 = vadd.f32 %v3631_v23, %v3630_v29  ;;  %v11929_v42 = vld [vmem:[#allocation79_spill] sm:$0xff] }
 0x3ce   :  { %v3440_v33 = vadd.f32 %v3376_v30, %v3312_v56  ;;  %v3249_v0 = vmul.f32 %v3185_v21, %v9182_v58  ;;  %v2562_v40 = vmul.f32 %v11923_v12, %v1974_v49  ;;  %vm241_vm1 = vcmp.ge.s32.totalorder %v9444_v5, 0  ;;  %v11926_v58 = vld [vmem:[#allocation209_spill] sm:$0xff]  ;;  %2042 = vadd.xlane.f32.xlu0 %v11930_v16  ;;  %v11931_v21 = vld [vmem:[#allocation132_spill] sm:$0xff]  ;;  %v1590_v49 = vpop.xlane.xlu2 %1589  ;;  %v11932_v30 = vld [vmem:[#allocation71_spill] sm:$0xff] }
 0x3cf   :  { %v3250_v28 = vmul.f32 %v3186_v47, %v9362_v51  ;;  %v3123_v52 = vmax.f32 %v3059_v32, 0.0  ;;  %v2577_v37 = vmul.f32 %v11924_v38, %v1977_v59  ;;  %v2729_v15 = vmul.f32 %v11927_v1, %v11926_v58  ;;  %v9462_v51 = vld [vmem:[%s10406_s1 + $0x108] sm:$0xff]  ;;  %1655 = vadd.xlane.f32.xlu1 %v11931_v21  ;;  %vm9503_vm4 = vmor %vm2718_vm15, %vm2719_vm14  ;;  %v11941_v21 = vld [vmem:[#allocation234_spill] sm:$0xff] }
 0x3d0   :  { %v3634_v29 = vadd.f32 %v3633_v34, %v3632_v31  ;;  %3505 = vst.msk [vmem:[#allocation2 + $0xe0] sm:$0xff] %vm16_vm9, %v3440_v33  ;;  %v3377_v2 = vsel %vm238_vm0, %v3249_v0, 0.0  ;;  %v3060_v19 = vsub.f32 1.0, %v2562_v40  ;;  %v9457_v8 = vmul.f32 %v11929_v42, %v11928_v50  ;;  %v3315_v34 = vld [vmem:[#allocation2 + $0xf8] sm:$0xff]  ;;  %v1980_v33 = vpop.xlane.xlu0 %1979  ;;  %v1593_v0 = vpop.xlane.xlu1 %1592 }
 0x3d1   :  { %vm242_vm2 = vcmp.ge.s32.totalorder %v9462_v51, 0  ;;  %v3441_v26 = vadd.f32 %v3377_v2, %v3313_v48  ;;  %v3378_v9 = vsel %vm239_vm10, %v3250_v28, 0.0  ;;  %v3187_v56 = vmul.f32 %v3123_v52, %v3123_v52  ;;  %v11945_v51 = vld [vmem:[#allocation139_spill] sm:$0xff] }
 0x3d2   :  { %v3061_v27 = vsub.f32 1.0, %v2577_v37  ;;  %v3635_v17 = vsel %vm16_vm9, %v3558_v24, 0.0  ;;  %v3442_v45 = vadd.f32 %v3378_v9, %v3314_v3  ;;  %v3124_v23 = vmax.f32 %v3060_v19, 0.0  ;;  %v11935_v24 = vld [vmem:[#allocation31_spill] sm:$0xff] }
 0x3d3   :  { %4173 = vlog2.f32 %v11879_v62  ;;  %3506 = vst.msk [vmem:[#allocation2 + $0xe8] sm:$0xff] %vm16_vm9, %v3441_v26  ;;  %v3251_v59 = vmul.f32 %v3187_v56, %v1779_v53  ;;  %v1716_v61 = vsub.f32 %v11932_v30, %v1590_v49  ;;  %v9474_v47 = vadd.f32 %v11897_v20, %v2716_v11  ;;  %v3561_v9 = vld [vmem:[#allocation2 + $0x88] sm:$0xff]  ;;  %v11940_v56 = vld [vmem:[#allocation134_spill] sm:$0xff] }
 0x3d4   :  { %v2730_v32 = vsub.f32 1.0, %v2729_v15  ;;  %3507 = vst.msk [vmem:[#allocation2 + $0xf0] sm:$0xff] %vm16_vm9, %v3442_v45  ;;  %v3125_v31 = vmax.f32 %v3061_v27, 0.0  ;;  %v9485_v62 = vsel %vm9423_vm13, %v9338_v44, %v2706_v18  ;;  %v1319_v53 = vmul.f32 0.6931472, %v9340_v55 }
 0x3d5   :  { %v2725_v11 = vor.u32 1.1754944e-38, %v2724_v14  ;;  %v3636_v48 = vadd.f32 %v3635_v17, %v3634_v29  ;;  %v3379_v12 = vsel %vm240_vm12, %v3251_v59, 0.0  ;;  %v3188_v40 = vmul.f32 %v3124_v23, %v3124_v23  ;;  %v11936_v14 = vld [vmem:[#allocation177_spill] sm:$0xff]  ;;  %v3316_v29 = vld [vmem:[#allocation2 + $0x100] sm:$0xff]  ;;  %v3317_v23 = vld [vmem:[#allocation2 + $0x108] sm:$0xff] }
 0x3d6   :  { %vm9492_vm3 = vcmp.eq.f32.partialorder %v2722_v10, 8.507059e+37  ;;  %v2745_v41 = vsub.f32 1.0, %v9457_v8  ;;  %v3443_v44 = vadd.f32 %v3379_v12, %v3315_v34  ;;  %v1780_v18 = vmax.f32 %v1716_v61, 0.0  ;;  %v11939_v10 = vld [vmem:[#allocation228_spill] sm:$0xff]  ;;  %1658 = vadd.xlane.f32.xlu0 %v11940_v56  ;;  %v1983_v49 = vpop.xlane.xlu2 %1982  ;;  %v11952_v56 = vld [vmem:[#allocation219_spill] sm:$0xff] }
 0x3d7   :  { %v2592_v55 = vmul.f32 %v11935_v24, %v1980_v33  ;;  %v1717_v28 = vsub.f32 %v11936_v14, %v1593_v0  ;;  %2045 = vadd.xlane.f32.xlu2 %v11939_v10  ;;  %v2721_v3 = vsel %vm9503_vm4, %v11897_v20, %v9474_v47  ;;  %v2731_v52 = vmul.f32 %v11927_v1, %v2730_v32  ;;  %v11942_v61 = vld [vmem:[#allocation180_spill] sm:$0xff] }
 0x3d8   :  { %vm2733_vm5 = vweird.f32 %v11926_v58  ;;  %vm2734_vm6 = vweird.f32 %v11927_v1  ;;  %v2737_v38 = vand.u32 2147483647, %v11926_v58  ;;  %vm243_vm7 = vcmp.ge.s32.totalorder %v9519_v57, 0  ;;  %3508 = vst.msk [vmem:[#allocation2 + $0xf8] sm:$0xff] %vm16_vm9, %v3443_v44  ;;  %2048 = vadd.xlane.f32.xlu1 %v11941_v21  ;;  %v1596_v5 = vpop.xlane.xlu0 %1595  ;;  %v1986_v0 = vpop.xlane.xlu1 %1985 }
 0x3d9   :  { %v4174_v37 = vpop.eup %4173  ;;  %v3189_v15 = vmul.f32 %v3125_v31, %v3125_v31  ;;  %v3252_v20 = vmul.f32 %v3188_v40, %v1780_v18  ;;  %v3062_v2 = vsub.f32 1.0, %v2592_v55  ;;  %v1781_v19 = vmax.f32 %v1717_v28, 0.0  ;;  %v9545_v18 = vld [vmem:[%s10406_s1 + $0x118] sm:$0xff]  ;;  %vm9578_vm12 = vmor %vm2733_vm5, %vm2734_vm6 }
 0x3da   :  { %v3637_v8 = vsel %vm16_vm9, %v3559_v25, 0.0  ;;  %v3639_v26 = vsel %vm16_vm9, %v3560_v6, 0.0  ;;  %v2739_v27 = vand.u32 2147483648, %v11926_v58  ;;  %4175 = vlog2.f32 %v11896_v22  ;;  %v11944_v6 = vld [vmem:[#allocation82_spill] sm:$0xff] }
 0x3db   :  { %v3638_v16 = vadd.f32 %v3637_v8, %v3636_v48  ;;  %v3380_v17 = vsel %vm241_vm1, %v3252_v20, 0.0  ;;  %v3253_v45 = vmul.f32 %v3189_v15, %v1781_v19  ;;  %v2746_v59 = vmul.f32 %v11929_v42, %v2745_v41  ;;  %v11943_v41 = vld [vmem:[#allocation10_spill] sm:$0xff]  ;;  %v11946_v15 = vld [vmem:[#allocation120_spill] sm:$0xff]  ;;  %v3563_v20 = vld [vmem:[#allocation2 + $0x98] sm:$0xff] }
 0x3dc   :  { %v3444_v34 = vadd.f32 %v3380_v17, %v3316_v29  ;;  %v3126_v30 = vmax.f32 %v3062_v2, 0.0  ;;  %v2607_v47 = vmul.f32 %v11942_v61, %v1983_v49  ;;  %v1321_v32 = vmul.f32 0.6931472, %v4174_v37  ;;  %v11949_v29 = vld [vmem:[#allocation142_spill] sm:$0xff] }
 0x3dd   :  { %v3640_v31 = vadd.f32 %v3639_v26, %v3638_v16  ;;  %v3641_v33 = vsel %vm16_vm9, %v3561_v9, 0.0  ;;  %v3381_v22 = vsel %vm242_vm2, %v3253_v45, 0.0  ;;  %v9537_v48 = vadd.f32 %v11927_v1, %v2731_v52  ;;  %v3318_v9 = vld [vmem:[#allocation2 + $0x110] sm:$0xff]  ;;  %v3564_v61 = vld [vmem:[#allocation2 + $0xa0] sm:$0xff] }
 0x3de   :  { %3509 = vst.msk [vmem:[#allocation2 + $0x100] sm:$0xff] %vm16_vm9, %v3444_v34  ;;  %v3445_v12 = vadd.f32 %v3381_v22, %v3317_v23  ;;  %v3063_v40 = vsub.f32 1.0, %v2607_v47  ;;  %v1718_v25 = vsub.f32 %v11943_v41, %v1596_v5  ;;  %v2622_v44 = vmul.f32 %v11944_v6, %v1986_v0  ;;  %2051 = vadd.xlane.f32.xlu0 %v11952_v56  ;;  %v11955_v23 = vld [vmem:[#allocation7_spill] sm:$0xff]  ;;  %v1599_v21 = vpop.xlane.xlu2 %1598  ;;  %v11960_v41 = vld [vmem:[#allocation220_spill] sm:$0xff]  ;;  %v3320_v16 = vld [vmem:[#allocation2 + $0x120] sm:$0xff] }
 0x3df   :  { %vm244_vm8 = vcmp.ge.s32.totalorder %v9545_v18, 0  ;;  %v9549_v24 = vadd.f32 %v1319_v53, %v11945_v51  ;;  %v9553_v55 = vsel %vm9492_vm3, %v2725_v11, %v2721_v3  ;;  %v9556_v14 = vadd.f32 %v11929_v42, %v2746_v59  ;;  %1661 = vadd.xlane.f32.xlu2 %v11946_v15 }
 0x3e0   :  { %vm2749_vm0 = vweird.f32 %v11929_v42  ;;  %v4176_v28 = vpop.eup %4175  ;;  %v3190_v10 = vmul.f32 %v3126_v30, %v3126_v30  ;;  %3510 = vst.msk [vmem:[#allocation2 + $0x108] sm:$0xff] %vm16_vm9, %v3445_v12  ;;  %v1782_v52 = vmax.f32 %v1718_v25, 0.0  ;;  %v3064_v37 = vsub.f32 1.0, %v2622_v44  ;;  %1664 = vadd.xlane.f32.xlu1 %v11955_v23  ;;  %v1989_v0 = vpop.xlane.xlu0 %1988  ;;  %v11966_v23 = vld [vmem:[#allocation55_spill] sm:$0xff]  ;;  %v9664_v12 = vld [vmem:[%s10406_s1 + $0x130] sm:$0xff] }
 0x3e1   :  { %vm9561_vm10 = vcmp.eq.f32.partialorder %v2737_v38, 8.507059e+37  ;;  %v2740_v11 = vor.u32 1.1754944e-38, %v2739_v27  ;;  %vm245_vm11 = vcmp.ge.s32.totalorder %v9568_v43, 0  ;;  %v3642_v3 = vadd.f32 %v3641_v33, %v3640_v31  ;;  %v11957_v31 = vld [vmem:[#allocation113_spill] sm:$0xff] }
 0x3e2   :  { %v9572_v2 = vadd.f32 %v1321_v32, %v11949_v29  ;;  %vm2748_vm13 = vweird.f32 %v11928_v50  ;;  %v2752_v19 = vand.u32 2147483647, %v11928_v50  ;;  %v3127_v8 = vmax.f32 %v3063_v40, 0.0 }
 0x3e3   :  { %v3254_v26 = vmul.f32 %v3190_v10, %v1782_v52  ;;  %v2736_v27 = vsel %vm9578_vm12, %v11927_v1, %v9537_v48  ;;  %vm9591_vm14 = vmor %vm2748_vm13, %vm2749_vm0  ;;  %v2754_v17 = vand.u32 2147483648, %v11928_v50  ;;  %v3643_v45 = vsel %vm16_vm9, %v3562_v4, 0.0  ;;  %v11956_v1 = vld [vmem:[#allocation239_spill] sm:$0xff]  ;;  %v1602_v48 = vpop.xlane.xlu1 %1601  ;;  %v3319_v52 = vld [vmem:[#allocation2 + $0x118] sm:$0xff] }
 0x3e4   :  { %v1323_v49 = vmul.f32 0.6931472, %v4176_v28  ;;  %v2751_v59 = vsel %vm9591_vm14, %v11929_v42, %v9556_v14  ;;  %v2760_v34 = vsub.f32 1.0, %v11956_v1  ;;  %v3645_v30 = vsel %vm16_vm9, %v3563_v20, 0.0  ;;  %v11961_v14 = vld [vmem:[#allocation129_spill] sm:$0xff]  ;;  %v11963_v20 = vld [vmem:[#allocation143_spill] sm:$0xff] }
 0x3e5   :  { %v3382_v47 = vsel %vm243_vm7, %v3254_v26, 0.0  ;;  %v3128_v32 = vmax.f32 %v3064_v37, 0.0  ;;  %v1719_v33 = vsub.f32 %v11957_v31, %v1599_v21  ;;  %v3644_v22 = vadd.f32 %v3643_v45, %v3642_v3  ;;  %v9621_v3 = vld [vmem:[%s10406_s1 + $0x128] sm:$0xff] }
 0x3e6   :  { %v3446_v5 = vadd.f32 %v3382_v47, %v3318_v9  ;;  %vm9607_vm15 = vcmp.eq.f32.partialorder %v2752_v19, 8.507059e+37  ;;  %4177 = vlog2.f32 %v11926_v58  ;;  %v3191_v42 = vmul.f32 %v3127_v8, %v3127_v8  ;;  %v11962_v58 = vld [vmem:[#allocation233_spill] sm:$0xff]  ;;  %v11964_v19 = vld [vmem:[#allocation166_spill] sm:$0xff]  ;;  %v3565_v26 = vld [vmem:[#allocation2 + $0xa8] sm:$0xff]  ;;  %v1992_v21 = vpop.xlane.xlu2 %1991 }
 0x3e7   :  { %v1783_v40 = vmax.f32 %v1719_v33, 0.0  ;;  %v2637_v25 = vmul.f32 %v11960_v41, %v1989_v0  ;;  %v1720_v57 = vsub.f32 %v8934_v36, %v1602_v48  ;;  %v3646_v6 = vadd.f32 %v3645_v30, %v3644_v22  ;;  %2054 = vadd.xlane.f32.xlu2 %v11962_v58  ;;  %v11968_v33 = vld [vmem:[#allocation23_spill] sm:$0xff] }
 0x3e8   :  { %v3647_v44 = vsel %vm16_vm9, %v3564_v61, 0.0  ;;  %3511 = vst.msk [vmem:[#allocation2 + $0x110] sm:$0xff] %vm16_vm9, %v3446_v5  ;;  %v2755_v51 = vor.u32 1.1754944e-38, %v2754_v17  ;;  %v2761_v28 = vmul.f32 %v11961_v14, %v2760_v34  ;;  %v3192_v4 = vmul.f32 %v3128_v32, %v3128_v32  ;;  %v11965_v17 = vld [vmem:[#allocation11_spill] sm:$0xff]  ;;  %2057 = vadd.xlane.f32.xlu1 %v11966_v23  ;;  %v1605_v47 = vpop.xlane.xlu0 %1604 }
 0x3e9   :  { %v3255_v10 = vmul.f32 %v3191_v42, %v1783_v40  ;;  %v3065_v37 = vsub.f32 1.0, %v2637_v25  ;;  %v1784_v15 = vmax.f32 %v1720_v57, 0.0  ;;  %vm246_vm1 = vcmp.ge.s32.totalorder %v9621_v3, 0  ;;  %1667 = vadd.xlane.f32.xlu0 %v11965_v17  ;;  %v3567_v40 = vld [vmem:[#allocation2 + $0xb8] sm:$0xff] }
 0x3ea   :  { %v9626_v36 = vsel %vm9561_vm10, %v2740_v11, %v2736_v27  ;;  %v9629_v29 = vadd.f32 %v1323_v49, %v11963_v20  ;;  %v9633_v38 = vsel %vm9607_vm15, %v2755_v51, %v2751_v59  ;;  %v2775_v8 = vsub.f32 1.0, %v11964_v19  ;;  %v3566_v27 = vld [vmem:[#allocation2 + $0xb0] sm:$0xff]  ;;  %v11967_v59 = vld [vmem:[#allocation30_spill] sm:$0xff]  ;;  %v3321_v20 = vld [vmem:[#allocation2 + $0x128] sm:$0xff] }
 0x3eb   :  { %v3383_v9 = vsel %vm244_vm8, %v3255_v10, 0.0  ;;  %v3256_v56 = vmul.f32 %v3192_v4, %v1784_v15  ;;  %vm2764_vm2 = vweird.f32 %v11961_v14  ;;  %4179 = vlog2.f32 %v11928_v50  ;;  %v1995_v32 = vpop.xlane.xlu1 %1994  ;;  %v11971_v51 = vld [vmem:[#allocation122_spill] sm:$0xff]  ;;  %v11973_v19 = vld [vmem:[#allocation235_spill] sm:$0xff] }
 0x3ec   :  { %v4178_v53 = vpop.eup %4177  ;;  %v3648_v11 = vadd.f32 %v3647_v44, %v3646_v6  ;;  %v3447_v45 = vadd.f32 %v3383_v9, %v3319_v52  ;;  %v2762_v49 = vadd.f32 %v11961_v14, %v2761_v28  ;;  %v2769_v18 = vand.u32 2147483648, %v11967_v59  ;;  %v9676_v28 = vld [vmem:[%s10406_s1 + $0x138] sm:$0xff] }
 0x3ed   :  { %v3129_v1 = vmax.f32 %v3065_v37, 0.0  ;;  %v3384_v34 = vsel %vm245_vm11, %v3256_v56, 0.0  ;;  %v2652_v30 = vmul.f32 %v8939_v7, %v1992_v21  ;;  %vm2763_vm3 = vweird.f32 %v11967_v59  ;;  %v11975_v9 = vld [vmem:[#allocation145_spill] sm:$0xff] }
 0x3ee   :  { %v3649_v50 = vsel %vm16_vm9, %v3565_v26, 0.0  ;;  %3512 = vst.msk [vmem:[#allocation2 + $0x118] sm:$0xff] %vm16_vm9, %v3447_v45  ;;  %v3448_v61 = vadd.f32 %v3384_v34, %v3320_v16  ;;  %v2767_v31 = vand.u32 2147483647, %v11967_v59  ;;  %v2776_v22 = vmul.f32 %v11968_v33, %v2775_v8  ;;  %vm9657_vm4 = vmor %vm2763_vm3, %vm2764_vm2  ;;  %v11974_v8 = vld [vmem:[#allocation168_spill] sm:$0xff]  ;;  %v1608_v26 = vpop.xlane.xlu2 %1607 }
 0x3ef   :  { %v3651_v5 = vsel %vm16_vm9, %v3566_v27, 0.0  ;;  %v3066_v0 = vsub.f32 1.0, %v2652_v30  ;;  %v1721_v43 = vsub.f32 %v9023_v63, %v1605_v47  ;;  %v2667_v7 = vmul.f32 %v9037_v60, %v1995_v32  ;;  %1670 = vadd.xlane.f32.xlu2 %v11971_v51  ;;  %v3569_v27 = vld [vmem:[#allocation2 + $0xc8] sm:$0xff]  ;;  %v3323_v51 = vld [vmem:[#allocation2 + $0x138] sm:$0xff] }
 0x3f0   :  { %vm247_vm5 = vcmp.ge.s32.totalorder %v9664_v12, 0  ;;  %v3650_v42 = vadd.f32 %v3649_v50, %v3648_v11  ;;  %3513 = vst.msk [vmem:[#allocation2 + $0x120] sm:$0xff] %vm16_vm9, %v3448_v61  ;;  %v1325_v63 = vmul.f32 0.6931472, %v4178_v53  ;;  %v2766_v60 = vsel %vm9657_vm4, %v11961_v14, %v2762_v49  ;;  %v11972_v14 = vld [vmem:[#allocation203_spill] sm:$0xff]  ;;  %1673 = vadd.xlane.f32.xlu1 %v11974_v8  ;;  %v11976_v53 = vld [vmem:[#allocation186_spill] sm:$0xff]  ;;  %v1998_v34 = vpop.xlane.xlu0 %1997 }
 0x3f1   :  { %v2770_v41 = vor.u32 1.1754944e-38, %v2769_v18  ;;  %v4180_v25 = vpop.eup %4179  ;;  %v3193_v57 = vmul.f32 %v3129_v1, %v3129_v1  ;;  %v1785_v6 = vmax.f32 %v1721_v43, 0.0  ;;  %v3067_v44 = vsub.f32 1.0, %v2667_v7  ;;  %2060 = vadd.xlane.f32.xlu0 %v11973_v19  ;;  %v3568_v11 = vld [vmem:[#allocation2 + $0xc0] sm:$0xff]  ;;  %v11979_v50 = vld [vmem:[#allocation179_spill] sm:$0xff]  ;;  %v11980_v7 = vld [vmem:[#allocation189_spill] sm:$0xff] }
 0x3f2   :  { %4181 = vlog2.f32 %v11967_v59  ;;  %vm248_vm6 = vcmp.ge.s32.totalorder %v9676_v28, 0  ;;  %v3652_v4 = vadd.f32 %v3651_v5, %v3650_v42  ;;  %v9680_v10 = vadd.f32 %v11968_v33, %v2776_v22  ;;  %v3322_v42 = vld [vmem:[#allocation2 + $0x130] sm:$0xff] }
 0x3f3   :  { %vm2779_vm7 = vweird.f32 %v11968_v33  ;;  %v2790_v52 = vsub.f32 1.0, %v11972_v14  ;;  %v3653_v37 = vsel %vm16_vm9, %v3567_v40, 0.0  ;;  %v3130_v15 = vmax.f32 %v3066_v0, 0.0  ;;  %v1611_v30 = vpop.xlane.xlu1 %1610 }
 0x3f4   :  { %v3257_v58 = vmul.f32 %v3193_v57, %v1785_v6  ;;  %vm2768_vm8 = vcmp.eq.f32.partialorder %v2767_v31, 8.507059e+37  ;;  %v9688_v56 = vadd.f32 %v1325_v63, %v11975_v9  ;;  %v1327_v17 = vmul.f32 0.6931472, %v4180_v25 }
 0x3f5   :  { %v9690_v16 = vsel %vm2768_vm8, %v2770_v41, %v2766_v60  ;;  %vm2778_vm0 = vweird.f32 %v11976_v53  ;;  %v3131_v23 = vmax.f32 %v3067_v44, 0.0  ;;  %v1722_v21 = vsub.f32 %v9112_v35, %v1608_v26  ;;  %v11981_v60 = vld [vmem:[#allocation227_spill] sm:$0xff]  ;;  %v3570_v41 = vld [vmem:[#allocation2 + $0xd0] sm:$0xff] }
 0x3f6   :  { %v3385_v45 = vsel %vm246_vm1, %v3257_v58, 0.0  ;;  %vm9698_vm10 = vmor %vm2778_vm0, %vm2779_vm7  ;;  %v2782_v59 = vand.u32 2147483647, %v11976_v53  ;;  %v3654_v18 = vadd.f32 %v3653_v37, %v3652_v4  ;;  %v2791_v61 = vmul.f32 %v11979_v50, %v2790_v52  ;;  %v11982_v4 = vld [vmem:[#allocation144_spill] sm:$0xff]  ;;  %v11983_v37 = vld [vmem:[#allocation243_spill] sm:$0xff] }
 0x3f7   :  { %v3449_v1 = vadd.f32 %v3385_v45, %v3321_v20  ;;  %v2781_v3 = vsel %vm9698_vm10, %v11968_v33, %v9680_v10  ;;  %v3194_v47 = vmul.f32 %v3130_v15, %v3130_v15  ;;  %v1786_v32 = vmax.f32 %v1722_v21, 0.0  ;;  %2063 = vadd.xlane.f32.xlu2 %v11981_v60  ;;  %v2001_v15 = vpop.xlane.xlu2 %2000  ;;  %v11984_v20 = vld [vmem:[#allocation57_spill] sm:$0xff]  ;;  %v11985_v45 = vld [vmem:[#allocation148_spill] sm:$0xff]  ;;  %v3324_v60 = vld [vmem:[#allocation2 + $0x140] sm:$0xff] }
 0x3f8   :  { %v4182_v35 = vpop.eup %4181  ;;  %v2682_v31 = vmul.f32 %v9154_v46, %v1998_v34  ;;  %v1723_v22 = vsub.f32 %v9236_v39, %v1611_v30  ;;  %v3655_v5 = vsel %vm16_vm9, %v3568_v11, 0.0  ;;  %v3657_v0 = vsel %vm16_vm9, %v3569_v27, 0.0  ;;  %v9719_v46 = vld [vmem:[%s10406_s1 + $0x140] sm:$0xff]  ;;  %2066 = vadd.xlane.f32.xlu1 %v11983_v37  ;;  %v1614_v11 = vpop.xlane.xlu0 %1613  ;;  %v3571_v34 = vld [vmem:[#allocation2 + $0xd8] sm:$0xff] }
 0x3f9   :  { %3514 = vst.msk [vmem:[#allocation2 + $0x128] sm:$0xff] %vm16_vm9, %v3449_v1  ;;  %v2784_v43 = vand.u32 2147483648, %v11976_v53  ;;  %vm2793_vm11 = vweird.f32 %v11980_v7  ;;  %v3195_v33 = vmul.f32 %v3131_v23, %v3131_v23  ;;  %v3258_v48 = vmul.f32 %v3194_v47, %v1786_v32  ;;  %1676 = vadd.xlane.f32.xlu0 %v11982_v4  ;;  %v3572_v30 = vld [vmem:[#allocation2 + $0xe0] sm:$0xff] }
 0x3fa   :  { %v3068_v40 = vsub.f32 1.0, %v2682_v31  ;;  %v1787_v63 = vmax.f32 %v1723_v22, 0.0  ;;  %vm249_vm12 = vcmp.ge.s32.totalorder %v9719_v46, 0  ;;  %v3656_v39 = vadd.f32 %v3655_v5, %v3654_v18  ;;  %v11989_v31 = vld [vmem:[#allocation20_spill] sm:$0xff]  ;;  %v11990_v22 = vld [vmem:[#allocation149_spill] sm:$0xff] }
 0x3fb   :  { %v1329_v25 = vmul.f32 0.6931472, %v4182_v35  ;;  %v2792_v57 = vadd.f32 %v11979_v50, %v2791_v61  ;;  %vm2794_vm13 = vweird.f32 %v11979_v50  ;;  %v3386_v6 = vsel %vm247_vm5, %v3258_v48, 0.0  ;;  %v2004_v27 = vpop.xlane.xlu1 %2003 }
 0x3fc   :  { %v3259_v44 = vmul.f32 %v3195_v33, %v1787_v63  ;;  %v2797_v10 = vand.u32 2147483647, %v11980_v7  ;;  %4183 = vlog2.f32 %v11976_v53  ;;  %v3658_v14 = vadd.f32 %v3657_v0, %v3656_v39  ;;  %vm9744_vm15 = vmor %vm2793_vm11, %vm2794_vm13  ;;  %v11991_v33 = vld [vmem:[#allocation91_spill] sm:$0xff] }
 0x3fd   :  { %v3450_v52 = vadd.f32 %v3386_v6, %v3322_v42  ;;  %v2799_v58 = vand.u32 2147483648, %v11980_v7  ;;  %v2805_v19 = vsub.f32 1.0, %v11984_v20  ;;  %v3659_v12 = vsel %vm16_vm9, %v3570_v41, 0.0  ;;  %v11992_v39 = vld [vmem:[#allocation147_spill] sm:$0xff] }
 0x3fe   :  { %v3132_v8 = vmax.f32 %v3068_v40, 0.0  ;;  %v3387_v26 = vsel %vm248_vm6, %v3259_v44, 0.0  ;;  %v2697_v9 = vmul.f32 %v9327_v13, %v2001_v15  ;;  %v9738_v23 = vadd.f32 %v1327_v17, %v11985_v45 }
 0x3ff   :  { %3515 = vst.msk [vmem:[#allocation2 + $0x130] sm:$0xff] %vm16_vm9, %v3450_v52  ;;  %v3451_v53 = vadd.f32 %v3387_v26, %v3323_v51  ;;  %vm2783_vm14 = vcmp.eq.f32.partialorder %v2782_v59, 8.507059e+37  ;;  %v2785_v21 = vor.u32 1.1754944e-38, %v2784_v43  ;;  %v1724_v13 = vsub.f32 %v9392_v54, %v1614_v11  ;;  %v9756_v59 = vld [vmem:[%s10406_s1 + $0x148] sm:$0xff]  ;;  %1679 = vadd.xlane.f32.xlu2 %v11989_v31 }
 0x400   :  { %v3069_v28 = vsub.f32 1.0, %v2697_v9  ;;  %v2712_v18 = vmul.f32 %v9485_v62, %v2004_v27  ;;  %v2796_v17 = vsel %vm9744_vm15, %v11979_v50, %v2792_v57  ;;  %vm250_vm1 = vcmp.ge.s32.totalorder %v9756_v59, 0  ;;  %v11988_v62 = vld [vmem:[#allocation140_spill] sm:$0xff]  ;;  %v1617_v57 = vpop.xlane.xlu2 %1616  ;;  %v11996_v11 = vld [vmem:[#allocation151_spill] sm:$0xff] }
 0x401   :  { %v3660_v1 = vadd.f32 %v3659_v12, %v3658_v14  ;;  %3516 = vst.msk [vmem:[#allocation2 + $0x138] sm:$0xff] %vm16_vm9, %v3451_v53  ;;  %v9760_v61 = vsel %vm2783_vm14, %v2785_v21, %v2781_v3  ;;  %v2800_v54 = vor.u32 1.1754944e-38, %v2799_v58  ;;  %v2806_v35 = vmul.f32 %v11988_v62, %v2805_v19  ;;  %v9774_v3 = vld [vmem:[%s10406_s1 + $0x150] sm:$0xff]  ;;  %1682 = vadd.xlane.f32.xlu0 %v11992_v39  ;;  %v2007_v58 = vpop.xlane.xlu0 %2006  ;;  %v3325_v21 = vld [vmem:[#allocation2 + $0x148] sm:$0xff] }
 0x402   :  { %v4184_v47 = vpop.eup %4183  ;;  %v3196_v32 = vmul.f32 %v3132_v8, %v3132_v8  ;;  %v1788_v50 = vmax.f32 %v1724_v13, 0.0  ;;  %v9765_v5 = vadd.f32 %v1329_v25, %v11990_v22  ;;  %vm2798_vm2 = vcmp.eq.f32.partialorder %v2797_v10, 8.507059e+37  ;;  %v3573_v25 = vld [vmem:[#allocation2 + $0xe8] sm:$0xff]  ;;  %v11993_v10 = vld [vmem:[#allocation240_spill] sm:$0xff]  ;;  %v11997_v13 = vld [vmem:[#allocation182_spill] sm:$0xff] }
 0x403   :  { %v3070_v0 = vsub.f32 1.0, %v2712_v18  ;;  %v9767_v43 = vsel %vm2798_vm2, %v2800_v54, %v2796_v17  ;;  %vm2808_vm3 = vweird.f32 %v11991_v33  ;;  %4185 = vlog2.f32 %v11980_v7  ;;  %v1620_v46 = vpop.xlane.xlu1 %1619  ;;  %v9811_v17 = vld [vmem:[%s10406_s1 + $0x158] sm:$0xff]  ;;  %v11998_v22 = vld [vmem:[#allocation184_spill] sm:$0xff] }
 0x404   :  { %vm251_vm4 = vcmp.ge.s32.totalorder %v9774_v3, 0  ;;  %v3661_v48 = vsel %vm16_vm9, %v3571_v34, 0.0  ;;  %v3663_v42 = vsel %vm16_vm9, %v3572_v30, 0.0  ;;  %v3133_v40 = vmax.f32 %v3069_v28, 0.0 }
 0x405   :  { %v3260_v63 = vmul.f32 %v3196_v32, %v1788_v50  ;;  %v3662_v41 = vadd.f32 %v3661_v48, %v3660_v1  ;;  %v1331_v7 = vmul.f32 0.6931472, %v4184_v47  ;;  %v2807_v6 = vadd.f32 %v11988_v62, %v2806_v35  ;;  %v3574_v1 = vld [vmem:[#allocation2 + $0xf0] sm:$0xff] }
 0x406   :  { %vm2809_vm5 = vweird.f32 %v11988_v62  ;;  %v1725_v51 = vsub.f32 %v9549_v24, %v1617_v57  ;;  %v2814_v4 = vand.u32 2147483648, %v11991_v33  ;;  %v2820_v14 = vsub.f32 1.0, %v11993_v10  ;;  %v3326_v50 = vld [vmem:[#allocation2 + $0x150] sm:$0xff]  ;;  %v12006_v24 = vld [vmem:[#allocation78_spill] sm:$0xff] }
 0x407   :  { %v3388_v44 = vsel %vm249_vm12, %v3260_v63, 0.0  ;;  %v3664_v52 = vadd.f32 %v3663_v42, %v3662_v41  ;;  %v3134_v15 = vmax.f32 %v3070_v0, 0.0  ;;  %v2812_v20 = vand.u32 2147483647, %v11991_v33  ;;  %vm9794_vm6 = vmor %vm2808_vm3, %vm2809_vm5 }
 0x408   :  { %v3452_v37 = vadd.f32 %v3388_v44, %v3324_v60  ;;  %v3665_v19 = vsel %vm16_vm9, %v3573_v25, 0.0  ;;  %v3197_v12 = vmul.f32 %v3133_v40, %v3133_v40  ;;  %v1789_v8 = vmax.f32 %v1725_v51, 0.0  ;;  %v2010_v31 = vpop.xlane.xlu2 %2009  ;;  %v3575_v40 = vld [vmem:[#allocation2 + $0xf8] sm:$0xff] }
 0x409   :  { %v2727_v26 = vmul.f32 %v9553_v55, %v2007_v58  ;;  %v4186_v9 = vpop.eup %4185  ;;  %v1726_v53 = vsub.f32 %v9572_v2, %v1620_v46  ;;  %v9801_v27 = vadd.f32 %v1331_v7, %v11996_v11  ;;  %v2811_v55 = vsel %vm9794_vm6, %v11988_v62, %v2807_v6  ;;  %v1623_v57 = vpop.xlane.xlu0 %1622  ;;  %v12005_v58 = vld [vmem:[#allocation146_spill] sm:$0xff]  ;;  %v9861_v11 = vld [vmem:[%s10406_s1 + $0x168] sm:$0xff] }
 0x40a   :  { %3517 = vst.msk [vmem:[#allocation2 + $0x140] sm:$0xff] %vm16_vm9, %v3452_v37  ;;  %4187 = vlog2.f32 %v11991_v33  ;;  %v3261_v45 = vmul.f32 %v3197_v12, %v1789_v8  ;;  %v2815_v28 = vor.u32 1.1754944e-38, %v2814_v4  ;;  %v2821_v18 = vmul.f32 %v11997_v13, %v2820_v14  ;;  %v11999_v33 = vld [vmem:[#allocation241_spill] sm:$0xff]  ;;  %v9836_v14 = vld [vmem:[%s10406_s1 + $0x160] sm:$0xff] }
 0x40b   :  { %v3071_v49 = vsub.f32 1.0, %v2727_v26  ;;  %vm252_vm7 = vcmp.ge.s32.totalorder %v9811_v17, 0  ;;  %v3666_v2 = vadd.f32 %v3665_v19, %v3664_v52  ;;  %v3198_v34 = vmul.f32 %v3134_v15, %v3134_v15  ;;  %v2013_v4 = vpop.xlane.xlu1 %2012  ;;  %v3576_v52 = vld [vmem:[#allocation2 + $0x100] sm:$0xff] }
 0x40c   :  { %v1790_v30 = vmax.f32 %v1726_v53, 0.0  ;;  %vm2813_vm8 = vcmp.eq.f32.partialorder %v2812_v20, 8.507059e+37  ;;  %v3389_v54 = vsel %vm250_vm1, %v3261_v45, 0.0  ;;  %v1333_v35 = vmul.f32 0.6931472, %v4186_v9  ;;  %v12007_v9 = vld [vmem:[#allocation242_spill] sm:$0xff] }
 0x40d   :  { %v9816_v62 = vsel %vm2813_vm8, %v2815_v28, %v2811_v55  ;;  %vm2824_vm0 = vweird.f32 %v11997_v13  ;;  %v3453_v47 = vadd.f32 %v3389_v54, %v3325_v21  ;;  %v2827_v0 = vand.u32 2147483647, %v11998_v22  ;;  %v3327_v28 = vld [vmem:[#allocation2 + $0x158] sm:$0xff] }
 0x40e   :  { %v3262_v32 = vmul.f32 %v3198_v34, %v1790_v30  ;;  %v2835_v48 = vsub.f32 1.0, %v11999_v33  ;;  %v3667_v42 = vsel %vm16_vm9, %v3574_v1, 0.0  ;;  %v3135_v63 = vmax.f32 %v3071_v49, 0.0  ;;  %v3577_v34 = vld [vmem:[#allocation2 + $0x108] sm:$0xff] }
 0x40f   :  { %v2742_v59 = vmul.f32 %v9626_v36, %v2010_v31  ;;  %v2822_v60 = vadd.f32 %v11997_v13, %v2821_v18  ;;  %v3668_v41 = vadd.f32 %v3667_v42, %v3666_v2  ;;  %3518 = vst.msk [vmem:[#allocation2 + $0x148] sm:$0xff] %vm16_vm9, %v3453_v47  ;;  %vm2823_vm10 = vweird.f32 %v11998_v22  ;;  %v12000_v36 = vld [vmem:[#allocation154_spill] sm:$0xff] }
 0x410   :  { %v4188_v39 = vpop.eup %4187  ;;  %v3390_v25 = vsel %vm251_vm4, %v3262_v32, 0.0  ;;  %v2829_v7 = vand.u32 2147483648, %v11998_v22  ;;  %v1727_v51 = vsub.f32 %v9629_v29, %v1623_v57  ;;  %v9831_v10 = vadd.f32 %v1333_v35, %v12000_v36  ;;  %vm9843_vm12 = vmor %vm2823_vm10, %vm2824_vm0  ;;  %v12008_v35 = vld [vmem:[#allocation155_spill] sm:$0xff] }
 0x411   :  { %v3454_v6 = vadd.f32 %v3390_v25, %v3326_v50  ;;  %v3072_v44 = vsub.f32 1.0, %v2742_v59  ;;  %vm253_vm11 = vcmp.ge.s32.totalorder %v9836_v14, 0  ;;  %v3669_v3 = vsel %vm16_vm9, %v3575_v40, 0.0  ;;  %v2016_v33 = vpop.xlane.xlu0 %2015 }
 0x412   :  { %v2757_v37 = vmul.f32 %v9633_v38, %v2013_v4  ;;  %vm9847_vm13 = vcmp.eq.f32.partialorder %v2827_v0, 8.507059e+37  ;;  %v2836_v20 = vmul.f32 %v12005_v58, %v2835_v48  ;;  %v3199_v19 = vmul.f32 %v3135_v63, %v3135_v63  ;;  %v12009_v48 = vld [vmem:[#allocation238_spill] sm:$0xff] }
 0x413   :  { %3519 = vst.msk [vmem:[#allocation2 + $0x150] sm:$0xff] %vm16_vm9, %v3454_v6  ;;  %v1791_v12 = vmax.f32 %v1727_v51, 0.0  ;;  %v2826_v38 = vsel %vm9843_vm12, %v11997_v13, %v2822_v60  ;;  %v1335_v8 = vmul.f32 0.6931472, %v4188_v39  ;;  %v2830_v46 = vor.u32 1.1754944e-38, %v2829_v7  ;;  %v1626_v13 = vpop.xlane.xlu2 %1625  ;;  %v1629_v60 = vpop.xlane.xlu1 %1628  ;;  %v3328_v7 = vld [vmem:[#allocation2 + $0x160] sm:$0xff] }
 0x414   :  { %v3073_v26 = vsub.f32 1.0, %v2757_v37  ;;  %vm2838_vm14 = vweird.f32 %v12006_v24  ;;  %v2850_v53 = vsub.f32 1.0, %v12007_v9  ;;  %vm254_vm15 = vcmp.ge.s32.totalorder %v9861_v11, 0  ;;  %v9937_v11 = vld [vmem:[%s10406_s1 + $0x178] sm:$0xff] }
 0x415   :  { %v3670_v55 = vadd.f32 %v3669_v3, %v3668_v41  ;;  %v3671_v45 = vsel %vm16_vm9, %v3576_v52, 0.0  ;;  %v3136_v21 = vmax.f32 %v3072_v44, 0.0  ;;  %v3263_v49 = vmul.f32 %v3199_v19, %v1791_v12  ;;  %v12012_v41 = vld [vmem:[#allocation245_spill] sm:$0xff]  ;;  %v12013_v44 = vld [vmem:[#allocation75_spill] sm:$0xff]  ;;  %v3578_v52 = vld [vmem:[#allocation2 + $0x110] sm:$0xff] }
 0x416   :  { %v9867_v18 = vsel %vm9847_vm13, %v2830_v46, %v2826_v38  ;;  %v2837_v2 = vadd.f32 %v12005_v58, %v2836_v20  ;;  %vm2839_vm1 = vweird.f32 %v12005_v58  ;;  %v2842_v1 = vand.u32 2147483647, %v12006_v24  ;;  %v3329_v20 = vld [vmem:[#allocation2 + $0x168] sm:$0xff]  ;;  %v12014_v12 = vld [vmem:[#allocation80_spill] sm:$0xff] }
 0x417   :  { %v3391_v30 = vsel %vm252_vm7, %v3263_v49, 0.0  ;;  %v1728_v54 = vsub.f32 %v9688_v56, %v1626_v13  ;;  %v9876_v47 = vadd.f32 %v1335_v8, %v12008_v35  ;;  %v2844_v32 = vand.u32 2147483648, %v12006_v24  ;;  %vm9885_vm2 = vmor %vm2838_vm14, %vm2839_vm1 }
 0x418   :  { %v3672_v50 = vadd.f32 %v3671_v45, %v3670_v55  ;;  %v3455_v31 = vadd.f32 %v3391_v30, %v3327_v28  ;;  %v3137_v0 = vmax.f32 %v3073_v26, 0.0  ;;  %v2851_v42 = vmul.f32 %v12009_v48, %v2850_v53 }
 0x419   :  { %v3200_v40 = vmul.f32 %v3136_v21, %v3136_v21  ;;  %v1792_v63 = vmax.f32 %v1728_v54, 0.0  ;;  %v2772_v59 = vmul.f32 %v9690_v16, %v2016_v33  ;;  %4189 = vlog2.f32 %v11998_v22  ;;  %v9902_v22 = vld [vmem:[%s10406_s1 + $0x170] sm:$0xff]  ;;  %v1632_v45 = vpop.xlane.xlu0 %1631 }
 0x41a   :  { %v3673_v17 = vsel %vm16_vm9, %v3577_v34, 0.0  ;;  %3520 = vst.msk [vmem:[#allocation2 + $0x158] sm:$0xff] %vm16_vm9, %v3455_v31  ;;  %v1729_v39 = vsub.f32 %v9738_v23, %v1629_v60  ;;  %v2841_v16 = vsel %vm9885_vm2, %v12005_v58, %v2837_v2  ;;  %v2865_v25 = vsub.f32 1.0, %v12012_v41  ;;  %v3579_v34 = vld [vmem:[#allocation2 + $0x118] sm:$0xff] }
 0x41b   :  { %v3264_v57 = vmul.f32 %v3200_v40, %v1792_v63  ;;  %v3074_v6 = vsub.f32 1.0, %v2772_v59  ;;  %vm2854_vm3 = vweird.f32 %v12009_v48  ;;  %v2857_v51 = vand.u32 2147483647, %v12013_v44  ;;  %v2019_v19 = vpop.xlane.xlu2 %2018  ;;  %v2022_v2 = vpop.xlane.xlu1 %2021  ;;  %v3580_v59 = vld [vmem:[#allocation2 + $0x120] sm:$0xff] }
 0x41c   :  { %vm255_vm4 = vcmp.ge.s32.totalorder %v9902_v22, 0  ;;  %v3201_v23 = vmul.f32 %v3137_v0, %v3137_v0  ;;  %v1793_v4 = vmax.f32 %v1729_v39, 0.0  ;;  %v2852_v36 = vadd.f32 %v12009_v48, %v2851_v42  ;;  %v12020_v0 = vld [vmem:[#allocation246_spill] sm:$0xff] }
 0x41d   :  { %4191 = vlog2.f32 %v12006_v24  ;;  %v3674_v3 = vadd.f32 %v3673_v17, %v3672_v50  ;;  %v3392_v37 = vsel %vm253_vm11, %v3264_v57, 0.0  ;;  %vm2843_vm5 = vcmp.eq.f32.partialorder %v2842_v1, 8.507059e+37  ;;  %v12019_v50 = vld [vmem:[#allocation94_spill] sm:$0xff]  ;;  %v3330_v17 = vld [vmem:[#allocation2 + $0x170] sm:$0xff] }
 0x41e   :  { %v2845_v29 = vor.u32 1.1754944e-38, %v2844_v32  ;;  %v3456_v15 = vadd.f32 %v3392_v37, %v3328_v7  ;;  %v3265_v58 = vmul.f32 %v3201_v23, %v1793_v4  ;;  %vm2853_vm6 = vweird.f32 %v12013_v44 }
 0x41f   :  { %v2866_v38 = vmul.f32 %v12014_v12, %v2865_v25  ;;  %v4190_v8 = vpop.eup %4189  ;;  %v3138_v26 = vmax.f32 %v3074_v6, 0.0  ;;  %v2787_v46 = vmul.f32 %v9760_v61, %v2019_v19  ;;  %vm9916_vm7 = vmor %vm2853_vm6, %vm2854_vm3  ;;  %v2859_v9 = vand.u32 2147483648, %v12013_v44  ;;  %v12023_v25 = vld [vmem:[#allocation157_spill] sm:$0xff] }
 0x420   :  { %v9912_v24 = vsel %vm2843_vm5, %v2845_v29, %v2841_v16  ;;  %v3675_v53 = vsel %vm16_vm9, %v3578_v52, 0.0  ;;  %3521 = vst.msk [vmem:[#allocation2 + $0x160] sm:$0xff] %vm16_vm9, %v3456_v15  ;;  %v3393_v55 = vsel %vm254_vm15, %v3265_v58, 0.0  ;;  %v2856_v61 = vsel %vm9916_vm7, %v12009_v48, %v2852_v36 }
 0x421   :  { %vm9928_vm8 = vcmp.eq.f32.partialorder %v2857_v51, 8.507059e+37  ;;  %v3457_v49 = vadd.f32 %v3393_v55, %v3329_v20  ;;  %v3075_v28 = vsub.f32 1.0, %v2787_v46  ;;  %v1730_v13 = vsub.f32 %v9765_v5, %v1632_v45  ;;  %v2025_v20 = vpop.xlane.xlu0 %2024 }
 0x422   :  { %4193 = vlog2.f32 %v12013_v44  ;;  %vm256_vm0 = vcmp.ge.s32.totalorder %v9937_v11, 0  ;;  %v2802_v30 = vmul.f32 %v9767_v43, %v2022_v2  ;;  %v1337_v54 = vmul.f32 0.6931472, %v4190_v8  ;;  %v9950_v43 = vld [vmem:[%s10406_s1 + $0x180] sm:$0xff]  ;;  %v12027_v8 = vld [vmem:[#allocation160_spill] sm:$0xff] }
 0x423   :  { %v4192_v1 = vpop.eup %4191  ;;  %v2867_v35 = vadd.f32 %v12014_v12, %v2866_v38  ;;  %vm2869_vm10 = vweird.f32 %v12014_v12  ;;  %v3202_v5 = vmul.f32 %v3138_v26, %v3138_v26  ;;  %3522 = vst.msk [vmem:[#allocation2 + $0x168] sm:$0xff] %vm16_vm9, %v3457_v49  ;;  %v1794_v32 = vmax.f32 %v1730_v13, 0.0  ;;  %v1635_v41 = vpop.xlane.xlu2 %1634 }
 0x424   :  { %v2872_v31 = vand.u32 2147483647, %v12019_v50  ;;  %v2880_v33 = vsub.f32 1.0, %v12020_v0  ;;  %v3676_v48 = vadd.f32 %v3675_v53, %v3674_v3  ;;  %v3076_v42 = vsub.f32 1.0, %v2802_v30  ;;  %v12026_v3 = vld [vmem:[#allocation72_spill] sm:$0xff]  ;;  %v1638_v22 = vpop.xlane.xlu1 %1637  ;;  %v3331_v53 = vld [vmem:[#allocation2 + $0x178] sm:$0xff] }
 0x425   :  { %v2860_v40 = vor.u32 1.1754944e-38, %v2859_v9  ;;  %vm2868_vm11 = vweird.f32 %v12019_v50  ;;  %vm257_vm12 = vcmp.ge.s32.totalorder %v9950_v43, 0  ;;  %v3677_v63 = vsel %vm16_vm9, %v3579_v34, 0.0  ;;  %v10032_v43 = vld [vmem:[%s10406_s1 + $0x190] sm:$0xff] }
 0x426   :  { %v3139_v60 = vmax.f32 %v3075_v28, 0.0  ;;  %v3266_v56 = vmul.f32 %v3202_v5, %v1794_v32  ;;  %v1339_v39 = vmul.f32 0.6931472, %v4192_v1  ;;  %vm9956_vm13 = vmor %vm2868_vm11, %vm2869_vm10  ;;  %v9961_v57 = vadd.f32 %v1337_v54, %v12023_v25  ;;  %v12029_v28 = vld [vmem:[#allocation81_spill] sm:$0xff]  ;;  %v3332_v5 = vld [vmem:[#allocation2 + $0x180] sm:$0xff] }
 0x427   :  { %v9965_v7 = vsel %vm9928_vm8, %v2860_v40, %v2856_v61  ;;  %v2871_v6 = vsel %vm9956_vm13, %v12014_v12, %v2867_v35  ;;  %v2874_v44 = vand.u32 2147483648, %v12019_v50  ;;  %v1731_v4 = vsub.f32 %v9801_v27, %v1635_v41  ;;  %v12028_v61 = vld [vmem:[#allocation34_spill] sm:$0xff] }
 0x428   :  { %v4194_v51 = vpop.eup %4193  ;;  %v3394_v23 = vsel %vm255_vm4, %v3266_v56, 0.0  ;;  %vm9974_vm14 = vcmp.eq.f32.partialorder %v2872_v31, 8.507059e+37  ;;  %v2881_v52 = vmul.f32 %v12026_v3, %v2880_v33  ;;  %v3678_v37 = vadd.f32 %v3677_v63, %v3676_v48  ;;  %v12030_v31 = vld [vmem:[#allocation161_spill] sm:$0xff]  ;;  %v3581_v33 = vld [vmem:[#allocation2 + $0x128] sm:$0xff] }
 0x429   :  { %v3679_v29 = vsel %vm16_vm9, %v3580_v59, 0.0  ;;  %v3458_v15 = vadd.f32 %v3394_v23, %v3330_v17  ;;  %v3140_v58 = vmax.f32 %v3076_v42, 0.0  ;;  %v3203_v19 = vmul.f32 %v3139_v60, %v3139_v60  ;;  %v1641_v59 = vpop.xlane.xlu0 %1640  ;;  %v3582_v17 = vld [vmem:[#allocation2 + $0x130] sm:$0xff] }
 0x42a   :  { %v1795_v12 = vmax.f32 %v1731_v4, 0.0  ;;  %v2817_v38 = vmul.f32 %v9816_v62, %v2025_v20  ;;  %v9982_v26 = vadd.f32 %v1339_v39, %v12027_v8  ;;  %v1732_v27 = vsub.f32 %v9831_v10, %v1638_v22  ;;  %v9992_v62 = vld [vmem:[%s10406_s1 + $0x188] sm:$0xff]  ;;  %v12037_v4 = vld [vmem:[#allocation196_spill] sm:$0xff] }
 0x42b   :  { %3523 = vst.msk [vmem:[#allocation2 + $0x170] sm:$0xff] %vm16_vm9, %v3458_v15  ;;  %v2875_v46 = vor.u32 1.1754944e-38, %v2874_v44  ;;  %v1341_v14 = vmul.f32 0.6931472, %v4194_v51  ;;  %vm2884_vm15 = vweird.f32 %v12026_v3  ;;  %v2882_v45 = vadd.f32 %v12026_v3, %v2881_v52  ;;  %v2028_v32 = vpop.xlane.xlu2 %2027  ;;  %v3333_v8 = vld [vmem:[#allocation2 + $0x188] sm:$0xff]  ;;  %v12045_v60 = vld [vmem:[#allocation8_spill] sm:$0xff] }
 0x42c   :  { %v3267_v9 = vmul.f32 %v3203_v19, %v1795_v12  ;;  %v3077_v55 = vsub.f32 1.0, %v2817_v38  ;;  %v2895_v21 = vsub.f32 1.0, %v12028_v61  ;;  %vm258_vm1 = vcmp.ge.s32.totalorder %v9992_v62, 0  ;;  %v2031_v25 = vpop.xlane.xlu1 %2030  ;;  %v10051_v19 = vld [vmem:[%s10406_s1 + $0x198] sm:$0xff]  ;;  %v12043_v61 = vld [vmem:[#allocation43_spill] sm:$0xff] }
 0x42d   :  { %v3204_v49 = vmul.f32 %v3140_v58, %v3140_v58  ;;  %v1796_v10 = vmax.f32 %v1732_v27, 0.0  ;;  %v2887_v13 = vand.u32 2147483647, %v12029_v28  ;;  %v2889_v2 = vand.u32 2147483648, %v12029_v28  ;;  %v12038_v27 = vld [vmem:[#allocation200_spill] sm:$0xff] }
 0x42e   :  { %v3680_v1 = vadd.f32 %v3679_v29, %v3678_v37  ;;  %v3395_v34 = vsel %vm256_vm0, %v3267_v9, 0.0  ;;  %v10001_v30 = vsel %vm9974_vm14, %v2875_v46, %v2871_v6  ;;  %4195 = vlog2.f32 %v12019_v50  ;;  %v12033_v50 = vld [vmem:[#allocation198_spill] sm:$0xff]  ;;  %v12036_v6 = vld [vmem:[#allocation152_spill] sm:$0xff] }
 0x42f   :  { %v3459_v54 = vadd.f32 %v3395_v34, %v3331_v53  ;;  %v3268_v35 = vmul.f32 %v3204_v49, %v1796_v10  ;;  %v10005_v0 = vadd.f32 %v1341_v14, %v12030_v31  ;;  %vm2883_vm2 = vweird.f32 %v12029_v28  ;;  %v3583_v49 = vld [vmem:[#allocation2 + $0x138] sm:$0xff] }
 0x430   :  { %v3141_v48 = vmax.f32 %v3077_v55, 0.0  ;;  %v2832_v11 = vmul.f32 %v9867_v18, %v2028_v32  ;;  %vm10011_vm3 = vmor %vm2883_vm2, %vm2884_vm15  ;;  %v2896_v40 = vmul.f32 %v12033_v50, %v2895_v21  ;;  %4197 = vlog2.f32 %v12029_v28 }
 0x431   :  { %3524 = vst.msk [vmem:[#allocation2 + $0x178] sm:$0xff] %vm16_vm9, %v3459_v54  ;;  %v3396_v63 = vsel %vm257_vm12, %v3268_v35, 0.0  ;;  %v2886_v18 = vsel %vm10011_vm3, %v12026_v3, %v2882_v45  ;;  %vm10023_vm4 = vcmp.eq.f32.partialorder %v2887_v13, 8.507059e+37  ;;  %v2890_v56 = vor.u32 1.1754944e-38, %v2889_v2  ;;  %v2034_v34 = vpop.xlane.xlu0 %2033 }
 0x432   :  { %v3460_v39 = vadd.f32 %v3396_v63, %v3332_v5  ;;  %v3078_v16 = vsub.f32 1.0, %v2832_v11  ;;  %v1733_v41 = vsub.f32 %v9876_v47, %v1641_v59  ;;  %v2910_v44 = vsub.f32 1.0, %v12036_v6  ;;  %v12044_v11 = vld [vmem:[#allocation247_spill] sm:$0xff]  ;;  %v12048_v6 = vld [vmem:[#allocation14_spill] sm:$0xff] }
 0x433   :  { %vm259_vm5 = vcmp.ge.s32.totalorder %v10032_v43, 0  ;;  %v3681_v51 = vsel %vm16_vm9, %v3581_v33, 0.0  ;;  %v2847_v23 = vmul.f32 %v9912_v24, %v2031_v25  ;;  %v2902_v36 = vand.u32 2147483647, %v12037_v4  ;;  %v1644_v14 = vpop.xlane.xlu2 %1643 }
 0x434   :  { %v2904_v3 = vand.u32 2147483648, %v12037_v4  ;;  %v4196_v52 = vpop.eup %4195  ;;  %v3205_v47 = vmul.f32 %v3141_v48, %v3141_v48  ;;  %3525 = vst.msk [vmem:[#allocation2 + $0x180] sm:$0xff] %vm16_vm9, %v3460_v39  ;;  %v1797_v37 = vmax.f32 %v1733_v41, 0.0  ;;  %v2897_v29 = vadd.f32 %v12033_v50, %v2896_v40  ;;  %v1647_v31 = vpop.xlane.xlu1 %1646  ;;  %v3334_v40 = vld [vmem:[#allocation2 + $0x190] sm:$0xff]  ;;  %v3584_v41 = vld [vmem:[#allocation2 + $0x140] sm:$0xff] }
 0x435   :  { %vm2899_vm6 = vweird.f32 %v12033_v50  ;;  %v3683_v15 = vsel %vm16_vm9, %v3582_v17, 0.0  ;;  %v3079_v58 = vsub.f32 1.0, %v2847_v23  ;;  %v10045_v20 = vsel %vm10023_vm4, %v2890_v56, %v2886_v18 }
 0x436   :  { %vm2898_vm7 = vweird.f32 %v12037_v4  ;;  %v4198_v24 = vpop.eup %4197  ;;  %vm260_vm8 = vcmp.ge.s32.totalorder %v10051_v19, 0  ;;  %v3682_v12 = vadd.f32 %v3681_v51, %v3680_v1  ;;  %v3142_v38 = vmax.f32 %v3078_v16, 0.0 }
 0x437   :  { %v3269_v22 = vmul.f32 %v3205_v47, %v1797_v37  ;;  %v2911_v46 = vmul.f32 %v12038_v27, %v2910_v44  ;;  %v1343_v9 = vmul.f32 0.6931472, %v4196_v52  ;;  %vm10057_vm0 = vmor %vm2898_vm7, %vm2899_vm6  ;;  %vm10061_vm10 = vcmp.eq.f32.partialorder %v2902_v36, 8.507059e+37  ;;  %v3335_v36 = vld [vmem:[#allocation2 + $0x198] sm:$0xff]  ;;  %v12051_v47 = vld [vmem:[#allocation202_spill] sm:$0xff] }
 0x438   :  { %v2905_v45 = vor.u32 1.1754944e-38, %v2904_v3  ;;  %vm2913_vm11 = vweird.f32 %v12043_v61  ;;  %v3684_v21 = vadd.f32 %v3683_v15, %v3682_v12  ;;  %v1734_v28 = vsub.f32 %v9961_v57, %v1644_v14 }
 0x439   :  { %v3397_v10 = vsel %vm258_vm1, %v3269_v22, 0.0  ;;  %v2901_v13 = vsel %vm10057_vm0, %v12033_v50, %v2897_v29  ;;  %v3143_v1 = vmax.f32 %v3079_v58, 0.0  ;;  %v1345_v54 = vmul.f32 0.6931472, %v4198_v24  ;;  %v12052_v58 = vld [vmem:[#allocation225_spill] sm:$0xff] }
 0x43a   :  { %v3461_v2 = vadd.f32 %v3397_v10, %v3333_v8  ;;  %vm2914_vm12 = vweird.f32 %v12038_v27  ;;  %v3206_v35 = vmul.f32 %v3142_v38, %v3142_v38  ;;  %v1798_v5 = vmax.f32 %v1734_v28, 0.0  ;;  %v3585_v38 = vld [vmem:[#allocation2 + $0x148] sm:$0xff]  ;;  %v1650_v8 = vpop.xlane.xlu0 %1649 }
 0x43b   :  { %v2862_v32 = vmul.f32 %v9965_v7, %v2034_v34  ;;  %v2912_v62 = vadd.f32 %v12038_v27, %v2911_v46  ;;  %v3685_v33 = vsel %vm16_vm9, %v3583_v49, 0.0  ;;  %v1735_v57 = vsub.f32 %v9982_v26, %v1647_v31  ;;  %v10085_v7 = vld [vmem:[%s10406_s1 + $0x1a0] sm:$0xff]  ;;  %vm10099_vm14 = vmor %vm2913_vm11, %vm2914_vm12  ;;  %v2037_v3 = vpop.xlane.xlu2 %2036 }
 0x43c   :  { %3526 = vst.msk [vmem:[#allocation2 + $0x188] sm:$0xff] %vm16_vm9, %v3461_v2  ;;  %v2917_v48 = vand.u32 2147483647, %v12043_v61  ;;  %v2925_v42 = vsub.f32 1.0, %v12044_v11  ;;  %v3270_v50 = vmul.f32 %v3206_v35, %v1798_v5  ;;  %v2919_v59 = vand.u32 2147483648, %v12043_v61  ;;  %v2040_v55 = vpop.xlane.xlu1 %2039  ;;  %v10144_v35 = vld [vmem:[%s10406_s1 + $0x1b0] sm:$0xff] }
 0x43d   :  { %v3080_v63 = vsub.f32 1.0, %v2862_v32  ;;  %4199 = vlog2.f32 %v12037_v4  ;;  %vm261_vm13 = vcmp.ge.s32.totalorder %v10085_v7, 0  ;;  %v3207_v18 = vmul.f32 %v3143_v1, %v3143_v1  ;;  %v3336_v31 = vld [vmem:[#allocation2 + $0x1a0] sm:$0xff] }
 0x43e   :  { %v1799_v26 = vmax.f32 %v1735_v57, 0.0  ;;  %v10089_v56 = vadd.f32 %v1343_v9, %v12045_v60  ;;  %v10093_v17 = vsel %vm10061_vm10, %v2905_v45, %v2901_v13  ;;  %v3686_v16 = vadd.f32 %v3685_v33, %v3684_v21  ;;  %v10129_v21 = vld [vmem:[%s10406_s1 + $0x1a8] sm:$0xff]  ;;  %v12054_v13 = vld [vmem:[#allocation230_spill] sm:$0xff] }
 0x43f   :  { %v3398_v25 = vsel %vm259_vm5, %v3270_v50, 0.0  ;;  %v10106_v44 = vadd.f32 %v1345_v54, %v12048_v6  ;;  %v2916_v51 = vsel %vm10099_vm14, %v12038_v27, %v2912_v62  ;;  %vm10111_vm15 = vcmp.eq.f32.partialorder %v2917_v48, 8.507059e+37  ;;  %v12053_v27 = vld [vmem:[#allocation185_spill] sm:$0xff]  ;;  %v12059_v50 = vld [vmem:[#allocation26_spill] sm:$0xff]  ;;  %v12069_v62 = vld [vmem:[#allocation68_spill] sm:$0xff] }
 0x440   :  { %v3462_v23 = vadd.f32 %v3398_v25, %v3334_v40  ;;  %v3271_v4 = vmul.f32 %v3207_v18, %v1799_v26  ;;  %v2926_v37 = vmul.f32 %v12051_v47, %v2925_v42  ;;  %v3144_v29 = vmax.f32 %v3080_v63, 0.0  ;;  %v12060_v25 = vld [vmem:[#allocation172_spill] sm:$0xff] }
 0x441   :  { %v2877_v43 = vmul.f32 %v10001_v30, %v2037_v3  ;;  %v2920_v15 = vor.u32 1.1754944e-38, %v2919_v59  ;;  %v2940_v24 = vsub.f32 1.0, %v12052_v58  ;;  %v3687_v12 = vsel %vm16_vm9, %v3584_v41, 0.0  ;;  %v12061_v3 = vld [vmem:[#allocation67_spill] sm:$0xff] }
 0x442   :  { %3527 = vst.msk [vmem:[#allocation2 + $0x190] sm:$0xff] %vm16_vm9, %v3462_v23  ;;  %v3399_v22 = vsel %vm260_vm8, %v3271_v4, 0.0  ;;  %vm2928_vm1 = vweird.f32 %v12053_v27  ;;  %v2932_v46 = vand.u32 2147483647, %v12053_v27  ;;  %v1736_v30 = vsub.f32 %v10005_v0, %v1650_v8  ;;  %v2043_v41 = vpop.xlane.xlu0 %2042 }
 0x443   :  { %v4200_v14 = vpop.eup %4199  ;;  %v3463_v9 = vadd.f32 %v3399_v22, %v3335_v36  ;;  %v3081_v53 = vsub.f32 1.0, %v2877_v43  ;;  %v2934_v45 = vand.u32 2147483648, %v12053_v27  ;;  %vm262_vm2 = vcmp.ge.s32.totalorder %v10129_v21, 0  ;;  %v1653_v11 = vpop.xlane.xlu2 %1652 }
 0x444   :  { %v2892_v19 = vmul.f32 %v10045_v20, %v2040_v55  ;;  %v2927_v49 = vadd.f32 %v12051_v47, %v2926_v37  ;;  %vm2929_vm3 = vweird.f32 %v12051_v47  ;;  %4201 = vlog2.f32 %v12043_v61  ;;  %v3586_v61 = vld [vmem:[#allocation2 + $0x150] sm:$0xff]  ;;  %v1656_v4 = vpop.xlane.xlu1 %1655 }
 0x445   :  { %v3689_v0 = vsel %vm16_vm9, %v3585_v38, 0.0  ;;  %v3208_v10 = vmul.f32 %v3144_v29, %v3144_v29  ;;  %3528 = vst.msk [vmem:[#allocation2 + $0x198] sm:$0xff] %vm16_vm9, %v3463_v9  ;;  %v1800_v28 = vmax.f32 %v1736_v30, 0.0  ;;  %v2941_v2 = vmul.f32 %v12054_v13, %v2940_v24  ;;  %vm10151_vm5 = vmor %vm2928_vm1, %vm2929_vm3  ;;  %v3338_v55 = vld [vmem:[#allocation2 + $0x1b0] sm:$0xff] }
 0x446   :  { %v3688_v1 = vadd.f32 %v3687_v12, %v3686_v16  ;;  %v3082_v34 = vsub.f32 1.0, %v2892_v19  ;;  %v2921_v54 = vsel %vm10111_vm15, %v2920_v15, %v2916_v51  ;;  %v1347_v20 = vmul.f32 0.6931472, %v4200_v14  ;;  %v3337_v15 = vld [vmem:[#allocation2 + $0x1a8] sm:$0xff] }
 0x447   :  { %vm263_vm4 = vcmp.ge.s32.totalorder %v10144_v35, 0  ;;  %v3145_v5 = vmax.f32 %v3081_v53, 0.0  ;;  %v3272_v32 = vmul.f32 %v3208_v10, %v1800_v28  ;;  %vm10155_vm6 = vcmp.eq.f32.partialorder %v2932_v46, 8.507059e+37  ;;  %v4332_v35 = vld [vmem:[%s10406_s1 + $0x1c0] sm:$0xff] }
 0x448   :  { %v2935_v57 = vor.u32 1.1754944e-38, %v2934_v45  ;;  %v3690_v48 = vadd.f32 %v3689_v0, %v3688_v1  ;;  %v2931_v42 = vsel %vm10151_vm5, %v12051_v47, %v2927_v49  ;;  %vm2944_vm7 = vweird.f32 %v12054_v13  ;;  %v12062_v47 = vld [vmem:[#allocation212_spill] sm:$0xff] }
 0x449   :  { %v2955_v40 = vsub.f32 1.0, %v12059_v50  ;;  %v3400_v63 = vsel %vm261_vm13, %v3272_v32, 0.0  ;;  %v1737_v59 = vsub.f32 %v10089_v56, %v1653_v11  ;;  %v10168_v18 = vadd.f32 %v12054_v13, %v2941_v2  ;;  %v12067_v49 = vld [vmem:[#allocation248_spill] sm:$0xff]  ;;  %v12072_v50 = vld [vmem:[#allocation65_spill] sm:$0xff] }
 0x44a   :  { %4203 = vlog2.f32 %v12053_v27  ;;  %v4202_v26 = vpop.eup %4201  ;;  %v3691_v60 = vsel %vm16_vm9, %v3586_v61, 0.0  ;;  %v3464_v39 = vadd.f32 %v3400_v63, %v3336_v31  ;;  %v3146_v16 = vmax.f32 %v3082_v34, 0.0  ;;  %v1659_v1 = vpop.xlane.xlu0 %1658  ;;  %v3587_v61 = vld [vmem:[#allocation2 + $0x158] sm:$0xff] }
 0x44b   :  { %v2947_v6 = vand.u32 2147483647, %v12060_v25  ;;  %v3209_v51 = vmul.f32 %v3145_v5, %v3145_v5  ;;  %v1801_v23 = vmax.f32 %v1737_v59, 0.0  ;;  %v2907_v7 = vmul.f32 %v10093_v17, %v2043_v41  ;;  %v2046_v45 = vpop.xlane.xlu2 %2045  ;;  %v12074_v41 = vld [vmem:[#allocation13_spill] sm:$0xff] }
 0x44c   :  { %v2949_v56 = vand.u32 2147483648, %v12060_v25  ;;  %3529 = vst.msk [vmem:[#allocation2 + $0x1a0] sm:$0xff] %vm16_vm9, %v3464_v39  ;;  %v1738_v36 = vsub.f32 %v10106_v44, %v1656_v4  ;;  %v1419_v52 = vadd.f32 %v1347_v20, %v12061_v3  ;;  %vm2943_vm8 = vweird.f32 %v12060_v25  ;;  %v10193_v44 = vld [vmem:[%s10406_s1 + $0x1b8] sm:$0xff] }
 0x44d   :  { %v2956_v37 = vmul.f32 %v12062_v47, %v2955_v40  ;;  %v10180_v29 = vadd.f32 %v3691_v60, %v3690_v48  ;;  %v3273_v43 = vmul.f32 %v3209_v51, %v1801_v23  ;;  %v3083_v58 = vsub.f32 1.0, %v2907_v7  ;;  %vm10186_vm0 = vmor %vm2943_vm8, %vm2944_vm7  ;;  %v4333_v51 = vld [vmem:[%s10406_s1 + $0x1c8] sm:$0xff]  ;;  %v3339_v4 = vld [vmem:[#allocation2 + $0x1b8] sm:$0xff] }
 0x44e   :  { %v2936_v17 = vsel %vm10155_vm6, %v2935_v57, %v2931_v42  ;;  %vm264_vm10 = vcmp.ge.s32.totalorder %v10193_v44, 0  ;;  %v3210_v12 = vmul.f32 %v3146_v16, %v3146_v16  ;;  %v1802_v38 = vmax.f32 %v1738_v36, 0.0 }
 0x44f   :  { %v1349_v22 = vmul.f32 0.6931472, %v4202_v26  ;;  %v2946_v8 = vsel %vm10186_vm0, %v12054_v13, %v10168_v18  ;;  %v3401_v46 = vsel %vm262_vm2, %v3273_v43, 0.0  ;;  %vm10202_vm11 = vcmp.eq.f32.partialorder %v2947_v6, 8.507059e+37  ;;  %v12068_v13 = vld [vmem:[#allocation90_spill] sm:$0xff]  ;;  %v12073_v26 = vld [vmem:[#allocation97_spill] sm:$0xff] }
 0x450   :  { %v4204_v27 = vpop.eup %4203  ;;  %v2950_v9 = vor.u32 1.1754944e-38, %v2949_v56  ;;  %vm2959_vm12 = vweird.f32 %v12062_v47  ;;  %v3465_v53 = vadd.f32 %v3401_v46, %v3337_v15  ;;  %v3274_v30 = vmul.f32 %v3210_v12, %v1802_v38 }
 0x451   :  { %v2957_v19 = vadd.f32 %v12062_v47, %v2956_v37  ;;  %v2970_v0 = vsub.f32 1.0, %v12067_v49  ;;  %v3147_v10 = vmax.f32 %v3083_v58, 0.0  ;;  %v2922_v28 = vmul.f32 %v2921_v54, %v2046_v45  ;;  %v2049_v54 = vpop.xlane.xlu1 %2048  ;;  %v12076_v58 = vld [vmem:[#allocation150_spill] sm:$0xff]  ;;  %v12095_v45 = vld [vmem:[#allocation164_spill] sm:$0xff] }
 0x452   :  { %v2964_v21 = vand.u32 2147483648, %v12068_v13  ;;  %4205 = vlog2.f32 %v12060_v25  ;;  %3530 = vst.msk [vmem:[#allocation2 + $0x1a8] sm:$0xff] %vm16_vm9, %v3465_v53  ;;  %v3402_v2 = vsel %vm263_vm4, %v3274_v30, 0.0  ;;  %v1351_v34 = vmul.f32 0.6931472, %v4204_v27  ;;  %v2052_v38 = vpop.xlane.xlu0 %2051 }
 0x453   :  { %vm2958_vm13 = vweird.f32 %v12068_v13  ;;  %v2962_v20 = vand.u32 2147483647, %v12068_v13  ;;  %v3466_v5 = vadd.f32 %v3402_v2, %v3338_v55  ;;  %v3084_v32 = vsub.f32 1.0, %v2922_v28  ;;  %v1662_v36 = vpop.xlane.xlu2 %1661 }
 0x454   :  { %v1739_v31 = vsub.f32 %v1419_v52, %v1659_v1  ;;  %v1420_v33 = vadd.f32 %v1349_v22, %v12069_v62  ;;  %vm10219_vm14 = vmor %vm2958_vm13, %vm2959_vm12  ;;  %vm265_vm15 = vcmp.ge.s32.totalorder %v4332_v35, 0  ;;  %v2937_v48 = vmul.f32 %v2936_v17, %v2049_v54  ;;  %v12075_v52 = vld [vmem:[#allocation93_spill] sm:$0xff] }
 0x455   :  { %v2951_v11 = vsel %vm10202_vm11, %v2950_v9, %v2946_v8  ;;  %v2961_v42 = vsel %vm10219_vm14, %v12062_v47, %v2957_v19  ;;  %v2971_v40 = vmul.f32 %v12072_v50, %v2970_v0  ;;  %v3211_v63 = vmul.f32 %v3147_v10, %v3147_v10  ;;  %3531 = vst.msk [vmem:[#allocation2 + $0x1b0] sm:$0xff] %vm16_vm9, %v3466_v5  ;;  %v12077_v8 = vld [vmem:[#allocation76_spill] sm:$0xff]  ;;  %v3340_v0 = vld [vmem:[#allocation2 + $0x1c0] sm:$0xff] }
 0x456   :  { %v1803_v59 = vmax.f32 %v1739_v31, 0.0  ;;  %v2965_v18 = vor.u32 1.1754944e-38, %v2964_v21  ;;  %v2985_v60 = vsub.f32 1.0, %v12073_v26  ;;  %v10235_v39 = vsel %vm16_vm9, %v3587_v61, 0.0  ;;  %v10271_v21 = vld [vmem:[%s10406_s1 + $0x1d0] sm:$0xff] }
 0x457   :  { %v3085_v16 = vsub.f32 1.0, %v2937_v48  ;;  %v1421_v25 = vadd.f32 %v1351_v34, %v12074_v41  ;;  %vm2963_vm1 = vcmp.eq.f32.partialorder %v2962_v20, 8.507059e+37  ;;  %vm266_vm2 = vcmp.ge.s32.totalorder %v4333_v51, 0  ;;  %v12082_v34 = vld [vmem:[#allocation25_spill] sm:$0xff]  ;;  %v12083_v20 = vld [vmem:[#allocation244_spill] sm:$0xff]  ;;  %v3341_v48 = vld [vmem:[#allocation2 + $0x1c8] sm:$0xff] }
 0x458   :  { %v4206_v6 = vpop.eup %4205  ;;  %v3148_v23 = vmax.f32 %v3084_v32, 0.0  ;;  %v3275_v7 = vmul.f32 %v3211_v63, %v1803_v59  ;;  %v2966_v56 = vsel %vm2963_vm1, %v2965_v18, %v2961_v42  ;;  %vm2974_vm3 = vweird.f32 %v12072_v50  ;;  %v12084_v32 = vld [vmem:[#allocation12_spill] sm:$0xff] }
 0x459   :  { %v2972_v3 = vadd.f32 %v12072_v50, %v2971_v40  ;;  %v2977_v47 = vand.u32 2147483647, %v12075_v52  ;;  %v2979_v37 = vand.u32 2147483648, %v12075_v52  ;;  %4207 = vlog2.f32 %v12068_v13  ;;  %v1665_v53 = vpop.xlane.xlu1 %1664 }
 0x45a   :  { %v3403_v43 = vsel %vm264_vm10, %v3275_v7, 0.0  ;;  %v1740_v15 = vsub.f32 %v1420_v33, %v1662_v36  ;;  %vm2973_vm4 = vweird.f32 %v12075_v52  ;;  %v2986_v17 = vmul.f32 %v12076_v58, %v2985_v60 }
 0x45b   :  { %v3467_v24 = vadd.f32 %v3403_v43, %v3339_v4  ;;  %v3149_v12 = vmax.f32 %v3085_v16, 0.0  ;;  %v1353_v22 = vmul.f32 0.6931472, %v4206_v6  ;;  %v3000_v27 = vsub.f32 1.0, %v12077_v8  ;;  %vm10253_vm5 = vmor %vm2973_vm4, %vm2974_vm3  ;;  %v12088_v6 = vld [vmem:[#allocation191_spill] sm:$0xff] }
 0x45c   :  { %v3212_v46 = vmul.f32 %v3148_v23, %v3148_v23  ;;  %v1804_v14 = vmax.f32 %v1740_v15, 0.0  ;;  %v2952_v9 = vmul.f32 %v2951_v11, %v2052_v38  ;;  %4209 = vlog2.f32 %v12075_v52  ;;  %v2055_v11 = vpop.xlane.xlu2 %2054  ;;  %v1668_v41 = vpop.xlane.xlu0 %1667  ;;  %v10303_v52 = vld [vmem:[%s10406_s1 + $0x1d8] sm:$0xff]  ;;  %v12090_v38 = vld [vmem:[#allocation74_spill] sm:$0xff] }
 0x45d   :  { %3532 = vst.msk [vmem:[#allocation2 + $0x1b8] sm:$0xff] %vm16_vm9, %v3467_v24  ;;  %v1741_v30 = vsub.f32 %v1421_v25, %v1665_v53  ;;  %v2976_v55 = vsel %vm10253_vm5, %v12072_v50, %v2972_v3  ;;  %vm10262_vm6 = vcmp.eq.f32.partialorder %v2977_v47, 8.507059e+37  ;;  %v2980_v19 = vor.u32 1.1754944e-38, %v2979_v37  ;;  %v12087_v50 = vld [vmem:[#allocation213_spill] sm:$0xff]  ;;  %v12089_v37 = vld [vmem:[#allocation206_spill] sm:$0xff] }
 0x45e   :  { %v3276_v49 = vmul.f32 %v3212_v46, %v1804_v14  ;;  %v3086_v10 = vsub.f32 1.0, %v2952_v9  ;;  %v2987_v28 = vadd.f32 %v12076_v58, %v2986_v17  ;;  %vm2989_vm7 = vweird.f32 %v12076_v58  ;;  %v3342_v14 = vld [vmem:[#allocation2 + $0x1d0] sm:$0xff] }
 0x45f   :  { %v4208_v13 = vpop.eup %4207  ;;  %vm267_vm8 = vcmp.ge.s32.totalorder %v10271_v21, 0  ;;  %v3213_v2 = vmul.f32 %v3149_v12, %v3149_v12  ;;  %v1805_v1 = vmax.f32 %v1741_v30, 0.0  ;;  %vm2988_vm0 = vweird.f32 %v12082_v34  ;;  %v3588_v30 = vld [vmem:[#allocation2 + $0x160] sm:$0xff] }
 0x460   :  { %v3001_v61 = vmul.f32 %v12083_v20, %v3000_v27  ;;  %v3404_v5 = vsel %vm265_vm15, %v3276_v49, 0.0  ;;  %v1422_v31 = vadd.f32 %v1353_v22, %v12084_v32  ;;  %v2981_v54 = vsel %vm10262_vm6, %v2980_v19, %v2976_v55  ;;  %vm10283_vm10 = vmor %vm2988_vm0, %vm2989_vm7  ;;  %v10320_v27 = vld [vmem:[%s10406_s1 + $0x1e0] sm:$0xff] }
 0x461   :  { %v2992_v62 = vand.u32 2147483647, %v12082_v34  ;;  %v3468_v33 = vadd.f32 %v3404_v5, %v3340_v0  ;;  %v3277_v57 = vmul.f32 %v3213_v2, %v1805_v1  ;;  %v2994_v35 = vand.u32 2147483648, %v12082_v34  ;;  %v2058_v36 = vpop.xlane.xlu1 %2057  ;;  %v3589_v1 = vld [vmem:[#allocation2 + $0x168] sm:$0xff] }
 0x462   :  { %v3015_v40 = vsub.f32 1.0, %v12087_v50  ;;  %v4210_v63 = vpop.eup %4209  ;;  %v3150_v59 = vmax.f32 %v3086_v10, 0.0  ;;  %v2967_v18 = vmul.f32 %v2966_v56, %v2055_v11  ;;  %v1355_v26 = vmul.f32 0.6931472, %v4208_v13  ;;  %v12096_v13 = vld [vmem:[#allocation215_spill] sm:$0xff]  ;;  %v3343_v50 = vld [vmem:[#allocation2 + $0x1d8] sm:$0xff] }
 0x463   :  { %v2991_v60 = vsel %vm10283_vm10, %v12076_v58, %v2987_v28  ;;  %3533 = vst.msk [vmem:[#allocation2 + $0x1c0] sm:$0xff] %vm16_vm9, %v3468_v33  ;;  %v3405_v16 = vsel %vm266_vm2, %v3277_v57, 0.0  ;;  %v10295_v25 = vadd.f32 %v12083_v20, %v3001_v61  ;;  %vm3004_vm11 = vweird.f32 %v12083_v20  ;;  %v3590_v33 = vld [vmem:[#allocation2 + $0x170] sm:$0xff] }
 0x464   :  { %v3007_v23 = vand.u32 2147483647, %v12088_v6  ;;  %v3469_v7 = vadd.f32 %v3405_v16, %v3341_v48  ;;  %v3087_v4 = vsub.f32 1.0, %v2967_v18  ;;  %v1742_v56 = vsub.f32 %v1422_v31, %v1668_v41  ;;  %v1671_v55 = vpop.xlane.xlu2 %1670  ;;  %v2061_v32 = vpop.xlane.xlu0 %2060 }
 0x465   :  { %v3009_v3 = vand.u32 2147483648, %v12088_v6  ;;  %vm268_vm12 = vcmp.ge.s32.totalorder %v10303_v52, 0  ;;  %v2982_v51 = vmul.f32 %v2981_v54, %v2058_v36  ;;  %v1357_v47 = vmul.f32 0.6931472, %v4210_v63 }
 0x466   :  { %4211 = vlog2.f32 %v12082_v34  ;;  %v3016_v43 = vmul.f32 %v12089_v37, %v3015_v40  ;;  %v3214_v15 = vmul.f32 %v3150_v59, %v3150_v59  ;;  %3534 = vst.msk [vmem:[#allocation2 + $0x1c8] sm:$0xff] %vm16_vm9, %v3469_v7  ;;  %v1806_v58 = vmax.f32 %v1742_v56, 0.0  ;;  %v3591_v59 = vld [vmem:[#allocation2 + $0x178] sm:$0xff]  ;;  %v3592_v7 = vld [vmem:[#allocation2 + $0x180] sm:$0xff] }
 0x467   :  { %v2995_v17 = vor.u32 1.1754944e-38, %v2994_v35  ;;  %vm3003_vm13 = vweird.f32 %v12088_v6  ;;  %v3151_v24 = vmax.f32 %v3087_v4, 0.0  ;;  %v3088_v12 = vsub.f32 1.0, %v2982_v51  ;;  %v3344_v51 = vld [vmem:[#allocation2 + $0x1e0] sm:$0xff] }
 0x468   :  { %v1423_v22 = vadd.f32 %v1355_v26, %v12090_v38  ;;  %vm2993_vm14 = vcmp.eq.f32.partialorder %v2992_v62, 8.507059e+37  ;;  %vm10313_vm15 = vmor %vm3003_vm13, %vm3004_vm11  ;;  %vm269_vm1 = vcmp.ge.s32.totalorder %v10320_v27, 0  ;;  %v3278_v46 = vmul.f32 %v3214_v15, %v1806_v58 }
 0x469   :  { %v2996_v9 = vsel %vm2993_vm14, %v2995_v17, %v2991_v60  ;;  %v3006_v53 = vsel %vm10313_vm15, %v12083_v20, %v10295_v25  ;;  %vm10327_vm2 = vcmp.eq.f32.partialorder %v3007_v23, 8.507059e+37  ;;  %v1424_v19 = vadd.f32 %v1357_v47, %v12095_v45  ;;  %v1674_v62 = vpop.xlane.xlu1 %1673  ;;  %v12101_v17 = vld [vmem:[#allocation165_spill] sm:$0xff] }
 0x46a   :  { %v3010_v49 = vor.u32 1.1754944e-38, %v3009_v3  ;;  %v3017_v0 = vadd.f32 %v12089_v37, %v3016_v43  ;;  %vm3019_vm3 = vweird.f32 %v12089_v37  ;;  %v3406_v10 = vsel %vm267_vm8, %v3278_v46, 0.0 }
 0x46b   :  { %v1743_v28 = vsub.f32 %v1423_v22, %v1671_v55  ;;  %v3022_v2 = vand.u32 2147483647, %v12096_v13  ;;  %4213 = vlog2.f32 %v12088_v6  ;;  %v3215_v20 = vmul.f32 %v3151_v24, %v3151_v24  ;;  %v3594_v55 = vld [vmem:[#allocation2 + $0x190] sm:$0xff] }
 0x46c   :  { %v4212_v34 = vpop.eup %4211  ;;  %v3470_v61 = vadd.f32 %v3406_v10, %v3342_v14  ;;  %v3152_v5 = vmax.f32 %v3088_v12, 0.0  ;;  %4215 = vlog2.f32 %v12096_v13  ;;  %v2997_v54 = vmul.f32 %v2996_v9, %v2061_v32  ;;  %v2064_v47 = vpop.xlane.xlu2 %2063  ;;  %v3593_v12 = vld [vmem:[#allocation2 + $0x188] sm:$0xff] }
 0x46d   :  { %v1807_v31 = vmax.f32 %v1743_v28, 0.0  ;;  %v3694_v21 = vadd.f32 %v10235_v39, %v10180_v29  ;;  %v3695_v57 = vsel %vm16_vm9, %v3588_v30, 0.0  ;;  %v1744_v48 = vsub.f32 %v1424_v19, %v1674_v62  ;;  %v1677_v22 = vpop.xlane.xlu0 %1676  ;;  %v3595_v28 = vld [vmem:[#allocation2 + $0x198] sm:$0xff]  ;;  %v12102_v32 = vld [vmem:[#allocation19_spill] sm:$0xff]  ;;  %v3598_v39 = vld [vmem:[#allocation2 + $0x1b0] sm:$0xff] }
 0x46e   :  { %3535 = vst.msk [vmem:[#allocation2 + $0x1d0] sm:$0xff] %vm16_vm9, %v3470_v61  ;;  %vm3018_vm4 = vweird.f32 %v12096_v13  ;;  %v3024_v11 = vand.u32 2147483648, %v12096_v13  ;;  %v3697_v42 = vsel %vm16_vm9, %v3589_v1, 0.0  ;;  %v3089_v40 = vsub.f32 1.0, %v2997_v54  ;;  %v3596_v54 = vld [vmem:[#allocation2 + $0x1a0] sm:$0xff] }
 0x46f   :  { %v3279_v35 = vmul.f32 %v3215_v20, %v1807_v31  ;;  %v1359_v63 = vmul.f32 0.6931472, %v4212_v34  ;;  %v3696_v18 = vadd.f32 %v3695_v57, %v3694_v21  ;;  %v3216_v26 = vmul.f32 %v3152_v5, %v3152_v5  ;;  %vm10350_vm5 = vmor %vm3018_vm4, %vm3019_vm3  ;;  %v3345_v5 = vld [vmem:[#allocation2 + $0x1e8] sm:$0xff]  ;;  %v12103_v21 = vld [vmem:[#allocation170_spill] sm:$0xff] }
 0x470   :  { %v1808_v60 = vmax.f32 %v1744_v48, 0.0  ;;  %v3011_v29 = vsel %vm10327_vm2, %v3010_v49, %v3006_v53  ;;  %v3699_v16 = vsel %vm16_vm9, %v3590_v33, 0.0  ;;  %v3021_v6 = vsel %vm10350_vm5, %v12089_v37, %v3017_v0 }
 0x471   :  { %v4214_v41 = vpop.eup %4213  ;;  %v3407_v25 = vsel %vm268_vm12, %v3279_v35, 0.0  ;;  %vm10360_vm6 = vcmp.eq.f32.partialorder %v3022_v2, 8.507059e+37  ;;  %v3698_v4 = vadd.f32 %v3697_v42, %v3696_v18  ;;  %v3025_v43 = vor.u32 1.1754944e-38, %v3024_v11  ;;  %v2067_v30 = vpop.xlane.xlu1 %2066  ;;  %v4337_v2 = vld [vmem:[%s10406_s1 + $0x1e8] sm:$0xff] }
 0x472   :  { %v4216_v56 = vpop.eup %4215  ;;  %v3471_v36 = vadd.f32 %v3407_v25, %v3343_v50  ;;  %v3280_v3 = vmul.f32 %v3216_v26, %v1808_v60  ;;  %v3701_v15 = vsel %vm16_vm9, %v3591_v59, 0.0  ;;  %v3153_v52 = vmax.f32 %v3089_v40, 0.0  ;;  %v3597_v50 = vld [vmem:[#allocation2 + $0x1a8] sm:$0xff] }
 0x473   :  { %v3012_v58 = vmul.f32 %v3011_v29, %v2064_v47  ;;  %v1425_v24 = vadd.f32 %v1359_v63, %v12101_v17  ;;  %v3700_v37 = vadd.f32 %v3699_v16, %v3698_v4  ;;  %v3026_v8 = vsel %vm10360_vm6, %v3025_v43, %v3021_v6 }
 0x474   :  { %3536 = vst.msk [vmem:[#allocation2 + $0x1d8] sm:$0xff] %vm16_vm9, %v3471_v36  ;;  %v3408_v38 = vsel %vm269_vm1, %v3280_v3, 0.0  ;;  %v1361_v46 = vmul.f32 0.6931472, %v4214_v41  ;;  %v3703_v14 = vsel %vm16_vm9, %v3592_v7, 0.0  ;;  %v3027_v19 = vmul.f32 %v3026_v8, %v2067_v30  ;;  %v1680_v33 = vpop.xlane.xlu2 %1679  ;;  %v4338_v41 = vld [vmem:[%s10406_s1 + $0x1f0] sm:$0xff] }
 0x475   :  { %v3472_v9 = vadd.f32 %v3408_v38, %v3344_v51  ;;  %v3090_v53 = vsub.f32 1.0, %v3012_v58  ;;  %v1745_v44 = vsub.f32 %v1425_v24, %v1677_v22  ;;  %v3702_v45 = vadd.f32 %v3701_v15, %v3700_v37  ;;  %v1683_v59 = vpop.xlane.xlu0 %1682  ;;  %v3346_v7 = vld [vmem:[#allocation2 + $0x1f0] sm:$0xff]  ;;  %v4339_v3 = vld [vmem:[%s10406_s1 + $0x1f8] sm:$0xff]  ;;  %v3601_v37 = vld [vmem:[#allocation2 + $0x1c8] sm:$0xff] }
 0x476   :  { %v1363_v49 = vmul.f32 0.6931472, %v4216_v56  ;;  %v3705_v0 = vsel %vm16_vm9, %v3593_v12, 0.0  ;;  %v3217_v10 = vmul.f32 %v3153_v52, %v3153_v52  ;;  %vm270_vm7 = vcmp.ge.s32.totalorder %v4337_v2, 0  ;;  %v3599_v56 = vld [vmem:[#allocation2 + $0x1b8] sm:$0xff]  ;;  %v3600_v52 = vld [vmem:[#allocation2 + $0x1c0] sm:$0xff] }
 0x477   :  { %3537 = vst.msk [vmem:[#allocation2 + $0x1e0] sm:$0xff] %vm16_vm9, %v3472_v9  ;;  %v1809_v27 = vmax.f32 %v1745_v44, 0.0  ;;  %v3704_v13 = vadd.f32 %v3703_v14, %v3702_v45  ;;  %v3091_v1 = vsub.f32 1.0, %v3027_v19  ;;  %v3707_v34 = vsel %vm16_vm9, %v3594_v55, 0.0  ;;  %v3347_v15 = vld [vmem:[#allocation2 + $0x1f8] sm:$0xff] }
 0x478   :  { %v3154_v20 = vmax.f32 %v3090_v53, 0.0  ;;  %v1426_v31 = vadd.f32 %v1361_v46, %v12102_v32  ;;  %v1427_v57 = vadd.f32 %v1363_v49, %v12103_v21  ;;  %v3709_v48 = vsel %vm16_vm9, %v3595_v28, 0.0  ;;  %v3602_v46 = vld [vmem:[#allocation2 + $0x1d0] sm:$0xff] }
 0x479   :  { %v3281_v61 = vmul.f32 %v3217_v10, %v1809_v27  ;;  %v3706_v62 = vadd.f32 %v3705_v0, %v3704_v13  ;;  %v3155_v42 = vmax.f32 %v3091_v1, 0.0  ;;  %v3711_v18 = vsel %vm16_vm9, %v3596_v54, 0.0 }
 0x47a   :  { %v1746_v35 = vsub.f32 %v1426_v31, %v1680_v33  ;;  %v3218_v26 = vmul.f32 %v3154_v20, %v3154_v20  ;;  %v1747_v29 = vsub.f32 %v1427_v57, %v1683_v59  ;;  %vm271_vm8 = vcmp.ge.s32.totalorder %v4338_v41, 0 }
 0x47b   :  { %v3409_v11 = vsel %vm270_vm7, %v3281_v61, 0.0  ;;  %v3708_v40 = vadd.f32 %v3707_v34, %v3706_v62  ;;  %v3713_v25 = vsel %vm16_vm9, %v3597_v50, 0.0  ;;  %v3219_v6 = vmul.f32 %v3155_v42, %v3155_v42  ;;  %v3603_v53 = vld [vmem:[#allocation2 + $0x1d8] sm:$0xff] }
 0x47c   :  { %v3473_v63 = vadd.f32 %v3409_v11, %v3345_v5  ;;  %v1810_v60 = vmax.f32 %v1746_v35, 0.0  ;;  %v1811_v4 = vmax.f32 %v1747_v29, 0.0  ;;  %vm272_vm0 = vcmp.ge.s32.totalorder %v4339_v3, 0 }
 0x47d   :  { %v3710_v16 = vadd.f32 %v3709_v48, %v3708_v40  ;;  %v3715_v51 = vsel %vm16_vm9, %v3598_v39, 0.0  ;;  %v3717_v24 = vsel %vm16_vm9, %v3599_v56, 0.0  ;;  %v3719_v8 = vsel %vm16_vm9, %v3600_v52, 0.0 }
 0x47e   :  { %3538 = vst.msk [vmem:[#allocation2 + $0x1e8] sm:$0xff] %vm16_vm9, %v3473_v63  ;;  %v3282_v23 = vmul.f32 %v3218_v26, %v1810_v60  ;;  %v3283_v43 = vmul.f32 %v3219_v6, %v1811_v4  ;;  %v3721_v9 = vsel %vm16_vm9, %v3601_v37, 0.0  ;;  %v3723_v30 = vsel %vm16_vm9, %v3602_v46, 0.0  ;;  %v3604_v55 = vld [vmem:[#allocation2 + $0x1e0] sm:$0xff] }
 0x47f   :  { %v3712_v36 = vadd.f32 %v3711_v18, %v3710_v16  ;;  %v3725_v19 = vsel %vm16_vm9, %v3603_v53, 0.0  ;;  %v3727_v10 = vsel %vm16_vm9, %v3604_v55, 0.0 }
 0x480   :  { %v3410_v47 = vsel %vm271_vm8, %v3282_v23, 0.0  ;;  %v3411_v12 = vsel %vm272_vm0, %v3283_v43, 0.0 }
 0x481   :  { %v3714_v58 = vadd.f32 %v3713_v25, %v3712_v36  ;;  %v3474_v17 = vadd.f32 %v3410_v47, %v3346_v7  ;;  %v3475_v22 = vadd.f32 %v3411_v12, %v3347_v15 }
 0x483   :  { %v3716_v38 = vadd.f32 %v3715_v51, %v3714_v58  ;;  %3539 = vst.msk [vmem:[#allocation2 + $0x1f0] sm:$0xff] %vm16_vm9, %v3474_v17 }
 0x484   :  { %3540 = vst.msk [vmem:[#allocation2 + $0x1f8] sm:$0xff] %vm16_vm9, %v3475_v22 }
 0x485   :  { %v3718_v14 = vadd.f32 %v3717_v24, %v3716_v38  ;;  %v3605_v49 = vld [vmem:[#allocation2 + $0x1e8] sm:$0xff] }
 0x486   :  { %v3729_v13 = vsel %vm16_vm9, %v3605_v49, 0.0 }
 0x487   :  { %v3720_v44 = vadd.f32 %v3719_v8, %v3718_v14 }
 0x489   :  { %v3722_v45 = vadd.f32 %v3721_v9, %v3720_v44 }
 0x48a   :  { %v3606_v27 = vld [vmem:[#allocation2 + $0x1f0] sm:$0xff] }
 0x48b   :  { %v3724_v0 = vadd.f32 %v3723_v30, %v3722_v45  ;;  %v3607_v2 = vld [vmem:[#allocation2 + $0x1f8] sm:$0xff]  ;;  %v3731_v34 = vsel %vm16_vm9, %v3606_v27, 0.0 }
 0x48c   :  { %v3733_v61 = vsel %vm16_vm9, %v3607_v2, 0.0 }
 0x48d   :  { %v3726_v28 = vadd.f32 %v3725_v19, %v3724_v0 }
 0x48f   :  { %v3728_v1 = vadd.f32 %v3727_v10, %v3726_v28 }
 0x491   :  { %v3730_v20 = vadd.f32 %v3729_v13, %v3728_v1 }
 0x493   :  { %v3732_v5 = vadd.f32 %v3731_v34, %v3730_v20 }
 0x495   :  { %v3734_v32 = vadd.f32 %v3733_v61, %v3732_v5 }
 0x497   :  { %3735 = vadd.xlane.f32.xlu1 %v3734_v32 }
 0x50a   :  { %v3736_v31 = vpop.xlane.xlu1 %3735 }
 0x50b   :  { %v3737_v54 = vrot.slane %v3736_v31, 4 }
 0x50d   :  { %v3738_v62 = vadd.f32 %v3737_v54, %v3736_v31 }
 0x50f   :  { %v3739_v33 = vrot.slane %v3738_v62, 2 }
 0x511   :  { %v3740_v21 = vadd.f32 %v3739_v33, %v3738_v62 }
 0x513   :  { %v3741_v57 = vrot.slane %v3740_v21, 1 }
 0x515   :  { %v3742_v48 = vadd.f32 %v3741_v57, %v3740_v21 }
 0x517   :  { %3825 = vpush %v3742_v48 }
 0x548   :  { %s3826_s4 = spop %3825 }
 0x549   :  { %3745 = sst [smem:[#allocation3]] %s3826_s4 }
 0x54a   :  { %3754 = dma.smem_to_hbm %s4356_s5, 16, %s3752_s3, [#allocation4]  }
 0x54b   :  { %4352 = dma.done.wait [#allocation4], 16  }
 0x54c   :  { %4353 = vsyncadd [#allocation4], 4294967280 }
 0x54d   :  { %3759 = sfence }
 0x54e   :  { %3760 = vsyncpa [#allocation4], 1 }

</bundles_post_ra>
